<compile_context>
chip_gen: v6e
topology: v6e:2x2x1
jax: 0.10.0
libtpu: 0.0.40
codegen_flags: <defaults>
</compile_context>

<pallas_src>
import numpy as np
import jax
import jax.numpy as jnp
from jax import lax
from jax.experimental import pallas as pl
from jax.experimental.pallas import tpu as pltpu


def _round_up(x, m):
    return ((x + m - 1) // m) * m


# ----------------------------------------------------------------------------
# Constant 0/1 tap-selection tensor for conv2 (stride 2, pad 1), built once.
#   S[t, o, p] = 1  iff output pixel o reads input pixel p through tap t.
# ----------------------------------------------------------------------------
def _conv2_tap_selection(H1, W1, H2, W2):
    n1, n2 = H1 * W1, H2 * W2
    S = np.zeros((9, n2, n1), np.float32)
    for dh in range(3):
        for dw in range(3):
            t = dh * 3 + dw
            for h2 in range(H2):
                for w2 in range(W2):
                    hi, wi = 2 * h2 + dh - 1, 2 * w2 + dw - 1
                    if 0 <= hi < H1 and 0 <= wi < W1:
                        S[t, h2 * W2 + w2, hi * W1 + wi] = 1.0
    return jnp.asarray(S)


# ----------------------------------------------------------------------------
# Fused kernel: whole discriminator forward for one block of Bt batch elements.
# ----------------------------------------------------------------------------
def _disc_kernel(p1_ref, w1_ref, b1_ref, w2_ref, b2_ref, wl_ref, bl_ref, o_ref):
    # ---- conv1 + leaky relu : one MXU matmul, batch on the M/sublane dim ----
    a1 = jnp.dot(p1_ref[...], w1_ref[...], preferred_element_type=jnp.float32)
    a1 = a1 + b1_ref[...]                         # (Bt, n1*64)
    y1 = jnp.where(a1 > 0, a1, 0.2 * a1)

    # ---- conv2 + leaky relu : single K = n1*64 contraction (gather folded) ----
    a2 = jnp.dot(y1, w2_ref[...], preferred_element_type=jnp.float32)
    a2 = a2 + b2_ref[...]                         # (Bt, n2*128)
    y2 = jnp.where(a2 > 0, a2, 0.2 * a2)

    # ---- linear (1 output feature): VPU multiply + lane reduce + sigmoid ----
    logit = jnp.sum(y2 * wl_ref[...], axis=1, keepdims=True) + bl_ref[...]   # (Bt, 1)
    e = jnp.exp(-jnp.abs(logit))                  # stable sigmoid
    prob = jnp.where(logit >= 0, 1.0 / (1.0 + e), e / (1.0 + e))

    # Dense (Bt, 128) unmasked store; wrapper slices out lane 0.
    o_ref[...] = jnp.broadcast_to(prob, o_ref.shape).astype(o_ref.dtype)


# ----------------------------------------------------------------------------
# Parameter initialization (deterministic, PyTorch layouts)
# ----------------------------------------------------------------------------
def init_params(key, matrix_size=12):
    k1, k2, k3, k4, k5, k6 = jax.random.split(key, 6)
    flat = 128 * (matrix_size // 4) * (matrix_size // 4)
    return {
        "w1": jax.random.normal(k1, (64, 1, 3, 3), jnp.float32) * 0.1,
        "b1": jax.random.normal(k2, (64,), jnp.float32) * 0.1,
        "w2": jax.random.normal(k3, (128, 64, 3, 3), jnp.float32) * 0.05,
        "b2": jax.random.normal(k4, (128,), jnp.float32) * 0.05,
        "wl": jax.random.normal(k5, (1, flat), jnp.float32) * 0.02,
        "bl": jax.random.normal(k6, (1,), jnp.float32) * 0.02,
    }


# ----------------------------------------------------------------------------
# Forward pass: weight lowering + tiny conv1 im2col (XLA prep) + one pallas_call
# ----------------------------------------------------------------------------
def discriminator_forward(params, x_nchw, block_batch=128):
    B, Cin, H, W = x_nchw.shape
    assert Cin == 1
    H1 = (H - 1) // 2 + 1
    W1 = (W - 1) // 2 + 1
    H2 = (H1 - 1) // 2 + 1
    W2 = (W1 - 1) // 2 + 1
    n1 = H1 * W1
    n2 = H2 * W2

    # Batch block: multiple of 8 sublanes; >=2 grid steps for large B (v7x megacore).
    Bt = min(block_batch, _round_up(B, 8))
    B_pad = _round_up(B, Bt)

    # ---- lowered weight matrices (cheap tensor algebra, folded under jit) ----
    # conv1: block-diagonal so conv1 is a single (Bt, n1*9) @ (n1*9, n1*64) matmul.
    w1m = jnp.transpose(params["w1"], (2, 3, 1, 0)).reshape(9, 64)        # (tap, cout)
    w1_big = jnp.kron(jnp.eye(n1, dtype=jnp.float32), w1m)                # (n1*9, n1*64)
    b1_big = jnp.tile(params["b1"], (n1,)).reshape(1, n1 * 64)

    # conv2: fuse the 0/1 tap-selection (patch gather) into the weights so the
    # whole conv is one (Bt, n1*64) @ (n1*64, n2*128) matmul.
    w2r = jnp.transpose(params["w2"], (2, 3, 1, 0)).reshape(9, 64, 128)   # (tap, cin, cout)
    sel = _conv2_tap_selection(H1, W1, H2, W2)                            # (9, n2, n1)
    w2_big = jnp.einsum("top,tcf->pcof", sel, w2r).reshape(n1 * 64, n2 * 128)
    b2_big = jnp.tile(params["b2"], (n2,)).reshape(1, n2 * 128)

    # linear weight: NCHW-flatten (c,h,w) order -> kernel's (h,w,c) order.
    wl_row = jnp.transpose(params["wl"].reshape(128, H2, W2), (1, 2, 0)).reshape(1, n2 * 128)
    bl = params["bl"].reshape(1, 1)

    # ---- conv1 im2col of the tiny 1-channel raw input (XLA prep, fused) ----
    # TODO(synk): could be moved in-kernel via strided slices; negligible at this size.
    x2 = jnp.pad(x_nchw[:, 0], ((0, B_pad - B), (1, 1), (1, 1)))
    taps = [x2[:, dh:dh + 2 * H1:2, dw:dw + 2 * W1:2]
            for dh in range(3) for dw in range(3)]
    p1 = jnp.stack(taps, axis=-1).reshape(B_pad, n1 * 9)                  # (B_pad, n1*9)

    out = pl.pallas_call(
        _disc_kernel,
        out_shape=jax.ShapeDtypeStruct((B_pad, 128), jnp.float32),
        grid=(B_pad // Bt,),
        in_specs=[
            pl.BlockSpec((Bt, n1 * 9), lambda b: (b, 0)),                 # conv1 patches
            pl.BlockSpec((n1 * 9, n1 * 64), lambda b: (0, 0)),            # lowered w1
            pl.BlockSpec((1, n1 * 64), lambda b: (0, 0)),                 # b1 (tiled)
            pl.BlockSpec((n1 * 64, n2 * 128), lambda b: (0, 0)),          # lowered w2 (gather fused)
            pl.BlockSpec((1, n2 * 128), lambda b: (0, 0)),                # b2 (tiled)
            pl.BlockSpec((1, n2 * 128), lambda b: (0, 0)),                # linear weight (h,w,c order)
            pl.BlockSpec((1, 1), lambda b: (0, 0)),                       # linear bias
        ],
        out_specs=pl.BlockSpec((Bt, 128), lambda b: (b, 0)),
        compiler_params=pltpu.CompilerParams(
            dimension_semantics=("parallel",),
            vmem_limit_bytes=48 * 1024 * 1024),
    )(p1, w1_big, b1_big, w2_big, b2_big, wl_row, bl)

    return out[:B, :1]                                                    # (B, 1)


# ----------------------------------------------------------------------------
# Plain-JAX reference (correctness check)
# ----------------------------------------------------------------------------
def reference_forward(params, x_nchw):
    dn = ("NCHW", "OIHW", "NCHW")
    hp = lax.Precision.HIGHEST
    y = lax.conv_general_dilated(x_nchw, params["w1"], (2, 2), [(1, 1), (1, 1)],
                                 dimension_numbers=dn, precision=hp)
    y = y + params["b1"][None, :, None, None]
    y = jnp.where(y > 0, y, 0.2 * y)
    y = lax.conv_general_dilated(y, params["w2"], (2, 2), [(1, 1), (1, 1)],
                                 dimension_numbers=dn, precision=hp)
    y = y + params["b2"][None, :, None, None]
    y = jnp.where(y > 0, y, 0.2 * y)
    y = y.reshape(y.shape[0], -1)
    y = jnp.dot(y, params["wl"].T, precision=hp) + params["bl"][None, :]
    return jax.nn.sigmoid(y)


if __name__ == "__main__":
    matrix_size = 12
    batch = 2
    key = jax.random.PRNGKey(0)
    kx, kp = jax.random.split(key)

    x = jax.random.normal(kx, (batch, 1, matrix_size, matrix_size), jnp.float32)
    params = init_params(kp, matrix_size)

    fwd = jax.jit(discriminator_forward)
    out = jax.block_until_ready(fwd(params, x))
    assert out.shape == (batch, 1), out.shape

    ref = jax.block_until_ready(reference_forward(params, x))
    assert jnp.allclose(out, ref, atol=2e-4, rtol=2e-4), (out, ref)

    print("KERNEL_OK")
</pallas_src>

<mosaic_0001>
module attributes {stable_mosaic.version = 11 : i64} {
  func.func @_disc_kernel(%arg0: i32, %arg1: memref<8x324xf32, #tpu.memory_space<vmem>>, %arg2: memref<324x2304xf32, #tpu.memory_space<vmem>>, %arg3: memref<1x2304xf32, #tpu.memory_space<vmem>>, %arg4: memref<2304x1152xf32, #tpu.memory_space<vmem>>, %arg5: memref<1x1152xf32, #tpu.memory_space<vmem>>, %arg6: memref<1x1152xf32, #tpu.memory_space<vmem>>, %arg7: memref<1x1xf32, #tpu.memory_space<vmem>>, %arg8: memref<8x128xf32, #tpu.memory_space<vmem>>) attributes {dimension_semantics = [#tpu.dimension_semantics<parallel>], iteration_bounds = array<i64: 1>, scalar_prefetch = 0 : i64, scratch_operands = 0 : i64, tpu.core_type = #tpu.core_type<tc>, window_params = [{transform_indices = @transform_0, window_bounds = array<i64: 8, 324>}, {pipeline_mode = #tpu.pipeline_mode<synchronous>, transform_indices = @transform_1, window_bounds = array<i64: 324, 2304>}, {pipeline_mode = #tpu.pipeline_mode<synchronous>, transform_indices = @transform_2, window_bounds = array<i64: 1, 2304>}, {pipeline_mode = #tpu.pipeline_mode<synchronous>, transform_indices = @transform_3, window_bounds = array<i64: 2304, 1152>}, {pipeline_mode = #tpu.pipeline_mode<synchronous>, transform_indices = @transform_4, window_bounds = array<i64: 1, 1152>}, {pipeline_mode = #tpu.pipeline_mode<synchronous>, transform_indices = @transform_5, window_bounds = array<i64: 1, 1152>}, {pipeline_mode = #tpu.pipeline_mode<synchronous>, transform_indices = @transform_6, window_bounds = array<i64: 1, 1>}, {transform_indices = @transform_7, window_bounds = array<i64: 8, 128>}]} {
    %c0 = arith.constant 0 : index
    %c0_0 = arith.constant 0 : index
    %0 = vector.load %arg1[%c0, %c0_0] : memref<8x324xf32, #tpu.memory_space<vmem>>, vector<8x324xf32>
    %c0_1 = arith.constant 0 : index
    %c0_2 = arith.constant 0 : index
    %1 = vector.load %arg2[%c0_1, %c0_2] : memref<324x2304xf32, #tpu.memory_space<vmem>>, vector<324x2304xf32>
    %cst = arith.constant dense<0.000000e+00> : vector<8x2304xf32>
    %2 = tpu.matmul %0, %1, %cst {dimension_numbers = #tpu.dot_dimension_numbers<[1], [0], [0], [1], [0, 0, 1, 1], [], []>} : vector<8x324xf32>, vector<324x2304xf32>, vector<8x2304xf32> -> vector<8x2304xf32>
    %c0_3 = arith.constant 0 : index
    %c0_4 = arith.constant 0 : index
    %3 = vector.load %arg3[%c0_3, %c0_4] : memref<1x2304xf32, #tpu.memory_space<vmem>>, vector<1x2304xf32>
    %4 = vector.broadcast %3 : vector<1x2304xf32> to vector<8x2304xf32>
    %5 = arith.addf %2, %4 : vector<8x2304xf32>
    %cst_5 = arith.constant 0.000000e+00 : f32
    %6 = vector.broadcast %cst_5 : f32 to vector<8x2304xf32>
    %7 = arith.cmpf ogt, %5, %6 : vector<8x2304xf32>
    %cst_6 = arith.constant 2.000000e-01 : f32
    %8 = vector.broadcast %cst_6 : f32 to vector<8x2304xf32>
    %9 = arith.mulf %8, %5 : vector<8x2304xf32>
    %10 = arith.select %7, %5, %9 : vector<8x2304xi1>, vector<8x2304xf32>
    %c0_7 = arith.constant 0 : index
    %c0_8 = arith.constant 0 : index
    %11 = vector.load %arg4[%c0_7, %c0_8] : memref<2304x1152xf32, #tpu.memory_space<vmem>>, vector<2304x1152xf32>
    %cst_9 = arith.constant dense<0.000000e+00> : vector<8x1152xf32>
    %12 = tpu.matmul %10, %11, %cst_9 {dimension_numbers = #tpu.dot_dimension_numbers<[1], [0], [0], [1], [0, 0, 1, 1], [], []>} : vector<8x2304xf32>, vector<2304x1152xf32>, vector<8x1152xf32> -> vector<8x1152xf32>
    %c0_10 = arith.constant 0 : index
    %c0_11 = arith.constant 0 : index
    %13 = vector.load %arg5[%c0_10, %c0_11] : memref<1x1152xf32, #tpu.memory_space<vmem>>, vector<1x1152xf32>
    %14 = vector.broadcast %13 : vector<1x1152xf32> to vector<8x1152xf32>
    %15 = arith.addf %12, %14 : vector<8x1152xf32>
    %cst_12 = arith.constant 0.000000e+00 : f32
    %16 = vector.broadcast %cst_12 : f32 to vector<8x1152xf32>
    %17 = arith.cmpf ogt, %15, %16 : vector<8x1152xf32>
    %cst_13 = arith.constant 2.000000e-01 : f32
    %18 = vector.broadcast %cst_13 : f32 to vector<8x1152xf32>
    %19 = arith.mulf %18, %15 : vector<8x1152xf32>
    %20 = arith.select %17, %15, %19 : vector<8x1152xi1>, vector<8x1152xf32>
    %c0_14 = arith.constant 0 : index
    %c0_15 = arith.constant 0 : index
    %21 = vector.load %arg6[%c0_14, %c0_15] : memref<1x1152xf32, #tpu.memory_space<vmem>>, vector<1x1152xf32>
    %22 = vector.broadcast %21 : vector<1x1152xf32> to vector<8x1152xf32>
    %23 = arith.mulf %20, %22 : vector<8x1152xf32>
    %cst_16 = arith.constant dense<0.000000e+00> : vector<8xf32>
    %24 = vector.multi_reduction <add>, %23, %cst_16 [1] : vector<8x1152xf32> to vector<8xf32>
    %25 = vector.shape_cast %24 : vector<8xf32> to vector<8x1xf32>
    %c0_17 = arith.constant 0 : index
    %c0_18 = arith.constant 0 : index
    %26 = vector.load %arg7[%c0_17, %c0_18] : memref<1x1xf32, #tpu.memory_space<vmem>>, vector<1x1xf32>
    %27 = vector.broadcast %26 : vector<1x1xf32> to vector<8x1xf32>
    %28 = arith.addf %25, %27 : vector<8x1xf32>
    %29 = math.absf %28 : vector<8x1xf32>
    %cst_19 = arith.constant 0.000000e+00 : f32
    %30 = vector.broadcast %cst_19 : f32 to vector<8x1xf32>
    %31 = arith.subf %30, %29 : vector<8x1xf32>
    %32 = math.exp %31 : vector<8x1xf32>
    %cst_20 = arith.constant 0.000000e+00 : f32
    %33 = vector.broadcast %cst_20 : f32 to vector<8x1xf32>
    %34 = arith.cmpf oge, %28, %33 : vector<8x1xf32>
    %cst_21 = arith.constant 1.000000e+00 : f32
    %35 = vector.broadcast %cst_21 : f32 to vector<8x1xf32>
    %36 = arith.addf %35, %32 : vector<8x1xf32>
    %cst_22 = arith.constant 1.000000e+00 : f32
    %37 = vector.broadcast %cst_22 : f32 to vector<8x1xf32>
    %38 = arith.divf %37, %36 : vector<8x1xf32>
    %cst_23 = arith.constant 1.000000e+00 : f32
    %39 = vector.broadcast %cst_23 : f32 to vector<8x1xf32>
    %40 = arith.addf %39, %32 : vector<8x1xf32>
    %41 = arith.divf %32, %40 : vector<8x1xf32>
    %42 = arith.select %34, %38, %41 : vector<8x1xi1>, vector<8x1xf32>
    %43 = vector.shape_cast %42 : vector<8x1xf32> to vector<8x1xf32>
    %44 = vector.broadcast %43 : vector<8x1xf32> to vector<8x128xf32>
    %c0_24 = arith.constant 0 : index
    %c0_25 = arith.constant 0 : index
    %45 = vector.load %arg8[%c0_24, %c0_25] : memref<8x128xf32, #tpu.memory_space<vmem>>, vector<8x128xf32>
    tpu.vector_store %arg8[%c0_24, %c0_25], %44 {strides = array<i32>} : memref<8x128xf32, #tpu.memory_space<vmem>>, vector<8x128xf32>,
    return
  }
  func.func @transform_0(%arg0: i32) -> (i32, i32) {
    %c0_i32 = arith.constant 0 : i32
    %c0_i32_0 = arith.constant 0 : i32
    return %arg0, %c0_i32 : i32, i32
  }
  func.func @transform_1(%arg0: i32) -> (i32, i32) {
    %c0_i32 = arith.constant 0 : i32
    %c0_i32_0 = arith.constant 0 : i32
    %c0_i32_1 = arith.constant 0 : i32
    return %c0_i32, %c0_i32_0 : i32, i32
  }
  func.func @transform_2(%arg0: i32) -> (i32, i32) {
    %c0_i32 = arith.constant 0 : i32
    %c0_i32_0 = arith.constant 0 : i32
    %c0_i32_1 = arith.constant 0 : i32
    return %c0_i32, %c0_i32_0 : i32, i32
  }
  func.func @transform_3(%arg0: i32) -> (i32, i32) {
    %c0_i32 = arith.constant 0 : i32
    %c0_i32_0 = arith.constant 0 : i32
    %c0_i32_1 = arith.constant 0 : i32
    return %c0_i32, %c0_i32_0 : i32, i32
  }
  func.func @transform_4(%arg0: i32) -> (i32, i32) {
    %c0_i32 = arith.constant 0 : i32
    %c0_i32_0 = arith.constant 0 : i32
    %c0_i32_1 = arith.constant 0 : i32
    return %c0_i32, %c0_i32_0 : i32, i32
  }
  func.func @transform_5(%arg0: i32) -> (i32, i32) {
    %c0_i32 = arith.constant 0 : i32
    %c0_i32_0 = arith.constant 0 : i32
    %c0_i32_1 = arith.constant 0 : i32
    return %c0_i32, %c0_i32_0 : i32, i32
  }
  func.func @transform_6(%arg0: i32) -> (i32, i32) {
    %c0_i32 = arith.constant 0 : i32
    %c0_i32_0 = arith.constant 0 : i32
    %c0_i32_1 = arith.constant 0 : i32
    return %c0_i32, %c0_i32_0 : i32, i32
  }
  func.func @transform_7(%arg0: i32) -> (i32, i32) {
    %c0_i32 = arith.constant 0 : i32
    %c0_i32_0 = arith.constant 0 : i32
    return %arg0, %c0_i32 : i32, i32
  }
}

</mosaic_0001>

<bundles_post_ra>
// kernel: mul.4
= control target key start
LH: loop header
LB: loop body
LE: loop exit
PB: predicated region body
PF: predicated region fallthrough
CT: control target
= control target key end

     0   :  { %vm17_vm0 = vcmask 523264   ;;  %s62_s0 = inlined_call_operand.vmem [shape: f32[3,3,64], index: 0, kind: input, shape index: {}]   ;;  %s63_s1 = inlined_call_operand.vmem [shape: f32[9,64], index: 1, kind: output, shape index: {}]  }
   0x1   :  { %v30_v0 = vld [vmem:[%s62_s0 + $0x8] sm:$0xf]  ;;  %v31_v1 = vld [vmem:[%s62_s0 + $0x4] sm:$0xf]  ;;  %v14_v2 = vld [vmem:[%s62_s0] sm:$0xf] }
   0x2   :  { %9 = vst [vmem:[#allocation0] sm:$0xf] %v30_v0  ;;  %13 = vst [vmem:[#allocation0 + $0x10] sm:$0xf] %v31_v1 }
   0x3   :  { %15 = vst [vmem:[#allocation0 + $0x8] sm:$0xf] %v14_v2 }
   0x9   :  { %v20_v4 = vld [vmem:[#allocation0 + $0x10] sm:$0x7]   ;;  %v25_v5 = vld [vmem:[#allocation0] sm:$0x7]  }
   0xa   :  { %v16_v3 = vld [vmem:[#allocation0 + $0x8] sm:$0x7]   ;;  %32 = vst.msk [vmem:[%s63_s1 + $0x3] sm:$0x7] %vm17_vm0, %v20_v4   ;;  %33 = vst.msk [vmem:[%s63_s1 + $0x6] sm:$0x7] %vm17_vm0, %v25_v5  }
   0xb   :  { %18 = vst.msk [vmem:[%s63_s1] sm:$0x7] %vm17_vm0, %v16_v3  }

// kernel: tile.13
= control target key start
LH: loop header
LB: loop body
LE: loop exit
PB: predicated region body
PF: predicated region fallthrough
CT: control target
= control target key end

     0   :  { %s46_s0 = inlined_call_operand.vmem [shape: f32[64], index: 0, kind: input, shape index: {}]   ;;  %s47_s1 = inlined_call_operand.vmem [shape: f32[36,64], index: 1, kind: output, shape index: {}]  }
   0x1   :  { %v4_v0 = vld [vmem:[%s46_s0] ss:$0 sm:$0xff] }
   0x2   :  { %5 = vst [vmem:[%s47_s1] sm:$0xff] %v4_v0  ;;  %14 = vst [vmem:[%s47_s1 + $0x8] sm:$0xff] %v4_v0 }
   0x3   :  { %15 = vst [vmem:[%s47_s1 + $0x10] sm:$0xff] %v4_v0  ;;  %16 = vst [vmem:[%s47_s1 + $0x18] sm:$0xff] %v4_v0 }
   0x4   :  { %17 = vst [vmem:[%s47_s1 + $0x20] sm:$0xff] %v4_v0 }

// kernel: tile.14
= control target key start
LH: loop header
LB: loop body
LE: loop exit
PB: predicated region body
PF: predicated region fallthrough
CT: control target
= control target key end

     0   :  { %s36_s8 = smov 3  ;;  %s208_s9 = smov 64   ;;  %vm3_vm0 = vcmask 523264   ;;  %vm23_vm1 = vcmask 1048064   ;;  %s291_s0 = inlined_call_operand.vmem [shape: f32[36,64], index: 0, kind: input, shape index: {}]   ;;  %s292_s1 = inlined_call_operand.vmem [shape: f32[1,2304], index: 1, kind: output, shape index: {}]  }
   0x1   :  { %v187_v0 = vld [vmem:[%s291_s0 + $0x1] ss:$2 sm:$0xff]   ;;  %v2_v2 = vld [vmem:[%s291_s0] ss:$2 sm:$0xff]   ;;  %v188_v3 = vld [vmem:[%s291_s0 + $0x11] ss:$2 sm:$0xff]  }
   0x2   :  { %21 = vrot.lane.b32.xlu0 %v187_v0, %s208_s9  ;;  %v189_v1 = vld [vmem:[%s291_s0 + $0x21] ss:$2 sm:%s36_s8]   ;;  %4 = vst.msk [vmem:[#allocation0] ss:$8 sm:$0xf] %vm3_vm0, %v2_v2   ;;  %s14_s16 = smov 3 }
   0x3   :  { %38 = vrot.lane.b32.xlu1 %v189_v1, %s208_s9  ;;  %5 = vst.msk [vmem:[#allocation0] ss:$8 sm:$0xf0] %vm3_vm0, %v2_v2   ;;  %v185_v4 = vld [vmem:[%s291_s0 + $0x10] ss:$2 sm:$0xff]  }
   0x4   :  { %v186_v5 = vld [vmem:[%s291_s0 + $0x20] ss:$2 sm:%s14_s16]   ;;  %10 = vst.msk [vmem:[#allocation0 + $0x40] ss:$8 sm:$0xf] %vm3_vm0, %v185_v4  }
   0x5   :  { %12 = vst.msk [vmem:[#allocation0 + $0x40] ss:$8 sm:$0xf0] %vm3_vm0, %v185_v4   ;;  %18 = vst.msk [vmem:[#allocation0 + $0x80] ss:$8 sm:$0x3] %vm3_vm0, %v186_v5  }
   0x6   :  { %28 = vrot.lane.b32.xlu0 %v188_v3, %s208_s9 }
  0x74   :  { %v22_v6 = vpop.permute.xlu0 %21  }
  0x75   :  { %24 = vst.msk [vmem:[#allocation0] ss:$8 sm:$0xf] %vm23_vm1, %v22_v6   ;;  %25 = vst.msk [vmem:[#allocation0] ss:$8 sm:$0xf0] %vm23_vm1, %v22_v6   ;;  %v39_v7 = vpop.permute.xlu1 %38  }
  0x76   :  { %42 = vst.msk [vmem:[#allocation0 + $0x80] ss:$8 sm:$0x3] %vm23_vm1, %v39_v7  }
  0x78   :  { %v29_v8 = vpop.permute.xlu0 %28  }
  0x79   :  { %32 = vst.msk [vmem:[#allocation0 + $0x40] ss:$8 sm:$0xf] %vm23_vm1, %v29_v8   ;;  %34 = vst.msk [vmem:[#allocation0 + $0x40] ss:$8 sm:$0xf0] %vm23_vm1, %v29_v8  }
  0x7c   :  { %v47_v9 = vld [vmem:[#allocation0] sm:$0x1]  ;;  %v52_v10 = vld [vmem:[#allocation0 + $0x8] sm:$0x1]  ;;  %v58_v11 = vld [vmem:[#allocation0 + $0x10] sm:$0x1] }
  0x7d   :  { %50 = vst [vmem:[%s292_s1] sm:$0x1] %v47_v9  ;;  %190 = vst [vmem:[%s292_s1 + $0x1] sm:$0x1] %v52_v10  ;;  %v65_v12 = vld [vmem:[#allocation0 + $0x18] sm:$0x1] }
  0x7e   :  { %191 = vst [vmem:[%s292_s1 + $0x2] sm:$0x1] %v58_v11  ;;  %v72_v13 = vld [vmem:[#allocation0 + $0x20] sm:$0x1]  ;;  %v79_v14 = vld [vmem:[#allocation0 + $0x28] sm:$0x1] }
  0x7f   :  { %192 = vst [vmem:[%s292_s1 + $0x3] sm:$0x1] %v65_v12  ;;  %193 = vst [vmem:[%s292_s1 + $0x4] sm:$0x1] %v72_v13  ;;  %v86_v15 = vld [vmem:[#allocation0 + $0x30] sm:$0x1] }
  0x80   :  { %194 = vst [vmem:[%s292_s1 + $0x5] sm:$0x1] %v79_v14  ;;  %v93_v16 = vld [vmem:[#allocation0 + $0x38] sm:$0x1]  ;;  %v156_v17 = vld [vmem:[#allocation0 + $0x80] sm:$0x1] }
  0x81   :  { %195 = vst [vmem:[%s292_s1 + $0x6] sm:$0x1] %v86_v15  ;;  %196 = vst [vmem:[%s292_s1 + $0x7] sm:$0x1] %v93_v16  ;;  %v163_v18 = vld [vmem:[#allocation0 + $0x88] sm:$0x1] }
  0x82   :  { %205 = vst [vmem:[%s292_s1 + $0x10] sm:$0x1] %v156_v17  ;;  %206 = vst [vmem:[%s292_s1 + $0x11] sm:$0x1] %v163_v18  ;;  %v100_v19 = vld [vmem:[#allocation0 + $0x40] sm:$0x1] }
  0x83   :  { %v107_v20 = vld [vmem:[#allocation0 + $0x48] sm:$0x1]  ;;  %v114_v21 = vld [vmem:[#allocation0 + $0x50] sm:$0x1]  ;;  %197 = vst [vmem:[%s292_s1 + $0x8] sm:$0x1] %v100_v19 }
  0x84   :  { %198 = vst [vmem:[%s292_s1 + $0x9] sm:$0x1] %v107_v20  ;;  %199 = vst [vmem:[%s292_s1 + $0xa] sm:$0x1] %v114_v21  ;;  %v121_v22 = vld [vmem:[#allocation0 + $0x58] sm:$0x1] }
  0x85   :  { %v128_v23 = vld [vmem:[#allocation0 + $0x60] sm:$0x1]  ;;  %v135_v24 = vld [vmem:[#allocation0 + $0x68] sm:$0x1]  ;;  %200 = vst [vmem:[%s292_s1 + $0xb] sm:$0x1] %v121_v22 }
  0x86   :  { %201 = vst [vmem:[%s292_s1 + $0xc] sm:$0x1] %v128_v23  ;;  %202 = vst [vmem:[%s292_s1 + $0xd] sm:$0x1] %v135_v24  ;;  %v142_v25 = vld [vmem:[#allocation0 + $0x70] sm:$0x1] }
  0x87   :  { %v149_v26 = vld [vmem:[#allocation0 + $0x78] sm:$0x1]  ;;  %203 = vst [vmem:[%s292_s1 + $0xe] sm:$0x1] %v142_v25 }
  0x88   :  { %204 = vst [vmem:[%s292_s1 + $0xf] sm:$0x1] %v149_v26 }

// kernel: discriminator_forward.1
= control target key start
LH: loop header
LB: loop body
LE: loop exit
PB: predicated region body
PF: predicated region fallthrough
CT: control target
= control target key end

     0   :  { %vm869_vm0 = vcmask 1043456   ;;  %v8567_v3 = vmov 0.0   ;;  %vm865_vm1 = vcmask 556032   ;;  %s19229_s1 = inlined_call_operand.vmem [shape: f32[324,2304], index: 1, kind: input, shape index: {}]   ;;  %s19230_s0 = inlined_call_operand.vmem [shape: f32[8,324], index: 0, kind: input, shape index: {}]   ;;  %s19231_s2 = inlined_call_operand.vmem [shape: f32[1,2304], index: 2, kind: input, shape index: {}]   ;;  %s19232_s3 = inlined_call_operand.vmem [shape: f32[2304,1152], index: 3, kind: input, shape index: {}]   ;;  %s19233_s4 = inlined_call_operand.vmem [shape: f32[1,1152], index: 4, kind: input, shape index: {}]   ;;  %s19234_s6 = inlined_call_operand.<no memory space> [shape: f32[1,1], index: 6, kind: input, shape index: {}]   ;;  %s19235_s5 = inlined_call_operand.vmem [shape: f32[1,1152], index: 5, kind: input, shape index: {}]   ;;  %s19236_s7 = inlined_call_operand.vmem [shape: f32[8,128], index: 7, kind: output, shape index: {}]  }
   0x1   :  { %v302_v0 = vld [vmem:[%s19229_s1 + $0x878] sm:$0xff]  ;;  %v752_v1 = vld [vmem:[%s19229_s1 + $0x1688] sm:$0xf]  ;;  %v301_v2 = vld [vmem:[%s19229_s1 + $0x870] sm:$0xff]  ;;  %1059 = vmatprep.mubr.f32.mxu1 %v8567_v3 }
   0x2   :  { %924 = vmatprep.subr.mxu0 %v302_v0  ;;  %8206 = vmatprep.subr.msk.mxu1 %vm869_vm0, %v752_v1  ;;  %v751_v4 = vld [vmem:[%s19229_s1 + $0x1680] sm:$0xf]  ;;  %v284_v5 = vld [vmem:[%s19229_s1 + $0x7e8] sm:$0xff]  ;;  %v734_v6 = vld [vmem:[%s19229_s1 + $0x15f8] sm:$0xff] }
   0x3   :  { %925 = vmatpush1.msra.mxu0 %v301_v2  ;;  %8207 = vmatpush1.msk.msra.mxu1 %vm869_vm0, %v751_v4  ;;  %v283_v7 = vld [vmem:[%s19229_s1 + $0x7e0] sm:$0xff]  ;;  %v733_v8 = vld [vmem:[%s19229_s1 + $0x15f0] sm:$0xff]  ;;  %v266_v9 = vld [vmem:[%s19229_s1 + $0x758] sm:$0xff] }
   0x4   :  { %926 = vmatprep.subr.mxu0 %v284_v5  ;;  %1011 = vmatprep.subr.mxu1 %v734_v6  ;;  %v716_v10 = vld [vmem:[%s19229_s1 + $0x1568] sm:$0xff]  ;;  %v265_v11 = vld [vmem:[%s19229_s1 + $0x750] sm:$0xff]  ;;  %v715_v12 = vld [vmem:[%s19229_s1 + $0x1560] sm:$0xff] }
   0x5   :  { %927 = vmatpush1.msra.mxu0 %v283_v7  ;;  %1012 = vmatpush1.msra.mxu1 %v733_v8  ;;  %v248_v13 = vld [vmem:[%s19229_s1 + $0x6c8] sm:$0xff]  ;;  %v698_v14 = vld [vmem:[%s19229_s1 + $0x14d8] sm:$0xff]  ;;  %v247_v15 = vld [vmem:[%s19229_s1 + $0x6c0] sm:$0xff] }
   0x6   :  { %928 = vmatprep.subr.mxu0 %v266_v9  ;;  %1013 = vmatprep.subr.mxu1 %v716_v10  ;;  %v697_v16 = vld [vmem:[%s19229_s1 + $0x14d0] sm:$0xff]  ;;  %v230_v17 = vld [vmem:[%s19229_s1 + $0x638] sm:$0xff]  ;;  %v680_v18 = vld [vmem:[%s19229_s1 + $0x1448] sm:$0xff] }
   0x7   :  { %929 = vmatpush1.msra.mxu0 %v265_v11  ;;  %1014 = vmatpush1.msra.mxu1 %v715_v12  ;;  %v229_v19 = vld [vmem:[%s19229_s1 + $0x630] sm:$0xff]  ;;  %v679_v20 = vld [vmem:[%s19229_s1 + $0x1440] sm:$0xff]  ;;  %v212_v21 = vld [vmem:[%s19229_s1 + $0x5a8] sm:$0xff] }
   0x8   :  { %930 = vmatprep.subr.mxu0 %v248_v13  ;;  %1015 = vmatprep.subr.mxu1 %v698_v14  ;;  %v662_v22 = vld [vmem:[%s19229_s1 + $0x13b8] sm:$0xff]  ;;  %v211_v23 = vld [vmem:[%s19229_s1 + $0x5a0] sm:$0xff]  ;;  %v661_v24 = vld [vmem:[%s19229_s1 + $0x13b0] sm:$0xff] }
   0x9   :  { %931 = vmatpush1.msra.mxu0 %v247_v15  ;;  %1016 = vmatpush1.msra.mxu1 %v697_v16  ;;  %v194_v25 = vld [vmem:[%s19229_s1 + $0x518] sm:$0xff]  ;;  %v644_v26 = vld [vmem:[%s19229_s1 + $0x1328] sm:$0xff]  ;;  %v193_v27 = vld [vmem:[%s19229_s1 + $0x510] sm:$0xff] }
   0xa   :  { %932 = vmatprep.subr.mxu0 %v230_v17  ;;  %1017 = vmatprep.subr.mxu1 %v680_v18  ;;  %v643_v28 = vld [vmem:[%s19229_s1 + $0x1320] sm:$0xff]  ;;  %v176_v29 = vld [vmem:[%s19229_s1 + $0x488] sm:$0xff]  ;;  %v626_v30 = vld [vmem:[%s19229_s1 + $0x1298] sm:$0xff] }
   0xb   :  { %933 = vmatpush1.msra.mxu0 %v229_v19  ;;  %1018 = vmatpush1.msra.mxu1 %v679_v20  ;;  %v175_v31 = vld [vmem:[%s19229_s1 + $0x480] sm:$0xff]  ;;  %v625_v32 = vld [vmem:[%s19229_s1 + $0x1290] sm:$0xff]  ;;  %v158_v33 = vld [vmem:[%s19229_s1 + $0x3f8] sm:$0xff] }
   0xc   :  { %934 = vmatprep.subr.mxu0 %v212_v21  ;;  %1019 = vmatprep.subr.mxu1 %v662_v22  ;;  %v608_v34 = vld [vmem:[%s19229_s1 + $0x1208] sm:$0xff]  ;;  %v157_v35 = vld [vmem:[%s19229_s1 + $0x3f0] sm:$0xff]  ;;  %v607_v36 = vld [vmem:[%s19229_s1 + $0x1200] sm:$0xff] }
   0xd   :  { %935 = vmatpush1.msra.mxu0 %v211_v23  ;;  %1020 = vmatpush1.msra.mxu1 %v661_v24  ;;  %v140_v37 = vld [vmem:[%s19229_s1 + $0x368] sm:$0xff]  ;;  %v139_v39 = vld [vmem:[%s19229_s1 + $0x360] sm:$0xff]  ;;  %v8732_v40 = vld [vmem:[%s19230_s0 + $0x10] sm:$0xff] }
   0xe   :  { %936 = vmatprep.subr.mxu0 %v194_v25  ;;  %1021 = vmatprep.subr.mxu1 %v644_v26  ;;  %v304_v38 = vld [vmem:[%s19229_s1 + $0x888] sm:$0xff]  ;;  %v303_v41 = vld [vmem:[%s19229_s1 + $0x880] sm:$0xff]  ;;  %v122_v42 = vld [vmem:[%s19229_s1 + $0x2d8] sm:$0xff] }
   0xf   :  { %937 = vmatpush1.msra.mxu0 %v193_v27  ;;  %1022 = vmatpush1.msra.mxu1 %v643_v28  ;;  %v286_v43 = vld [vmem:[%s19229_s1 + $0x7f8] sm:$0xff]  ;;  %v121_v44 = vld [vmem:[%s19229_s1 + $0x2d0] sm:$0xff]  ;;  %v104_v46 = vld [vmem:[%s19229_s1 + $0x248] sm:$0xff] }
  0x10   :  { %938 = vmatprep.subr.mxu0 %v176_v29  ;;  %1023 = vmatprep.subr.mxu1 %v626_v30  ;;  %v285_v45 = vld [vmem:[%s19229_s1 + $0x7f0] sm:$0xff]  ;;  %v268_v47 = vld [vmem:[%s19229_s1 + $0x768] sm:$0xff]  ;;  %v103_v48 = vld [vmem:[%s19229_s1 + $0x240] sm:$0xff] }
  0x11   :  { %939 = vmatpush1.msra.mxu0 %v175_v31  ;;  %1024 = vmatpush1.msra.mxu1 %v625_v32  ;;  %v267_v49 = vld [vmem:[%s19229_s1 + $0x760] sm:$0xff]  ;;  %v86_v50 = vld [vmem:[%s19229_s1 + $0x1b8] sm:$0xff]  ;;  %v85_v52 = vld [vmem:[%s19229_s1 + $0x1b0] sm:$0xff] }
  0x12   :  { %940 = vmatprep.subr.mxu0 %v158_v33  ;;  %1025 = vmatprep.subr.mxu1 %v608_v34  ;;  %v250_v51 = vld [vmem:[%s19229_s1 + $0x6d8] sm:$0xff]  ;;  %v249_v53 = vld [vmem:[%s19229_s1 + $0x6d0] sm:$0xff]  ;;  %v68_v54 = vld [vmem:[%s19229_s1 + $0x128] sm:$0xff] }
  0x13   :  { %941 = vmatpush1.msra.mxu0 %v157_v35  ;;  %1026 = vmatpush1.msra.mxu1 %v607_v36  ;;  %v232_v55 = vld [vmem:[%s19229_s1 + $0x648] sm:$0xff]  ;;  %v67_v56 = vld [vmem:[%s19229_s1 + $0x120] sm:$0xff]  ;;  %v50_v58 = vld [vmem:[%s19229_s1 + $0x98] sm:$0xff] }
  0x14   :  { %942 = vmatprep.subr.mxu0 %v140_v37  ;;  %1066 = vmatprep.subr.mxu1 %v304_v38  ;;  %v231_v57 = vld [vmem:[%s19229_s1 + $0x640] sm:$0xff]  ;;  %v214_v59 = vld [vmem:[%s19229_s1 + $0x5b8] sm:$0xff]  ;;  %v49_v60 = vld [vmem:[%s19229_s1 + $0x90] sm:$0xff] }
  0x15   :  { %943 = vmatpush1.msra.mxu0 %v139_v39  ;;  %8208 = vmatmul.mubr.msk.f32.vlgmr.msra.gmra.mxu1 %vm865_vm1, %v8732_v40  ;;  %v213_v61 = vld [vmem:[%s19229_s1 + $0x5b0] sm:$0xff]  ;;  %v32_v62 = vld [vmem:[%s19229_s1 + $0x8] sm:$0xff]  ;;  %v31_v0 = vld [vmem:[%s19229_s1] sm:$0xff] }
  0x16   :  { %1067 = vmatpush1.msra.mxu1 %v303_v41  ;;  %944 = vmatprep.subr.mxu0 %v122_v42  ;;  %v196_v63 = vld [vmem:[%s19229_s1 + $0x528] sm:$0xff]  ;;  %v195_v1 = vld [vmem:[%s19229_s1 + $0x520] sm:$0xff]  ;;  %v590_v2 = vld [vmem:[%s19229_s1 + $0x1178] sm:$0xff] }
  0x17   :  { %1068 = vmatprep.subr.mxu1 %v286_v43  ;;  %945 = vmatpush1.msra.mxu0 %v121_v44  ;;  %v178_v4 = vld [vmem:[%s19229_s1 + $0x498] sm:$0xff]  ;;  %v589_v5 = vld [vmem:[%s19229_s1 + $0x1170] sm:$0xff]  ;;  %v572_v7 = vld [vmem:[%s19229_s1 + $0x10e8] sm:$0xff] }
  0x18   :  { %1069 = vmatpush1.msra.mxu1 %v285_v45  ;;  %946 = vmatprep.subr.mxu0 %v104_v46  ;;  %v177_v6 = vld [vmem:[%s19229_s1 + $0x490] sm:$0xff]  ;;  %v160_v8 = vld [vmem:[%s19229_s1 + $0x408] sm:$0xff]  ;;  %v571_v9 = vld [vmem:[%s19229_s1 + $0x10e0] sm:$0xff] }
  0x19   :  { %1070 = vmatprep.subr.mxu1 %v268_v47  ;;  %947 = vmatpush1.msra.mxu0 %v103_v48  ;;  %v159_v10 = vld [vmem:[%s19229_s1 + $0x400] sm:$0xff]  ;;  %v554_v11 = vld [vmem:[%s19229_s1 + $0x1058] sm:$0xff]  ;;  %v553_v13 = vld [vmem:[%s19229_s1 + $0x1050] sm:$0xff] }
  0x1a   :  { %1071 = vmatpush1.msra.mxu1 %v267_v49  ;;  %948 = vmatprep.subr.mxu0 %v86_v50  ;;  %v142_v12 = vld [vmem:[%s19229_s1 + $0x378] sm:$0xff]  ;;  %v141_v14 = vld [vmem:[%s19229_s1 + $0x370] sm:$0xff]  ;;  %v536_v15 = vld [vmem:[%s19229_s1 + $0xfc8] sm:$0xff] }
  0x1b   :  { %1072 = vmatprep.subr.mxu1 %v250_v51  ;;  %949 = vmatpush1.msra.mxu0 %v85_v52  ;;  %v124_v16 = vld [vmem:[%s19229_s1 + $0x2e8] sm:$0xff]  ;;  %v535_v17 = vld [vmem:[%s19229_s1 + $0xfc0] sm:$0xff]  ;;  %v518_v19 = vld [vmem:[%s19229_s1 + $0xf38] sm:$0xff] }
  0x1c   :  { %1073 = vmatpush1.msra.mxu1 %v249_v53  ;;  %950 = vmatprep.subr.mxu0 %v68_v54  ;;  %v123_v18 = vld [vmem:[%s19229_s1 + $0x2e0] sm:$0xff]  ;;  %v106_v20 = vld [vmem:[%s19229_s1 + $0x258] sm:$0xff]  ;;  %v517_v21 = vld [vmem:[%s19229_s1 + $0xf30] sm:$0xff] }
  0x1d   :  { %1074 = vmatprep.subr.mxu1 %v232_v55  ;;  %951 = vmatpush1.msra.mxu0 %v67_v56  ;;  %v105_v22 = vld [vmem:[%s19229_s1 + $0x250] sm:$0xff]  ;;  %v500_v23 = vld [vmem:[%s19229_s1 + $0xea8] sm:$0xff]  ;;  %v499_v25 = vld [vmem:[%s19229_s1 + $0xea0] sm:$0xff] }
  0x1e   :  { %1075 = vmatpush1.msra.mxu1 %v231_v57  ;;  %952 = vmatprep.subr.mxu0 %v50_v58  ;;  %v88_v24 = vld [vmem:[%s19229_s1 + $0x1c8] sm:$0xff]  ;;  %v87_v26 = vld [vmem:[%s19229_s1 + $0x1c0] sm:$0xff]  ;;  %v482_v27 = vld [vmem:[%s19229_s1 + $0xe18] sm:$0xff] }
  0x1f   :  { %1076 = vmatprep.subr.mxu1 %v214_v59  ;;  %953 = vmatpush1.msra.mxu0 %v49_v60  ;;  %v70_v28 = vld [vmem:[%s19229_s1 + $0x138] sm:$0xff]  ;;  %v481_v29 = vld [vmem:[%s19229_s1 + $0xe10] sm:$0xff]  ;;  %v464_v31 = vld [vmem:[%s19229_s1 + $0xd88] sm:$0xff] }
  0x20   :  { %1077 = vmatpush1.msra.mxu1 %v213_v61  ;;  %954 = vmatprep.subr.mxu0 %v32_v62  ;;  %v69_v30 = vld [vmem:[%s19229_s1 + $0x130] sm:$0xff]  ;;  %v52_v32 = vld [vmem:[%s19229_s1 + $0xa8] sm:$0xff]  ;;  %v463_v33 = vld [vmem:[%s19229_s1 + $0xd80] sm:$0xff] }
  0x21   :  { %1078 = vmatprep.subr.mxu1 %v196_v63  ;;  %955 = vmatpush1.msra.mxu0 %v31_v0  ;;  %v51_v34 = vld [vmem:[%s19229_s1 + $0xa0] sm:$0xff]  ;;  %v446_v35 = vld [vmem:[%s19229_s1 + $0xcf8] sm:$0xff]  ;;  %v445_v37 = vld [vmem:[%s19229_s1 + $0xcf0] sm:$0xff] }
  0x22   :  { %1079 = vmatpush1.msra.mxu1 %v195_v1  ;;  %956 = vmatprep.subr.mxu0 %v590_v2  ;;  %v34_v36 = vld [vmem:[%s19229_s1 + $0x18] sm:$0xff]  ;;  %v33_v38 = vld [vmem:[%s19229_s1 + $0x10] sm:$0xff]  ;;  %v428_v39 = vld [vmem:[%s19229_s1 + $0xc68] sm:$0xff] }
  0x23   :  { %1080 = vmatprep.subr.mxu1 %v178_v4  ;;  %957 = vmatpush2.msra.mxu0 %v589_v5  ;;  %v592_v41 = vld [vmem:[%s19229_s1 + $0x1188] sm:$0xff]  ;;  %v427_v42 = vld [vmem:[%s19229_s1 + $0xc60] sm:$0xff]  ;;  %v410_v44 = vld [vmem:[%s19229_s1 + $0xbd8] sm:$0xff] }
  0x24   :  { %1081 = vmatpush1.msra.mxu1 %v177_v6  ;;  %958 = vmatprep.subr.mxu0 %v572_v7  ;;  %v591_v43 = vld [vmem:[%s19229_s1 + $0x1180] sm:$0xff]  ;;  %v574_v45 = vld [vmem:[%s19229_s1 + $0x10f8] sm:$0xff]  ;;  %v409_v46 = vld [vmem:[%s19229_s1 + $0xbd0] sm:$0xff] }
  0x25   :  { %1082 = vmatprep.subr.mxu1 %v160_v8  ;;  %959 = vmatpush2.msra.mxu0 %v571_v9  ;;  %v573_v47 = vld [vmem:[%s19229_s1 + $0x10f0] sm:$0xff]  ;;  %v392_v48 = vld [vmem:[%s19229_s1 + $0xb48] sm:$0xff]  ;;  %v391_v50 = vld [vmem:[%s19229_s1 + $0xb40] sm:$0xff] }
  0x26   :  { %1083 = vmatpush1.msra.mxu1 %v159_v10  ;;  %960 = vmatprep.subr.mxu0 %v554_v11  ;;  %v556_v49 = vld [vmem:[%s19229_s1 + $0x1068] sm:$0xff]  ;;  %v555_v51 = vld [vmem:[%s19229_s1 + $0x1060] sm:$0xff]  ;;  %v374_v52 = vld [vmem:[%s19229_s1 + $0xab8] sm:$0xff] }
  0x27   :  { %1084 = vmatprep.subr.mxu1 %v142_v12  ;;  %961 = vmatpush2.msra.mxu0 %v553_v13  ;;  %v538_v53 = vld [vmem:[%s19229_s1 + $0xfd8] sm:$0xff]  ;;  %v373_v54 = vld [vmem:[%s19229_s1 + $0xab0] sm:$0xff]  ;;  %v356_v56 = vld [vmem:[%s19229_s1 + $0xa28] sm:$0xff] }
  0x28   :  { %1085 = vmatpush1.msra.mxu1 %v141_v14  ;;  %962 = vmatprep.subr.mxu0 %v536_v15  ;;  %v537_v55 = vld [vmem:[%s19229_s1 + $0xfd0] sm:$0xff]  ;;  %v520_v57 = vld [vmem:[%s19229_s1 + $0xf48] sm:$0xff]  ;;  %v355_v58 = vld [vmem:[%s19229_s1 + $0xa20] sm:$0xff] }
  0x29   :  { %1086 = vmatprep.subr.mxu1 %v124_v16  ;;  %963 = vmatpush2.msra.mxu0 %v535_v17  ;;  %v519_v59 = vld [vmem:[%s19229_s1 + $0xf40] sm:$0xff]  ;;  %v338_v60 = vld [vmem:[%s19229_s1 + $0x998] sm:$0xff]  ;;  %v337_v62 = vld [vmem:[%s19229_s1 + $0x990] sm:$0xff] }
  0x2a   :  { %1087 = vmatpush1.msra.mxu1 %v123_v18  ;;  %964 = vmatprep.subr.mxu0 %v518_v19  ;;  %v502_v61 = vld [vmem:[%s19229_s1 + $0xeb8] sm:$0xff]  ;;  %v501_v63 = vld [vmem:[%s19229_s1 + $0xeb0] sm:$0xff]  ;;  %v320_v0 = vld [vmem:[%s19229_s1 + $0x908] sm:$0xff] }
  0x2b   :  { %1088 = vmatprep.subr.mxu1 %v106_v20  ;;  %965 = vmatpush2.msra.mxu0 %v517_v21  ;;  %v484_v1 = vld [vmem:[%s19229_s1 + $0xe28] sm:$0xff]  ;;  %v319_v2 = vld [vmem:[%s19229_s1 + $0x900] sm:$0xff]  ;;  %v466_v7 = vld [vmem:[%s19229_s1 + $0xd98] sm:$0xff] }
  0x2c   :  { %1089 = vmatpush1.msra.mxu1 %v105_v22  ;;  %966 = vmatprep.subr.mxu0 %v500_v23  ;;  %v9003_v4 = vld [vmem:[%s19230_s0 + $0x8] sm:$0xff]  ;;  %v483_v5 = vld [vmem:[%s19229_s1 + $0xe20] sm:$0xff]  ;;  %v754_v8 = vld [vmem:[%s19229_s1 + $0x1698] sm:$0xf] }
  0x2d   :  { %1090 = vmatprep.subr.mxu1 %v88_v24  ;;  %967 = vmatpush2.msra.mxu0 %v499_v25  ;;  %v9011_v6 = vld [vmem:[%s19230_s0] sm:$0xff]  ;;  %v465_v9 = vld [vmem:[%s19229_s1 + $0xd90] sm:$0xff]  ;;  %v448_v11 = vld [vmem:[%s19229_s1 + $0xd08] sm:$0xff] }
  0x2e   :  { %1091 = vmatpush1.msra.mxu1 %v87_v26  ;;  %968 = vmatprep.subr.mxu0 %v482_v27  ;;  %v753_v10 = vld [vmem:[%s19229_s1 + $0x1690] sm:$0xf]  ;;  %v736_v12 = vld [vmem:[%s19229_s1 + $0x1608] sm:$0xff]  ;;  %v447_v13 = vld [vmem:[%s19229_s1 + $0xd00] sm:$0xff] }
  0x2f   :  { %1092 = vmatprep.subr.mxu1 %v70_v28  ;;  %969 = vmatpush2.msra.mxu0 %v481_v29  ;;  %v735_v14 = vld [vmem:[%s19229_s1 + $0x1600] sm:$0xff]  ;;  %v430_v15 = vld [vmem:[%s19229_s1 + $0xc78] sm:$0xff]  ;;  %v429_v17 = vld [vmem:[%s19229_s1 + $0xc70] sm:$0xff] }
  0x30   :  { %1093 = vmatpush1.msra.mxu1 %v69_v30  ;;  %970 = vmatprep.subr.mxu0 %v464_v31  ;;  %v718_v16 = vld [vmem:[%s19229_s1 + $0x1578] sm:$0xff]  ;;  %v717_v18 = vld [vmem:[%s19229_s1 + $0x1570] sm:$0xff]  ;;  %v412_v19 = vld [vmem:[%s19229_s1 + $0xbe8] sm:$0xff] }
  0x31   :  { %1094 = vmatprep.subr.mxu1 %v52_v32  ;;  %971 = vmatpush2.msra.mxu0 %v463_v33  ;;  %v700_v20 = vld [vmem:[%s19229_s1 + $0x14e8] sm:$0xff]  ;;  %v411_v21 = vld [vmem:[%s19229_s1 + $0xbe0] sm:$0xff]  ;;  %v394_v23 = vld [vmem:[%s19229_s1 + $0xb58] sm:$0xff] }
  0x32   :  { %1095 = vmatpush1.msra.mxu1 %v51_v34  ;;  %972 = vmatprep.subr.mxu0 %v446_v35  ;;  %v699_v22 = vld [vmem:[%s19229_s1 + $0x14e0] sm:$0xff]  ;;  %v682_v24 = vld [vmem:[%s19229_s1 + $0x1458] sm:$0xff]  ;;  %v393_v25 = vld [vmem:[%s19229_s1 + $0xb50] sm:$0xff] }
  0x33   :  { %1096 = vmatprep.subr.mxu1 %v34_v36  ;;  %973 = vmatpush2.msra.mxu0 %v445_v37  ;;  %v681_v26 = vld [vmem:[%s19229_s1 + $0x1450] sm:$0xff]  ;;  %v376_v27 = vld [vmem:[%s19229_s1 + $0xac8] sm:$0xff]  ;;  %v375_v29 = vld [vmem:[%s19229_s1 + $0xac0] sm:$0xff] }
  0x34   :  { %1097 = vmatpush1.msra.mxu1 %v33_v38  ;;  %974 = vmatprep.subr.mxu0 %v428_v39  ;;  %v664_v28 = vld [vmem:[%s19229_s1 + $0x13c8] sm:$0xff]  ;;  %v663_v30 = vld [vmem:[%s19229_s1 + $0x13c0] sm:$0xff]  ;;  %v358_v31 = vld [vmem:[%s19229_s1 + $0xa38] sm:$0xff] }
  0x35   :  { %1098 = vmatprep.subr.mxu1 %v592_v41  ;;  %975 = vmatpush2.msra.mxu0 %v427_v42  ;;  %v646_v32 = vld [vmem:[%s19229_s1 + $0x1338] sm:$0xff]  ;;  %v357_v33 = vld [vmem:[%s19229_s1 + $0xa30] sm:$0xff]  ;;  %v340_v35 = vld [vmem:[%s19229_s1 + $0x9a8] sm:$0xff] }
  0x36   :  { %1099 = vmatpush2.msra.mxu1 %v591_v43  ;;  %976 = vmatprep.subr.mxu0 %v410_v44  ;;  %v645_v34 = vld [vmem:[%s19229_s1 + $0x1330] sm:$0xff]  ;;  %v628_v36 = vld [vmem:[%s19229_s1 + $0x12a8] sm:$0xff]  ;;  %v339_v37 = vld [vmem:[%s19229_s1 + $0x9a0] sm:$0xff] }
  0x37   :  { %1100 = vmatprep.subr.mxu1 %v574_v45  ;;  %977 = vmatpush2.msra.mxu0 %v409_v46  ;;  %v627_v38 = vld [vmem:[%s19229_s1 + $0x12a0] sm:$0xff]  ;;  %v322_v39 = vld [vmem:[%s19229_s1 + $0x918] sm:$0xff]  ;;  %v321_v42 = vld [vmem:[%s19229_s1 + $0x910] sm:$0xff] }
  0x38   :  { %1101 = vmatpush2.msra.mxu1 %v573_v47  ;;  %978 = vmatprep.subr.mxu0 %v392_v48  ;;  %v610_v41 = vld [vmem:[%s19229_s1 + $0x1218] sm:$0xff]  ;;  %v609_v43 = vld [vmem:[%s19229_s1 + $0x1210] sm:$0xff]  ;;  %v756_v45 = vld [vmem:[%s19229_s1 + $0x16a8] sm:$0xf] }
  0x39   :  { %1102 = vmatprep.subr.mxu1 %v556_v49  ;;  %979 = vmatpush2.msra.mxu0 %v391_v50  ;;  %v306_v44 = vld [vmem:[%s19229_s1 + $0x898] sm:$0xff]  ;;  %v305_v46 = vld [vmem:[%s19229_s1 + $0x890] sm:$0xff]  ;;  %v755_v47 = vld [vmem:[%s19229_s1 + $0x16a0] sm:$0xf] }
  0x3a   :  { %1103 = vmatpush2.msra.mxu1 %v555_v51  ;;  %980 = vmatprep.subr.mxu0 %v374_v52  ;;  %v288_v48 = vld [vmem:[%s19229_s1 + $0x808] sm:$0xff]  ;;  %v738_v49 = vld [vmem:[%s19229_s1 + $0x1618] sm:$0xff]  ;;  %v287_v50 = vld [vmem:[%s19229_s1 + $0x800] sm:$0xff] }
  0x3b   :  { %1104 = vmatprep.subr.mxu1 %v538_v53  ;;  %981 = vmatpush2.msra.mxu0 %v373_v54  ;;  %v737_v51 = vld [vmem:[%s19229_s1 + $0x1610] sm:$0xff]  ;;  %v270_v52 = vld [vmem:[%s19229_s1 + $0x778] sm:$0xff]  ;;  %v720_v53 = vld [vmem:[%s19229_s1 + $0x1588] sm:$0xff] }
  0x3c   :  { %1105 = vmatpush2.msra.mxu1 %v537_v55  ;;  %982 = vmatprep.subr.mxu0 %v356_v56  ;;  %v269_v54 = vld [vmem:[%s19229_s1 + $0x770] sm:$0xff]  ;;  %v719_v55 = vld [vmem:[%s19229_s1 + $0x1580] sm:$0xff]  ;;  %v252_v56 = vld [vmem:[%s19229_s1 + $0x6e8] sm:$0xff] }
  0x3d   :  { %1106 = vmatprep.subr.mxu1 %v520_v57  ;;  %983 = vmatpush2.msra.mxu0 %v355_v58  ;;  %v702_v57 = vld [vmem:[%s19229_s1 + $0x14f8] sm:$0xff]  ;;  %v251_v58 = vld [vmem:[%s19229_s1 + $0x6e0] sm:$0xff] }
  0x3e   :  { %1107 = vmatpush2.msra.mxu1 %v519_v59  ;;  %984 = vmatprep.subr.mxu0 %v338_v60  ;;  %v701_v59 = vld [vmem:[%s19229_s1 + $0x14f0] sm:$0xff]  ;;  %v234_v60 = vld [vmem:[%s19229_s1 + $0x658] sm:$0xff] }
  0x3f   :  { %1108 = vmatprep.subr.mxu1 %v502_v61  ;;  %985 = vmatpush2.msra.mxu0 %v337_v62  ;;  %v684_v61 = vld [vmem:[%s19229_s1 + $0x1468] sm:$0xff]  ;;  %v233_v62 = vld [vmem:[%s19229_s1 + $0x650] sm:$0xff] }
  0x40   :  { %1109 = vmatpush2.msra.mxu1 %v501_v63  ;;  %986 = vmatprep.subr.mxu0 %v320_v0  ;;  %v683_v63 = vld [vmem:[%s19229_s1 + $0x1460] sm:$0xff]  ;;  %v216_v0 = vld [vmem:[%s19229_s1 + $0x5c8] sm:$0xff] }
  0x41   :  { %1110 = vmatprep.subr.mxu1 %v484_v1  ;;  %987 = vmatpush2.msra.mxu0 %v319_v2  ;;  %v666_v1 = vld [vmem:[%s19229_s1 + $0x13d8] sm:$0xff]  ;;  %v215_v2 = vld [vmem:[%s19229_s1 + $0x5c0] sm:$0xff] }
  0x42   :  { %988 = vmatprep.mubr.f32.mxu0 %v9003_v4  ;;  %1111 = vmatpush2.msra.mxu1 %v483_v5  ;;  %v665_v5 = vld [vmem:[%s19229_s1 + $0x13d0] sm:$0xff] }
  0x43   :  { %989 = vmatmul.mubr.f32.vlgmr.msra.gmra.mxu0 %v9011_v6  ;;  %1112 = vmatprep.subr.mxu1 %v466_v7  ;;  %v198_v7 = vld [vmem:[%s19229_s1 + $0x538] sm:$0xff] }
  0x44   :  { %8209 = vmatprep.subr.msk.mxu0 %vm869_vm0, %v754_v8  ;;  %1113 = vmatpush2.msra.mxu1 %v465_v9  ;;  %v648_v8 = vld [vmem:[%s19229_s1 + $0x1348] sm:$0xff]  ;;  %v197_v9 = vld [vmem:[%s19229_s1 + $0x530] sm:$0xff] }
  0x45   :  { %8210 = vmatpush1.msk.msra.mxu0 %vm869_vm0, %v753_v10  ;;  %1114 = vmatprep.subr.mxu1 %v448_v11  ;;  %v647_v10 = vld [vmem:[%s19229_s1 + $0x1340] sm:$0xff]  ;;  %v180_v11 = vld [vmem:[%s19229_s1 + $0x4a8] sm:$0xff] }
  0x46   :  { %1153 = vmatprep.subr.mxu0 %v736_v12  ;;  %1115 = vmatpush2.msra.mxu1 %v447_v13  ;;  %v630_v12 = vld [vmem:[%s19229_s1 + $0x12b8] sm:$0xff]  ;;  %v179_v13 = vld [vmem:[%s19229_s1 + $0x4a0] sm:$0xff] }
  0x47   :  { %1154 = vmatpush1.msra.mxu0 %v735_v14  ;;  %1116 = vmatprep.subr.mxu1 %v430_v15  ;;  %v629_v14 = vld [vmem:[%s19229_s1 + $0x12b0] sm:$0xff]  ;;  %v162_v15 = vld [vmem:[%s19229_s1 + $0x418] sm:$0xff] }
  0x48   :  { %1155 = vmatprep.subr.mxu0 %v718_v16  ;;  %1117 = vmatpush2.msra.mxu1 %v429_v17  ;;  %v612_v16 = vld [vmem:[%s19229_s1 + $0x1228] sm:$0xff]  ;;  %v161_v17 = vld [vmem:[%s19229_s1 + $0x410] sm:$0xff] }
  0x49   :  { %1156 = vmatpush1.msra.mxu0 %v717_v18  ;;  %1118 = vmatprep.subr.mxu1 %v412_v19  ;;  %v611_v18 = vld [vmem:[%s19229_s1 + $0x1220] sm:$0xff]  ;;  %v144_v19 = vld [vmem:[%s19229_s1 + $0x388] sm:$0xff] }
  0x4a   :  { %1157 = vmatprep.subr.mxu0 %v700_v20  ;;  %1119 = vmatpush2.msra.mxu1 %v411_v21  ;;  %v308_v20 = vld [vmem:[%s19229_s1 + $0x8a8] sm:$0xff]  ;;  %v143_v21 = vld [vmem:[%s19229_s1 + $0x380] sm:$0xff] }
  0x4b   :  { %1158 = vmatpush1.msra.mxu0 %v699_v22  ;;  %1120 = vmatprep.subr.mxu1 %v394_v23  ;;  %v307_v22 = vld [vmem:[%s19229_s1 + $0x8a0] sm:$0xff]  ;;  %v126_v23 = vld [vmem:[%s19229_s1 + $0x2f8] sm:$0xff] }
  0x4c   :  { %1159 = vmatprep.subr.mxu0 %v682_v24  ;;  %1121 = vmatpush2.msra.mxu1 %v393_v25  ;;  %v290_v24 = vld [vmem:[%s19229_s1 + $0x818] sm:$0xff]  ;;  %v125_v25 = vld [vmem:[%s19229_s1 + $0x2f0] sm:$0xff] }
  0x4d   :  { %1160 = vmatpush1.msra.mxu0 %v681_v26  ;;  %1122 = vmatprep.subr.mxu1 %v376_v27  ;;  %v289_v26 = vld [vmem:[%s19229_s1 + $0x810] sm:$0xff]  ;;  %v108_v27 = vld [vmem:[%s19229_s1 + $0x268] sm:$0xff] }
  0x4e   :  { %1161 = vmatprep.subr.mxu0 %v664_v28  ;;  %1123 = vmatpush2.msra.mxu1 %v375_v29  ;;  %v272_v28 = vld [vmem:[%s19229_s1 + $0x788] sm:$0xff]  ;;  %v107_v29 = vld [vmem:[%s19229_s1 + $0x260] sm:$0xff] }
  0x4f   :  { %1162 = vmatpush1.msra.mxu0 %v663_v30  ;;  %1124 = vmatprep.subr.mxu1 %v358_v31  ;;  %v90_v30 = vld [vmem:[%s19229_s1 + $0x1d8] sm:$0xff] }
  0x50   :  { %1163 = vmatprep.subr.mxu0 %v646_v32  ;;  %1125 = vmatpush2.msra.mxu1 %v357_v33  ;;  %v254_v31 = vld [vmem:[%s19229_s1 + $0x6f8] sm:$0xff]  ;;  %v89_v32 = vld [vmem:[%s19229_s1 + $0x1d0] sm:$0xff] }
  0x51   :  { %1164 = vmatpush1.msra.mxu0 %v645_v34  ;;  %1126 = vmatprep.subr.mxu1 %v340_v35  ;;  %v253_v33 = vld [vmem:[%s19229_s1 + $0x6f0] sm:$0xff]  ;;  %v72_v34 = vld [vmem:[%s19229_s1 + $0x148] sm:$0xff] }
  0x52   :  { %1165 = vmatprep.subr.mxu0 %v628_v36  ;;  %1127 = vmatpush2.msra.mxu1 %v339_v37  ;;  %v236_v35 = vld [vmem:[%s19229_s1 + $0x668] sm:$0xff]  ;;  %v71_v36 = vld [vmem:[%s19229_s1 + $0x140] sm:$0xff] }
  0x53   :  { %1166 = vmatpush1.msra.mxu0 %v627_v38  ;;  %1128 = vmatprep.subr.mxu1 %v322_v39  ;;  %v235_v37 = vld [vmem:[%s19229_s1 + $0x660] sm:$0xff]  ;;  %v54_v38 = vld [vmem:[%s19229_s1 + $0xb8] sm:$0xff] }
  0x54   :  { %1167 = vmatprep.subr.mxu0 %v610_v41  ;;  %1129 = vmatpush2.msra.mxu1 %v321_v42  ;;  %v218_v39 = vld [vmem:[%s19229_s1 + $0x5d8] sm:$0xff]  ;;  %v53_v41 = vld [vmem:[%s19229_s1 + $0xb0] sm:$0xff] }
  0x55   :  { %1130 = vmatprep.mubr.f32.mxu1 %v9003_v4  ;;  %1168 = vmatpush1.msra.mxu0 %v609_v43  ;;  %v217_v42 = vld [vmem:[%s19229_s1 + $0x5d0] sm:$0xff]  ;;  %v36_v43 = vld [vmem:[%s19229_s1 + $0x28] sm:$0xff] }
  0x56   :  { %1201 = vmatprep.mubr.f32.mxu0 %v8567_v3  ;;  %1131 = vmatmul.mubr.f32.vlgmr.msra.gmra.mxu1 %v9011_v6 }
  0x57   :  { %8211 = vmatmul.mubr.msk.f32.vlgmr.msra.gmra.mxu0 %vm865_vm1, %v8732_v40  ;;  %1208 = vmatprep.subr.mxu0 %v306_v44  ;;  %v200_v44 = vld [vmem:[%s19229_s1 + $0x548] sm:$0xff] }
  0x58   :  { %8212 = vmatprep.subr.msk.mxu1 %vm869_vm0, %v756_v45  ;;  %1209 = vmatpush1.msra.mxu0 %v305_v46  ;;  %v35_v45 = vld [vmem:[%s19229_s1 + $0x20] sm:$0xff] }
  0x59   :  { %8213 = vmatpush1.msk.msra.mxu1 %vm869_vm0, %v755_v47  ;;  %1210 = vmatprep.subr.mxu0 %v288_v48  ;;  %v199_v46 = vld [vmem:[%s19229_s1 + $0x540] sm:$0xff]  ;;  %v594_v47 = vld [vmem:[%s19229_s1 + $0x1198] sm:$0xff] }
  0x5a   :  { %1295 = vmatprep.subr.mxu1 %v738_v49  ;;  %1211 = vmatpush1.msra.mxu0 %v287_v50  ;;  %v182_v48 = vld [vmem:[%s19229_s1 + $0x4b8] sm:$0xff]  ;;  %v593_v49 = vld [vmem:[%s19229_s1 + $0x1190] sm:$0xff] }
  0x5b   :  { %1296 = vmatpush1.msra.mxu1 %v737_v51  ;;  %1212 = vmatprep.subr.mxu0 %v270_v52  ;;  %v181_v50 = vld [vmem:[%s19229_s1 + $0x4b0] sm:$0xff]  ;;  %v576_v51 = vld [vmem:[%s19229_s1 + $0x1108] sm:$0xff] }
  0x5c   :  { %1297 = vmatprep.subr.mxu1 %v720_v53  ;;  %1213 = vmatpush1.msra.mxu0 %v269_v54  ;;  %v164_v52 = vld [vmem:[%s19229_s1 + $0x428] sm:$0xff]  ;;  %v575_v53 = vld [vmem:[%s19229_s1 + $0x1100] sm:$0xff] }
  0x5d   :  { %1298 = vmatpush1.msra.mxu1 %v719_v55  ;;  %1214 = vmatprep.subr.mxu0 %v252_v56  ;;  %v163_v54 = vld [vmem:[%s19229_s1 + $0x420] sm:$0xff]  ;;  %v558_v55 = vld [vmem:[%s19229_s1 + $0x1078] sm:$0xff] }
  0x5e   :  { %1299 = vmatprep.subr.mxu1 %v702_v57  ;;  %1215 = vmatpush1.msra.mxu0 %v251_v58  ;;  %v146_v56 = vld [vmem:[%s19229_s1 + $0x398] sm:$0xff]  ;;  %v557_v57 = vld [vmem:[%s19229_s1 + $0x1070] sm:$0xff] }
  0x5f   :  { %1300 = vmatpush1.msra.mxu1 %v701_v59  ;;  %1216 = vmatprep.subr.mxu0 %v234_v60  ;;  %v145_v58 = vld [vmem:[%s19229_s1 + $0x390] sm:$0xff]  ;;  %v540_v59 = vld [vmem:[%s19229_s1 + $0xfe8] sm:$0xff] }
  0x60   :  { %1301 = vmatprep.subr.mxu1 %v684_v61  ;;  %1217 = vmatpush1.msra.mxu0 %v233_v62  ;;  %v128_v60 = vld [vmem:[%s19229_s1 + $0x308] sm:$0xff]  ;;  %v539_v61 = vld [vmem:[%s19229_s1 + $0xfe0] sm:$0xff] }
  0x61   :  { %1302 = vmatpush1.msra.mxu1 %v683_v63  ;;  %1218 = vmatprep.subr.mxu0 %v216_v0  ;;  %v127_v62 = vld [vmem:[%s19229_s1 + $0x300] sm:$0xff]  ;;  %v522_v63 = vld [vmem:[%s19229_s1 + $0xf58] sm:$0xff] }
  0x62   :  { %1303 = vmatprep.subr.mxu1 %v666_v1  ;;  %1219 = vmatpush1.msra.mxu0 %v215_v2  ;;  %v110_v0 = vld [vmem:[%s19229_s1 + $0x278] sm:$0xff]  ;;  %v521_v1 = vld [vmem:[%s19229_s1 + $0xf50] sm:$0xff] }
  0x63   :  { %1304 = vmatpush1.msra.mxu1 %v665_v5  ;;  %1220 = vmatprep.subr.mxu0 %v198_v7  ;;  %v109_v2 = vld [vmem:[%s19229_s1 + $0x270] sm:$0xff]  ;;  %v504_v5 = vld [vmem:[%s19229_s1 + $0xec8] sm:$0xff] }
  0x64   :  { %1305 = vmatprep.subr.mxu1 %v648_v8  ;;  %1221 = vmatpush1.msra.mxu0 %v197_v9  ;;  %v92_v7 = vld [vmem:[%s19229_s1 + $0x1e8] sm:$0xff]  ;;  %v503_v8 = vld [vmem:[%s19229_s1 + $0xec0] sm:$0xff] }
  0x65   :  { %1306 = vmatpush1.msra.mxu1 %v647_v10  ;;  %1222 = vmatprep.subr.mxu0 %v180_v11  ;;  %v91_v9 = vld [vmem:[%s19229_s1 + $0x1e0] sm:$0xff]  ;;  %v486_v10 = vld [vmem:[%s19229_s1 + $0xe38] sm:$0xff] }
  0x66   :  { %1307 = vmatprep.subr.mxu1 %v630_v12  ;;  %1223 = vmatpush1.msra.mxu0 %v179_v13  ;;  %v74_v11 = vld [vmem:[%s19229_s1 + $0x158] sm:$0xff]  ;;  %v485_v12 = vld [vmem:[%s19229_s1 + $0xe30] sm:$0xff] }
  0x67   :  { %1308 = vmatpush1.msra.mxu1 %v629_v14  ;;  %1224 = vmatprep.subr.mxu0 %v162_v15  ;;  %v73_v13 = vld [vmem:[%s19229_s1 + $0x150] sm:$0xff]  ;;  %v468_v14 = vld [vmem:[%s19229_s1 + $0xda8] sm:$0xff] }
  0x68   :  { %1309 = vmatprep.subr.mxu1 %v612_v16  ;;  %1225 = vmatpush1.msra.mxu0 %v161_v17  ;;  %v56_v15 = vld [vmem:[%s19229_s1 + $0xc8] sm:$0xff]  ;;  %v467_v16 = vld [vmem:[%s19229_s1 + $0xda0] sm:$0xff] }
  0x69   :  { %1310 = vmatpush1.msra.mxu1 %v611_v18  ;;  %1226 = vmatprep.subr.mxu0 %v144_v19  ;;  %v55_v17 = vld [vmem:[%s19229_s1 + $0xc0] sm:$0xff]  ;;  %v450_v18 = vld [vmem:[%s19229_s1 + $0xd18] sm:$0xff] }
  0x6a   :  { %1343 = vmatprep.mubr.f32.mxu1 %v8567_v3  ;;  %1350 = vmatprep.subr.mxu1 %v308_v20  ;;  %v38_v19 = vld [vmem:[%s19229_s1 + $0x38] sm:$0xff]  ;;  %v449_v20 = vld [vmem:[%s19229_s1 + $0xd10] sm:$0xff] }
  0x6b   :  { %1227 = vmatpush1.msra.mxu0 %v143_v21  ;;  %8214 = vmatmul.mubr.msk.f32.vlgmr.msra.gmra.mxu1 %vm865_vm1, %v8732_v40  ;;  %v271_v40 = vld [vmem:[%s19229_s1 + $0x780] sm:$0xff]  ;;  %v37_v21 = vld [vmem:[%s19229_s1 + $0x30] sm:$0xff] }
  0x6c   :  { %1351 = vmatpush1.msra.mxu1 %v307_v22  ;;  %1228 = vmatprep.subr.mxu0 %v126_v23  ;;  %v432_v22 = vld [vmem:[%s19229_s1 + $0xc88] sm:$0xff] }
  0x6d   :  { %1352 = vmatprep.subr.mxu1 %v290_v24  ;;  %1229 = vmatpush1.msra.mxu0 %v125_v25  ;;  %v596_v23 = vld [vmem:[%s19229_s1 + $0x11a8] sm:$0xff]  ;;  %v431_v24 = vld [vmem:[%s19229_s1 + $0xc80] sm:$0xff] }
  0x6e   :  { %1353 = vmatpush1.msra.mxu1 %v289_v26  ;;  %1230 = vmatprep.subr.mxu0 %v108_v27  ;;  %v595_v25 = vld [vmem:[%s19229_s1 + $0x11a0] sm:$0xff]  ;;  %v414_v26 = vld [vmem:[%s19229_s1 + $0xbf8] sm:$0xff] }
  0x6f   :  { %1354 = vmatprep.subr.mxu1 %v272_v28  ;;  %1231 = vmatpush1.msra.mxu0 %v107_v29  ;;  %v578_v27 = vld [vmem:[%s19229_s1 + $0x1118] sm:$0xff]  ;;  %v413_v28 = vld [vmem:[%s19229_s1 + $0xbf0] sm:$0xff] }
  0x70   :  { %1355 = vmatpush1.msra.mxu1 %v271_v40  ;;  %1232 = vmatprep.subr.mxu0 %v90_v30  ;;  %v577_v29 = vld [vmem:[%s19229_s1 + $0x1110] sm:$0xff]  ;;  %v396_v40 = vld [vmem:[%s19229_s1 + $0xb68] sm:$0xff] }
  0x71   :  { %1356 = vmatprep.subr.mxu1 %v254_v31  ;;  %1233 = vmatpush1.msra.mxu0 %v89_v32  ;;  %v560_v30 = vld [vmem:[%s19229_s1 + $0x1088] sm:$0xff]  ;;  %v395_v31 = vld [vmem:[%s19229_s1 + $0xb60] sm:$0xff] }
  0x72   :  { %1357 = vmatpush1.msra.mxu1 %v253_v33  ;;  %1234 = vmatprep.subr.mxu0 %v72_v34  ;;  %v559_v32 = vld [vmem:[%s19229_s1 + $0x1080] sm:$0xff]  ;;  %v378_v33 = vld [vmem:[%s19229_s1 + $0xad8] sm:$0xff] }
  0x73   :  { %1358 = vmatprep.subr.mxu1 %v236_v35  ;;  %1235 = vmatpush1.msra.mxu0 %v71_v36  ;;  %v542_v34 = vld [vmem:[%s19229_s1 + $0xff8] sm:$0xff]  ;;  %v377_v35 = vld [vmem:[%s19229_s1 + $0xad0] sm:$0xff] }
  0x74   :  { %1359 = vmatpush1.msra.mxu1 %v235_v37  ;;  %1236 = vmatprep.subr.mxu0 %v54_v38  ;;  %v541_v36 = vld [vmem:[%s19229_s1 + $0xff0] sm:$0xff]  ;;  %v360_v37 = vld [vmem:[%s19229_s1 + $0xa48] sm:$0xff] }
  0x75   :  { %1360 = vmatprep.subr.mxu1 %v218_v39  ;;  %1237 = vmatpush1.msra.mxu0 %v53_v41  ;;  %v524_v38 = vld [vmem:[%s19229_s1 + $0xf68] sm:$0xff]  ;;  %v359_v39 = vld [vmem:[%s19229_s1 + $0xa40] sm:$0xff] }
  0x76   :  { %1361 = vmatpush1.msra.mxu1 %v217_v42  ;;  %1238 = vmatprep.subr.mxu0 %v36_v43  ;;  %v523_v41 = vld [vmem:[%s19229_s1 + $0xf60] sm:$0xff]  ;;  %v342_v42 = vld [vmem:[%s19229_s1 + $0x9b8] sm:$0xff] }
  0x77   :  { %1362 = vmatprep.subr.mxu1 %v200_v44  ;;  %1239 = vmatpush1.msra.mxu0 %v35_v45  ;;  %v506_v43 = vld [vmem:[%s19229_s1 + $0xed8] sm:$0xff]  ;;  %v341_v44 = vld [vmem:[%s19229_s1 + $0x9b0] sm:$0xff] }
  0x78   :  { %1363 = vmatpush1.msra.mxu1 %v199_v46  ;;  %1240 = vmatprep.subr.mxu0 %v594_v47  ;;  %v505_v45 = vld [vmem:[%s19229_s1 + $0xed0] sm:$0xff]  ;;  %v324_v46 = vld [vmem:[%s19229_s1 + $0x928] sm:$0xff] }
  0x79   :  { %1364 = vmatprep.subr.mxu1 %v182_v48  ;;  %1241 = vmatpush2.msra.mxu0 %v593_v49  ;;  %v488_v47 = vld [vmem:[%s19229_s1 + $0xe48] sm:$0xff]  ;;  %v323_v48 = vld [vmem:[%s19229_s1 + $0x920] sm:$0xff] }
  0x7a   :  { %1365 = vmatpush1.msra.mxu1 %v181_v50  ;;  %1242 = vmatprep.subr.mxu0 %v576_v51  ;;  %v487_v49 = vld [vmem:[%s19229_s1 + $0xe40] sm:$0xff]  ;;  %v470_v50 = vld [vmem:[%s19229_s1 + $0xdb8] sm:$0xff] }
  0x7b   :  { %1366 = vmatprep.subr.mxu1 %v164_v52  ;;  %1243 = vmatpush2.msra.mxu0 %v575_v53  ;;  %v758_v51 = vld [vmem:[%s19229_s1 + $0x16b8] sm:$0xf]  ;;  %v469_v52 = vld [vmem:[%s19229_s1 + $0xdb0] sm:$0xff] }
  0x7c   :  { %1367 = vmatpush1.msra.mxu1 %v163_v54  ;;  %1244 = vmatprep.subr.mxu0 %v558_v55  ;;  %v757_v53 = vld [vmem:[%s19229_s1 + $0x16b0] sm:$0xf]  ;;  %v452_v54 = vld [vmem:[%s19229_s1 + $0xd28] sm:$0xff] }
  0x7d   :  { %1368 = vmatprep.subr.mxu1 %v146_v56  ;;  %1245 = vmatpush2.msra.mxu0 %v557_v57  ;;  %v740_v55 = vld [vmem:[%s19229_s1 + $0x1628] sm:$0xff]  ;;  %v451_v56 = vld [vmem:[%s19229_s1 + $0xd20] sm:$0xff] }
  0x7e   :  { %1369 = vmatpush1.msra.mxu1 %v145_v58  ;;  %1246 = vmatprep.subr.mxu0 %v540_v59  ;;  %v739_v57 = vld [vmem:[%s19229_s1 + $0x1620] sm:$0xff]  ;;  %v434_v58 = vld [vmem:[%s19229_s1 + $0xc98] sm:$0xff] }
  0x7f   :  { %1370 = vmatprep.subr.mxu1 %v128_v60  ;;  %1247 = vmatpush2.msra.mxu0 %v539_v61  ;;  %v722_v59 = vld [vmem:[%s19229_s1 + $0x1598] sm:$0xff]  ;;  %v433_v60 = vld [vmem:[%s19229_s1 + $0xc90] sm:$0xff] }
  0x80   :  { %1371 = vmatpush1.msra.mxu1 %v127_v62  ;;  %1248 = vmatprep.subr.mxu0 %v522_v63  ;;  %v721_v61 = vld [vmem:[%s19229_s1 + $0x1590] sm:$0xff]  ;;  %v416_v62 = vld [vmem:[%s19229_s1 + $0xc08] sm:$0xff] }
  0x81   :  { %1372 = vmatprep.subr.mxu1 %v110_v0  ;;  %1249 = vmatpush2.msra.mxu0 %v521_v1  ;;  %v704_v63 = vld [vmem:[%s19229_s1 + $0x1508] sm:$0xff]  ;;  %v415_v0 = vld [vmem:[%s19229_s1 + $0xc00] sm:$0xff] }
  0x82   :  { %1373 = vmatpush1.msra.mxu1 %v109_v2  ;;  %1250 = vmatprep.subr.mxu0 %v504_v5  ;;  %v703_v1 = vld [vmem:[%s19229_s1 + $0x1500] sm:$0xff]  ;;  %v398_v2 = vld [vmem:[%s19229_s1 + $0xb78] sm:$0xff] }
  0x83   :  { %1374 = vmatprep.subr.mxu1 %v92_v7  ;;  %1251 = vmatpush2.msra.mxu0 %v503_v8  ;;  %v686_v5 = vld [vmem:[%s19229_s1 + $0x1478] sm:$0xff]  ;;  %v397_v7 = vld [vmem:[%s19229_s1 + $0xb70] sm:$0xff] }
  0x84   :  { %1375 = vmatpush1.msra.mxu1 %v91_v9  ;;  %1252 = vmatprep.subr.mxu0 %v486_v10  ;;  %v685_v8 = vld [vmem:[%s19229_s1 + $0x1470] sm:$0xff]  ;;  %v380_v9 = vld [vmem:[%s19229_s1 + $0xae8] sm:$0xff] }
  0x85   :  { %1376 = vmatprep.subr.mxu1 %v74_v11  ;;  %1253 = vmatpush2.msra.mxu0 %v485_v12  ;;  %v668_v10 = vld [vmem:[%s19229_s1 + $0x13e8] sm:$0xff]  ;;  %v379_v11 = vld [vmem:[%s19229_s1 + $0xae0] sm:$0xff] }
  0x86   :  { %1377 = vmatpush1.msra.mxu1 %v73_v13  ;;  %1254 = vmatprep.subr.mxu0 %v468_v14  ;;  %v667_v12 = vld [vmem:[%s19229_s1 + $0x13e0] sm:$0xff]  ;;  %v362_v13 = vld [vmem:[%s19229_s1 + $0xa58] sm:$0xff] }
  0x87   :  { %1378 = vmatprep.subr.mxu1 %v56_v15  ;;  %1255 = vmatpush2.msra.mxu0 %v467_v16  ;;  %v650_v14 = vld [vmem:[%s19229_s1 + $0x1358] sm:$0xff]  ;;  %v361_v15 = vld [vmem:[%s19229_s1 + $0xa50] sm:$0xff] }
  0x88   :  { %1379 = vmatpush1.msra.mxu1 %v55_v17  ;;  %1256 = vmatprep.subr.mxu0 %v450_v18  ;;  %v649_v16 = vld [vmem:[%s19229_s1 + $0x1350] sm:$0xff]  ;;  %v344_v17 = vld [vmem:[%s19229_s1 + $0x9c8] sm:$0xff] }
  0x89   :  { %1380 = vmatprep.subr.mxu1 %v38_v19  ;;  %1257 = vmatpush2.msra.mxu0 %v449_v20  ;;  %v632_v18 = vld [vmem:[%s19229_s1 + $0x12c8] sm:$0xff]  ;;  %v343_v19 = vld [vmem:[%s19229_s1 + $0x9c0] sm:$0xff] }
  0x8a   :  { %1381 = vmatpush1.msra.mxu1 %v37_v21  ;;  %1258 = vmatprep.subr.mxu0 %v432_v22  ;;  %v631_v20 = vld [vmem:[%s19229_s1 + $0x12c0] sm:$0xff]  ;;  %v326_v21 = vld [vmem:[%s19229_s1 + $0x938] sm:$0xff] }
  0x8b   :  { %1382 = vmatprep.subr.mxu1 %v596_v23  ;;  %1259 = vmatpush2.msra.mxu0 %v431_v24  ;;  %v614_v22 = vld [vmem:[%s19229_s1 + $0x1238] sm:$0xff]  ;;  %v325_v23 = vld [vmem:[%s19229_s1 + $0x930] sm:$0xff] }
  0x8c   :  { %1383 = vmatpush2.msra.mxu1 %v595_v25  ;;  %1260 = vmatprep.subr.mxu0 %v414_v26  ;;  %v613_v24 = vld [vmem:[%s19229_s1 + $0x1230] sm:$0xff]  ;;  %v310_v25 = vld [vmem:[%s19229_s1 + $0x8b8] sm:$0xff]  ;;  %v760_v26 = vld [vmem:[%s19229_s1 + $0x16c8] sm:$0xf] }
  0x8d   :  { %1384 = vmatprep.subr.mxu1 %v578_v27  ;;  %1261 = vmatpush2.msra.mxu0 %v413_v28  ;;  %v309_v27 = vld [vmem:[%s19229_s1 + $0x8b0] sm:$0xff]  ;;  %v759_v28 = vld [vmem:[%s19229_s1 + $0x16c0] sm:$0xf] }
  0x8e   :  { %1385 = vmatpush2.msra.mxu1 %v577_v29  ;;  %1262 = vmatprep.subr.mxu0 %v396_v40  ;;  %v9652_v29 = vld [vmem:[%s19230_s0 + $0x10] sm:$0xff]  ;;  %v291_v40 = vld [vmem:[%s19229_s1 + $0x820] sm:$0xff] }
  0x8f   :  { %1386 = vmatprep.subr.mxu1 %v560_v30  ;;  %1263 = vmatpush2.msra.mxu0 %v395_v31  ;;  %v741_v30 = vld [vmem:[%s19229_s1 + $0x1630] sm:$0xff]  ;;  %v274_v31 = vld [vmem:[%s19229_s1 + $0x798] sm:$0xff] }
  0x90   :  { %1387 = vmatpush2.msra.mxu1 %v559_v32  ;;  %1264 = vmatprep.subr.mxu0 %v378_v33  ;;  %v724_v32 = vld [vmem:[%s19229_s1 + $0x15a8] sm:$0xff]  ;;  %v273_v33 = vld [vmem:[%s19229_s1 + $0x790] sm:$0xff] }
  0x91   :  { %1388 = vmatprep.subr.mxu1 %v542_v34  ;;  %1265 = vmatpush2.msra.mxu0 %v377_v35  ;;  %v723_v34 = vld [vmem:[%s19229_s1 + $0x15a0] sm:$0xff]  ;;  %v256_v35 = vld [vmem:[%s19229_s1 + $0x708] sm:$0xff] }
  0x92   :  { %1389 = vmatpush2.msra.mxu1 %v541_v36  ;;  %1266 = vmatprep.subr.mxu0 %v360_v37  ;;  %v706_v36 = vld [vmem:[%s19229_s1 + $0x1518] sm:$0xff]  ;;  %v255_v37 = vld [vmem:[%s19229_s1 + $0x700] sm:$0xff] }
  0x93   :  { %1390 = vmatprep.subr.mxu1 %v524_v38  ;;  %1267 = vmatpush2.msra.mxu0 %v359_v39  ;;  %v705_v38 = vld [vmem:[%s19229_s1 + $0x1510] sm:$0xff]  ;;  %v238_v39 = vld [vmem:[%s19229_s1 + $0x678] sm:$0xff] }
  0x94   :  { %1391 = vmatpush2.msra.mxu1 %v523_v41  ;;  %1268 = vmatprep.subr.mxu0 %v342_v42  ;;  %v688_v41 = vld [vmem:[%s19229_s1 + $0x1488] sm:$0xff]  ;;  %v237_v42 = vld [vmem:[%s19229_s1 + $0x670] sm:$0xff] }
  0x95   :  { %1392 = vmatprep.subr.mxu1 %v506_v43  ;;  %1269 = vmatpush2.msra.mxu0 %v341_v44  ;;  %v687_v43 = vld [vmem:[%s19229_s1 + $0x1480] sm:$0xff]  ;;  %v220_v44 = vld [vmem:[%s19229_s1 + $0x5e8] sm:$0xff] }
  0x96   :  { %1393 = vmatpush2.msra.mxu1 %v505_v45  ;;  %1270 = vmatprep.subr.mxu0 %v324_v46  ;;  %v670_v45 = vld [vmem:[%s19229_s1 + $0x13f8] sm:$0xff]  ;;  %v219_v46 = vld [vmem:[%s19229_s1 + $0x5e0] sm:$0xff] }
  0x97   :  { %1394 = vmatprep.subr.mxu1 %v488_v47  ;;  %1271 = vmatpush2.msra.mxu0 %v323_v48  ;;  %v669_v47 = vld [vmem:[%s19229_s1 + $0x13f0] sm:$0xff]  ;;  %v202_v48 = vld [vmem:[%s19229_s1 + $0x558] sm:$0xff] }
  0x98   :  { %1272 = vmatprep.mubr.f32.mxu0 %v9003_v4  ;;  %1395 = vmatpush2.msra.mxu1 %v487_v49  ;;  %v652_v49 = vld [vmem:[%s19229_s1 + $0x1368] sm:$0xff] }
  0x99   :  { %1273 = vmatmul.mubr.f32.vlgmr.msra.gmra.mxu0 %v9011_v6  ;;  %1396 = vmatprep.subr.mxu1 %v470_v50  ;;  %v201_v50 = vld [vmem:[%s19229_s1 + $0x550] sm:$0xff] }
  0x9a   :  { %8215 = vmatprep.subr.msk.mxu0 %vm869_vm0, %v758_v51  ;;  %1397 = vmatpush2.msra.mxu1 %v469_v52  ;;  %v651_v51 = vld [vmem:[%s19229_s1 + $0x1360] sm:$0xff]  ;;  %v184_v52 = vld [vmem:[%s19229_s1 + $0x4c8] sm:$0xff] }
  0x9b   :  { %8216 = vmatpush1.msk.msra.mxu0 %vm869_vm0, %v757_v53  ;;  %1398 = vmatprep.subr.mxu1 %v452_v54  ;;  %v634_v53 = vld [vmem:[%s19229_s1 + $0x12d8] sm:$0xff]  ;;  %v183_v54 = vld [vmem:[%s19229_s1 + $0x4c0] sm:$0xff] }
  0x9c   :  { %1437 = vmatprep.subr.mxu0 %v740_v55  ;;  %1399 = vmatpush2.msra.mxu1 %v451_v56  ;;  %v633_v55 = vld [vmem:[%s19229_s1 + $0x12d0] sm:$0xff]  ;;  %v166_v56 = vld [vmem:[%s19229_s1 + $0x438] sm:$0xff] }
  0x9d   :  { %1438 = vmatpush1.msra.mxu0 %v739_v57  ;;  %1400 = vmatprep.subr.mxu1 %v434_v58  ;;  %v616_v57 = vld [vmem:[%s19229_s1 + $0x1248] sm:$0xff]  ;;  %v165_v58 = vld [vmem:[%s19229_s1 + $0x430] sm:$0xff] }
  0x9e   :  { %1439 = vmatprep.subr.mxu0 %v722_v59  ;;  %1401 = vmatpush2.msra.mxu1 %v433_v60  ;;  %v615_v59 = vld [vmem:[%s19229_s1 + $0x1240] sm:$0xff]  ;;  %v148_v60 = vld [vmem:[%s19229_s1 + $0x3a8] sm:$0xff] }
  0x9f   :  { %1440 = vmatpush1.msra.mxu0 %v721_v61  ;;  %1402 = vmatprep.subr.mxu1 %v416_v62  ;;  %v312_v61 = vld [vmem:[%s19229_s1 + $0x8c8] sm:$0xff]  ;;  %v147_v62 = vld [vmem:[%s19229_s1 + $0x3a0] sm:$0xff] }
  0xa0   :  { %1441 = vmatprep.subr.mxu0 %v704_v63  ;;  %1403 = vmatpush2.msra.mxu1 %v415_v0  ;;  %v311_v63 = vld [vmem:[%s19229_s1 + $0x8c0] sm:$0xff]  ;;  %v130_v0 = vld [vmem:[%s19229_s1 + $0x318] sm:$0xff] }
  0xa1   :  { %1442 = vmatpush1.msra.mxu0 %v703_v1  ;;  %1404 = vmatprep.subr.mxu1 %v398_v2  ;;  %v294_v1 = vld [vmem:[%s19229_s1 + $0x838] sm:$0xff]  ;;  %v129_v2 = vld [vmem:[%s19229_s1 + $0x310] sm:$0xff] }
  0xa2   :  { %1443 = vmatprep.subr.mxu0 %v686_v5  ;;  %1405 = vmatpush2.msra.mxu1 %v397_v7  ;;  %v293_v5 = vld [vmem:[%s19229_s1 + $0x830] sm:$0xff]  ;;  %v112_v7 = vld [vmem:[%s19229_s1 + $0x288] sm:$0xff] }
  0xa3   :  { %1444 = vmatpush1.msra.mxu0 %v685_v8  ;;  %1406 = vmatprep.subr.mxu1 %v380_v9  ;;  %v276_v8 = vld [vmem:[%s19229_s1 + $0x7a8] sm:$0xff]  ;;  %v111_v9 = vld [vmem:[%s19229_s1 + $0x280] sm:$0xff] }
  0xa4   :  { %1445 = vmatprep.subr.mxu0 %v668_v10  ;;  %1407 = vmatpush2.msra.mxu1 %v379_v11  ;;  %v275_v10 = vld [vmem:[%s19229_s1 + $0x7a0] sm:$0xff]  ;;  %v94_v11 = vld [vmem:[%s19229_s1 + $0x1f8] sm:$0xff] }
  0xa5   :  { %1446 = vmatpush1.msra.mxu0 %v667_v12  ;;  %1408 = vmatprep.subr.mxu1 %v362_v13  ;;  %v258_v12 = vld [vmem:[%s19229_s1 + $0x718] sm:$0xff]  ;;  %v93_v13 = vld [vmem:[%s19229_s1 + $0x1f0] sm:$0xff] }
  0xa6   :  { %1447 = vmatprep.subr.mxu0 %v650_v14  ;;  %1409 = vmatpush2.msra.mxu1 %v361_v15  ;;  %v257_v14 = vld [vmem:[%s19229_s1 + $0x710] sm:$0xff]  ;;  %v76_v15 = vld [vmem:[%s19229_s1 + $0x168] sm:$0xff] }
  0xa7   :  { %1448 = vmatpush1.msra.mxu0 %v649_v16  ;;  %1410 = vmatprep.subr.mxu1 %v344_v17  ;;  %v240_v16 = vld [vmem:[%s19229_s1 + $0x688] sm:$0xff]  ;;  %v75_v17 = vld [vmem:[%s19229_s1 + $0x160] sm:$0xff] }
  0xa8   :  { %1449 = vmatprep.subr.mxu0 %v632_v18  ;;  %1411 = vmatpush2.msra.mxu1 %v343_v19  ;;  %v239_v18 = vld [vmem:[%s19229_s1 + $0x680] sm:$0xff]  ;;  %v58_v19 = vld [vmem:[%s19229_s1 + $0xd8] sm:$0xff] }
  0xa9   :  { %1450 = vmatpush1.msra.mxu0 %v631_v20  ;;  %1412 = vmatprep.subr.mxu1 %v326_v21  ;;  %v222_v20 = vld [vmem:[%s19229_s1 + $0x5f8] sm:$0xff]  ;;  %v57_v21 = vld [vmem:[%s19229_s1 + $0xd0] sm:$0xff] }
  0xaa   :  { %1451 = vmatprep.subr.mxu0 %v614_v22  ;;  %1413 = vmatpush2.msra.mxu1 %v325_v23  ;;  %v221_v22 = vld [vmem:[%s19229_s1 + $0x5f0] sm:$0xff]  ;;  %v40_v23 = vld [vmem:[%s19229_s1 + $0x48] sm:$0xff] }
  0xab   :  { %1414 = vmatprep.mubr.f32.mxu1 %v9003_v4  ;;  %1452 = vmatpush1.msra.mxu0 %v613_v24  ;;  %v292_v4 = vld [vmem:[%s19229_s1 + $0x828] sm:$0xff] }
  0xac   :  { %1485 = vmatprep.mubr.f32.mxu0 %v8567_v3  ;;  %1415 = vmatmul.mubr.f32.vlgmr.msra.gmra.mxu1 %v9011_v6  ;;  %v742_v6 = vld [vmem:[%s19229_s1 + $0x1638] sm:$0xff]  ;;  %v204_v24 = vld [vmem:[%s19229_s1 + $0x568] sm:$0xff] }
  0xad   :  { %8217 = vmatmul.mubr.msk.f32.vlgmr.msra.gmra.mxu0 %vm865_vm1, %v9652_v29  ;;  %1492 = vmatprep.subr.mxu0 %v310_v25  ;;  %v39_v25 = vld [vmem:[%s19229_s1 + $0x40] sm:$0xff] }
  0xae   :  { %8218 = vmatprep.subr.msk.mxu1 %vm869_vm0, %v760_v26  ;;  %1493 = vmatpush1.msra.mxu0 %v309_v27  ;;  %v203_v26 = vld [vmem:[%s19229_s1 + $0x560] sm:$0xff]  ;;  %v598_v27 = vld [vmem:[%s19229_s1 + $0x11b8] sm:$0xff] }
  0xaf   :  { %8219 = vmatpush1.msk.msra.mxu1 %vm869_vm0, %v759_v28  ;;  %1494 = vmatprep.subr.mxu0 %v292_v4  ;;  %v186_v28 = vld [vmem:[%s19229_s1 + $0x4d8] sm:$0xff]  ;;  %v597_v4 = vld [vmem:[%s19229_s1 + $0x11b0] sm:$0xff] }
  0xb0   :  { %1579 = vmatprep.subr.mxu1 %v742_v6  ;;  %1495 = vmatpush1.msra.mxu0 %v291_v40  ;;  %v185_v6 = vld [vmem:[%s19229_s1 + $0x4d0] sm:$0xff]  ;;  %v580_v40 = vld [vmem:[%s19229_s1 + $0x1128] sm:$0xff] }
  0xb1   :  { %1580 = vmatpush1.msra.mxu1 %v741_v30  ;;  %1496 = vmatprep.subr.mxu0 %v274_v31  ;;  %v168_v30 = vld [vmem:[%s19229_s1 + $0x448] sm:$0xff]  ;;  %v579_v31 = vld [vmem:[%s19229_s1 + $0x1120] sm:$0xff] }
  0xb2   :  { %1581 = vmatprep.subr.mxu1 %v724_v32  ;;  %1497 = vmatpush1.msra.mxu0 %v273_v33  ;;  %v167_v32 = vld [vmem:[%s19229_s1 + $0x440] sm:$0xff]  ;;  %v562_v33 = vld [vmem:[%s19229_s1 + $0x1098] sm:$0xff] }
  0xb3   :  { %1582 = vmatpush1.msra.mxu1 %v723_v34  ;;  %1498 = vmatprep.subr.mxu0 %v256_v35  ;;  %v150_v34 = vld [vmem:[%s19229_s1 + $0x3b8] sm:$0xff]  ;;  %v561_v35 = vld [vmem:[%s19229_s1 + $0x1090] sm:$0xff] }
  0xb4   :  { %1583 = vmatprep.subr.mxu1 %v706_v36  ;;  %1499 = vmatpush1.msra.mxu0 %v255_v37  ;;  %v149_v36 = vld [vmem:[%s19229_s1 + $0x3b0] sm:$0xff]  ;;  %v544_v37 = vld [vmem:[%s19229_s1 + $0x1008] sm:$0xff] }
  0xb5   :  { %1584 = vmatpush1.msra.mxu1 %v705_v38  ;;  %1500 = vmatprep.subr.mxu0 %v238_v39  ;;  %v132_v38 = vld [vmem:[%s19229_s1 + $0x328] sm:$0xff]  ;;  %v543_v39 = vld [vmem:[%s19229_s1 + $0x1000] sm:$0xff] }
  0xb6   :  { %1585 = vmatprep.subr.mxu1 %v688_v41  ;;  %1501 = vmatpush1.msra.mxu0 %v237_v42  ;;  %v131_v41 = vld [vmem:[%s19229_s1 + $0x320] sm:$0xff]  ;;  %v526_v42 = vld [vmem:[%s19229_s1 + $0xf78] sm:$0xff] }
  0xb7   :  { %1586 = vmatpush1.msra.mxu1 %v687_v43  ;;  %1502 = vmatprep.subr.mxu0 %v220_v44  ;;  %v114_v43 = vld [vmem:[%s19229_s1 + $0x298] sm:$0xff]  ;;  %v525_v44 = vld [vmem:[%s19229_s1 + $0xf70] sm:$0xff] }
  0xb8   :  { %1587 = vmatprep.subr.mxu1 %v670_v45  ;;  %1503 = vmatpush1.msra.mxu0 %v219_v46  ;;  %v113_v45 = vld [vmem:[%s19229_s1 + $0x290] sm:$0xff]  ;;  %v508_v46 = vld [vmem:[%s19229_s1 + $0xee8] sm:$0xff] }
  0xb9   :  { %1588 = vmatpush1.msra.mxu1 %v669_v47  ;;  %1504 = vmatprep.subr.mxu0 %v202_v48  ;;  %v96_v47 = vld [vmem:[%s19229_s1 + $0x208] sm:$0xff]  ;;  %v507_v48 = vld [vmem:[%s19229_s1 + $0xee0] sm:$0xff] }
  0xba   :  { %1589 = vmatprep.subr.mxu1 %v652_v49  ;;  %1505 = vmatpush1.msra.mxu0 %v201_v50  ;;  %v95_v49 = vld [vmem:[%s19229_s1 + $0x200] sm:$0xff]  ;;  %v490_v50 = vld [vmem:[%s19229_s1 + $0xe58] sm:$0xff] }
  0xbb   :  { %1590 = vmatpush1.msra.mxu1 %v651_v51  ;;  %1506 = vmatprep.subr.mxu0 %v184_v52  ;;  %v78_v51 = vld [vmem:[%s19229_s1 + $0x178] sm:$0xff]  ;;  %v489_v52 = vld [vmem:[%s19229_s1 + $0xe50] sm:$0xff] }
  0xbc   :  { %1591 = vmatprep.subr.mxu1 %v634_v53  ;;  %1507 = vmatpush1.msra.mxu0 %v183_v54  ;;  %v77_v53 = vld [vmem:[%s19229_s1 + $0x170] sm:$0xff]  ;;  %v472_v54 = vld [vmem:[%s19229_s1 + $0xdc8] sm:$0xff] }
  0xbd   :  { %1592 = vmatpush1.msra.mxu1 %v633_v55  ;;  %1508 = vmatprep.subr.mxu0 %v166_v56  ;;  %v60_v55 = vld [vmem:[%s19229_s1 + $0xe8] sm:$0xff]  ;;  %v471_v56 = vld [vmem:[%s19229_s1 + $0xdc0] sm:$0xff] }
  0xbe   :  { %1593 = vmatprep.subr.mxu1 %v616_v57  ;;  %1509 = vmatpush1.msra.mxu0 %v165_v58  ;;  %v59_v57 = vld [vmem:[%s19229_s1 + $0xe0] sm:$0xff]  ;;  %v454_v58 = vld [vmem:[%s19229_s1 + $0xd38] sm:$0xff] }
  0xbf   :  { %1594 = vmatpush1.msra.mxu1 %v615_v59  ;;  %1510 = vmatprep.subr.mxu0 %v148_v60  ;;  %v42_v59 = vld [vmem:[%s19229_s1 + $0x58] sm:$0xff]  ;;  %v453_v60 = vld [vmem:[%s19229_s1 + $0xd30] sm:$0xff] }
  0xc0   :  { %1627 = vmatprep.mubr.f32.mxu1 %v8567_v3  ;;  %1634 = vmatprep.subr.mxu1 %v312_v61  ;;  %v41_v61 = vld [vmem:[%s19229_s1 + $0x50] sm:$0xff] }
  0xc1   :  { %1511 = vmatpush1.msra.mxu0 %v147_v62  ;;  %8220 = vmatmul.mubr.msk.f32.vlgmr.msra.gmra.mxu1 %vm865_vm1, %v9652_v29  ;;  %v436_v62 = vld [vmem:[%s19229_s1 + $0xca8] sm:$0xff] }
  0xc2   :  { %1635 = vmatpush1.msra.mxu1 %v311_v63  ;;  %1512 = vmatprep.subr.mxu0 %v130_v0  ;;  %v600_v63 = vld [vmem:[%s19229_s1 + $0x11c8] sm:$0xff]  ;;  %v435_v0 = vld [vmem:[%s19229_s1 + $0xca0] sm:$0xff] }
  0xc3   :  { %1636 = vmatprep.subr.mxu1 %v294_v1  ;;  %1513 = vmatpush1.msra.mxu0 %v129_v2  ;;  %v599_v1 = vld [vmem:[%s19229_s1 + $0x11c0] sm:$0xff]  ;;  %v418_v2 = vld [vmem:[%s19229_s1 + $0xc18] sm:$0xff] }
  0xc4   :  { %1637 = vmatpush1.msra.mxu1 %v293_v5  ;;  %1514 = vmatprep.subr.mxu0 %v112_v7  ;;  %v582_v5 = vld [vmem:[%s19229_s1 + $0x1138] sm:$0xff]  ;;  %v417_v7 = vld [vmem:[%s19229_s1 + $0xc10] sm:$0xff] }
  0xc5   :  { %1638 = vmatprep.subr.mxu1 %v276_v8  ;;  %1515 = vmatpush1.msra.mxu0 %v111_v9  ;;  %v581_v8 = vld [vmem:[%s19229_s1 + $0x1130] sm:$0xff]  ;;  %v400_v9 = vld [vmem:[%s19229_s1 + $0xb88] sm:$0xff] }
  0xc6   :  { %1639 = vmatpush1.msra.mxu1 %v275_v10  ;;  %1516 = vmatprep.subr.mxu0 %v94_v11  ;;  %v564_v10 = vld [vmem:[%s19229_s1 + $0x10a8] sm:$0xff]  ;;  %v399_v11 = vld [vmem:[%s19229_s1 + $0xb80] sm:$0xff] }
  0xc7   :  { %1640 = vmatprep.subr.mxu1 %v258_v12  ;;  %1517 = vmatpush1.msra.mxu0 %v93_v13  ;;  %v563_v12 = vld [vmem:[%s19229_s1 + $0x10a0] sm:$0xff]  ;;  %v382_v13 = vld [vmem:[%s19229_s1 + $0xaf8] sm:$0xff] }
  0xc8   :  { %1641 = vmatpush1.msra.mxu1 %v257_v14  ;;  %1518 = vmatprep.subr.mxu0 %v76_v15  ;;  %v546_v14 = vld [vmem:[%s19229_s1 + $0x1018] sm:$0xff]  ;;  %v381_v15 = vld [vmem:[%s19229_s1 + $0xaf0] sm:$0xff] }
  0xc9   :  { %1642 = vmatprep.subr.mxu1 %v240_v16  ;;  %1519 = vmatpush1.msra.mxu0 %v75_v17  ;;  %v545_v16 = vld [vmem:[%s19229_s1 + $0x1010] sm:$0xff]  ;;  %v364_v17 = vld [vmem:[%s19229_s1 + $0xa68] sm:$0xff] }
  0xca   :  { %1643 = vmatpush1.msra.mxu1 %v239_v18  ;;  %1520 = vmatprep.subr.mxu0 %v58_v19  ;;  %v528_v18 = vld [vmem:[%s19229_s1 + $0xf88] sm:$0xff]  ;;  %v363_v19 = vld [vmem:[%s19229_s1 + $0xa60] sm:$0xff] }
  0xcb   :  { %1644 = vmatprep.subr.mxu1 %v222_v20  ;;  %1521 = vmatpush1.msra.mxu0 %v57_v21  ;;  %v527_v20 = vld [vmem:[%s19229_s1 + $0xf80] sm:$0xff]  ;;  %v346_v21 = vld [vmem:[%s19229_s1 + $0x9d8] sm:$0xff] }
  0xcc   :  { %1645 = vmatpush1.msra.mxu1 %v221_v22  ;;  %1522 = vmatprep.subr.mxu0 %v40_v23  ;;  %v510_v22 = vld [vmem:[%s19229_s1 + $0xef8] sm:$0xff]  ;;  %v345_v23 = vld [vmem:[%s19229_s1 + $0x9d0] sm:$0xff] }
  0xcd   :  { %1646 = vmatprep.subr.mxu1 %v204_v24  ;;  %1523 = vmatpush1.msra.mxu0 %v39_v25  ;;  %v509_v24 = vld [vmem:[%s19229_s1 + $0xef0] sm:$0xff]  ;;  %v328_v25 = vld [vmem:[%s19229_s1 + $0x948] sm:$0xff] }
  0xce   :  { %1647 = vmatpush1.msra.mxu1 %v203_v26  ;;  %1524 = vmatprep.subr.mxu0 %v598_v27  ;;  %v492_v26 = vld [vmem:[%s19229_s1 + $0xe68] sm:$0xff]  ;;  %v327_v27 = vld [vmem:[%s19229_s1 + $0x940] sm:$0xff] }
  0xcf   :  { %1648 = vmatprep.subr.mxu1 %v186_v28  ;;  %1525 = vmatpush2.msra.mxu0 %v597_v4  ;;  %v491_v28 = vld [vmem:[%s19229_s1 + $0xe60] sm:$0xff]  ;;  %v474_v4 = vld [vmem:[%s19229_s1 + $0xdd8] sm:$0xff] }
  0xd0   :  { %1649 = vmatpush1.msra.mxu1 %v185_v6  ;;  %1526 = vmatprep.subr.mxu0 %v580_v40  ;;  %v762_v6 = vld [vmem:[%s19229_s1 + $0x16d8] sm:$0xf]  ;;  %v473_v40 = vld [vmem:[%s19229_s1 + $0xdd0] sm:$0xff] }
  0xd1   :  { %1650 = vmatprep.subr.mxu1 %v168_v30  ;;  %1527 = vmatpush2.msra.mxu0 %v579_v31  ;;  %v10042_v30 = vld [vmem:[%s19230_s0 + $0x8] sm:$0xff]  ;;  %v761_v31 = vld [vmem:[%s19229_s1 + $0x16d0] sm:$0xf] }
  0xd2   :  { %1651 = vmatpush1.msra.mxu1 %v167_v32  ;;  %1528 = vmatprep.subr.mxu0 %v562_v33  ;;  %v456_v32 = vld [vmem:[%s19229_s1 + $0xd48] sm:$0xff]  ;;  %v10054_v33 = vld [vmem:[%s19230_s0] sm:$0xff] }
  0xd3   :  { %1652 = vmatprep.subr.mxu1 %v150_v34  ;;  %1529 = vmatpush2.msra.mxu0 %v561_v35  ;;  %v744_v34 = vld [vmem:[%s19229_s1 + $0x1648] sm:$0xff]  ;;  %v455_v35 = vld [vmem:[%s19229_s1 + $0xd40] sm:$0xff] }
  0xd4   :  { %1653 = vmatpush1.msra.mxu1 %v149_v36  ;;  %1530 = vmatprep.subr.mxu0 %v544_v37  ;;  %v743_v36 = vld [vmem:[%s19229_s1 + $0x1640] sm:$0xff]  ;;  %v438_v37 = vld [vmem:[%s19229_s1 + $0xcb8] sm:$0xff] }
  0xd5   :  { %1654 = vmatprep.subr.mxu1 %v132_v38  ;;  %1531 = vmatpush2.msra.mxu0 %v543_v39  ;;  %v726_v38 = vld [vmem:[%s19229_s1 + $0x15b8] sm:$0xff]  ;;  %v437_v39 = vld [vmem:[%s19229_s1 + $0xcb0] sm:$0xff] }
  0xd6   :  { %1655 = vmatpush1.msra.mxu1 %v131_v41  ;;  %1532 = vmatprep.subr.mxu0 %v526_v42  ;;  %v725_v41 = vld [vmem:[%s19229_s1 + $0x15b0] sm:$0xff]  ;;  %v420_v42 = vld [vmem:[%s19229_s1 + $0xc28] sm:$0xff] }
  0xd7   :  { %1656 = vmatprep.subr.mxu1 %v114_v43  ;;  %1533 = vmatpush2.msra.mxu0 %v525_v44  ;;  %v708_v43 = vld [vmem:[%s19229_s1 + $0x1528] sm:$0xff]  ;;  %v419_v44 = vld [vmem:[%s19229_s1 + $0xc20] sm:$0xff] }
  0xd8   :  { %1657 = vmatpush1.msra.mxu1 %v113_v45  ;;  %1534 = vmatprep.subr.mxu0 %v508_v46  ;;  %v707_v45 = vld [vmem:[%s19229_s1 + $0x1520] sm:$0xff]  ;;  %v402_v46 = vld [vmem:[%s19229_s1 + $0xb98] sm:$0xff] }
  0xd9   :  { %1658 = vmatprep.subr.mxu1 %v96_v47  ;;  %1535 = vmatpush2.msra.mxu0 %v507_v48  ;;  %v775_v47 = vlaneseq  ;;  %v690_v48 = vld [vmem:[%s19229_s1 + $0x1498] sm:$0xff] }
  0xda   :  { %1659 = vmatpush1.msra.mxu1 %v95_v49  ;;  %1536 = vmatprep.subr.mxu0 %v490_v50  ;;  %v401_v49 = vld [vmem:[%s19229_s1 + $0xb90] sm:$0xff] }
  0xdb   :  { %1660 = vmatprep.subr.mxu1 %v78_v51  ;;  %1537 = vmatpush2.msra.mxu0 %v489_v52  ;;  %v689_v50 = vld [vmem:[%s19229_s1 + $0x1490] sm:$0xff]  ;;  %v384_v51 = vld [vmem:[%s19229_s1 + $0xb08] sm:$0xff] }
  0xdc   :  { %1661 = vmatpush1.msra.mxu1 %v77_v53  ;;  %1538 = vmatprep.subr.mxu0 %v472_v54  ;;  %v672_v52 = vld [vmem:[%s19229_s1 + $0x1408] sm:$0xff]  ;;  %v383_v53 = vld [vmem:[%s19229_s1 + $0xb00] sm:$0xff] }
  0xdd   :  { %1662 = vmatprep.subr.mxu1 %v60_v55  ;;  %1539 = vmatpush2.msra.mxu0 %v471_v56  ;;  %v671_v54 = vld [vmem:[%s19229_s1 + $0x1400] sm:$0xff]  ;;  %v366_v55 = vld [vmem:[%s19229_s1 + $0xa78] sm:$0xff]  ;;  %v10119_v56 = vshrl.u32 %v775_v47, 7  ;;  %v637_v47 = vld [vmem:[%s19229_s1 + $0x12f0] sm:$0xff] }
  0xde   :  { %1663 = vmatpush1.msra.mxu1 %v59_v57  ;;  %1540 = vmatprep.subr.mxu0 %v454_v58  ;;  %v654_v57 = vld [vmem:[%s19229_s1 + $0x1378] sm:$0xff]  ;;  %v365_v58 = vld [vmem:[%s19229_s1 + $0xa70] sm:$0xff] }
  0xdf   :  { %1664 = vmatprep.subr.mxu1 %v42_v59  ;;  %1541 = vmatpush2.msra.mxu0 %v453_v60  ;;  %v653_v59 = vld [vmem:[%s19229_s1 + $0x1370] sm:$0xff]  ;;  %v348_v60 = vld [vmem:[%s19229_s1 + $0x9e8] sm:$0xff] }
  0xe0   :  { %1665 = vmatpush1.msra.mxu1 %v41_v61  ;;  %1542 = vmatprep.subr.mxu0 %v436_v62  ;;  %v636_v61 = vld [vmem:[%s19229_s1 + $0x12e8] sm:$0xff]  ;;  %v347_v62 = vld [vmem:[%s19229_s1 + $0x9e0] sm:$0xff] }
  0xe1   :  { %1666 = vmatprep.subr.mxu1 %v600_v63  ;;  %1543 = vmatpush2.msra.mxu0 %v435_v0  ;;  %v635_v63 = vld [vmem:[%s19229_s1 + $0x12e0] sm:$0xff]  ;;  %v330_v0 = vld [vmem:[%s19229_s1 + $0x958] sm:$0xff] }
  0xe2   :  { %1667 = vmatpush2.msra.mxu1 %v599_v1  ;;  %1544 = vmatprep.subr.mxu0 %v418_v2  ;;  %v10146_v1 = vsub.s32 0, %v10119_v56  ;;  %v618_v2 = vld [vmem:[%s19229_s1 + $0x1258] sm:$0xff] }
  0xe3   :  { %1668 = vmatprep.subr.mxu1 %v582_v5  ;;  %1545 = vmatpush2.msra.mxu0 %v417_v7  ;;  %v329_v5 = vld [vmem:[%s19229_s1 + $0x950] sm:$0xff]  ;;  %v10157_v7 = vld [vmem:[%s19231_s2] sm:$0xff] }
  0xe4   :  { %1669 = vmatpush2.msra.mxu1 %v581_v8  ;;  %1546 = vmatprep.subr.mxu0 %v400_v9  ;;  %19241 = vst [vmem:[#allocation3_spill] sm:$0xff] %v10146_v1  ;;  %v617_v8 = vld [vmem:[%s19229_s1 + $0x1250] sm:$0xff]  ;;  %v314_v9 = vld [vmem:[%s19229_s1 + $0x8d8] sm:$0xff] }
  0xe5   :  { %1670 = vmatprep.subr.mxu1 %v564_v10  ;;  %1547 = vmatpush2.msra.mxu0 %v399_v11  ;;  %v778_v10 = vrot.slane %v10157_v7, %v10146_v1  ;;  %v764_v11 = vld [vmem:[%s19229_s1 + $0x16e8] sm:$0xf] }
  0xe6   :  { %1671 = vmatpush2.msra.mxu1 %v563_v12  ;;  %1548 = vmatprep.subr.mxu0 %v382_v13  ;;  %v313_v12 = vld [vmem:[%s19229_s1 + $0x8d0] sm:$0xff]  ;;  %v763_v13 = vld [vmem:[%s19229_s1 + $0x16e0] sm:$0xf] }
  0xe7   :  { %1672 = vmatprep.subr.mxu1 %v546_v14  ;;  %1549 = vmatpush2.msra.mxu0 %v381_v15  ;;  %v296_v14 = vld [vmem:[%s19229_s1 + $0x848] sm:$0xff]  ;;  %v746_v15 = vld [vmem:[%s19229_s1 + $0x1658] sm:$0xff] }
  0xe8   :  { %1673 = vmatpush2.msra.mxu1 %v545_v16  ;;  %1550 = vmatprep.subr.mxu0 %v364_v17  ;;  %v295_v16 = vld [vmem:[%s19229_s1 + $0x840] sm:$0xff] }
  0xe9   :  { %1674 = vmatprep.subr.mxu1 %v528_v18  ;;  %1551 = vmatpush2.msra.mxu0 %v363_v19  ;;  %v745_v18 = vld [vmem:[%s19229_s1 + $0x1650] sm:$0xff]  ;;  %v278_v19 = vld [vmem:[%s19229_s1 + $0x7b8] sm:$0xff] }
  0xea   :  { %1675 = vmatpush2.msra.mxu1 %v527_v20  ;;  %1552 = vmatprep.subr.mxu0 %v346_v21  ;;  %v1061_v21 = vpop.f32.mrf.mxu1 }
  0xeb   :  { %1676 = vmatprep.subr.mxu1 %v510_v22  ;;  %1553 = vmatpush2.msra.mxu0 %v345_v23  ;;  %v728_v22 = vld [vmem:[%s19229_s1 + $0x15c8] sm:$0xff]  ;;  %v277_v23 = vld [vmem:[%s19229_s1 + $0x7b0] sm:$0xff] }
  0xec   :  { %1677 = vmatpush2.msra.mxu1 %v509_v24  ;;  %1554 = vmatprep.subr.mxu0 %v328_v25  ;;  %v727_v24 = vld [vmem:[%s19229_s1 + $0x15c0] sm:$0xff]  ;;  %v260_v25 = vld [vmem:[%s19229_s1 + $0x728] sm:$0xff] }
  0xed   :  { %1678 = vmatprep.subr.mxu1 %v492_v26  ;;  %1555 = vmatpush2.msra.mxu0 %v327_v27  ;;  %v710_v27 = vld [vmem:[%s19229_s1 + $0x1538] sm:$0xff] }
  0xee   :  { %1556 = vmatprep.mubr.f32.mxu0 %v10042_v30  ;;  %1679 = vmatpush2.msra.mxu1 %v491_v28  ;;  %v259_v28 = vld [vmem:[%s19229_s1 + $0x720] sm:$0xff] }
  0xef   :  { %1557 = vmatmul.mubr.f32.vlgmr.msra.gmra.mxu0 %v10054_v33  ;;  %1680 = vmatprep.subr.mxu1 %v474_v4  ;;  %v709_v4 = vld [vmem:[%s19229_s1 + $0x1530] sm:$0xff] }
  0xf0   :  { %8221 = vmatprep.subr.msk.mxu0 %vm869_vm0, %v762_v6  ;;  %1681 = vmatpush2.msra.mxu1 %v473_v40  ;;  %v242_v6 = vld [vmem:[%s19229_s1 + $0x698] sm:$0xff]  ;;  %v692_v40 = vld [vmem:[%s19229_s1 + $0x14a8] sm:$0xff] }
  0xf1   :  { %8222 = vmatpush1.msk.msra.mxu0 %vm869_vm0, %v761_v31  ;;  %1682 = vmatprep.subr.mxu1 %v456_v32  ;;  %v241_v31 = vld [vmem:[%s19229_s1 + $0x690] sm:$0xff]  ;;  %v691_v32 = vld [vmem:[%s19229_s1 + $0x14a0] sm:$0xff] }
  0xf2   :  { %1721 = vmatprep.subr.mxu0 %v744_v34  ;;  %1683 = vmatpush2.msra.mxu1 %v455_v35  ;;  %v224_v34 = vld [vmem:[%s19229_s1 + $0x608] sm:$0xff]  ;;  %v674_v35 = vld [vmem:[%s19229_s1 + $0x1418] sm:$0xff] }
  0xf3   :  { %1722 = vmatpush1.msra.mxu0 %v743_v36  ;;  %1684 = vmatprep.subr.mxu1 %v438_v37  ;;  %v223_v36 = vld [vmem:[%s19229_s1 + $0x600] sm:$0xff]  ;;  %v673_v37 = vld [vmem:[%s19229_s1 + $0x1410] sm:$0xff] }
  0xf4   :  { %1723 = vmatprep.subr.mxu0 %v726_v38  ;;  %1685 = vmatpush2.msra.mxu1 %v437_v39  ;;  %v206_v38 = vld [vmem:[%s19229_s1 + $0x578] sm:$0xff]  ;;  %v656_v39 = vld [vmem:[%s19229_s1 + $0x1388] sm:$0xff] }
  0xf5   :  { %1724 = vmatpush1.msra.mxu0 %v725_v41  ;;  %1686 = vmatprep.subr.mxu1 %v420_v42  ;;  %v205_v41 = vld [vmem:[%s19229_s1 + $0x570] sm:$0xff]  ;;  %v655_v42 = vld [vmem:[%s19229_s1 + $0x1380] sm:$0xff] }
  0xf6   :  { %1725 = vmatprep.subr.mxu0 %v708_v43  ;;  %1687 = vmatpush2.msra.mxu1 %v419_v44  ;;  %v188_v43 = vld [vmem:[%s19229_s1 + $0x4e8] sm:$0xff]  ;;  %v638_v44 = vld [vmem:[%s19229_s1 + $0x12f8] sm:$0xff] }
  0xf7   :  { %1726 = vmatpush1.msra.mxu0 %v707_v45  ;;  %1688 = vmatprep.subr.mxu1 %v402_v46  ;;  %v187_v45 = vld [vmem:[%s19229_s1 + $0x4e0] sm:$0xff]  ;;  %v10267_v46 = vsub.s32 2, %v10119_v56 }
  0xf8   :  { %1727 = vmatprep.subr.mxu0 %v690_v48  ;;  %1689 = vmatpush2.msra.mxu1 %v401_v49  ;;  %v170_v48 = vld [vmem:[%s19229_s1 + $0x458] sm:$0xff]  ;;  %v620_v49 = vld [vmem:[%s19229_s1 + $0x1268] sm:$0xff] }
  0xf9   :  { %1728 = vmatpush1.msra.mxu0 %v689_v50  ;;  %1690 = vmatprep.subr.mxu1 %v384_v51  ;;  %19242 = vst [vmem:[#allocation4_spill] sm:$0xff] %v10267_v46  ;;  %v169_v50 = vld [vmem:[%s19229_s1 + $0x450] sm:$0xff]  ;;  %v619_v51 = vld [vmem:[%s19229_s1 + $0x1260] sm:$0xff] }
  0xfa   :  { %1729 = vmatprep.subr.mxu0 %v672_v52  ;;  %1691 = vmatpush2.msra.mxu1 %v383_v53  ;;  %v152_v52 = vld [vmem:[%s19229_s1 + $0x3c8] sm:$0xff] }
  0xfb   :  { %1730 = vmatpush1.msra.mxu0 %v671_v54  ;;  %1692 = vmatprep.subr.mxu1 %v366_v55  ;;  %v316_v53 = vld [vmem:[%s19229_s1 + $0x8e8] sm:$0xff]  ;;  %v786_v54 = vrot.slane %v10157_v7, %v10267_v46  ;;  %v10292_v55 = vpop.f32.mrf.mxu1 }
  0xfc   :  { %1731 = vmatprep.subr.mxu0 %v654_v57  ;;  %1693 = vmatpush2.msra.mxu1 %v365_v58  ;;  %v151_v57 = vld [vmem:[%s19229_s1 + $0x3c0] sm:$0xff] }
  0xfd   :  { %1732 = vmatpush1.msra.mxu0 %v653_v59  ;;  %1694 = vmatprep.subr.mxu1 %v348_v60  ;;  %v315_v58 = vld [vmem:[%s19229_s1 + $0x8e0] sm:$0xff]  ;;  %v134_v59 = vld [vmem:[%s19229_s1 + $0x338] sm:$0xff] }
  0xfe   :  { %1733 = vmatprep.subr.mxu0 %v636_v61  ;;  %1695 = vmatpush2.msra.mxu1 %v347_v62  ;;  %v298_v61 = vld [vmem:[%s19229_s1 + $0x858] sm:$0xff]  ;;  %v133_v62 = vld [vmem:[%s19229_s1 + $0x330] sm:$0xff] }
  0xff   :  { %1734 = vmatpush1.msra.mxu0 %v635_v63  ;;  %1696 = vmatprep.subr.mxu1 %v330_v0  ;;  %v297_v0 = vld [vmem:[%s19229_s1 + $0x850] sm:$0xff] }
 0x100   :  { %1735 = vmatprep.subr.mxu0 %v618_v2  ;;  %1697 = vmatpush2.msra.mxu1 %v329_v5  ;;  %v116_v2 = vld [vmem:[%s19229_s1 + $0x2a8] sm:$0xff] }
 0x101   :  { %1698 = vmatprep.mubr.f32.mxu1 %v10042_v30  ;;  %1736 = vmatpush1.msra.mxu0 %v617_v8  ;;  %v280_v8 = vld [vmem:[%s19229_s1 + $0x7c8] sm:$0xff] }
 0x102   :  { %1769 = vmatprep.mubr.f32.mxu0 %v8567_v3  ;;  %1699 = vmatmul.mubr.f32.vlgmr.msra.gmra.mxu1 %v10054_v33 }
 0x103   :  { %8223 = vmatmul.mubr.msk.f32.vlgmr.msra.gmra.mxu0 %vm865_vm1, %v9652_v29  ;;  %1776 = vmatprep.subr.mxu0 %v314_v9  ;;  %v990_v17 = vpop.f32.mrf.mxu0  ;;  %v115_v9 = vld [vmem:[%s19229_s1 + $0x2a0] sm:$0xff] }
 0x104   :  { %8224 = vmatprep.subr.msk.mxu1 %vm869_vm0, %v764_v11  ;;  %1777 = vmatpush1.msra.mxu0 %v313_v12  ;;  %v991_v20 = vadd.f32 %v990_v17, %v778_v10  ;;  %v279_v10 = vld [vmem:[%s19229_s1 + $0x7c0] sm:$0xff]  ;;  %v98_v11 = vld [vmem:[%s19229_s1 + $0x218] sm:$0xff]  ;;  %v244_v17 = vld [vmem:[%s19229_s1 + $0x6a8] sm:$0xff] }
 0x105   :  { %8225 = vmatpush1.msk.msra.mxu1 %vm869_vm0, %v763_v13  ;;  %1778 = vmatprep.subr.mxu0 %v296_v14  ;;  %v10303_v60 = vpop.f32.mrf.mxu0  ;;  %v262_v13 = vld [vmem:[%s19229_s1 + $0x738] sm:$0xff]  ;;  %v97_v14 = vld [vmem:[%s19229_s1 + $0x210] sm:$0xff] }
 0x106   :  { %1863 = vmatprep.subr.mxu1 %v746_v15  ;;  %1779 = vmatpush1.msra.mxu0 %v295_v16  ;;  %v10210_v26 = vadd.f32 %v1061_v21, %v991_v20  ;;  %v261_v15 = vld [vmem:[%s19229_s1 + $0x730] sm:$0xff]  ;;  %v80_v16 = vld [vmem:[%s19229_s1 + $0x188] sm:$0xff]  ;;  %v62_v20 = vld [vmem:[%s19229_s1 + $0xf8] sm:$0xff] }
 0x107   :  { %1864 = vmatpush1.msra.mxu1 %v745_v18  ;;  %1780 = vmatprep.subr.mxu0 %v278_v19  ;;  %v79_v18 = vld [vmem:[%s19229_s1 + $0x180] sm:$0xff]  ;;  %v226_v21 = vld [vmem:[%s19229_s1 + $0x618] sm:$0xff] }
 0x108   :  { %1865 = vmatprep.subr.mxu1 %v728_v22  ;;  %1781 = vmatpush1.msra.mxu0 %v277_v23  ;;  %v243_v19 = vld [vmem:[%s19229_s1 + $0x6a0] sm:$0xff]  ;;  %v61_v22 = vld [vmem:[%s19229_s1 + $0xf0] sm:$0xff]  ;;  %vm2202_vm4 = vcmp.gt.f32.partialorder %v10210_v26, 0.0 }
 0x109   :  { %1866 = vmatpush1.msra.mxu1 %v727_v24  ;;  %1782 = vmatprep.subr.mxu0 %v260_v25  ;;  %v225_v23 = vld [vmem:[%s19229_s1 + $0x610] sm:$0xff]  ;;  %v44_v24 = vld [vmem:[%s19229_s1 + $0x68] sm:$0xff] }
 0x10a   :  { %1867 = vmatprep.subr.mxu1 %v710_v27  ;;  %1783 = vmatpush1.msra.mxu0 %v259_v28  ;;  %v208_v25 = vld [vmem:[%s19229_s1 + $0x588] sm:$0xff]  ;;  %v43_v27 = vld [vmem:[%s19229_s1 + $0x60] sm:$0xff] }
 0x10b   :  { %1868 = vmatpush1.msra.mxu1 %v709_v4  ;;  %1784 = vmatprep.subr.mxu0 %v242_v6  ;;  %v207_v28 = vld [vmem:[%s19229_s1 + $0x580] sm:$0xff]  ;;  %v602_v4 = vld [vmem:[%s19229_s1 + $0x11d8] sm:$0xff] }
 0x10c   :  { %1869 = vmatprep.subr.mxu1 %v692_v40  ;;  %1785 = vmatpush1.msra.mxu0 %v241_v31  ;;  %v190_v6 = vld [vmem:[%s19229_s1 + $0x4f8] sm:$0xff]  ;;  %v601_v40 = vld [vmem:[%s19229_s1 + $0x11d0] sm:$0xff] }
 0x10d   :  { %1870 = vmatpush1.msra.mxu1 %v691_v32  ;;  %1786 = vmatprep.subr.mxu0 %v224_v34  ;;  %v189_v31 = vld [vmem:[%s19229_s1 + $0x4f0] sm:$0xff]  ;;  %v584_v32 = vld [vmem:[%s19229_s1 + $0x1148] sm:$0xff] }
 0x10e   :  { %1871 = vmatprep.subr.mxu1 %v674_v35  ;;  %1787 = vmatpush1.msra.mxu0 %v223_v36  ;;  %v172_v34 = vld [vmem:[%s19229_s1 + $0x468] sm:$0xff]  ;;  %v583_v35 = vld [vmem:[%s19229_s1 + $0x1140] sm:$0xff] }
 0x10f   :  { %1872 = vmatpush1.msra.mxu1 %v673_v37  ;;  %1788 = vmatprep.subr.mxu0 %v206_v38  ;;  %v171_v36 = vld [vmem:[%s19229_s1 + $0x460] sm:$0xff]  ;;  %v566_v37 = vld [vmem:[%s19229_s1 + $0x10b8] sm:$0xff] }
 0x110   :  { %1873 = vmatprep.subr.mxu1 %v656_v39  ;;  %1789 = vmatpush1.msra.mxu0 %v205_v41  ;;  %v154_v38 = vld [vmem:[%s19229_s1 + $0x3d8] sm:$0xff]  ;;  %v565_v39 = vld [vmem:[%s19229_s1 + $0x10b0] sm:$0xff] }
 0x111   :  { %1874 = vmatpush1.msra.mxu1 %v655_v42  ;;  %1790 = vmatprep.subr.mxu0 %v188_v43  ;;  %v153_v41 = vld [vmem:[%s19229_s1 + $0x3d0] sm:$0xff]  ;;  %v548_v42 = vld [vmem:[%s19229_s1 + $0x1028] sm:$0xff] }
 0x112   :  { %1875 = vmatprep.subr.mxu1 %v638_v44  ;;  %1791 = vmatpush1.msra.mxu0 %v187_v45  ;;  %v136_v43 = vld [vmem:[%s19229_s1 + $0x348] sm:$0xff]  ;;  %v547_v44 = vld [vmem:[%s19229_s1 + $0x1020] sm:$0xff] }
 0x113   :  { %1876 = vmatpush1.msra.mxu1 %v637_v47  ;;  %1792 = vmatprep.subr.mxu0 %v170_v48  ;;  %v135_v45 = vld [vmem:[%s19229_s1 + $0x340] sm:$0xff]  ;;  %v530_v47 = vld [vmem:[%s19229_s1 + $0xf98] sm:$0xff] }
 0x114   :  { %1877 = vmatprep.subr.mxu1 %v620_v49  ;;  %1793 = vmatpush1.msra.mxu0 %v169_v50  ;;  %v118_v48 = vld [vmem:[%s19229_s1 + $0x2b8] sm:$0xff]  ;;  %v529_v49 = vld [vmem:[%s19229_s1 + $0xf90] sm:$0xff] }
 0x115   :  { %1878 = vmatpush1.msra.mxu1 %v619_v51  ;;  %1794 = vmatprep.subr.mxu0 %v152_v52  ;;  %v117_v50 = vld [vmem:[%s19229_s1 + $0x2b0] sm:$0xff]  ;;  %v512_v51 = vld [vmem:[%s19229_s1 + $0xf08] sm:$0xff] }
 0x116   :  { %1911 = vmatprep.mubr.f32.mxu1 %v8567_v3  ;;  %1918 = vmatprep.subr.mxu1 %v316_v53  ;;  %v1132_v63 = vpop.f32.mrf.mxu1  ;;  %v100_v52 = vld [vmem:[%s19229_s1 + $0x228] sm:$0xff]  ;;  %v511_v53 = vld [vmem:[%s19229_s1 + $0xf00] sm:$0xff] }
 0x117   :  { %1795 = vmatpush1.msra.mxu0 %v151_v57  ;;  %8226 = vmatmul.mubr.msk.f32.vlgmr.msra.gmra.mxu1 %vm865_vm1, %v9652_v29  ;;  %v1133_v5 = vadd.f32 %v1132_v63, %v786_v54  ;;  %v1203_v29 = vpop.f32.mrf.mxu0  ;;  %v99_v54 = vld [vmem:[%s19229_s1 + $0x220] sm:$0xff]  ;;  %v494_v57 = vld [vmem:[%s19229_s1 + $0xe78] sm:$0xff]  ;;  %v64_v63 = vld [vmem:[%s19229_s1 + $0x108] sm:$0xff] }
 0x118   :  { %1919 = vmatpush1.msra.mxu1 %v315_v58  ;;  %1796 = vmatprep.subr.mxu0 %v134_v59  ;;  %v82_v58 = vld [vmem:[%s19229_s1 + $0x198] sm:$0xff]  ;;  %v493_v59 = vld [vmem:[%s19229_s1 + $0xe70] sm:$0xff] }
 0x119   :  { %1920 = vmatprep.subr.mxu1 %v298_v61  ;;  %1797 = vmatpush1.msra.mxu0 %v133_v62  ;;  %v10332_v12 = vadd.f32 %v1203_v29, %v1133_v5  ;;  %v81_v61 = vld [vmem:[%s19229_s1 + $0x190] sm:$0xff]  ;;  %v476_v62 = vld [vmem:[%s19229_s1 + $0xde8] sm:$0xff]  ;;  %v458_v5 = vld [vmem:[%s19229_s1 + $0xd58] sm:$0xff] }
 0x11a   :  { %1921 = vmatpush1.msra.mxu1 %v297_v0  ;;  %1798 = vmatprep.subr.mxu0 %v116_v2  ;;  %v475_v0 = vld [vmem:[%s19229_s1 + $0xde0] sm:$0xff]  ;;  %v45_v29 = vld [vmem:[%s19229_s1 + $0x70] sm:$0xff] }
 0x11b   :  { %1922 = vmatprep.subr.mxu1 %v280_v8  ;;  %1799 = vmatpush1.msra.mxu0 %v115_v9  ;;  %v63_v2 = vld [vmem:[%s19229_s1 + $0x100] sm:$0xff]  ;;  %v46_v8 = vld [vmem:[%s19229_s1 + $0x78] sm:$0xff]  ;;  %v457_v9 = vld [vmem:[%s19229_s1 + $0xd50] sm:$0xff]  ;;  %vm2204_vm6 = vcmp.gt.f32.partialorder %v10332_v12, 0.0 }
 0x11c   :  { %1923 = vmatpush1.msra.mxu1 %v279_v10  ;;  %1800 = vmatprep.subr.mxu0 %v98_v11  ;;  %v440_v10 = vld [vmem:[%s19229_s1 + $0xcc8] sm:$0xff] }
 0x11d   :  { %1924 = vmatprep.subr.mxu1 %v262_v13  ;;  %1801 = vmatpush1.msra.mxu0 %v97_v14  ;;  %v604_v11 = vld [vmem:[%s19229_s1 + $0x11e8] sm:$0xff]  ;;  %v439_v13 = vld [vmem:[%s19229_s1 + $0xcc0] sm:$0xff] }
 0x11e   :  { %1925 = vmatpush1.msra.mxu1 %v261_v15  ;;  %1802 = vmatprep.subr.mxu0 %v80_v16  ;;  %v603_v14 = vld [vmem:[%s19229_s1 + $0x11e0] sm:$0xff]  ;;  %v422_v15 = vld [vmem:[%s19229_s1 + $0xc38] sm:$0xff] }
 0x11f   :  { %1926 = vmatprep.subr.mxu1 %v244_v17  ;;  %1803 = vmatpush1.msra.mxu0 %v79_v18  ;;  %v586_v16 = vld [vmem:[%s19229_s1 + $0x1158] sm:$0xff]  ;;  %v421_v17 = vld [vmem:[%s19229_s1 + $0xc30] sm:$0xff] }
 0x120   :  { %1927 = vmatpush1.msra.mxu1 %v243_v19  ;;  %1804 = vmatprep.subr.mxu0 %v62_v20  ;;  %v585_v18 = vld [vmem:[%s19229_s1 + $0x1150] sm:$0xff]  ;;  %v404_v19 = vld [vmem:[%s19229_s1 + $0xba8] sm:$0xff] }
 0x121   :  { %1928 = vmatprep.subr.mxu1 %v226_v21  ;;  %1805 = vmatpush1.msra.mxu0 %v61_v22  ;;  %v568_v20 = vld [vmem:[%s19229_s1 + $0x10c8] sm:$0xff]  ;;  %v403_v21 = vld [vmem:[%s19229_s1 + $0xba0] sm:$0xff] }
 0x122   :  { %1929 = vmatpush1.msra.mxu1 %v225_v23  ;;  %1806 = vmatprep.subr.mxu0 %v44_v24  ;;  %v567_v22 = vld [vmem:[%s19229_s1 + $0x10c0] sm:$0xff]  ;;  %v386_v23 = vld [vmem:[%s19229_s1 + $0xb18] sm:$0xff] }
 0x123   :  { %1930 = vmatprep.subr.mxu1 %v208_v25  ;;  %1807 = vmatpush1.msra.mxu0 %v43_v27  ;;  %v550_v24 = vld [vmem:[%s19229_s1 + $0x1038] sm:$0xff]  ;;  %v385_v25 = vld [vmem:[%s19229_s1 + $0xb10] sm:$0xff] }
 0x124   :  { %1931 = vmatpush1.msra.mxu1 %v207_v28  ;;  %1808 = vmatprep.subr.mxu0 %v602_v4  ;;  %v549_v27 = vld [vmem:[%s19229_s1 + $0x1030] sm:$0xff]  ;;  %v368_v28 = vld [vmem:[%s19229_s1 + $0xa88] sm:$0xff] }
 0x125   :  { %1932 = vmatprep.subr.mxu1 %v190_v6  ;;  %1809 = vmatpush2.msra.mxu0 %v601_v40  ;;  %v532_v4 = vld [vmem:[%s19229_s1 + $0xfa8] sm:$0xff]  ;;  %v367_v6 = vld [vmem:[%s19229_s1 + $0xa80] sm:$0xff] }
 0x126   :  { %1933 = vmatpush1.msra.mxu1 %v189_v31  ;;  %1810 = vmatprep.subr.mxu0 %v584_v32  ;;  %v531_v40 = vld [vmem:[%s19229_s1 + $0xfa0] sm:$0xff]  ;;  %v350_v31 = vld [vmem:[%s19229_s1 + $0x9f8] sm:$0xff] }
 0x127   :  { %1934 = vmatprep.subr.mxu1 %v172_v34  ;;  %1811 = vmatpush2.msra.mxu0 %v583_v35  ;;  %v514_v32 = vld [vmem:[%s19229_s1 + $0xf18] sm:$0xff]  ;;  %v349_v34 = vld [vmem:[%s19229_s1 + $0x9f0] sm:$0xff] }
 0x128   :  { %1935 = vmatpush1.msra.mxu1 %v171_v36  ;;  %1812 = vmatprep.subr.mxu0 %v566_v37  ;;  %v513_v35 = vld [vmem:[%s19229_s1 + $0xf10] sm:$0xff]  ;;  %v332_v36 = vld [vmem:[%s19229_s1 + $0x968] sm:$0xff] }
 0x129   :  { %1936 = vmatprep.subr.mxu1 %v154_v38  ;;  %1813 = vmatpush2.msra.mxu0 %v565_v39  ;;  %v496_v37 = vld [vmem:[%s19229_s1 + $0xe88] sm:$0xff]  ;;  %v331_v38 = vld [vmem:[%s19229_s1 + $0x960] sm:$0xff] }
 0x12a   :  { %1937 = vmatpush1.msra.mxu1 %v153_v41  ;;  %1814 = vmatprep.subr.mxu0 %v548_v42  ;;  %v495_v39 = vld [vmem:[%s19229_s1 + $0xe80] sm:$0xff]  ;;  %v478_v41 = vld [vmem:[%s19229_s1 + $0xdf8] sm:$0xff] }
 0x12b   :  { %1938 = vmatprep.subr.mxu1 %v136_v43  ;;  %1815 = vmatpush2.msra.mxu0 %v547_v44  ;;  %v766_v42 = vld [vmem:[%s19229_s1 + $0x16f8] sm:$0xf]  ;;  %v477_v43 = vld [vmem:[%s19229_s1 + $0xdf0] sm:$0xff] }
 0x12c   :  { %1939 = vmatpush1.msra.mxu1 %v135_v45  ;;  %1816 = vmatprep.subr.mxu0 %v530_v47  ;;  %v765_v44 = vld [vmem:[%s19229_s1 + $0x16f0] sm:$0xf]  ;;  %v460_v45 = vld [vmem:[%s19229_s1 + $0xd68] sm:$0xff] }
 0x12d   :  { %1940 = vmatprep.subr.mxu1 %v118_v48  ;;  %1817 = vmatpush2.msra.mxu0 %v529_v49  ;;  %v748_v47 = vld [vmem:[%s19229_s1 + $0x1668] sm:$0xff]  ;;  %v459_v48 = vld [vmem:[%s19229_s1 + $0xd60] sm:$0xff] }
 0x12e   :  { %1941 = vmatpush1.msra.mxu1 %v117_v50  ;;  %1818 = vmatprep.subr.mxu0 %v512_v51  ;;  %v747_v49 = vld [vmem:[%s19229_s1 + $0x1660] sm:$0xff]  ;;  %v442_v50 = vld [vmem:[%s19229_s1 + $0xcd8] sm:$0xff] }
 0x12f   :  { %1942 = vmatprep.subr.mxu1 %v100_v52  ;;  %1819 = vmatpush2.msra.mxu0 %v511_v53  ;;  %v730_v51 = vld [vmem:[%s19229_s1 + $0x15d8] sm:$0xff]  ;;  %v441_v52 = vld [vmem:[%s19229_s1 + $0xcd0] sm:$0xff] }
 0x130   :  { %1943 = vmatpush1.msra.mxu1 %v99_v54  ;;  %1820 = vmatprep.subr.mxu0 %v494_v57  ;;  %v729_v53 = vld [vmem:[%s19229_s1 + $0x15d0] sm:$0xff]  ;;  %v424_v54 = vld [vmem:[%s19229_s1 + $0xc48] sm:$0xff] }
 0x131   :  { %1944 = vmatprep.subr.mxu1 %v82_v58  ;;  %1821 = vmatpush2.msra.mxu0 %v493_v59  ;;  %v712_v57 = vld [vmem:[%s19229_s1 + $0x1548] sm:$0xff]  ;;  %v423_v58 = vld [vmem:[%s19229_s1 + $0xc40] sm:$0xff] }
 0x132   :  { %1945 = vmatpush1.msra.mxu1 %v81_v61  ;;  %1822 = vmatprep.subr.mxu0 %v476_v62  ;;  %v711_v59 = vld [vmem:[%s19229_s1 + $0x1540] sm:$0xff]  ;;  %v406_v61 = vld [vmem:[%s19229_s1 + $0xbb8] sm:$0xff] }
 0x133   :  { %1946 = vmatprep.subr.mxu1 %v64_v63  ;;  %1823 = vmatpush2.msra.mxu0 %v475_v0  ;;  %v694_v62 = vld [vmem:[%s19229_s1 + $0x14b8] sm:$0xff]  ;;  %v405_v63 = vld [vmem:[%s19229_s1 + $0xbb0] sm:$0xff] }
 0x134   :  { %1947 = vmatpush1.msra.mxu1 %v63_v2  ;;  %1824 = vmatprep.subr.mxu0 %v458_v5  ;;  %v693_v0 = vld [vmem:[%s19229_s1 + $0x14b0] sm:$0xff]  ;;  %v388_v2 = vld [vmem:[%s19229_s1 + $0xb28] sm:$0xff] }
 0x135   :  { %1948 = vmatprep.subr.mxu1 %v46_v8  ;;  %1825 = vmatpush2.msra.mxu0 %v457_v9  ;;  %v676_v5 = vld [vmem:[%s19229_s1 + $0x1428] sm:$0xff]  ;;  %v387_v8 = vld [vmem:[%s19229_s1 + $0xb20] sm:$0xff] }
 0x136   :  { %1949 = vmatpush1.msra.mxu1 %v45_v29  ;;  %1826 = vmatprep.subr.mxu0 %v440_v10  ;;  %v675_v9 = vld [vmem:[%s19229_s1 + $0x1420] sm:$0xff]  ;;  %v370_v29 = vld [vmem:[%s19229_s1 + $0xa98] sm:$0xff] }
 0x137   :  { %1950 = vmatprep.subr.mxu1 %v604_v11  ;;  %1827 = vmatpush2.msra.mxu0 %v439_v13  ;;  %v658_v10 = vld [vmem:[%s19229_s1 + $0x1398] sm:$0xff]  ;;  %v369_v11 = vld [vmem:[%s19229_s1 + $0xa90] sm:$0xff] }
 0x138   :  { %1951 = vmatpush2.msra.mxu1 %v603_v14  ;;  %1828 = vmatprep.subr.mxu0 %v422_v15  ;;  %v657_v13 = vld [vmem:[%s19229_s1 + $0x1390] sm:$0xff]  ;;  %v352_v14 = vld [vmem:[%s19229_s1 + $0xa08] sm:$0xff] }
 0x139   :  { %1952 = vmatprep.subr.mxu1 %v586_v16  ;;  %1829 = vmatpush2.msra.mxu0 %v421_v17  ;;  %v640_v15 = vld [vmem:[%s19229_s1 + $0x1308] sm:$0xff]  ;;  %v351_v16 = vld [vmem:[%s19229_s1 + $0xa00] sm:$0xff] }
 0x13a   :  { %1953 = vmatpush2.msra.mxu1 %v585_v18  ;;  %1830 = vmatprep.subr.mxu0 %v404_v19  ;;  %v639_v17 = vld [vmem:[%s19229_s1 + $0x1300] sm:$0xff]  ;;  %v334_v18 = vld [vmem:[%s19229_s1 + $0x978] sm:$0xff]  ;;  %v10675_v19 = vsub.s32 4, %v10119_v56 }
 0x13b   :  { %1954 = vmatprep.subr.mxu1 %v568_v20  ;;  %1831 = vmatpush2.msra.mxu0 %v403_v21  ;;  %v622_v20 = vld [vmem:[%s19229_s1 + $0x1278] sm:$0xff]  ;;  %v333_v21 = vld [vmem:[%s19229_s1 + $0x970] sm:$0xff] }
 0x13c   :  { %1955 = vmatpush2.msra.mxu1 %v567_v22  ;;  %1832 = vmatprep.subr.mxu0 %v386_v23  ;;  %v621_v22 = vld [vmem:[%s19229_s1 + $0x1270] sm:$0xff]  ;;  %v318_v23 = vld [vmem:[%s19229_s1 + $0x8f8] sm:$0xff] }
 0x13d   :  { %1956 = vmatprep.subr.mxu1 %v550_v24  ;;  %1833 = vmatpush2.msra.mxu0 %v385_v25  ;;  %v794_v24 = vrot.slane %v10157_v7, %v10675_v19  ;;  %v10691_v25 = vpop.f32.mrf.mxu0 }
 0x13e   :  { %1957 = vmatpush2.msra.mxu1 %v549_v27  ;;  %1834 = vmatprep.subr.mxu0 %v368_v28  ;;  %v768_v27 = vld [vmem:[%s19229_s1 + $0x1708] sm:$0xf]  ;;  %v317_v28 = vld [vmem:[%s19229_s1 + $0x8f0] sm:$0xff] }
 0x13f   :  { %1958 = vmatprep.subr.mxu1 %v532_v4  ;;  %1835 = vmatpush2.msra.mxu0 %v367_v6  ;;  %v767_v4 = vld [vmem:[%s19229_s1 + $0x1700] sm:$0xf]  ;;  %v10709_v6 = vsub.s32 1, %v10119_v56 }
 0x140   :  { %1959 = vmatpush2.msra.mxu1 %v531_v40  ;;  %1836 = vmatprep.subr.mxu0 %v350_v31  ;;  %v10711_v40 = vpop.f32.mrf.mxu1  ;;  %v10716_v31 = vld [vmem:[%s19230_s0 + $0x10] sm:$0xff] }
 0x141   :  { %1960 = vmatprep.subr.mxu1 %v514_v32  ;;  %1837 = vmatpush2.msra.mxu0 %v349_v34  ;;  %19243 = vst [vmem:[#allocation5_spill] sm:$0xff] %v10709_v6  ;;  %v299_v32 = vld [vmem:[%s19229_s1 + $0x860] sm:$0xff] }
 0x142   :  { %1961 = vmatpush2.msra.mxu1 %v513_v35  ;;  %1838 = vmatprep.subr.mxu0 %v332_v36  ;;  %v749_v35 = vld [vmem:[%s19229_s1 + $0x1670] sm:$0xff]  ;;  %v282_v36 = vld [vmem:[%s19229_s1 + $0x7d8] sm:$0xff] }
 0x143   :  { %1962 = vmatprep.subr.mxu1 %v496_v37  ;;  %1839 = vmatpush2.msra.mxu0 %v331_v38  ;;  %v1345_v38 = vpop.f32.mrf.mxu1 }
 0x144   :  { %1840 = vmatprep.mubr.f32.mxu0 %v10042_v30  ;;  %1963 = vmatpush2.msra.mxu1 %v495_v39  ;;  %v732_v39 = vld [vmem:[%s19229_s1 + $0x15e8] sm:$0xff] }
 0x145   :  { %1841 = vmatmul.mubr.f32.vlgmr.msra.gmra.mxu0 %v10054_v33  ;;  %1964 = vmatprep.subr.mxu1 %v478_v41  ;;  %v281_v41 = vld [vmem:[%s19229_s1 + $0x7d0] sm:$0xff] }
 0x146   :  { %8227 = vmatprep.subr.msk.mxu0 %vm869_vm0, %v766_v42  ;;  %1965 = vmatpush2.msra.mxu1 %v477_v43  ;;  %v731_v42 = vld [vmem:[%s19229_s1 + $0x15e0] sm:$0xff]  ;;  %v264_v43 = vld [vmem:[%s19229_s1 + $0x748] sm:$0xff] }
 0x147   :  { %8228 = vmatpush1.msk.msra.mxu0 %vm869_vm0, %v765_v44  ;;  %1966 = vmatprep.subr.mxu1 %v460_v45  ;;  %v782_v45 = vrot.slane %v10157_v7, %v10709_v6 }
 0x148   :  { %2005 = vmatprep.subr.mxu0 %v748_v47  ;;  %1967 = vmatpush2.msra.mxu1 %v459_v48  ;;  %v714_v47 = vld [vmem:[%s19229_s1 + $0x1558] sm:$0xff]  ;;  %v263_v48 = vld [vmem:[%s19229_s1 + $0x740] sm:$0xff] }
 0x149   :  { %2006 = vmatpush1.msra.mxu0 %v747_v49  ;;  %1968 = vmatprep.subr.mxu1 %v442_v50  ;;  %v713_v49 = vld [vmem:[%s19229_s1 + $0x1550] sm:$0xff]  ;;  %v246_v50 = vld [vmem:[%s19229_s1 + $0x6b8] sm:$0xff] }
 0x14a   :  { %2007 = vmatprep.subr.mxu0 %v730_v51  ;;  %1969 = vmatpush2.msra.mxu1 %v441_v52  ;;  %v696_v51 = vld [vmem:[%s19229_s1 + $0x14c8] sm:$0xff]  ;;  %v245_v52 = vld [vmem:[%s19229_s1 + $0x6b0] sm:$0xff] }
 0x14b   :  { %2008 = vmatpush1.msra.mxu0 %v729_v53  ;;  %1970 = vmatprep.subr.mxu1 %v424_v54  ;;  %v695_v53 = vld [vmem:[%s19229_s1 + $0x14c0] sm:$0xff]  ;;  %v228_v54 = vld [vmem:[%s19229_s1 + $0x628] sm:$0xff] }
 0x14c   :  { %2009 = vmatprep.subr.mxu0 %v712_v57  ;;  %1971 = vmatpush2.msra.mxu1 %v423_v58  ;;  %v993_v57 = vadd.f32 %v10303_v60, %v782_v45  ;;  %v678_v58 = vld [vmem:[%s19229_s1 + $0x1438] sm:$0xff]  ;;  %v83_v45 = vld [vmem:[%s19229_s1 + $0x1a0] sm:$0xff] }
 0x14d   :  { %2010 = vmatpush1.msra.mxu0 %v711_v59  ;;  %1972 = vmatprep.subr.mxu1 %v406_v61  ;;  %v227_v59 = vld [vmem:[%s19229_s1 + $0x620] sm:$0xff]  ;;  %v677_v61 = vld [vmem:[%s19229_s1 + $0x1430] sm:$0xff]  ;;  %v210_v60 = vld [vmem:[%s19229_s1 + $0x598] sm:$0xff] }
 0x14e   :  { %2011 = vmatprep.subr.mxu0 %v694_v62  ;;  %1973 = vmatpush2.msra.mxu1 %v405_v63  ;;  %v660_v62 = vld [vmem:[%s19229_s1 + $0x13a8] sm:$0xff]  ;;  %v209_v63 = vld [vmem:[%s19229_s1 + $0x590] sm:$0xff] }
 0x14f   :  { %2012 = vmatpush1.msra.mxu0 %v693_v0  ;;  %1974 = vmatprep.subr.mxu1 %v388_v2  ;;  %v659_v0 = vld [vmem:[%s19229_s1 + $0x13a0] sm:$0xff]  ;;  %v192_v2 = vld [vmem:[%s19229_s1 + $0x508] sm:$0xff] }
 0x150   :  { %2013 = vmatprep.subr.mxu0 %v676_v5  ;;  %1975 = vmatpush2.msra.mxu1 %v387_v8  ;;  %v1064_v5 = vadd.f32 %v10292_v55, %v993_v57  ;;  %v642_v8 = vld [vmem:[%s19229_s1 + $0x1318] sm:$0xff]  ;;  %v2337_v57 = vld [vmem:[%s19232_s3 + $0x288] sm:$0xff] }
 0x151   :  { %2014 = vmatpush1.msra.mxu0 %v675_v9  ;;  %1976 = vmatprep.subr.mxu1 %v370_v29  ;;  %v191_v9 = vld [vmem:[%s19229_s1 + $0x500] sm:$0xff]  ;;  %v10807_v29 = vsub.s32 6, %v10119_v56  ;;  %v174_v55 = vld [vmem:[%s19229_s1 + $0x478] sm:$0xff] }
 0x152   :  { %2015 = vmatprep.subr.mxu0 %v658_v10  ;;  %1977 = vmatpush2.msra.mxu1 %v369_v11  ;;  %v641_v10 = vld [vmem:[%s19229_s1 + $0x1310] sm:$0xff]  ;;  %v624_v11 = vld [vmem:[%s19229_s1 + $0x1288] sm:$0xff]  ;;  %vm2203_vm2 = vcmp.gt.f32.partialorder %v1064_v5, 0.0 }
 0x153   :  { %2016 = vmatpush1.msra.mxu0 %v657_v13  ;;  %1978 = vmatprep.subr.mxu1 %v352_v14  ;;  %v173_v13 = vld [vmem:[%s19229_s1 + $0x470] sm:$0xff]  ;;  %v623_v14 = vld [vmem:[%s19229_s1 + $0x1280] sm:$0xff] }
 0x154   :  { %2017 = vmatprep.subr.mxu0 %v640_v15  ;;  %1979 = vmatpush2.msra.mxu1 %v351_v16  ;;  %v2221_v15 = vmul.f32 0.2, %v1064_v5  ;;  %v156_v16 = vld [vmem:[%s19229_s1 + $0x3e8] sm:$0xff] }
 0x155   :  { %2018 = vmatpush1.msra.mxu0 %v639_v17  ;;  %1980 = vmatprep.subr.mxu1 %v334_v18  ;;  %v802_v17 = vrot.slane %v10157_v7, %v10807_v29  ;;  %v10829_v18 = vpop.f32.mrf.mxu1  ;;  %v2391_v7 = vld [vmem:[%s19232_s3 + $0x438] sm:$0xff] }
 0x156   :  { %2019 = vmatprep.subr.mxu0 %v622_v20  ;;  %1981 = vmatpush2.msra.mxu1 %v333_v21  ;;  %v2392_v20 = vld [vmem:[%s19232_s3 + $0x440] sm:$0xff] }
 0x157   :  { %1982 = vmatprep.mubr.f32.mxu1 %v10042_v30  ;;  %2020 = vmatpush1.msra.mxu0 %v621_v22  ;;  %v300_v30 = vld [vmem:[%s19229_s1 + $0x868] sm:$0xff]  ;;  %v155_v21 = vld [vmem:[%s19229_s1 + $0x3e0] sm:$0xff] }
 0x158   :  { %2053 = vmatprep.mubr.f32.mxu0 %v8567_v3  ;;  %1983 = vmatmul.mubr.f32.vlgmr.msra.gmra.mxu1 %v10054_v33  ;;  %v750_v33 = vld [vmem:[%s19229_s1 + $0x1678] sm:$0xff] }
 0x159   :  { %8229 = vmatmul.mubr.msk.f32.vlgmr.msra.gmra.mxu0 %vm865_vm1, %v10716_v31  ;;  %2060 = vmatprep.subr.mxu0 %v318_v23  ;;  %v1274_v34 = vpop.f32.mrf.mxu0  ;;  %v138_v23 = vld [vmem:[%s19229_s1 + $0x358] sm:$0xff] }
 0x15a   :  { %8230 = vmatprep.subr.msk.mxu1 %vm869_vm0, %v768_v27  ;;  %2061 = vmatpush1.msra.mxu0 %v317_v28  ;;  %v1275_v37 = vadd.f32 %v1274_v34, %v794_v24  ;;  %v2383_v24 = vld [vmem:[%s19232_s3 + $0x3f8] sm:$0xff]  ;;  %v137_v28 = vld [vmem:[%s19229_s1 + $0x350] sm:$0xff]  ;;  %v119_v34 = vld [vmem:[%s19229_s1 + $0x2c0] sm:$0xff] }
 0x15b   :  { %8231 = vmatpush1.msk.msra.mxu1 %vm869_vm0, %v767_v4  ;;  %2062 = vmatprep.subr.mxu0 %v300_v30  ;;  %v10841_v22 = vpop.f32.mrf.mxu0  ;;  %v2382_v4 = vld [vmem:[%s19232_s3 + $0x3f0] sm:$0xff] }
 0x15c   :  { %2147 = vmatprep.subr.mxu1 %v750_v33  ;;  %2063 = vmatpush1.msra.mxu0 %v299_v32  ;;  %v10746_v44 = vadd.f32 %v1345_v38, %v1275_v37  ;;  %v2374_v33 = vld [vmem:[%s19232_s3 + $0x3b0] sm:$0xff]  ;;  %v102_v37 = vld [vmem:[%s19229_s1 + $0x238] sm:$0xff]  ;;  %v2365_v38 = vld [vmem:[%s19232_s3 + $0x368] sm:$0xff] }
 0x15d   :  { %2148 = vmatpush1.msra.mxu1 %v749_v35  ;;  %2064 = vmatprep.subr.mxu0 %v282_v36  ;;  %v2373_v35 = vld [vmem:[%s19232_s3 + $0x3a8] sm:$0xff] }
 0x15e   :  { %2149 = vmatprep.subr.mxu1 %v732_v39  ;;  %2065 = vmatpush1.msra.mxu0 %v281_v41  ;;  %v101_v39 = vld [vmem:[%s19229_s1 + $0x230] sm:$0xff]  ;;  %v2364_v41 = vld [vmem:[%s19232_s3 + $0x360] sm:$0xff]  ;;  %vm2206_vm8 = vcmp.gt.f32.partialorder %v10746_v44, 0.0 }
 0x15f   :  { %2150 = vmatpush1.msra.mxu1 %v731_v42  ;;  %2066 = vmatprep.subr.mxu0 %v264_v43  ;;  %v84_v42 = vld [vmem:[%s19229_s1 + $0x1a8] sm:$0xff]  ;;  %v2356_v43 = vld [vmem:[%s19232_s3 + $0x320] sm:$0xff] }
 0x160   :  { %2151 = vmatprep.subr.mxu1 %v714_v47  ;;  %2067 = vmatpush1.msra.mxu0 %v263_v48  ;;  %v2355_v47 = vld [vmem:[%s19232_s3 + $0x318] sm:$0xff] }
 0x161   :  { %2152 = vmatpush1.msra.mxu1 %v713_v49  ;;  %2068 = vmatprep.subr.mxu0 %v246_v50  ;;  %v66_v48 = vld [vmem:[%s19229_s1 + $0x118] sm:$0xff]  ;;  %v65_v50 = vld [vmem:[%s19229_s1 + $0x110] sm:$0xff] }
 0x162   :  { %2153 = vmatprep.subr.mxu1 %v696_v51  ;;  %2069 = vmatpush1.msra.mxu0 %v245_v52  ;;  %v2347_v49 = vld [vmem:[%s19232_s3 + $0x2d8] sm:$0xff]  ;;  %v2346_v51 = vld [vmem:[%s19232_s3 + $0x2d0] sm:$0xff]  ;;  %v48_v52 = vld [vmem:[%s19229_s1 + $0x88] sm:$0xff] }
 0x163   :  { %2154 = vmatpush1.msra.mxu1 %v695_v53  ;;  %2070 = vmatprep.subr.mxu0 %v228_v54  ;;  %v2338_v53 = vld [vmem:[%s19232_s3 + $0x290] sm:$0xff]  ;;  %v47_v54 = vld [vmem:[%s19229_s1 + $0x80] sm:$0xff] }
 0x164   :  { %2155 = vmatprep.subr.mxu1 %v678_v58  ;;  %2071 = vmatpush1.msra.mxu0 %v227_v59  ;;  %v606_v58 = vld [vmem:[%s19229_s1 + $0x11f8] sm:$0xff]  ;;  %v2329_v59 = vld [vmem:[%s19232_s3 + $0x248] sm:$0xff] }
 0x165   :  { %2156 = vmatpush1.msra.mxu1 %v677_v61  ;;  %2072 = vmatprep.subr.mxu0 %v210_v60  ;;  %v605_v61 = vld [vmem:[%s19229_s1 + $0x11f0] sm:$0xff]  ;;  %v2328_v60 = vld [vmem:[%s19232_s3 + $0x240] sm:$0xff] }
 0x166   :  { %2157 = vmatprep.subr.mxu1 %v660_v62  ;;  %2073 = vmatpush1.msra.mxu0 %v209_v63  ;;  %v588_v62 = vld [vmem:[%s19229_s1 + $0x1168] sm:$0xff]  ;;  %v2320_v63 = vld [vmem:[%s19232_s3 + $0x200] sm:$0xff] }
 0x167   :  { %2158 = vmatpush1.msra.mxu1 %v659_v0  ;;  %2074 = vmatprep.subr.mxu0 %v192_v2  ;;  %v587_v0 = vld [vmem:[%s19229_s1 + $0x1160] sm:$0xff]  ;;  %v2319_v2 = vld [vmem:[%s19232_s3 + $0x1f8] sm:$0xff] }
 0x168   :  { %2159 = vmatprep.subr.mxu1 %v642_v8  ;;  %2075 = vmatpush1.msra.mxu0 %v191_v9  ;;  %v2311_v8 = vld [vmem:[%s19232_s3 + $0x1b8] sm:$0xff]  ;;  %v569_v9 = vld [vmem:[%s19229_s1 + $0x10d0] sm:$0xff] }
 0x169   :  { %2160 = vmatpush1.msra.mxu1 %v641_v10  ;;  %2076 = vmatprep.subr.mxu0 %v174_v55  ;;  %v2310_v10 = vld [vmem:[%s19232_s3 + $0x1b0] sm:$0xff]  ;;  %v552_v55 = vld [vmem:[%s19229_s1 + $0x1048] sm:$0xff] }
 0x16a   :  { %2161 = vmatprep.subr.mxu1 %v624_v11  ;;  %2077 = vmatpush1.msra.mxu0 %v173_v13  ;;  %v2302_v11 = vld [vmem:[%s19232_s3 + $0x170] sm:$0xff]  ;;  %v551_v13 = vld [vmem:[%s19229_s1 + $0x1040] sm:$0xff] }
 0x16b   :  { %2162 = vmatpush1.msra.mxu1 %v623_v14  ;;  %2195 = vmatprep.mubr.f32.mxu1 %v8567_v3  ;;  %v10852_v3 = vsel %vm2203_vm2, %v1064_v5, %v2221_v15  ;;  %v570_v5 = vld [vmem:[%s19229_s1 + $0x10d8] sm:$0xff]  ;;  %v2301_v14 = vld [vmem:[%s19232_s3 + $0x168] sm:$0xff] }
 0x16c   :  { %2078 = vmatprep.subr.mxu0 %v156_v16  ;;  %8232 = vmatmul.mubr.msk.f32.vlgmr.msra.gmra.mxu1 %vm865_vm1, %v10716_v31  ;;  %v1416_v27 = vpop.f32.mrf.mxu1  ;;  %v120_v31 = vld [vmem:[%s19229_s1 + $0x2c8] sm:$0xff]  ;;  %v534_v15 = vld [vmem:[%s19229_s1 + $0xfb8] sm:$0xff] }
 0x16d   :  { %4897 = vmatprep.subr.mxu1 %v2392_v20  ;;  %2079 = vmatpush1.msra.mxu0 %v155_v21  ;;  %v1417_v30 = vadd.f32 %v1416_v27, %v802_v17  ;;  %v1487_v32 = vpop.f32.mrf.mxu0  ;;  %v2293_v16 = vld [vmem:[%s19232_s3 + $0x128] sm:$0xff]  ;;  %v533_v17 = vld [vmem:[%s19229_s1 + $0xfb0] sm:$0xff]  ;;  %v2292_v20 = vld [vmem:[%s19232_s3 + $0x120] sm:$0xff] }
 0x16e   :  { %4898 = vmatpush1.msra.mxu1 %v2391_v7  ;;  %4961 = vmatprep.mubr.f32.mxu1 %v10852_v3  ;;  %v516_v21 = vld [vmem:[%s19229_s1 + $0xf28] sm:$0xff]  ;;  %v2284_v7 = vld [vmem:[%s19232_s3 + $0xe0] sm:$0xff]  ;;  %v498_v27 = vld [vmem:[%s19229_s1 + $0xe98] sm:$0xff] }
 0x16f   :  { %2080 = vmatprep.subr.mxu0 %v138_v23  ;;  %4899 = vmatprep.subr.mxu1 %v2383_v24  ;;  %v10873_v36 = vadd.f32 %v1487_v32, %v1417_v30  ;;  %v515_v23 = vld [vmem:[%s19229_s1 + $0xf20] sm:$0xff]  ;;  %v2283_v24 = vld [vmem:[%s19232_s3 + $0xd8] sm:$0xff]  ;;  %v2274_v30 = vld [vmem:[%s19232_s3 + $0x90] sm:$0xff] }
 0x170   :  { %2081 = vmatpush1.msra.mxu0 %v137_v28  ;;  %4900 = vmatpush1.msra.mxu1 %v2382_v4  ;;  %v2275_v28 = vld [vmem:[%s19232_s3 + $0x98] sm:$0xff]  ;;  %v497_v4 = vld [vmem:[%s19229_s1 + $0xe90] sm:$0xff]  ;;  %v479_v32 = vld [vmem:[%s19229_s1 + $0xe00] sm:$0xff] }
 0x171   :  { %2082 = vmatprep.subr.mxu0 %v120_v31  ;;  %4901 = vmatprep.subr.mxu1 %v2374_v33  ;;  %v480_v31 = vld [vmem:[%s19229_s1 + $0xe08] sm:$0xff]  ;;  %v2266_v33 = vld [vmem:[%s19232_s3 + $0x50] sm:$0xff]  ;;  %vm2208_vm10 = vcmp.gt.f32.partialorder %v10873_v36, 0.0 }
 0x172   :  { %2083 = vmatpush1.msra.mxu0 %v119_v34  ;;  %4902 = vmatpush1.msra.mxu1 %v2373_v35  ;;  %v2265_v34 = vld [vmem:[%s19232_s3 + $0x48] sm:$0xff]  ;;  %v462_v35 = vld [vmem:[%s19229_s1 + $0xd78] sm:$0xff] }
 0x173   :  { %2084 = vmatprep.subr.mxu0 %v102_v37  ;;  %4903 = vmatprep.subr.mxu1 %v2365_v38  ;;  %v2257_v37 = vld [vmem:[%s19232_s3 + $0x8] sm:$0xff]  ;;  %v11026_v38 = vsub.s32 3, %v10119_v56 }
 0x174   :  { %2085 = vmatpush1.msra.mxu0 %v101_v39  ;;  %4904 = vmatpush1.msra.mxu1 %v2364_v41  ;;  %v461_v39 = vld [vmem:[%s19229_s1 + $0xd70] sm:$0xff]  ;;  %v2256_v41 = vld [vmem:[%s19232_s3] sm:$0xff] }
 0x175   :  { %2086 = vmatprep.subr.mxu0 %v84_v42  ;;  %4905 = vmatprep.subr.mxu1 %v2356_v43  ;;  %19244 = vst [vmem:[#allocation6_spill] sm:$0xff] %v11026_v38  ;;  %v444_v42 = vld [vmem:[%s19229_s1 + $0xce8] sm:$0xff]  ;;  %v2536_v43 = vld [vmem:[%s19232_s3 + $0x8c0] sm:$0xff] }
 0x176   :  { %2087 = vmatpush1.msra.mxu0 %v83_v45  ;;  %4906 = vmatpush1.msra.mxu1 %v2355_v47  ;;  %v443_v45 = vld [vmem:[%s19229_s1 + $0xce0] sm:$0xff]  ;;  %v2535_v47 = vld [vmem:[%s19232_s3 + $0x8b8] sm:$0xff] }
 0x177   :  { %2088 = vmatprep.subr.mxu0 %v66_v48  ;;  %4907 = vmatprep.subr.mxu1 %v2347_v49  ;;  %v426_v48 = vld [vmem:[%s19229_s1 + $0xc58] sm:$0xff] }
 0x178   :  { %2089 = vmatpush1.msra.mxu0 %v65_v50  ;;  %4908 = vmatpush1.msra.mxu1 %v2346_v51  ;;  %v2527_v49 = vld [vmem:[%s19232_s3 + $0x878] sm:$0xff]  ;;  %v11055_v50 = vld [vmem:[%s19231_s2] sm:$0xff] }
 0x179   :  { %2090 = vmatprep.subr.mxu0 %v48_v52  ;;  %4909 = vmatprep.subr.mxu1 %v2338_v53  ;;  %v790_v51 = vrot.slane %v11055_v50, %v11026_v38  ;;  %v425_v52 = vld [vmem:[%s19229_s1 + $0xc50] sm:$0xff] }
 0x17a   :  { %2091 = vmatpush1.msra.mxu0 %v47_v54  ;;  %4910 = vmatpush1.msra.mxu1 %v2337_v57  ;;  %v2526_v53 = vld [vmem:[%s19232_s3 + $0x870] sm:$0xff]  ;;  %v408_v54 = vld [vmem:[%s19229_s1 + $0xbc8] sm:$0xff] }
 0x17b   :  { %2092 = vmatprep.subr.mxu0 %v606_v58  ;;  %4911 = vmatprep.subr.mxu1 %v2329_v59  ;;  %v2518_v57 = vld [vmem:[%s19232_s3 + $0x830] sm:$0xff]  ;;  %v407_v58 = vld [vmem:[%s19229_s1 + $0xbc0] sm:$0xff]  ;;  %v2517_v59 = vld [vmem:[%s19232_s3 + $0x828] sm:$0xff] }
 0x17c   :  { %2093 = vmatpush2.msra.mxu0 %v605_v61  ;;  %4912 = vmatpush1.msra.mxu1 %v2328_v60  ;;  %v390_v61 = vld [vmem:[%s19229_s1 + $0xb38] sm:$0xff]  ;;  %v2509_v60 = vld [vmem:[%s19232_s3 + $0x7e8] sm:$0xff] }
 0x17d   :  { %2094 = vmatprep.subr.mxu0 %v588_v62  ;;  %4913 = vmatprep.subr.mxu1 %v2320_v63  ;;  %v1135_v62 = vadd.f32 %v10711_v40, %v790_v51  ;;  %v389_v63 = vld [vmem:[%s19229_s1 + $0xb30] sm:$0xff]  ;;  %v2500_v40 = vld [vmem:[%s19232_s3 + $0x7a0] sm:$0xff] }
 0x17e   :  { %2095 = vmatpush2.msra.mxu0 %v587_v0  ;;  %4914 = vmatpush1.msra.mxu1 %v2319_v2  ;;  %v2508_v0 = vld [vmem:[%s19232_s3 + $0x7e0] sm:$0xff]  ;;  %v372_v2 = vld [vmem:[%s19229_s1 + $0xaa8] sm:$0xff] }
 0x17f   :  { %2096 = vmatprep.subr.mxu0 %v570_v5  ;;  %4915 = vmatprep.subr.mxu1 %v2311_v8  ;;  %v371_v5 = vld [vmem:[%s19229_s1 + $0xaa0] sm:$0xff]  ;;  %v2499_v8 = vld [vmem:[%s19232_s3 + $0x798] sm:$0xff] }
 0x180   :  { %2097 = vmatpush2.msra.mxu0 %v569_v9  ;;  %4916 = vmatpush1.msra.mxu1 %v2310_v10  ;;  %v354_v9 = vld [vmem:[%s19229_s1 + $0xa18] sm:$0xff]  ;;  %v2436_v51 = vld [vmem:[%s19232_s3 + $0x5a0] sm:$0xff] }
 0x181   :  { %2098 = vmatprep.subr.mxu0 %v552_v55  ;;  %4917 = vmatprep.subr.mxu1 %v2302_v11  ;;  %v2491_v10 = vld [vmem:[%s19232_s3 + $0x758] sm:$0xff]  ;;  %v1206_v55 = vadd.f32 %v10691_v25, %v1135_v62  ;;  %v353_v11 = vld [vmem:[%s19229_s1 + $0xa10] sm:$0xff]  ;;  %v2625_v62 = vld [vmem:[%s19232_s3 + $0xb88] sm:$0xff] }
 0x182   :  { %2099 = vmatpush2.msra.mxu0 %v551_v13  ;;  %4918 = vmatpush1.msra.mxu1 %v2301_v14  ;;  %v2490_v13 = vld [vmem:[%s19232_s3 + $0x750] sm:$0xff]  ;;  %v336_v14 = vld [vmem:[%s19229_s1 + $0x988] sm:$0xff] }
 0x183   :  { %2100 = vmatprep.subr.mxu0 %v534_v15  ;;  %4919 = vmatprep.subr.mxu1 %v2293_v16  ;;  %v2482_v25 = vld [vmem:[%s19232_s3 + $0x710] sm:$0xff]  ;;  %v335_v15 = vld [vmem:[%s19229_s1 + $0x980] sm:$0xff]  ;;  %v2481_v16 = vld [vmem:[%s19232_s3 + $0x708] sm:$0xff]  ;;  %vm2205_vm3 = vcmp.gt.f32.partialorder %v1206_v55, 0.0 }
 0x184   :  { %2101 = vmatpush2.msra.mxu0 %v533_v17  ;;  %4920 = vmatpush1.msra.mxu1 %v2292_v20  ;;  %v2223_v17 = vmul.f32 0.2, %v1206_v55  ;;  %v2473_v20 = vld [vmem:[%s19232_s3 + $0x6c8] sm:$0xff] }
 0x185   :  { %2102 = vmatprep.subr.mxu0 %v516_v21  ;;  %4921 = vmatprep.subr.mxu1 %v2284_v7  ;;  %v2680_v21 = vld [vmem:[%s19232_s3 + $0xd40] sm:$0xff]  ;;  %v8563_v7 = vld [vmem:[%s19230_s0 + $0x8] sm:$0xff] }
 0x186   :  { %2103 = vmatpush2.msra.mxu0 %v515_v23  ;;  %4922 = vmatpush1.msra.mxu1 %v2283_v24  ;;  %v2472_v23 = vld [vmem:[%s19232_s3 + $0x6c0] sm:$0xff]  ;;  %v2679_v24 = vld [vmem:[%s19232_s3 + $0xd38] sm:$0xff] }
 0x187   :  { %2104 = vmatprep.subr.mxu0 %v498_v27  ;;  %4923 = vmatprep.subr.mxu1 %v2275_v28  ;;  %v8564_v27 = vld [vmem:[%s19230_s0] sm:$0xff] }
 0x188   :  { %2105 = vmatpush2.msra.mxu0 %v497_v4  ;;  %4924 = vmatpush1.msra.mxu1 %v2274_v30  ;;  %v2464_v28 = vld [vmem:[%s19232_s3 + $0x680] sm:$0xff]  ;;  %v11149_v4 = vsub.s32 5, %v10119_v56  ;;  %v2671_v30 = vld [vmem:[%s19232_s3 + $0xcf8] sm:$0xff] }
 0x189   :  { %2106 = vmatprep.subr.mxu0 %v480_v31  ;;  %4925 = vmatprep.subr.mxu1 %v2266_v33  ;;  %v2463_v31 = vld [vmem:[%s19232_s3 + $0x678] sm:$0xff]  ;;  %v11157_v33 = vsel %vm2205_vm3, %v1206_v55, %v2223_v17  ;;  %v2400_v55 = vld [vmem:[%s19232_s3 + $0x480] sm:$0xff] }
 0x18a   :  { %2107 = vmatpush2.msra.mxu0 %v479_v32  ;;  %4926 = vmatpush1.msra.mxu1 %v2265_v34  ;;  %v2670_v32 = vld [vmem:[%s19232_s3 + $0xcf0] sm:$0xff]  ;;  %v2455_v34 = vld [vmem:[%s19232_s3 + $0x638] sm:$0xff] }
 0x18b   :  { %2108 = vmatprep.subr.mxu0 %v462_v35  ;;  %4927 = vmatprep.subr.mxu1 %v2257_v37  ;;  %v2662_v35 = vld [vmem:[%s19232_s3 + $0xcb0] sm:$0xff] }
 0x18c   :  { %2109 = vmatpush2.msra.mxu0 %v461_v39  ;;  %4928 = vmatpush1.msra.mxu1 %v2256_v41  ;;  %v2454_v37 = vld [vmem:[%s19232_s3 + $0x630] sm:$0xff]  ;;  %v2661_v39 = vld [vmem:[%s19232_s3 + $0xca8] sm:$0xff] }
 0x18d   :  { %2110 = vmatprep.subr.mxu0 %v444_v42  ;;  %4929 = vmatprep.subr.mxu1 %v2536_v43  ;;  %v2446_v41 = vld [vmem:[%s19232_s3 + $0x5f0] sm:$0xff]  ;;  %v798_v42 = vrot.slane %v11055_v50, %v11149_v4  ;;  %v2653_v43 = vld [vmem:[%s19232_s3 + $0xc68] sm:$0xff] }
 0x18e   :  { %2111 = vmatpush2.msra.mxu0 %v443_v45  ;;  %4930 = vmatpush2.msra.mxu1 %v2535_v47  ;;  %v2445_v45 = vld [vmem:[%s19232_s3 + $0x5e8] sm:$0xff]  ;;  %v2652_v47 = vld [vmem:[%s19232_s3 + $0xc60] sm:$0xff] }
 0x18f   :  { %2112 = vmatprep.subr.mxu0 %v426_v48  ;;  %4931 = vmatprep.subr.mxu1 %v2527_v49  ;;  %v2437_v48 = vld [vmem:[%s19232_s3 + $0x5a8] sm:$0xff]  ;;  %v2644_v49 = vld [vmem:[%s19232_s3 + $0xc20] sm:$0xff] }
 0x190   :  { %2113 = vmatpush2.msra.mxu0 %v425_v52  ;;  %4932 = vmatpush2.msra.mxu1 %v2526_v53  ;;  %v2643_v52 = vld [vmem:[%s19232_s3 + $0xc18] sm:$0xff]  ;;  %v2428_v53 = vld [vmem:[%s19232_s3 + $0x560] sm:$0xff] }
 0x191   :  { %2114 = vmatprep.subr.mxu0 %v408_v54  ;;  %4933 = vmatprep.subr.mxu1 %v2518_v57  ;;  %v1277_v54 = vadd.f32 %v10841_v22, %v798_v42  ;;  %v2635_v57 = vld [vmem:[%s19232_s3 + $0xbd8] sm:$0xff] }
 0x192   :  { %2115 = vmatpush2.msra.mxu0 %v407_v58  ;;  %4934 = vmatpush2.msra.mxu1 %v2517_v59  ;;  %v2427_v58 = vld [vmem:[%s19232_s3 + $0x558] sm:$0xff]  ;;  %v2634_v59 = vld [vmem:[%s19232_s3 + $0xbd0] sm:$0xff] }
 0x193   :  { %2116 = vmatprep.subr.mxu0 %v390_v61  ;;  %4935 = vmatprep.subr.mxu1 %v2509_v60  ;;  %v2419_v22 = vld [vmem:[%s19232_s3 + $0x518] sm:$0xff]  ;;  %v2626_v61 = vld [vmem:[%s19232_s3 + $0xb90] sm:$0xff] }
 0x194   :  { %2117 = vmatpush2.msra.mxu0 %v389_v63  ;;  %4936 = vmatpush2.msra.mxu1 %v2508_v0  ;;  %v2418_v60 = vld [vmem:[%s19232_s3 + $0x510] sm:$0xff]  ;;  %v1348_v0 = vadd.f32 %v10829_v18, %v1277_v54  ;;  %v2401_v18 = vld [vmem:[%s19232_s3 + $0x488] sm:$0xff]  ;;  %v2923_v54 = vld [vmem:[%s19232_s3 + $0x14d8] sm:$0xff] }
 0x195   :  { %2118 = vmatprep.subr.mxu0 %v372_v2  ;;  %4937 = vmatprep.subr.mxu1 %v2500_v40  ;;  %v2410_v63 = vld [vmem:[%s19232_s3 + $0x4d0] sm:$0xff]  ;;  %v2617_v2 = vld [vmem:[%s19232_s3 + $0xb48] sm:$0xff] }
 0x196   :  { %2119 = vmatpush2.msra.mxu0 %v371_v5  ;;  %4938 = vmatpush2.msra.mxu1 %v2499_v8  ;;  %v2409_v40 = vld [vmem:[%s19232_s3 + $0x4c8] sm:$0xff]  ;;  %v2220_v5 = vmul.f32 0.2, %v10210_v26  ;;  %v2616_v8 = vld [vmem:[%s19232_s3 + $0xb40] sm:$0xff]  ;;  %vm2207_vm5 = vcmp.gt.f32.partialorder %v1348_v0, 0.0 }
 0x197   :  { %2120 = vmatprep.subr.mxu0 %v354_v9  ;;  %4939 = vmatprep.subr.mxu1 %v2491_v10  ;;  %v11246_v9 = vld [vmem:[%s19231_s2 + $0x8] sm:$0xff]  ;;  %v2608_v10 = vld [vmem:[%s19232_s3 + $0xb00] sm:$0xff] }
 0x198   :  { %2121 = vmatpush2.msra.mxu0 %v353_v11  ;;  %4940 = vmatpush2.msra.mxu1 %v2490_v13  ;;  %v2607_v11 = vld [vmem:[%s19232_s3 + $0xaf8] sm:$0xff]  ;;  %v2225_v13 = vmul.f32 0.2, %v1348_v0  ;;  %v11271_v17 = vsel %vm2202_vm4, %v10210_v26, %v2220_v5  ;;  %v2896_v5 = vld [vmem:[%s19232_s3 + $0x1400] sm:$0xff] }
 0x199   :  { %2122 = vmatprep.subr.mxu0 %v336_v14  ;;  %4941 = vmatprep.subr.mxu1 %v2482_v25  ;;  %v2599_v14 = vld [vmem:[%s19232_s3 + $0xab8] sm:$0xff]  ;;  %v2968_v25 = vld [vmem:[%s19232_s3 + $0x1640] sm:$0xff] }
 0x19a   :  { %2123 = vmatpush2.msra.mxu0 %v335_v15  ;;  %2124 = vmatprep.mubr.f32.mxu0 %v8563_v7  ;;  %v810_v15 = vrot.slane %v11246_v9, %v10146_v1  ;;  %v2590_v7 = vld [vmem:[%s19232_s3 + $0xa70] sm:$0xff]  ;;  %v2959_v26 = vld [vmem:[%s19232_s3 + $0x15f8] sm:$0xff] }
 0x19b   :  { %4942 = vmatpush2.msra.mxu1 %v2481_v16  ;;  %2125 = vmatmul.mubr.f32.vlgmr.msra.gmra.mxu0 %v8564_v27  ;;  %v11266_v16 = vpop.f32.mrf.mxu0 }
 0x19c   :  { %4943 = vmatprep.subr.mxu1 %v2473_v20  ;;  %4968 = vmatprep.subr.mxu0 %v2680_v21  ;;  %v2598_v20 = vld [vmem:[%s19232_s3 + $0xab0] sm:$0xff]  ;;  %v2967_v21 = vld [vmem:[%s19232_s3 + $0x1638] sm:$0xff] }
 0x19d   :  { %4944 = vmatpush2.msra.mxu1 %v2472_v23  ;;  %4969 = vmatpush1.msra.mxu0 %v2679_v24  ;;  %v11283_v23 = vpop.f32.mrf.mxu1  ;;  %v2589_v24 = vld [vmem:[%s19232_s3 + $0xa68] sm:$0xff] }
 0x19e   :  { %5032 = vmatprep.mubr.f32.mxu0 %v11157_v33  ;;  %4945 = vmatprep.subr.mxu1 %v2464_v28  ;;  %v11292_v28 = vsel %vm2207_vm5, %v1348_v0, %v2225_v13  ;;  %v2823_v0 = vld [vmem:[%s19232_s3 + $0x11b8] sm:$0xff]  ;;  %v818_v13 = vrot.slane %v11246_v9, %v10267_v46 }
 0x19f   :  { %4970 = vmatprep.subr.mxu0 %v2671_v30  ;;  %4946 = vmatpush2.msra.mxu1 %v2463_v31  ;;  %v2958_v30 = vld [vmem:[%s19232_s3 + $0x15f0] sm:$0xff]  ;;  %v2581_v31 = vld [vmem:[%s19232_s3 + $0xa28] sm:$0xff] }
 0x1a0   :  { %4971 = vmatpush1.msra.mxu0 %v2670_v32  ;;  %4947 = vmatprep.subr.mxu1 %v2455_v34  ;;  %v1629_v34 = vpop.f32.mrf.mxu1 }
 0x1a1   :  { %4972 = vmatprep.subr.mxu0 %v2662_v35  ;;  %4948 = vmatpush2.msra.mxu1 %v2454_v37  ;;  %v2950_v35 = vld [vmem:[%s19232_s3 + $0x15b0] sm:$0xff]  ;;  %v2580_v37 = vld [vmem:[%s19232_s3 + $0xa20] sm:$0xff] }
 0x1a2   :  { %4973 = vmatpush1.msra.mxu0 %v2661_v39  ;;  %4949 = vmatprep.subr.mxu1 %v2446_v41  ;;  %v2949_v39 = vld [vmem:[%s19232_s3 + $0x15a8] sm:$0xff]  ;;  %v2572_v41 = vld [vmem:[%s19232_s3 + $0x9e0] sm:$0xff] }
 0x1a3   :  { %4974 = vmatprep.subr.mxu0 %v2653_v43  ;;  %4950 = vmatpush2.msra.mxu1 %v2445_v45  ;;  %v2941_v43 = vld [vmem:[%s19232_s3 + $0x1568] sm:$0xff]  ;;  %v2571_v45 = vld [vmem:[%s19232_s3 + $0x9d8] sm:$0xff] }
 0x1a4   :  { %4975 = vmatpush1.msra.mxu0 %v2652_v47  ;;  %4951 = vmatprep.subr.mxu1 %v2437_v48  ;;  %v2940_v47 = vld [vmem:[%s19232_s3 + $0x1560] sm:$0xff]  ;;  %v2563_v48 = vld [vmem:[%s19232_s3 + $0x998] sm:$0xff] }
 0x1a5   :  { %4976 = vmatprep.subr.mxu0 %v2644_v49  ;;  %4952 = vmatpush2.msra.mxu1 %v2436_v51  ;;  %v2932_v49 = vld [vmem:[%s19232_s3 + $0x1520] sm:$0xff]  ;;  %v2562_v51 = vld [vmem:[%s19232_s3 + $0x990] sm:$0xff] }
 0x1a6   :  { %4977 = vmatpush1.msra.mxu0 %v2643_v52  ;;  %4953 = vmatprep.subr.mxu1 %v2428_v53  ;;  %v2931_v52 = vld [vmem:[%s19232_s3 + $0x1518] sm:$0xff]  ;;  %v2554_v53 = vld [vmem:[%s19232_s3 + $0x950] sm:$0xff] }
 0x1a7   :  { %4978 = vmatprep.subr.mxu0 %v2635_v57  ;;  %4954 = vmatpush2.msra.mxu1 %v2427_v58  ;;  %v2553_v57 = vld [vmem:[%s19232_s3 + $0x948] sm:$0xff]  ;;  %v2922_v58 = vld [vmem:[%s19232_s3 + $0x14d0] sm:$0xff] }
 0x1a8   :  { %4979 = vmatpush1.msra.mxu0 %v2634_v59  ;;  %4955 = vmatprep.subr.mxu1 %v2419_v22  ;;  %v2545_v59 = vld [vmem:[%s19232_s3 + $0x908] sm:$0xff]  ;;  %v2914_v22 = vld [vmem:[%s19232_s3 + $0x1490] sm:$0xff] }
 0x1a9   :  { %4980 = vmatprep.subr.mxu0 %v2626_v61  ;;  %4956 = vmatpush2.msra.mxu1 %v2418_v60  ;;  %v2544_v61 = vld [vmem:[%s19232_s3 + $0x900] sm:$0xff]  ;;  %v2913_v60 = vld [vmem:[%s19232_s3 + $0x1488] sm:$0xff] }
 0x1aa   :  { %4981 = vmatpush1.msra.mxu0 %v2625_v62  ;;  %4957 = vmatprep.subr.mxu1 %v2410_v63  ;;  %v2824_v62 = vld [vmem:[%s19232_s3 + $0x11c0] sm:$0xff]  ;;  %v2905_v63 = vld [vmem:[%s19232_s3 + $0x1448] sm:$0xff] }
 0x1ab   :  { %4982 = vmatprep.subr.mxu0 %v2617_v2  ;;  %4958 = vmatpush2.msra.mxu1 %v2409_v40  ;;  %v2904_v2 = vld [vmem:[%s19232_s3 + $0x1440] sm:$0xff]  ;;  %v2815_v40 = vld [vmem:[%s19232_s3 + $0x1178] sm:$0xff] }
 0x1ac   :  { %4983 = vmatpush1.msra.mxu0 %v2616_v8  ;;  %4959 = vmatprep.subr.mxu1 %v2401_v18  ;;  %v2814_v8 = vld [vmem:[%s19232_s3 + $0x1170] sm:$0xff]  ;;  %v2895_v18 = vld [vmem:[%s19232_s3 + $0x13f8] sm:$0xff] }
 0x1ad   :  { %4984 = vmatprep.subr.mxu0 %v2608_v10  ;;  %4960 = vmatpush2.msra.mxu1 %v2400_v55  ;;  %v2806_v10 = vld [vmem:[%s19232_s3 + $0x1130] sm:$0xff]  ;;  %v2887_v55 = vld [vmem:[%s19232_s3 + $0x13b8] sm:$0xff] }
 0x1ae   :  { %4985 = vmatpush1.msra.mxu0 %v2607_v11  ;;  %4962 = vmatmul.mubr.f32.vlgmr.msra.gmra.mxu1 %v11271_v17  ;;  %v2805_v11 = vld [vmem:[%s19232_s3 + $0x1128] sm:$0xff] }
 0x1af   :  { %4986 = vmatprep.subr.mxu0 %v2599_v14  ;;  %5039 = vmatprep.subr.mxu1 %v2968_v25  ;;  %v1558_v27 = vpop.f32.mrf.mxu0  ;;  %v11395_v14 = vpop.f32.mrf.mxu1  ;;  %v2886_v25 = vld [vmem:[%s19232_s3 + $0x13b0] sm:$0xff] }
 0x1b0   :  { %4987 = vmatpush1.msra.mxu0 %v2598_v20  ;;  %5040 = vmatpush1.msra.mxu1 %v2967_v21  ;;  %v1559_v32 = vadd.f32 %v1558_v27, %v810_v15  ;;  %v2797_v15 = vld [vmem:[%s19232_s3 + $0x10e8] sm:$0xff]  ;;  %v2878_v20 = vld [vmem:[%s19232_s3 + $0x1370] sm:$0xff]  ;;  %v2796_v21 = vld [vmem:[%s19232_s3 + $0x10e0] sm:$0xff] }
 0x1b1   :  { %5103 = vmatprep.mubr.f32.mxu1 %v11292_v28  ;;  %4988 = vmatprep.subr.mxu0 %v2590_v7  ;;  %v11409_v7 = vpop.f32.mrf.mxu0 }
 0x1b2   :  { %5041 = vmatprep.subr.mxu1 %v2959_v26  ;;  %4989 = vmatpush1.msra.mxu0 %v2589_v24  ;;  %v11313_v42 = vadd.f32 %v1629_v34, %v1559_v32  ;;  %v2877_v26 = vld [vmem:[%s19232_s3 + $0x1368] sm:$0xff]  ;;  %v2788_v24 = vld [vmem:[%s19232_s3 + $0x10a0] sm:$0xff] }
 0x1b3   :  { %5042 = vmatpush1.msra.mxu1 %v2958_v30  ;;  %4990 = vmatprep.subr.mxu0 %v2581_v31  ;;  %v2869_v30 = vld [vmem:[%s19232_s3 + $0x1328] sm:$0xff]  ;;  %v2787_v31 = vld [vmem:[%s19232_s3 + $0x1098] sm:$0xff]  ;;  %v2868_v34 = vld [vmem:[%s19232_s3 + $0x1320] sm:$0xff] }
 0x1b4   :  { %5043 = vmatprep.subr.mxu1 %v2950_v35  ;;  %4991 = vmatpush1.msra.mxu0 %v2580_v37  ;;  %v2779_v35 = vld [vmem:[%s19232_s3 + $0x1058] sm:$0xff]  ;;  %vm2210_vm12 = vcmp.gt.f32.partialorder %v11313_v42, 0.0 }
 0x1b5   :  { %5044 = vmatpush1.msra.mxu1 %v2949_v39  ;;  %4992 = vmatprep.subr.mxu0 %v2572_v41  ;;  %v2860_v39 = vld [vmem:[%s19232_s3 + $0x12e0] sm:$0xff]  ;;  %v2778_v41 = vld [vmem:[%s19232_s3 + $0x1050] sm:$0xff] }
 0x1b6   :  { %5045 = vmatprep.subr.mxu1 %v2941_v43  ;;  %4993 = vmatpush1.msra.mxu0 %v2571_v45  ;;  %v2859_v45 = vld [vmem:[%s19232_s3 + $0x12d8] sm:$0xff] }
 0x1b7   :  { %5046 = vmatpush1.msra.mxu1 %v2940_v47  ;;  %4994 = vmatprep.subr.mxu0 %v2563_v48  ;;  %v2770_v47 = vld [vmem:[%s19232_s3 + $0x1010] sm:$0xff]  ;;  %v2851_v48 = vld [vmem:[%s19232_s3 + $0x1298] sm:$0xff] }
 0x1b8   :  { %5047 = vmatprep.subr.mxu1 %v2932_v49  ;;  %4995 = vmatpush1.msra.mxu0 %v2562_v51  ;;  %v2769_v49 = vld [vmem:[%s19232_s3 + $0x1008] sm:$0xff]  ;;  %v2850_v51 = vld [vmem:[%s19232_s3 + $0x1290] sm:$0xff] }
 0x1b9   :  { %5048 = vmatpush1.msra.mxu1 %v2931_v52  ;;  %4996 = vmatprep.subr.mxu0 %v2554_v53  ;;  %v2761_v52 = vld [vmem:[%s19232_s3 + $0xfc8] sm:$0xff]  ;;  %v2842_v53 = vld [vmem:[%s19232_s3 + $0x1250] sm:$0xff] }
 0x1ba   :  { %5049 = vmatprep.subr.mxu1 %v2923_v54  ;;  %4997 = vmatpush1.msra.mxu0 %v2553_v57  ;;  %v2760_v54 = vld [vmem:[%s19232_s3 + $0xfc0] sm:$0xff]  ;;  %v2841_v57 = vld [vmem:[%s19232_s3 + $0x1248] sm:$0xff] }
 0x1bb   :  { %5050 = vmatpush1.msra.mxu1 %v2922_v58  ;;  %4998 = vmatprep.subr.mxu0 %v2545_v59  ;;  %v2752_v58 = vld [vmem:[%s19232_s3 + $0xf80] sm:$0xff]  ;;  %v11468_v59 = vsub.s32 7, %v10119_v56  ;;  %v2743_v56 = vld [vmem:[%s19232_s3 + $0xf38] sm:$0xff] }
 0x1bc   :  { %5051 = vmatprep.subr.mxu1 %v2914_v22  ;;  %4999 = vmatpush1.msra.mxu0 %v2544_v61  ;;  %v2833_v22 = vld [vmem:[%s19232_s3 + $0x1208] sm:$0xff]  ;;  %v2751_v61 = vld [vmem:[%s19232_s3 + $0xf78] sm:$0xff] }
 0x1bd   :  { %5052 = vmatpush1.msra.mxu1 %v2913_v60  ;;  %5000 = vmatprep.subr.mxu0 %v2824_v62  ;;  %v2832_v60 = vld [vmem:[%s19232_s3 + $0x1200] sm:$0xff] }
 0x1be   :  { %5053 = vmatprep.subr.mxu1 %v2905_v63  ;;  %5001 = vmatpush2.msra.mxu0 %v2823_v0  ;;  %v3112_v62 = vld [vmem:[%s19232_s3 + $0x1ac0] sm:$0xff]  ;;  %v2742_v63 = vld [vmem:[%s19232_s3 + $0xf30] sm:$0xff]  ;;  %v3111_v0 = vld [vmem:[%s19232_s3 + $0x1ab8] sm:$0xff] }
 0x1bf   :  { %5054 = vmatpush1.msra.mxu1 %v2904_v2  ;;  %5002 = vmatprep.subr.mxu0 %v2815_v40  ;;  %v2734_v2 = vld [vmem:[%s19232_s3 + $0xef0] sm:$0xff]  ;;  %v806_v40 = vrot.slane %v11055_v50, %v11468_v59  ;;  %v2725_v50 = vld [vmem:[%s19232_s3 + $0xea8] sm:$0xff] }
 0x1c0   :  { %5055 = vmatprep.subr.mxu1 %v2896_v5  ;;  %5003 = vmatpush2.msra.mxu0 %v2814_v8  ;;  %v3103_v5 = vld [vmem:[%s19232_s3 + $0x1a78] sm:$0xff]  ;;  %v2733_v8 = vld [vmem:[%s19232_s3 + $0xee8] sm:$0xff] }
 0x1c1   :  { %5056 = vmatpush1.msra.mxu1 %v2895_v18  ;;  %5004 = vmatprep.subr.mxu0 %v2806_v10  ;;  %v3102_v18 = vld [vmem:[%s19232_s3 + $0x1a70] sm:$0xff] }
 0x1c2   :  { %5057 = vmatprep.subr.mxu1 %v2887_v55  ;;  %5005 = vmatpush2.msra.mxu0 %v2805_v11  ;;  %v1700_v27 = vpop.f32.mrf.mxu1  ;;  %v3094_v10 = vld [vmem:[%s19232_s3 + $0x1a30] sm:$0xff]  ;;  %v2724_v55 = vld [vmem:[%s19232_s3 + $0xea0] sm:$0xff]  ;;  %v3093_v11 = vld [vmem:[%s19232_s3 + $0x1a28] sm:$0xff] }
 0x1c3   :  { %5058 = vmatpush1.msra.mxu1 %v2886_v25  ;;  %5006 = vmatprep.subr.mxu0 %v2797_v15  ;;  %v1701_v32 = vadd.f32 %v1700_v27, %v818_v13  ;;  %v1771_v37 = vpop.f32.mrf.mxu0  ;;  %v2716_v13 = vld [vmem:[%s19232_s3 + $0xe60] sm:$0xff]  ;;  %v1419_v25 = vadd.f32 %v11283_v23, %v806_v40  ;;  %v3085_v15 = vld [vmem:[%s19232_s3 + $0x19e8] sm:$0xff]  ;;  %v2707_v23 = vld [vmem:[%s19232_s3 + $0xe18] sm:$0xff] }
 0x1c4   :  { %5059 = vmatprep.subr.mxu1 %v2878_v20  ;;  %5007 = vmatpush2.msra.mxu0 %v2796_v21  ;;  %v2715_v20 = vld [vmem:[%s19232_s3 + $0xe58] sm:$0xff]  ;;  %v3084_v21 = vld [vmem:[%s19232_s3 + $0x19e0] sm:$0xff]  ;;  %v3021_v40 = vld [vmem:[%s19232_s3 + $0x17e8] sm:$0xff] }
 0x1c5   :  { %5060 = vmatpush1.msra.mxu1 %v2877_v26  ;;  %5008 = vmatprep.subr.mxu0 %v2788_v24  ;;  %v11435_v43 = vadd.f32 %v1771_v37, %v1701_v32  ;;  %v3076_v26 = vld [vmem:[%s19232_s3 + $0x19a0] sm:$0xff]  ;;  %v2706_v24 = vld [vmem:[%s19232_s3 + $0xe10] sm:$0xff]  ;;  %v3075_v27 = vld [vmem:[%s19232_s3 + $0x1998] sm:$0xff] }
 0x1c6   :  { %5061 = vmatprep.subr.mxu1 %v2869_v30  ;;  %5009 = vmatpush2.msra.mxu0 %v2787_v31  ;;  %v2698_v30 = vld [vmem:[%s19232_s3 + $0xdd0] sm:$0xff]  ;;  %v1490_v31 = vadd.f32 %v11266_v16, %v1419_v25  ;;  %v3067_v32 = vld [vmem:[%s19232_s3 + $0x1958] sm:$0xff]  ;;  %v2689_v16 = vld [vmem:[%s19232_s3 + $0xd88] sm:$0xff] }
 0x1c7   :  { %5062 = vmatpush1.msra.mxu1 %v2868_v34  ;;  %5010 = vmatprep.subr.mxu0 %v2779_v35  ;;  %v2697_v34 = vld [vmem:[%s19232_s3 + $0xdc8] sm:$0xff]  ;;  %v2222_v35 = vmul.f32 0.2, %v10332_v12  ;;  %v3066_v37 = vld [vmem:[%s19232_s3 + $0x1950] sm:$0xff]  ;;  %v3003_v25 = vld [vmem:[%s19232_s3 + $0x1758] sm:$0xff]  ;;  %vm2212_vm14 = vcmp.gt.f32.partialorder %v11435_v43, 0.0 }
 0x1c8   :  { %5063 = vmatprep.subr.mxu1 %v2860_v39  ;;  %5011 = vmatpush2.msra.mxu0 %v2778_v41  ;;  %v3058_v39 = vld [vmem:[%s19232_s3 + $0x1910] sm:$0xff]  ;;  %v2688_v41 = vld [vmem:[%s19232_s3 + $0xd80] sm:$0xff]  ;;  %vm2209_vm7 = vcmp.gt.f32.partialorder %v1490_v31, 0.0 }
 0x1c9   :  { %5064 = vmatpush1.msra.mxu1 %v2859_v45  ;;  %5012 = vmatprep.subr.mxu0 %v2770_v47  ;;  %v3057_v45 = vld [vmem:[%s19232_s3 + $0x1908] sm:$0xff]  ;;  %v2227_v47 = vmul.f32 0.2, %v1490_v31 }
 0x1ca   :  { %5065 = vmatprep.subr.mxu1 %v2851_v48  ;;  %5013 = vmatpush2.msra.mxu0 %v2769_v49  ;;  %v3049_v48 = vld [vmem:[%s19232_s3 + $0x18c8] sm:$0xff]  ;;  %v3256_v49 = vld [vmem:[%s19232_s3 + $0x1f40] sm:$0xff] }
 0x1cb   :  { %5066 = vmatpush1.msra.mxu1 %v2850_v51  ;;  %5014 = vmatprep.subr.mxu0 %v2761_v52  ;;  %v11576_v51 = vsel %vm2204_vm6, %v10332_v12, %v2222_v35  ;;  %v3048_v52 = vld [vmem:[%s19232_s3 + $0x18c0] sm:$0xff]  ;;  %v3247_v12 = vld [vmem:[%s19232_s3 + $0x1ef8] sm:$0xff] }
 0x1cc   :  { %5067 = vmatprep.subr.mxu1 %v2842_v53  ;;  %5015 = vmatpush2.msra.mxu0 %v2760_v54  ;;  %v3255_v53 = vld [vmem:[%s19232_s3 + $0x1f38] sm:$0xff]  ;;  %v3040_v54 = vld [vmem:[%s19232_s3 + $0x1880] sm:$0xff] }
 0x1cd   :  { %5068 = vmatpush1.msra.mxu1 %v2841_v57  ;;  %5016 = vmatprep.subr.mxu0 %v2752_v58  ;;  %v3039_v57 = vld [vmem:[%s19232_s3 + $0x1878] sm:$0xff]  ;;  %v11594_v58 = vsel %vm2209_vm7, %v1490_v31, %v2227_v47  ;;  %v2224_v31 = vmul.f32 0.2, %v10746_v44  ;;  %v2976_v35 = vld [vmem:[%s19232_s3 + $0x1680] sm:$0xff]  ;;  %v3174_v47 = vld [vmem:[%s19232_s3 + $0x1cb0] sm:$0xff] }
 0x1ce   :  { %5069 = vmatprep.subr.mxu1 %v2833_v22  ;;  %5017 = vmatpush2.msra.mxu0 %v2751_v61  ;;  %v3246_v22 = vld [vmem:[%s19232_s3 + $0x1ef0] sm:$0xff]  ;;  %v3031_v61 = vld [vmem:[%s19232_s3 + $0x1838] sm:$0xff] }
 0x1cf   :  { %5070 = vmatpush1.msra.mxu1 %v2832_v60  ;;  %5018 = vmatprep.subr.mxu0 %v2743_v56  ;;  %v3238_v60 = vld [vmem:[%s19232_s3 + $0x1eb0] sm:$0xff] }
 0x1d0   :  { %5071 = vmatprep.subr.mxu1 %v3112_v62  ;;  %5019 = vmatpush2.msra.mxu0 %v2742_v63  ;;  %v3030_v56 = vld [vmem:[%s19232_s3 + $0x1830] sm:$0xff]  ;;  %v3237_v62 = vld [vmem:[%s19232_s3 + $0x1ea8] sm:$0xff] }
 0x1d1   :  { %5072 = vmatpush2.msra.mxu1 %v3111_v0  ;;  %5020 = vmatprep.subr.mxu0 %v2734_v2  ;;  %v3022_v63 = vld [vmem:[%s19232_s3 + $0x17f0] sm:$0xff]  ;;  %v814_v0 = vrot.slane %v11246_v9, %v10709_v6  ;;  %v3229_v2 = vld [vmem:[%s19232_s3 + $0x1e68] sm:$0xff] }
 0x1d2   :  { %5073 = vmatprep.subr.mxu1 %v3103_v5  ;;  %5021 = vmatpush2.msra.mxu0 %v2733_v8  ;;  %v3228_v5 = vld [vmem:[%s19232_s3 + $0x1e60] sm:$0xff]  ;;  %v3013_v8 = vld [vmem:[%s19232_s3 + $0x17a8] sm:$0xff] }
 0x1d3   :  { %5074 = vmatpush2.msra.mxu1 %v3102_v18  ;;  %5022 = vmatprep.subr.mxu0 %v2725_v50  ;;  %v3220_v18 = vld [vmem:[%s19232_s3 + $0x1e20] sm:$0xff] }
 0x1d4   :  { %5075 = vmatprep.subr.mxu1 %v3094_v10  ;;  %5023 = vmatpush2.msra.mxu0 %v2724_v55  ;;  %v3012_v50 = vld [vmem:[%s19232_s3 + $0x17a0] sm:$0xff]  ;;  %v3219_v10 = vld [vmem:[%s19232_s3 + $0x1e18] sm:$0xff] }
 0x1d5   :  { %5076 = vmatpush2.msra.mxu1 %v3093_v11  ;;  %5024 = vmatprep.subr.mxu0 %v2716_v13  ;;  %v3004_v55 = vld [vmem:[%s19232_s3 + $0x1760] sm:$0xff]  ;;  %v1561_v11 = vadd.f32 %v11409_v7, %v814_v0  ;;  %v3211_v13 = vld [vmem:[%s19232_s3 + $0x1dd8] sm:$0xff] }
 0x1d6   :  { %5077 = vmatprep.subr.mxu1 %v3085_v15  ;;  %5025 = vmatpush2.msra.mxu0 %v2715_v20  ;;  %v3210_v15 = vld [vmem:[%s19232_s3 + $0x1dd0] sm:$0xff]  ;;  %v2995_v7 = vld [vmem:[%s19232_s3 + $0x1718] sm:$0xff] }
 0x1d7   :  { %5078 = vmatpush2.msra.mxu1 %v3084_v21  ;;  %5026 = vmatprep.subr.mxu0 %v2707_v23  ;;  %v3202_v20 = vld [vmem:[%s19232_s3 + $0x1d90] sm:$0xff]  ;;  %v3201_v23 = vld [vmem:[%s19232_s3 + $0x1d88] sm:$0xff]  ;;  %v3139_v0 = vld [vmem:[%s19232_s3 + $0x1b98] sm:$0xff] }
 0x1d8   :  { %5079 = vmatprep.subr.mxu1 %v3076_v26  ;;  %5027 = vmatpush2.msra.mxu0 %v2706_v24  ;;  %v2994_v21 = vld [vmem:[%s19232_s3 + $0x1710] sm:$0xff]  ;;  %v1632_v24 = vadd.f32 %v11395_v14, %v1561_v11  ;;  %v2977_v14 = vld [vmem:[%s19232_s3 + $0x1688] sm:$0xff] }
 0x1d9   :  { %5080 = vmatpush2.msra.mxu1 %v3075_v27  ;;  %5028 = vmatprep.subr.mxu0 %v2698_v30  ;;  %v2986_v26 = vld [vmem:[%s19232_s3 + $0x16d0] sm:$0xff]  ;;  %v3193_v27 = vld [vmem:[%s19232_s3 + $0x1d48] sm:$0xff] }
 0x1da   :  { %5081 = vmatprep.subr.mxu1 %v3067_v32  ;;  %5029 = vmatpush2.msra.mxu0 %v2697_v34  ;;  %v2985_v30 = vld [vmem:[%s19232_s3 + $0x16c8] sm:$0xff]  ;;  %v3192_v32 = vld [vmem:[%s19232_s3 + $0x1d40] sm:$0xff]  ;;  %vm2211_vm9 = vcmp.gt.f32.partialorder %v1632_v24, 0.0  ;;  %v3490_v11 = vld [vmem:[%s19232_s3 + $0x2690] sm:$0xff] }
 0x1db   :  { %5082 = vmatpush2.msra.mxu1 %v3066_v37  ;;  %5030 = vmatprep.subr.mxu0 %v2689_v16  ;;  %v3184_v34 = vld [vmem:[%s19232_s3 + $0x1d00] sm:$0xff]  ;;  %v3183_v37 = vld [vmem:[%s19232_s3 + $0x1cf8] sm:$0xff]  ;;  %v2229_v16 = vmul.f32 0.2, %v1632_v24 }
 0x1dc   :  { %5083 = vmatprep.subr.mxu1 %v3058_v39  ;;  %5031 = vmatpush2.msra.mxu0 %v2688_v41  ;;  %v3175_v39 = vld [vmem:[%s19232_s3 + $0x1cb8] sm:$0xff]  ;;  %v3544_v41 = vld [vmem:[%s19232_s3 + $0x2840] sm:$0xff] }
 0x1dd   :  { %5084 = vmatpush2.msra.mxu1 %v3057_v45  ;;  %5033 = vmatmul.mubr.f32.vlgmr.msra.gmra.mxu0 %v11576_v51  ;;  %v11699_v45 = vsel %vm2206_vm8, %v10746_v44, %v2224_v31  ;;  %v3535_v44 = vld [vmem:[%s19232_s3 + $0x27f8] sm:$0xff] }
 0x1de   :  { %5085 = vmatprep.subr.mxu1 %v3049_v48  ;;  %5110 = vmatprep.subr.mxu0 %v3256_v49  ;;  %v3543_v48 = vld [vmem:[%s19232_s3 + $0x2838] sm:$0xff]  ;;  %v3166_v49 = vld [vmem:[%s19232_s3 + $0x1c70] sm:$0xff] }
 0x1df   :  { %5086 = vmatpush2.msra.mxu1 %v3048_v52  ;;  %5111 = vmatpush1.msra.mxu0 %v3255_v53  ;;  %v3165_v52 = vld [vmem:[%s19232_s3 + $0x1c68] sm:$0xff]  ;;  %v11717_v53 = vsel %vm2211_vm9, %v1632_v24, %v2229_v16  ;;  %v3390_v24 = vld [vmem:[%s19232_s3 + $0x2370] sm:$0xff]  ;;  %v3463_v31 = vld [vmem:[%s19232_s3 + $0x25b8] sm:$0xff] }
 0x1e0   :  { %5174 = vmatprep.mubr.f32.mxu0 %v11594_v58  ;;  %5087 = vmatprep.subr.mxu1 %v3040_v54  ;;  %v3534_v54 = vld [vmem:[%s19232_s3 + $0x27f0] sm:$0xff] }
 0x1e1   :  { %5112 = vmatprep.subr.mxu0 %v3247_v12  ;;  %5088 = vmatpush2.msra.mxu1 %v3039_v57  ;;  %v3157_v12 = vld [vmem:[%s19232_s3 + $0x1c28] sm:$0xff]  ;;  %v3526_v57 = vld [vmem:[%s19232_s3 + $0x27b0] sm:$0xff] }
 0x1e2   :  { %5113 = vmatpush1.msra.mxu0 %v3246_v22  ;;  %5089 = vmatprep.subr.mxu1 %v3031_v61  ;;  %v3156_v22 = vld [vmem:[%s19232_s3 + $0x1c20] sm:$0xff]  ;;  %v3525_v61 = vld [vmem:[%s19232_s3 + $0x27a8] sm:$0xff]  ;;  %v3454_v16 = vld [vmem:[%s19232_s3 + $0x2570] sm:$0xff] }
 0x1e3   :  { %5114 = vmatprep.subr.mxu0 %v3238_v60  ;;  %5090 = vmatpush2.msra.mxu1 %v3030_v56  ;;  %v3148_v60 = vld [vmem:[%s19232_s3 + $0x1be0] sm:$0xff]  ;;  %v3517_v56 = vld [vmem:[%s19232_s3 + $0x2768] sm:$0xff] }
 0x1e4   :  { %5115 = vmatpush1.msra.mxu0 %v3237_v62  ;;  %5091 = vmatprep.subr.mxu1 %v3022_v63  ;;  %v3147_v62 = vld [vmem:[%s19232_s3 + $0x1bd8] sm:$0xff]  ;;  %v3516_v63 = vld [vmem:[%s19232_s3 + $0x2760] sm:$0xff] }
 0x1e5   :  { %5116 = vmatprep.subr.mxu0 %v3229_v2  ;;  %5092 = vmatpush2.msra.mxu1 %v3021_v40  ;;  %v3508_v2 = vld [vmem:[%s19232_s3 + $0x2720] sm:$0xff]  ;;  %v3138_v40 = vld [vmem:[%s19232_s3 + $0x1b90] sm:$0xff] }
 0x1e6   :  { %5117 = vmatpush1.msra.mxu0 %v3228_v5  ;;  %5093 = vmatprep.subr.mxu1 %v3013_v8  ;;  %v3507_v5 = vld [vmem:[%s19232_s3 + $0x2718] sm:$0xff]  ;;  %v3130_v8 = vld [vmem:[%s19232_s3 + $0x1b50] sm:$0xff] }
 0x1e7   :  { %5118 = vmatprep.subr.mxu0 %v3220_v18  ;;  %5094 = vmatpush2.msra.mxu1 %v3012_v50  ;;  %v3499_v18 = vld [vmem:[%s19232_s3 + $0x26d8] sm:$0xff]  ;;  %v3129_v50 = vld [vmem:[%s19232_s3 + $0x1b48] sm:$0xff] }
 0x1e8   :  { %5119 = vmatpush1.msra.mxu0 %v3219_v10  ;;  %5095 = vmatprep.subr.mxu1 %v3004_v55  ;;  %v3498_v10 = vld [vmem:[%s19232_s3 + $0x26d0] sm:$0xff]  ;;  %v3121_v55 = vld [vmem:[%s19232_s3 + $0x1b08] sm:$0xff] }
 0x1e9   :  { %5120 = vmatprep.subr.mxu0 %v3211_v13  ;;  %5096 = vmatpush2.msra.mxu1 %v3003_v25  ;;  %v3120_v13 = vld [vmem:[%s19232_s3 + $0x1b00] sm:$0xff]  ;;  %v3489_v25 = vld [vmem:[%s19232_s3 + $0x2688] sm:$0xff] }
 0x1ea   :  { %5121 = vmatpush1.msra.mxu0 %v3210_v15  ;;  %5097 = vmatprep.subr.mxu1 %v2995_v7  ;;  %v3400_v15 = vld [vmem:[%s19232_s3 + $0x23c0] sm:$0xff]  ;;  %v3481_v7 = vld [vmem:[%s19232_s3 + $0x2648] sm:$0xff] }
 0x1eb   :  { %5122 = vmatprep.subr.mxu0 %v3202_v20  ;;  %5098 = vmatpush2.msra.mxu1 %v2994_v21  ;;  %v3399_v20 = vld [vmem:[%s19232_s3 + $0x23b8] sm:$0xff]  ;;  %v3480_v21 = vld [vmem:[%s19232_s3 + $0x2640] sm:$0xff] }
 0x1ec   :  { %5123 = vmatpush1.msra.mxu0 %v3201_v23  ;;  %5099 = vmatprep.subr.mxu1 %v2986_v26  ;;  %v3391_v23 = vld [vmem:[%s19232_s3 + $0x2378] sm:$0xff]  ;;  %v3472_v26 = vld [vmem:[%s19232_s3 + $0x2600] sm:$0xff] }
 0x1ed   :  { %5124 = vmatprep.subr.mxu0 %v3193_v27  ;;  %5100 = vmatpush2.msra.mxu1 %v2985_v30  ;;  %v3471_v27 = vld [vmem:[%s19232_s3 + $0x25f8] sm:$0xff]  ;;  %v3382_v30 = vld [vmem:[%s19232_s3 + $0x2330] sm:$0xff] }
 0x1ee   :  { %5125 = vmatpush1.msra.mxu0 %v3192_v32  ;;  %5101 = vmatprep.subr.mxu1 %v2977_v14  ;;  %v3381_v32 = vld [vmem:[%s19232_s3 + $0x2328] sm:$0xff]  ;;  %v3462_v14 = vld [vmem:[%s19232_s3 + $0x25b0] sm:$0xff] }
 0x1ef   :  { %5126 = vmatprep.subr.mxu0 %v3184_v34  ;;  %5102 = vmatpush2.msra.mxu1 %v2976_v35  ;;  %v3373_v34 = vld [vmem:[%s19232_s3 + $0x22e8] sm:$0xff]  ;;  %v826_v35 = vrot.slane %v11246_v9, %v10675_v19 }
 0x1f0   :  { %5127 = vmatpush1.msra.mxu0 %v3183_v37  ;;  %5104 = vmatmul.mubr.f32.vlgmr.msra.gmra.mxu1 %v11699_v45  ;;  %v11824_v37 = vpop.f32.mrf.mxu0 }
 0x1f1   :  { %5128 = vmatprep.subr.mxu0 %v3175_v39  ;;  %5181 = vmatprep.subr.mxu1 %v3544_v41  ;;  %v3372_v39 = vld [vmem:[%s19232_s3 + $0x22e0] sm:$0xff]  ;;  %v3453_v41 = vld [vmem:[%s19232_s3 + $0x2568] sm:$0xff] }
 0x1f2   :  { %5129 = vmatpush1.msra.mxu0 %v3174_v47  ;;  %5182 = vmatpush1.msra.mxu1 %v3543_v48  ;;  %v3364_v47 = vld [vmem:[%s19232_s3 + $0x22a0] sm:$0xff]  ;;  %v11838_v48 = vpop.f32.mrf.mxu1 }
 0x1f3   :  { %5245 = vmatprep.mubr.f32.mxu1 %v11717_v53  ;;  %5130 = vmatprep.subr.mxu0 %v3166_v49  ;;  %v3445_v49 = vld [vmem:[%s19232_s3 + $0x2528] sm:$0xff] }
 0x1f4   :  { %5183 = vmatprep.subr.mxu1 %v3535_v44  ;;  %5131 = vmatpush1.msra.mxu0 %v3165_v52  ;;  %v3363_v44 = vld [vmem:[%s19232_s3 + $0x2298] sm:$0xff] }
 0x1f5   :  { %5184 = vmatpush1.msra.mxu1 %v3534_v54  ;;  %5132 = vmatprep.subr.mxu0 %v3157_v12  ;;  %v3444_v54 = vld [vmem:[%s19232_s3 + $0x2520] sm:$0xff]  ;;  %v3355_v12 = vld [vmem:[%s19232_s3 + $0x2258] sm:$0xff] }
 0x1f6   :  { %5185 = vmatprep.subr.mxu1 %v3526_v57  ;;  %5133 = vmatpush1.msra.mxu0 %v3156_v22  ;;  %v1913_v22 = vpop.f32.mrf.mxu1 }
 0x1f7   :  { %5186 = vmatpush1.msra.mxu1 %v3525_v61  ;;  %5134 = vmatprep.subr.mxu0 %v3148_v60  ;;  %v3436_v61 = vld [vmem:[%s19232_s3 + $0x24e0] sm:$0xff]  ;;  %v3354_v60 = vld [vmem:[%s19232_s3 + $0x2250] sm:$0xff] }
 0x1f8   :  { %5187 = vmatprep.subr.mxu1 %v3517_v56  ;;  %5135 = vmatpush1.msra.mxu0 %v3147_v62  ;;  %v3435_v56 = vld [vmem:[%s19232_s3 + $0x24d8] sm:$0xff]  ;;  %v3346_v62 = vld [vmem:[%s19232_s3 + $0x2210] sm:$0xff] }
 0x1f9   :  { %5188 = vmatpush1.msra.mxu1 %v3516_v63  ;;  %5136 = vmatprep.subr.mxu0 %v3139_v0  ;;  %v3427_v0 = vld [vmem:[%s19232_s3 + $0x2498] sm:$0xff] }
 0x1fa   :  { %5189 = vmatprep.subr.mxu1 %v3508_v2  ;;  %5137 = vmatpush1.msra.mxu0 %v3138_v40  ;;  %v3345_v2 = vld [vmem:[%s19232_s3 + $0x2208] sm:$0xff]  ;;  %v3426_v40 = vld [vmem:[%s19232_s3 + $0x2490] sm:$0xff] }
 0x1fb   :  { %5190 = vmatpush1.msra.mxu1 %v3507_v5  ;;  %5138 = vmatprep.subr.mxu0 %v3130_v8  ;;  %v3337_v5 = vld [vmem:[%s19232_s3 + $0x21c8] sm:$0xff]  ;;  %v3418_v8 = vld [vmem:[%s19232_s3 + $0x2450] sm:$0xff] }
 0x1fc   :  { %5191 = vmatprep.subr.mxu1 %v3499_v18  ;;  %5139 = vmatpush1.msra.mxu0 %v3129_v50  ;;  %v3336_v18 = vld [vmem:[%s19232_s3 + $0x21c0] sm:$0xff]  ;;  %v3417_v50 = vld [vmem:[%s19232_s3 + $0x2448] sm:$0xff] }
 0x1fd   :  { %5192 = vmatpush1.msra.mxu1 %v3498_v10  ;;  %5140 = vmatprep.subr.mxu0 %v3121_v55  ;;  %v3328_v10 = vld [vmem:[%s19232_s3 + $0x2180] sm:$0xff]  ;;  %v3409_v55 = vld [vmem:[%s19232_s3 + $0x2408] sm:$0xff] }
 0x1fe   :  { %5193 = vmatprep.subr.mxu1 %v3490_v11  ;;  %5141 = vmatpush1.msra.mxu0 %v3120_v13  ;;  %v3327_v11 = vld [vmem:[%s19232_s3 + $0x2178] sm:$0xff]  ;;  %v3408_v13 = vld [vmem:[%s19232_s3 + $0x2400] sm:$0xff] }
 0x1ff   :  { %5194 = vmatpush1.msra.mxu1 %v3489_v25  ;;  %5142 = vmatprep.subr.mxu0 %v3400_v15  ;;  %v3319_v25 = vld [vmem:[%s19232_s3 + $0x2138] sm:$0xff]  ;;  %v3688_v15 = vld [vmem:[%s19232_s3 + $0x2cc0] sm:$0xff] }
 0x200   :  { %5195 = vmatprep.subr.mxu1 %v3481_v7  ;;  %5143 = vmatpush2.msra.mxu0 %v3399_v20  ;;  %v3318_v7 = vld [vmem:[%s19232_s3 + $0x2130] sm:$0xff]  ;;  %v3687_v20 = vld [vmem:[%s19232_s3 + $0x2cb8] sm:$0xff] }
 0x201   :  { %5196 = vmatpush1.msra.mxu1 %v3480_v21  ;;  %5144 = vmatprep.subr.mxu0 %v3391_v23  ;;  %v3310_v21 = vld [vmem:[%s19232_s3 + $0x20f0] sm:$0xff]  ;;  %v822_v23 = vrot.slane %v11246_v9, %v11026_v38 }
 0x202   :  { %5197 = vmatprep.subr.mxu1 %v3472_v26  ;;  %5145 = vmatpush2.msra.mxu0 %v3390_v24  ;;  %v3679_v26 = vld [vmem:[%s19232_s3 + $0x2c78] sm:$0xff]  ;;  %v3309_v24 = vld [vmem:[%s19232_s3 + $0x20e8] sm:$0xff] }
 0x203   :  { %5198 = vmatpush1.msra.mxu1 %v3471_v27  ;;  %5146 = vmatprep.subr.mxu0 %v3382_v30  ;;  %v3678_v27 = vld [vmem:[%s19232_s3 + $0x2c70] sm:$0xff]  ;;  %v3301_v30 = vld [vmem:[%s19232_s3 + $0x20a8] sm:$0xff] }
 0x204   :  { %5199 = vmatprep.subr.mxu1 %v3463_v31  ;;  %5147 = vmatpush2.msra.mxu0 %v3381_v32  ;;  %v3670_v31 = vld [vmem:[%s19232_s3 + $0x2c30] sm:$0xff]  ;;  %v3300_v32 = vld [vmem:[%s19232_s3 + $0x20a0] sm:$0xff] }
 0x205   :  { %5200 = vmatpush1.msra.mxu1 %v3462_v14  ;;  %5148 = vmatprep.subr.mxu0 %v3373_v34  ;;  %v1842_v52 = vpop.f32.mrf.mxu0  ;;  %v3669_v14 = vld [vmem:[%s19232_s3 + $0x2c28] sm:$0xff]  ;;  %v3292_v34 = vld [vmem:[%s19232_s3 + $0x2060] sm:$0xff] }
 0x206   :  { %5201 = vmatprep.subr.mxu1 %v3454_v16  ;;  %5149 = vmatpush2.msra.mxu0 %v3372_v39  ;;  %v1843_v57 = vadd.f32 %v1842_v52, %v826_v35  ;;  %v1703_v35 = vadd.f32 %v11838_v48, %v822_v23  ;;  %v3661_v16 = vld [vmem:[%s19232_s3 + $0x2be8] sm:$0xff]  ;;  %v3291_v39 = vld [vmem:[%s19232_s3 + $0x2058] sm:$0xff]  ;;  %v3660_v48 = vld [vmem:[%s19232_s3 + $0x2be0] sm:$0xff] }
 0x207   :  { %5202 = vmatpush1.msra.mxu1 %v3453_v41  ;;  %5150 = vmatprep.subr.mxu0 %v3364_v47  ;;  %v834_v41 = vrot.slane %v11246_v9, %v10807_v29  ;;  %v11949_v47 = vpop.f32.mrf.mxu1  ;;  %v3282_v9 = vld [vmem:[%s19232_s3 + $0x2010] sm:$0xff]  ;;  %v11963_v52 = vpop.f32.mrf.mxu0  ;;  %v3607_v23 = vld [vmem:[%s19232_s3 + $0x2a38] sm:$0xff] }
 0x208   :  { %5203 = vmatprep.subr.mxu1 %v3445_v49  ;;  %5151 = vmatpush2.msra.mxu0 %v3363_v44  ;;  %v11864_v63 = vadd.f32 %v1913_v22, %v1843_v57  ;;  %v3283_v49 = vld [vmem:[%s19232_s3 + $0x2018] sm:$0xff]  ;;  %v3652_v44 = vld [vmem:[%s19232_s3 + $0x2ba0] sm:$0xff]  ;;  %v1774_v22 = vadd.f32 %v11824_v37, %v1703_v35  ;;  %v3265_v37 = vld [vmem:[%s19232_s3 + $0x1f88] sm:$0xff] }
 0x209   :  { %5204 = vmatpush1.msra.mxu1 %v3444_v54  ;;  %5152 = vmatprep.subr.mxu0 %v3355_v12  ;;  %v3651_v54 = vld [vmem:[%s19232_s3 + $0x2b98] sm:$0xff]  ;;  %v3274_v12 = vld [vmem:[%s19232_s3 + $0x1fd0] sm:$0xff]  ;;  %v3804_v35 = vld [vmem:[%s19232_s3 + $0x3060] sm:$0xff] }
 0x20a   :  { %5205 = vmatprep.subr.mxu1 %v3436_v61  ;;  %5153 = vmatpush2.msra.mxu0 %v3354_v60  ;;  %v3643_v61 = vld [vmem:[%s19232_s3 + $0x2b58] sm:$0xff]  ;;  %v3273_v60 = vld [vmem:[%s19232_s3 + $0x1fc8] sm:$0xff]  ;;  %vm2213_vm11 = vcmp.gt.f32.partialorder %v1774_v22, 0.0  ;;  %vm2214_vm0 = vcmp.gt.f32.partialorder %v11864_v63, 0.0 }
 0x20b   :  { %5206 = vmatpush1.msra.mxu1 %v3435_v56  ;;  %5154 = vmatprep.subr.mxu0 %v3346_v62  ;;  %v2226_v62 = vmul.f32 0.2, %v10873_v36 }
 0x20c   :  { %5207 = vmatprep.subr.mxu1 %v3427_v0  ;;  %5155 = vmatpush2.msra.mxu0 %v3345_v2  ;;  %v3642_v0 = vld [vmem:[%s19232_s3 + $0x2b50] sm:$0xff] }
 0x20d   :  { %5208 = vmatpush1.msra.mxu1 %v3426_v40  ;;  %5156 = vmatprep.subr.mxu0 %v3337_v5  ;;  %v3634_v40 = vld [vmem:[%s19232_s3 + $0x2b10] sm:$0xff]  ;;  %v3264_v5 = vld [vmem:[%s19232_s3 + $0x1f80] sm:$0xff] }
 0x20e   :  { %5209 = vmatprep.subr.mxu1 %v3418_v8  ;;  %5157 = vmatpush2.msra.mxu0 %v3336_v18  ;;  %v3633_v18 = vld [vmem:[%s19232_s3 + $0x2b08] sm:$0xff] }
 0x20f   :  { %5210 = vmatpush1.msra.mxu1 %v3417_v50  ;;  %5158 = vmatprep.subr.mxu0 %v3328_v10  ;;  %v2231_v50 = vmul.f32 0.2, %v1774_v22  ;;  %v3625_v10 = vld [vmem:[%s19232_s3 + $0x2ac8] sm:$0xff] }
 0x210   :  { %5211 = vmatprep.subr.mxu1 %v3409_v55  ;;  %5159 = vmatpush2.msra.mxu0 %v3327_v11  ;;  %v3832_v55 = vld [vmem:[%s19232_s3 + $0x3140] sm:$0xff]  ;;  %v12004_v11 = vsel %vm2208_vm10, %v10873_v36, %v2226_v62  ;;  %v3823_v36 = vld [vmem:[%s19232_s3 + $0x30f8] sm:$0xff]  ;;  %v3769_v62 = vld [vmem:[%s19232_s3 + $0x2f48] sm:$0xff] }
 0x211   :  { %5212 = vmatpush1.msra.mxu1 %v3408_v13  ;;  %5160 = vmatprep.subr.mxu0 %v3319_v25  ;;  %v3624_v13 = vld [vmem:[%s19232_s3 + $0x2ac0] sm:$0xff]  ;;  %v3831_v25 = vld [vmem:[%s19232_s3 + $0x3138] sm:$0xff] }
 0x212   :  { %5213 = vmatprep.subr.mxu1 %v3688_v15  ;;  %5161 = vmatpush2.msra.mxu0 %v3318_v7  ;;  %v3616_v15 = vld [vmem:[%s19232_s3 + $0x2a80] sm:$0xff]  ;;  %v3615_v7 = vld [vmem:[%s19232_s3 + $0x2a78] sm:$0xff] }
 0x213   :  { %5214 = vmatpush2.msra.mxu1 %v3687_v20  ;;  %5162 = vmatprep.subr.mxu0 %v3310_v21  ;;  %v12022_v20 = vsel %vm2213_vm11, %v1774_v22, %v2231_v50  ;;  %v3822_v21 = vld [vmem:[%s19232_s3 + $0x30f0] sm:$0xff] }
 0x214   :  { %5215 = vmatprep.subr.mxu1 %v3679_v26  ;;  %5163 = vmatpush2.msra.mxu0 %v3309_v24  ;;  %v3814_v26 = vld [vmem:[%s19232_s3 + $0x30b0] sm:$0xff] }
 0x215   :  { %5216 = vmatpush2.msra.mxu1 %v3678_v27  ;;  %5164 = vmatprep.subr.mxu0 %v3301_v30  ;;  %v3606_v24 = vld [vmem:[%s19232_s3 + $0x2a30] sm:$0xff]  ;;  %v3813_v27 = vld [vmem:[%s19232_s3 + $0x30a8] sm:$0xff] }
 0x216   :  { %5217 = vmatprep.subr.mxu1 %v3670_v31  ;;  %5165 = vmatpush2.msra.mxu0 %v3300_v32  ;;  %v3598_v30 = vld [vmem:[%s19232_s3 + $0x29f0] sm:$0xff]  ;;  %v12046_v31 = vld [vmem:[%s19231_s2 + $0x8] sm:$0xff] }
 0x217   :  { %5218 = vmatpush2.msra.mxu1 %v3669_v14  ;;  %5166 = vmatprep.subr.mxu0 %v3292_v34  ;;  %v830_v32 = vrot.slane %v12046_v31, %v11149_v4  ;;  %v3805_v14 = vld [vmem:[%s19232_s3 + $0x3068] sm:$0xff]  ;;  %v3570_v22 = vld [vmem:[%s19232_s3 + $0x2910] sm:$0xff] }
 0x218   :  { %5219 = vmatprep.subr.mxu1 %v3661_v16  ;;  %5167 = vmatpush2.msra.mxu0 %v3291_v39  ;;  %v1984_v57 = vpop.f32.mrf.mxu1  ;;  %v3597_v34 = vld [vmem:[%s19232_s3 + $0x29e8] sm:$0xff]  ;;  %v3796_v39 = vld [vmem:[%s19232_s3 + $0x3020] sm:$0xff] }
 0x219   :  { %5220 = vmatpush2.msra.mxu1 %v3660_v48  ;;  %5168 = vmatprep.subr.mxu0 %v3283_v49  ;;  %v1985_v56 = vadd.f32 %v1984_v57, %v834_v41  ;;  %v2055_v2 = vpop.f32.mrf.mxu0  ;;  %v3589_v16 = vld [vmem:[%s19232_s3 + $0x29a8] sm:$0xff]  ;;  %v3588_v41 = vld [vmem:[%s19232_s3 + $0x29a0] sm:$0xff]  ;;  %v3795_v48 = vld [vmem:[%s19232_s3 + $0x3018] sm:$0xff] }
 0x21a   :  { %5221 = vmatprep.subr.mxu1 %v3652_v44  ;;  %5169 = vmatpush2.msra.mxu0 %v3282_v9  ;;  %v3580_v49 = vld [vmem:[%s19232_s3 + $0x2960] sm:$0xff]  ;;  %v1845_v44 = vadd.f32 %v11963_v52, %v830_v32  ;;  %v3787_v9 = vld [vmem:[%s19232_s3 + $0x2fd8] sm:$0xff]  ;;  %v3778_v57 = vld [vmem:[%s19232_s3 + $0x2f90] sm:$0xff] }
 0x21b   :  { %5222 = vmatpush2.msra.mxu1 %v3651_v54  ;;  %5170 = vmatprep.subr.mxu0 %v3274_v12  ;;  %v11992_v8 = vadd.f32 %v2055_v2, %v1985_v56  ;;  %v3579_v54 = vld [vmem:[%s19232_s3 + $0x2958] sm:$0xff]  ;;  %v3786_v12 = vld [vmem:[%s19232_s3 + $0x2fd0] sm:$0xff]  ;;  %v3768_v2 = vld [vmem:[%s19232_s3 + $0x2f40] sm:$0xff] }
 0x21c   :  { %5223 = vmatprep.subr.mxu1 %v3643_v61  ;;  %5171 = vmatpush2.msra.mxu0 %v3273_v60  ;;  %v3571_v52 = vld [vmem:[%s19232_s3 + $0x2918] sm:$0xff]  ;;  %v3777_v61 = vld [vmem:[%s19232_s3 + $0x2f88] sm:$0xff]  ;;  %v3562_v60 = vld [vmem:[%s19232_s3 + $0x28d0] sm:$0xff]  ;;  %v1916_v56 = vadd.f32 %v11949_v47, %v1845_v44 }
 0x21d   :  { %5224 = vmatpush2.msra.mxu1 %v3642_v0  ;;  %5172 = vmatprep.subr.mxu0 %v3265_v37  ;;  %v3561_v0 = vld [vmem:[%s19232_s3 + $0x28c8] sm:$0xff]  ;;  %v2228_v37 = vmul.f32 0.2, %v11313_v42  ;;  %v3724_v32 = vld [vmem:[%s19232_s3 + $0x2de0] sm:$0xff]  ;;  %v4075_v44 = vld [vmem:[%s19232_s3 + $0x38d8] sm:$0xff]  ;;  %vm2216_vm2 = vcmp.gt.f32.partialorder %v11992_v8, 0.0 }
 0x21e   :  { %5225 = vmatprep.subr.mxu1 %v3634_v40  ;;  %5173 = vmatpush2.msra.mxu0 %v3264_v5  ;;  %v3553_v47 = vld [vmem:[%s19232_s3 + $0x2888] sm:$0xff]  ;;  %v3760_v40 = vld [vmem:[%s19232_s3 + $0x2f00] sm:$0xff]  ;;  %v2233_v50 = vmul.f32 0.2, %v1916_v56  ;;  %vm2215_vm13 = vcmp.gt.f32.partialorder %v1916_v56, 0.0 }
 0x21f   :  { %5226 = vmatpush2.msra.mxu1 %v3633_v18  ;;  %5175 = vmatmul.mubr.f32.vlgmr.msra.gmra.mxu0 %v12004_v11  ;;  %v3552_v5 = vld [vmem:[%s19232_s3 + $0x2880] sm:$0xff]  ;;  %v3759_v18 = vld [vmem:[%s19232_s3 + $0x2ef8] sm:$0xff] }
 0x220   :  { %5227 = vmatprep.subr.mxu1 %v3625_v10  ;;  %5252 = vmatprep.subr.mxu0 %v3832_v55  ;;  %v3751_v10 = vld [vmem:[%s19232_s3 + $0x2eb8] sm:$0xff]  ;;  %v4120_v55 = vld [vmem:[%s19232_s3 + $0x3a40] sm:$0xff] }
 0x221   :  { %5228 = vmatpush2.msra.mxu1 %v3624_v13  ;;  %5253 = vmatpush1.msra.mxu0 %v3831_v25  ;;  %v12132_v13 = vsel %vm2210_vm12, %v11313_v42, %v2228_v37  ;;  %v3750_v25 = vld [vmem:[%s19232_s3 + $0x2eb0] sm:$0xff]  ;;  %v4111_v42 = vld [vmem:[%s19232_s3 + $0x39f8] sm:$0xff]  ;;  %v4048_v37 = vld [vmem:[%s19232_s3 + $0x3800] sm:$0xff] }
 0x222   :  { %5316 = vmatprep.mubr.f32.mxu0 %v12022_v20  ;;  %5229 = vmatprep.subr.mxu1 %v3616_v15  ;;  %v4119_v15 = vld [vmem:[%s19232_s3 + $0x3a38] sm:$0xff] }
 0x223   :  { %5254 = vmatprep.subr.mxu0 %v3823_v36  ;;  %5230 = vmatpush2.msra.mxu1 %v3615_v7  ;;  %v3742_v36 = vld [vmem:[%s19232_s3 + $0x2e70] sm:$0xff]  ;;  %v3741_v7 = vld [vmem:[%s19232_s3 + $0x2e68] sm:$0xff] }
 0x224   :  { %5255 = vmatpush1.msra.mxu0 %v3822_v21  ;;  %5231 = vmatprep.subr.mxu1 %v3607_v23  ;;  %v12150_v21 = vsel %vm2215_vm13, %v1916_v56, %v2233_v50  ;;  %v4110_v23 = vld [vmem:[%s19232_s3 + $0x39f0] sm:$0xff]  ;;  %v3975_v56 = vld [vmem:[%s19232_s3 + $0x35b8] sm:$0xff] }
 0x225   :  { %5256 = vmatprep.subr.mxu0 %v3814_v26  ;;  %5232 = vmatpush2.msra.mxu1 %v3606_v24  ;;  %v3733_v26 = vld [vmem:[%s19232_s3 + $0x2e28] sm:$0xff]  ;;  %v4102_v24 = vld [vmem:[%s19232_s3 + $0x39b0] sm:$0xff] }
 0x226   :  { %5257 = vmatpush1.msra.mxu0 %v3813_v27  ;;  %5233 = vmatprep.subr.mxu1 %v3598_v30  ;;  %v3732_v27 = vld [vmem:[%s19232_s3 + $0x2e20] sm:$0xff]  ;;  %v4101_v30 = vld [vmem:[%s19232_s3 + $0x39a8] sm:$0xff]  ;;  %v4038_v50 = vld [vmem:[%s19232_s3 + $0x37b0] sm:$0xff] }
 0x227   :  { %5258 = vmatprep.subr.mxu0 %v3805_v14  ;;  %5234 = vmatpush2.msra.mxu1 %v3597_v34  ;;  %v4093_v14 = vld [vmem:[%s19232_s3 + $0x3968] sm:$0xff]  ;;  %v3723_v34 = vld [vmem:[%s19232_s3 + $0x2dd8] sm:$0xff] }
 0x228   :  { %5259 = vmatpush1.msra.mxu0 %v3804_v35  ;;  %5235 = vmatprep.subr.mxu1 %v3589_v16  ;;  %v4092_v35 = vld [vmem:[%s19232_s3 + $0x3960] sm:$0xff]  ;;  %v3715_v16 = vld [vmem:[%s19232_s3 + $0x2d98] sm:$0xff] }
 0x229   :  { %5260 = vmatprep.subr.mxu0 %v3796_v39  ;;  %5236 = vmatpush2.msra.mxu1 %v3588_v41  ;;  %v4084_v39 = vld [vmem:[%s19232_s3 + $0x3920] sm:$0xff]  ;;  %v3714_v41 = vld [vmem:[%s19232_s3 + $0x2d90] sm:$0xff] }
 0x22a   :  { %5261 = vmatpush1.msra.mxu0 %v3795_v48  ;;  %5237 = vmatprep.subr.mxu1 %v3580_v49  ;;  %v4083_v48 = vld [vmem:[%s19232_s3 + $0x3918] sm:$0xff]  ;;  %v3706_v49 = vld [vmem:[%s19232_s3 + $0x2d50] sm:$0xff] }
 0x22b   :  { %5262 = vmatprep.subr.mxu0 %v3787_v9  ;;  %5238 = vmatpush2.msra.mxu1 %v3579_v54  ;;  %v3705_v9 = vld [vmem:[%s19232_s3 + $0x2d48] sm:$0xff]  ;;  %v4074_v54 = vld [vmem:[%s19232_s3 + $0x38d0] sm:$0xff] }
 0x22c   :  { %5263 = vmatpush1.msra.mxu0 %v3786_v12  ;;  %5239 = vmatprep.subr.mxu1 %v3571_v52  ;;  %v3697_v12 = vld [vmem:[%s19232_s3 + $0x2d08] sm:$0xff]  ;;  %v4066_v52 = vld [vmem:[%s19232_s3 + $0x3890] sm:$0xff] }
 0x22d   :  { %5264 = vmatprep.subr.mxu0 %v3778_v57  ;;  %5240 = vmatpush2.msra.mxu1 %v3570_v22  ;;  %v3696_v57 = vld [vmem:[%s19232_s3 + $0x2d00] sm:$0xff]  ;;  %v4065_v22 = vld [vmem:[%s19232_s3 + $0x3888] sm:$0xff] }
 0x22e   :  { %5265 = vmatpush1.msra.mxu0 %v3777_v61  ;;  %5241 = vmatprep.subr.mxu1 %v3562_v60  ;;  %v3976_v61 = vld [vmem:[%s19232_s3 + $0x35c0] sm:$0xff]  ;;  %v4057_v60 = vld [vmem:[%s19232_s3 + $0x3848] sm:$0xff] }
 0x22f   :  { %5266 = vmatprep.subr.mxu0 %v3769_v62  ;;  %5242 = vmatpush2.msra.mxu1 %v3561_v0  ;;  %v4056_v62 = vld [vmem:[%s19232_s3 + $0x3840] sm:$0xff]  ;;  %v3967_v0 = vld [vmem:[%s19232_s3 + $0x3578] sm:$0xff] }
 0x230   :  { %5267 = vmatpush1.msra.mxu0 %v3768_v2  ;;  %5243 = vmatprep.subr.mxu1 %v3553_v47  ;;  %v3966_v2 = vld [vmem:[%s19232_s3 + $0x3570] sm:$0xff]  ;;  %v4047_v47 = vld [vmem:[%s19232_s3 + $0x37f8] sm:$0xff] }
 0x231   :  { %5268 = vmatprep.subr.mxu0 %v3760_v40  ;;  %5244 = vmatpush2.msra.mxu1 %v3552_v5  ;;  %v3958_v40 = vld [vmem:[%s19232_s3 + $0x3530] sm:$0xff]  ;;  %v4039_v5 = vld [vmem:[%s19232_s3 + $0x37b8] sm:$0xff] }
 0x232   :  { %5269 = vmatpush1.msra.mxu0 %v3759_v18  ;;  %5246 = vmatmul.mubr.f32.vlgmr.msra.gmra.mxu1 %v12132_v13  ;;  %v3957_v18 = vld [vmem:[%s19232_s3 + $0x3528] sm:$0xff] }
 0x233   :  { %5270 = vmatprep.subr.mxu0 %v3751_v10  ;;  %5323 = vmatprep.subr.mxu1 %v4120_v55  ;;  %v3949_v10 = vld [vmem:[%s19232_s3 + $0x34e8] sm:$0xff]  ;;  %v4030_v55 = vld [vmem:[%s19232_s3 + $0x3770] sm:$0xff] }
 0x234   :  { %5271 = vmatpush1.msra.mxu0 %v3750_v25  ;;  %5324 = vmatpush1.msra.mxu1 %v4119_v15  ;;  %v3948_v25 = vld [vmem:[%s19232_s3 + $0x34e0] sm:$0xff]  ;;  %v4029_v15 = vld [vmem:[%s19232_s3 + $0x3768] sm:$0xff] }
 0x235   :  { %5387 = vmatprep.mubr.f32.mxu1 %v12150_v21  ;;  %5272 = vmatprep.subr.mxu0 %v3742_v36  ;;  %v3940_v36 = vld [vmem:[%s19232_s3 + $0x34a0] sm:$0xff] }
 0x236   :  { %5325 = vmatprep.subr.mxu1 %v4111_v42  ;;  %5273 = vmatpush1.msra.mxu0 %v3741_v7  ;;  %v4021_v42 = vld [vmem:[%s19232_s3 + $0x3728] sm:$0xff]  ;;  %v3939_v7 = vld [vmem:[%s19232_s3 + $0x3498] sm:$0xff] }
 0x237   :  { %5326 = vmatpush1.msra.mxu1 %v4110_v23  ;;  %5274 = vmatprep.subr.mxu0 %v3733_v26  ;;  %v4020_v23 = vld [vmem:[%s19232_s3 + $0x3720] sm:$0xff]  ;;  %v3931_v26 = vld [vmem:[%s19232_s3 + $0x3458] sm:$0xff] }
 0x238   :  { %5327 = vmatprep.subr.mxu1 %v4102_v24  ;;  %5275 = vmatpush1.msra.mxu0 %v3732_v27  ;;  %v4012_v24 = vld [vmem:[%s19232_s3 + $0x36e0] sm:$0xff]  ;;  %v3930_v27 = vld [vmem:[%s19232_s3 + $0x3450] sm:$0xff] }
 0x239   :  { %5328 = vmatpush1.msra.mxu1 %v4101_v30  ;;  %5276 = vmatprep.subr.mxu0 %v3724_v32  ;;  %v4011_v30 = vld [vmem:[%s19232_s3 + $0x36d8] sm:$0xff]  ;;  %v3922_v32 = vld [vmem:[%s19232_s3 + $0x3410] sm:$0xff] }
 0x23a   :  { %5329 = vmatprep.subr.mxu1 %v4093_v14  ;;  %5277 = vmatpush1.msra.mxu0 %v3723_v34  ;;  %v4003_v14 = vld [vmem:[%s19232_s3 + $0x3698] sm:$0xff]  ;;  %v3921_v34 = vld [vmem:[%s19232_s3 + $0x3408] sm:$0xff] }
 0x23b   :  { %5330 = vmatpush1.msra.mxu1 %v4092_v35  ;;  %5278 = vmatprep.subr.mxu0 %v3715_v16  ;;  %v4002_v35 = vld [vmem:[%s19232_s3 + $0x3690] sm:$0xff]  ;;  %v3913_v16 = vld [vmem:[%s19232_s3 + $0x33c8] sm:$0xff] }
 0x23c   :  { %5331 = vmatprep.subr.mxu1 %v4084_v39  ;;  %5279 = vmatpush1.msra.mxu0 %v3714_v41  ;;  %v3994_v39 = vld [vmem:[%s19232_s3 + $0x3650] sm:$0xff]  ;;  %v3912_v41 = vld [vmem:[%s19232_s3 + $0x33c0] sm:$0xff] }
 0x23d   :  { %5332 = vmatpush1.msra.mxu1 %v4083_v48  ;;  %5280 = vmatprep.subr.mxu0 %v3706_v49  ;;  %v3993_v48 = vld [vmem:[%s19232_s3 + $0x3648] sm:$0xff]  ;;  %v3904_v49 = vld [vmem:[%s19232_s3 + $0x3380] sm:$0xff] }
 0x23e   :  { %5333 = vmatprep.subr.mxu1 %v4075_v44  ;;  %5281 = vmatpush1.msra.mxu0 %v3705_v9  ;;  %v3985_v44 = vld [vmem:[%s19232_s3 + $0x3608] sm:$0xff]  ;;  %v3903_v9 = vld [vmem:[%s19232_s3 + $0x3378] sm:$0xff] }
 0x23f   :  { %5334 = vmatpush1.msra.mxu1 %v4074_v54  ;;  %5282 = vmatprep.subr.mxu0 %v3697_v12  ;;  %v3984_v54 = vld [vmem:[%s19232_s3 + $0x3600] sm:$0xff]  ;;  %v3895_v12 = vld [vmem:[%s19232_s3 + $0x3338] sm:$0xff] }
 0x240   :  { %5335 = vmatprep.subr.mxu1 %v4066_v52  ;;  %5283 = vmatpush1.msra.mxu0 %v3696_v57  ;;  %v4264_v52 = vld [vmem:[%s19232_s3 + $0x3ec0] sm:$0xff]  ;;  %v3894_v57 = vld [vmem:[%s19232_s3 + $0x3330] sm:$0xff] }
 0x241   :  { %5336 = vmatpush1.msra.mxu1 %v4065_v22  ;;  %5284 = vmatprep.subr.mxu0 %v3976_v61  ;;  %v4263_v22 = vld [vmem:[%s19232_s3 + $0x3eb8] sm:$0xff]  ;;  %v3886_v61 = vld [vmem:[%s19232_s3 + $0x32f0] sm:$0xff] }
 0x242   :  { %5337 = vmatprep.subr.mxu1 %v4057_v60  ;;  %5285 = vmatpush2.msra.mxu0 %v3975_v56  ;;  %v838_v60 = vrot.slane %v12046_v31, %v11468_v59  ;;  %v4255_v56 = vld [vmem:[%s19232_s3 + $0x3e78] sm:$0xff]  ;;  %v3877_v31 = vld [vmem:[%s19232_s3 + $0x32a8] sm:$0xff] }
 0x243   :  { %5338 = vmatpush1.msra.mxu1 %v4056_v62  ;;  %5286 = vmatprep.subr.mxu0 %v3967_v0  ;;  %v3885_v62 = vld [vmem:[%s19232_s3 + $0x32e8] sm:$0xff]  ;;  %v1986_v0 = vpop.f32.mrf.mxu1 }
 0x244   :  { %5339 = vmatprep.subr.mxu1 %v4048_v37  ;;  %5287 = vmatpush2.msra.mxu0 %v3966_v2  ;;  %v4254_v37 = vld [vmem:[%s19232_s3 + $0x3e70] sm:$0xff] }
 0x245   :  { %5340 = vmatpush1.msra.mxu1 %v4047_v47  ;;  %5288 = vmatprep.subr.mxu0 %v3958_v40  ;;  %v4246_v2 = vld [vmem:[%s19232_s3 + $0x3e30] sm:$0xff]  ;;  %v3876_v47 = vld [vmem:[%s19232_s3 + $0x32a0] sm:$0xff] }
 0x246   :  { %5341 = vmatprep.subr.mxu1 %v4039_v5  ;;  %5289 = vmatpush2.msra.mxu0 %v3957_v18  ;;  %v12362_v40 = vld [vmem:[%s19231_s2 + $0x10] sm:$0x3]  ;;  %v4245_v5 = vld [vmem:[%s19232_s3 + $0x3e28] sm:$0xff]  ;;  %v3868_v18 = vld [vmem:[%s19232_s3 + $0x3260] sm:$0xff] }
 0x247   :  { %5342 = vmatpush1.msra.mxu1 %v4038_v50  ;;  %5290 = vmatprep.subr.mxu0 %v3949_v10  ;;  %v1987_v50 = vadd.f32 %v1986_v0, %v838_v60  ;;  %v4237_v10 = vld [vmem:[%s19232_s3 + $0x3de8] sm:$0xff]  ;;  %v4192_v60 = vld [vmem:[%s19232_s3 + $0x3c80] sm:$0xff]  ;;  %v4398_v0 = vld [vmem:[%s19232_s3 + $0x42f0] sm:$0xff] }
 0x248   :  { %5343 = vmatprep.subr.mxu1 %v4030_v55  ;;  %5291 = vmatpush2.msra.mxu0 %v3948_v25  ;;  %v3867_v55 = vld [vmem:[%s19232_s3 + $0x3258] sm:$0xff]  ;;  %v4236_v25 = vld [vmem:[%s19232_s3 + $0x3de0] sm:$0xff] }
 0x249   :  { %5344 = vmatpush1.msra.mxu1 %v4029_v15  ;;  %5292 = vmatprep.subr.mxu0 %v3940_v36  ;;  %v3859_v15 = vld [vmem:[%s19232_s3 + $0x3218] sm:$0xff]  ;;  %v842_v36 = vrot.slane %v12362_v40, %v10146_v1 }
 0x24a   :  { %5345 = vmatprep.subr.mxu1 %v4021_v42  ;;  %5293 = vmatpush2.msra.mxu0 %v3939_v7  ;;  %v2057_v42 = vpop.f32.mrf.mxu0  ;;  %v4228_v7 = vld [vmem:[%s19232_s3 + $0x3da0] sm:$0xff] }
 0x24b   :  { %5346 = vmatpush1.msra.mxu1 %v4020_v23  ;;  %5294 = vmatprep.subr.mxu0 %v3931_v26  ;;  %v3858_v23 = vld [vmem:[%s19232_s3 + $0x3210] sm:$0xff]  ;;  %v4227_v26 = vld [vmem:[%s19232_s3 + $0x3d98] sm:$0xff] }
 0x24c   :  { %5347 = vmatprep.subr.mxu1 %v4012_v24  ;;  %5295 = vmatpush2.msra.mxu0 %v3930_v27  ;;  %v3850_v24 = vld [vmem:[%s19232_s3 + $0x31d0] sm:$0xff]  ;;  %v2058_v27 = vadd.f32 %v2057_v42, %v1987_v50  ;;  %v4381_v50 = vld [vmem:[%s19232_s3 + $0x4268] sm:$0xff]  ;;  %v4371_v42 = vld [vmem:[%s19232_s3 + $0x4218] sm:$0xff] }
 0x24d   :  { %5348 = vmatpush1.msra.mxu1 %v4011_v30  ;;  %5296 = vmatprep.subr.mxu0 %v3922_v32  ;;  %v4219_v30 = vld [vmem:[%s19232_s3 + $0x3d58] sm:$0xff]  ;;  %v3849_v32 = vld [vmem:[%s19232_s3 + $0x31c8] sm:$0xff] }
 0x24e   :  { %5349 = vmatprep.subr.mxu1 %v4003_v14  ;;  %5297 = vmatpush2.msra.mxu0 %v3921_v34  ;;  %v2230_v34 = vmul.f32 0.2, %v11435_v43  ;;  %vm2217_vm15 = vcmp.gt.f32.partialorder %v2058_v27, 0.0 }
 0x24f   :  { %5350 = vmatpush1.msra.mxu1 %v4002_v35  ;;  %5298 = vmatprep.subr.mxu0 %v3913_v16  ;;  %v4218_v35 = vld [vmem:[%s19232_s3 + $0x3d50] sm:$0xff]  ;;  %v3841_v16 = vld [vmem:[%s19232_s3 + $0x3188] sm:$0xff] }
 0x250   :  { %5351 = vmatprep.subr.mxu1 %v3994_v39  ;;  %5299 = vmatpush2.msra.mxu0 %v3912_v41  ;;  %v2197_v41 = vpop.f32.mrf.mxu1 }
 0x251   :  { %5352 = vmatpush1.msra.mxu1 %v3993_v48  ;;  %5300 = vmatprep.subr.mxu0 %v3904_v49  ;;  %v4210_v48 = vld [vmem:[%s19232_s3 + $0x3d10] sm:$0xff]  ;;  %v3840_v49 = vld [vmem:[%s19232_s3 + $0x3180] sm:$0xff] }
 0x252   :  { %5353 = vmatprep.subr.mxu1 %v3985_v44  ;;  %5301 = vmatpush2.msra.mxu0 %v3903_v9  ;;  %v4209_v44 = vld [vmem:[%s19232_s3 + $0x3d08] sm:$0xff] }
 0x253   :  { %5354 = vmatpush1.msra.mxu1 %v3984_v54  ;;  %5302 = vmatprep.subr.mxu0 %v3895_v12  ;;  %v2235_v54 = vmul.f32 0.2, %v2058_v27  ;;  %v4201_v12 = vld [vmem:[%s19232_s3 + $0x3cc8] sm:$0xff] }
 0x254   :  { %5355 = vmatprep.subr.mxu1 %v4264_v52  ;;  %5303 = vmatpush2.msra.mxu0 %v3894_v57  ;;  %v4408_v52 = vld [vmem:[%s19232_s3 + $0x4340] sm:$0xff]  ;;  %v12428_v57 = vsel %vm2212_vm14, %v11435_v43, %v2230_v34  ;;  %v4399_v43 = vld [vmem:[%s19232_s3 + $0x42f8] sm:$0xff]  ;;  %v2199_v34 = vpop.f32.mrf.mxu1 }
 0x255   :  { %5356 = vmatpush2.msra.mxu1 %v4263_v22  ;;  %5304 = vmatprep.subr.mxu0 %v3886_v61  ;;  %v4200_v22 = vld [vmem:[%s19232_s3 + $0x3cc0] sm:$0xff]  ;;  %v4407_v61 = vld [vmem:[%s19232_s3 + $0x4338] sm:$0xff] }
 0x256   :  { %5357 = vmatprep.subr.mxu1 %v4255_v56  ;;  %5305 = vmatpush2.msra.mxu0 %v3885_v62  ;;  %v4191_v56 = vld [vmem:[%s19232_s3 + $0x3c78] sm:$0xff]  ;;  %v12446_v62 = vsel %vm2217_vm15, %v2058_v27, %v2235_v54  ;;  %v4362_v27 = vld [vmem:[%s19232_s3 + $0x41d0] sm:$0xff]  ;;  %v4129_v54 = vld [vmem:[%s19232_s3 + $0x3a88] sm:$0xff] }
 0x257   :  { %5358 = vmatpush2.msra.mxu1 %v4254_v37  ;;  %5306 = vmatprep.subr.mxu0 %v3877_v31  ;;  %v4183_v37 = vld [vmem:[%s19232_s3 + $0x3c38] sm:$0xff]  ;;  %v4390_v31 = vld [vmem:[%s19232_s3 + $0x42b0] sm:$0xff] }
 0x258   :  { %5359 = vmatprep.subr.mxu1 %v4246_v2  ;;  %5307 = vmatpush2.msra.mxu0 %v3876_v47  ;;  %v4182_v2 = vld [vmem:[%s19232_s3 + $0x3c30] sm:$0xff]  ;;  %v4389_v47 = vld [vmem:[%s19232_s3 + $0x42a8] sm:$0xff] }
 0x259   :  { %5360 = vmatpush2.msra.mxu1 %v4245_v5  ;;  %5308 = vmatprep.subr.mxu0 %v3868_v18  ;;  %v4174_v5 = vld [vmem:[%s19232_s3 + $0x3bf0] sm:$0xff]  ;;  %v846_v18 = vrot.slane %v12362_v40, %v10709_v6  ;;  %v4165_v40 = vld [vmem:[%s19232_s3 + $0x3ba8] sm:$0xff] }
 0x25a   :  { %5361 = vmatprep.subr.mxu1 %v4237_v10  ;;  %5309 = vmatpush2.msra.mxu0 %v3867_v55  ;;  %v4173_v10 = vld [vmem:[%s19232_s3 + $0x3be8] sm:$0xff] }
 0x25b   :  { %5362 = vmatpush2.msra.mxu1 %v4236_v25  ;;  %5310 = vmatprep.subr.mxu0 %v3859_v15  ;;  %v2126_v14 = vpop.f32.mrf.mxu0  ;;  %v4380_v25 = vld [vmem:[%s19232_s3 + $0x4260] sm:$0xff] }
 0x25c   :  { %5363 = vmatprep.subr.mxu1 %v4228_v7  ;;  %5311 = vmatpush2.msra.mxu0 %v3858_v23  ;;  %v2127_v39 = vadd.f32 %v2126_v14, %v842_v36  ;;  %v4372_v15 = vld [vmem:[%s19232_s3 + $0x4220] sm:$0xff]  ;;  %v4146_v14 = vld [vmem:[%s19232_s3 + $0x3b10] sm:$0xff] }
 0x25d   :  { %5364 = vmatpush2.msra.mxu1 %v4227_v26  ;;  %5312 = vmatprep.subr.mxu0 %v3850_v24  ;;  %v2128_v55 = vpop.f32.mrf.mxu0  ;;  %v4164_v36 = vld [vmem:[%s19232_s3 + $0x3ba0] sm:$0xff]  ;;  %v4363_v26 = vld [vmem:[%s19232_s3 + $0x41d8] sm:$0xff] }
 0x25e   :  { %5365 = vmatprep.subr.mxu1 %v4219_v30  ;;  %5313 = vmatpush2.msra.mxu0 %v3849_v32  ;;  %v12419_v9 = vadd.f32 %v2197_v41, %v2127_v39  ;;  %v4156_v7 = vld [vmem:[%s19232_s3 + $0x3b60] sm:$0xff]  ;;  %v2129_v23 = vadd.f32 %v2128_v55, %v846_v18  ;;  %v4155_v24 = vld [vmem:[%s19232_s3 + $0x3b58] sm:$0xff]  ;;  %v4354_v32 = vld [vmem:[%s19232_s3 + $0x4190] sm:$0xff] }
 0x25f   :  { %5366 = vmatpush2.msra.mxu1 %v4218_v35  ;;  %5314 = vmatprep.subr.mxu0 %v3841_v16  ;;  %v4147_v30 = vld [vmem:[%s19232_s3 + $0x3b18] sm:$0xff]  ;;  %v4353_v35 = vld [vmem:[%s19232_s3 + $0x4188] sm:$0xff]  ;;  %v4138_v16 = vld [vmem:[%s19232_s3 + $0x3ad0] sm:$0xff] }
 0x260   :  { %5367 = vmatprep.subr.mxu1 %v4210_v48  ;;  %5315 = vmatpush2.msra.mxu0 %v3840_v49  ;;  %v2200_v39 = vadd.f32 %v2199_v34, %v2129_v23  ;;  %v4345_v41 = vld [vmem:[%s19232_s3 + $0x4148] sm:$0xff]  ;;  %v2232_v49 = vmul.f32 0.2, %v11864_v63  ;;  %v4290_v23 = vld [vmem:[%s19232_s3 + $0x3f90] sm:$0xff]  ;;  %vm2218_vm3 = vcmp.gt.f32.partialorder %v12419_v9, 0.0 }
 0x261   :  { %5368 = vmatpush2.msra.mxu1 %v4209_v44  ;;  %5317 = vmatmul.mubr.f32.vlgmr.msra.gmra.mxu0 %v12428_v57  ;;  %v4137_v48 = vld [vmem:[%s19232_s3 + $0x3ac8] sm:$0xff]  ;;  %v4344_v44 = vld [vmem:[%s19232_s3 + $0x4140] sm:$0xff]  ;;  %v4642_v34 = vld [vmem:[%s19232_s3 + $0x4a90] sm:$0xff] }
 0x262   :  { %5369 = vmatprep.subr.mxu1 %v4201_v12  ;;  %5394 = vmatprep.subr.mxu0 %v4408_v52  ;;  %v4336_v12 = vld [vmem:[%s19232_s3 + $0x4100] sm:$0xff]  ;;  %vm2219_vm1 = vcmp.gt.f32.partialorder %v2200_v39, 0.0  ;;  %v4309_v18 = vld [vmem:[%s19232_s3 + $0x4028] sm:$0xff] }
 0x263   :  { %5370 = vmatpush2.msra.mxu1 %v4200_v22  ;;  %5395 = vmatpush1.msra.mxu0 %v4407_v61  ;;  %v4128_v52 = vld [vmem:[%s19232_s3 + $0x3a80] sm:$0xff]  ;;  %v4335_v22 = vld [vmem:[%s19232_s3 + $0x40f8] sm:$0xff]  ;;  %v2237_v61 = vmul.f32 0.2, %v2200_v39  ;;  %v4677_v55 = vld [vmem:[%s19232_s3 + $0x4ba8] sm:$0xff] }
 0x264   :  { %5458 = vmatprep.mubr.f32.mxu0 %v12446_v62  ;;  %5371 = vmatprep.subr.mxu1 %v4192_v60  ;;  %v4327_v60 = vld [vmem:[%s19232_s3 + $0x40b8] sm:$0xff] }
 0x265   :  { %5396 = vmatprep.subr.mxu0 %v4399_v43  ;;  %5372 = vmatpush2.msra.mxu1 %v4191_v56  ;;  %v4696_v43 = vld [vmem:[%s19232_s3 + $0x4c40] sm:$0xff]  ;;  %v12549_v56 = vsel %vm2214_vm0, %v11864_v63, %v2232_v49  ;;  %v4687_v63 = vld [vmem:[%s19232_s3 + $0x4bf8] sm:$0xff] }
 0x266   :  { %5397 = vmatpush1.msra.mxu0 %v4398_v0  ;;  %5373 = vmatprep.subr.mxu1 %v4183_v37  ;;  %v4326_v0 = vld [vmem:[%s19232_s3 + $0x40b0] sm:$0xff]  ;;  %v4695_v37 = vld [vmem:[%s19232_s3 + $0x4c38] sm:$0xff]  ;;  %v4632_v49 = vld [vmem:[%s19232_s3 + $0x4a40] sm:$0xff] }
 0x267   :  { %5398 = vmatprep.subr.mxu0 %v4390_v31  ;;  %5374 = vmatpush2.msra.mxu1 %v4182_v2  ;;  %v4318_v31 = vld [vmem:[%s19232_s3 + $0x4070] sm:$0xff]  ;;  %v4317_v2 = vld [vmem:[%s19232_s3 + $0x4068] sm:$0xff] }
 0x268   :  { %5399 = vmatpush1.msra.mxu0 %v4389_v47  ;;  %5375 = vmatprep.subr.mxu1 %v4174_v5  ;;  %v12567_v47 = vsel %vm2219_vm1, %v2200_v39, %v2237_v61  ;;  %v4686_v5 = vld [vmem:[%s19232_s3 + $0x4bf0] sm:$0xff]  ;;  %v4552_v39 = vld [vmem:[%s19232_s3 + $0x47c0] sm:$0xff]  ;;  %v4615_v61 = vld [vmem:[%s19232_s3 + $0x49b8] sm:$0xff] }
 0x269   :  { %5400 = vmatprep.subr.mxu0 %v4381_v50  ;;  %5376 = vmatpush2.msra.mxu1 %v4173_v10  ;;  %v4678_v50 = vld [vmem:[%s19232_s3 + $0x4bb0] sm:$0xff]  ;;  %v4308_v10 = vld [vmem:[%s19232_s3 + $0x4020] sm:$0xff] }
 0x26a   :  { %5401 = vmatpush1.msra.mxu0 %v4380_v25  ;;  %5377 = vmatprep.subr.mxu1 %v4165_v40  ;;  %v4300_v25 = vld [vmem:[%s19232_s3 + $0x3fe0] sm:$0xff]  ;;  %v4669_v40 = vld [vmem:[%s19232_s3 + $0x4b68] sm:$0xff] }
 0x26b   :  { %5402 = vmatprep.subr.mxu0 %v4372_v15  ;;  %5378 = vmatpush2.msra.mxu1 %v4164_v36  ;;  %v4299_v15 = vld [vmem:[%s19232_s3 + $0x3fd8] sm:$0xff]  ;;  %v4668_v36 = vld [vmem:[%s19232_s3 + $0x4b60] sm:$0xff] }
 0x26c   :  { %5403 = vmatpush1.msra.mxu0 %v4371_v42  ;;  %5379 = vmatprep.subr.mxu1 %v4156_v7  ;;  %v4291_v42 = vld [vmem:[%s19232_s3 + $0x3f98] sm:$0xff]  ;;  %v4660_v7 = vld [vmem:[%s19232_s3 + $0x4b20] sm:$0xff] }
 0x26d   :  { %5404 = vmatprep.subr.mxu0 %v4363_v26  ;;  %5380 = vmatpush2.msra.mxu1 %v4155_v24  ;;  %v4659_v26 = vld [vmem:[%s19232_s3 + $0x4b18] sm:$0xff]  ;;  %v4282_v24 = vld [vmem:[%s19232_s3 + $0x3f50] sm:$0xff] }
 0x26e   :  { %5405 = vmatpush1.msra.mxu0 %v4362_v27  ;;  %5381 = vmatprep.subr.mxu1 %v4147_v30  ;;  %v4651_v27 = vld [vmem:[%s19232_s3 + $0x4ad8] sm:$0xff]  ;;  %v4281_v30 = vld [vmem:[%s19232_s3 + $0x3f48] sm:$0xff] }
 0x26f   :  { %5406 = vmatprep.subr.mxu0 %v4354_v32  ;;  %5382 = vmatpush2.msra.mxu1 %v4146_v14  ;;  %v4650_v32 = vld [vmem:[%s19232_s3 + $0x4ad0] sm:$0xff]  ;;  %v4273_v14 = vld [vmem:[%s19232_s3 + $0x3f08] sm:$0xff] }
 0x270   :  { %5407 = vmatpush1.msra.mxu0 %v4353_v35  ;;  %5383 = vmatprep.subr.mxu1 %v4138_v16  ;;  %v4272_v35 = vld [vmem:[%s19232_s3 + $0x3f00] sm:$0xff]  ;;  %v4641_v16 = vld [vmem:[%s19232_s3 + $0x4a88] sm:$0xff] }
 0x271   :  { %5408 = vmatprep.subr.mxu0 %v4345_v41  ;;  %5384 = vmatpush2.msra.mxu1 %v4137_v48  ;;  %v4633_v41 = vld [vmem:[%s19232_s3 + $0x4a48] sm:$0xff]  ;;  %v4551_v48 = vld [vmem:[%s19232_s3 + $0x47b8] sm:$0xff] }
 0x272   :  { %5409 = vmatpush1.msra.mxu0 %v4344_v44  ;;  %5385 = vmatprep.subr.mxu1 %v4129_v54  ;;  %v4543_v44 = vld [vmem:[%s19232_s3 + $0x4778] sm:$0xff]  ;;  %v4624_v54 = vld [vmem:[%s19232_s3 + $0x4a00] sm:$0xff] }
 0x273   :  { %5410 = vmatprep.subr.mxu0 %v4336_v12  ;;  %5386 = vmatpush2.msra.mxu1 %v4128_v52  ;;  %v4542_v12 = vld [vmem:[%s19232_s3 + $0x4770] sm:$0xff]  ;;  %v4623_v52 = vld [vmem:[%s19232_s3 + $0x49f8] sm:$0xff] }
 0x274   :  { %5411 = vmatpush1.msra.mxu0 %v4335_v22  ;;  %5388 = vmatmul.mubr.f32.vlgmr.msra.gmra.mxu1 %v12549_v56  ;;  %v4534_v22 = vld [vmem:[%s19232_s3 + $0x4730] sm:$0xff] }
 0x275   :  { %5412 = vmatprep.subr.mxu0 %v4327_v60  ;;  %5465 = vmatprep.subr.mxu1 %v4696_v43  ;;  %v4533_v60 = vld [vmem:[%s19232_s3 + $0x4728] sm:$0xff]  ;;  %v4614_v43 = vld [vmem:[%s19232_s3 + $0x49b0] sm:$0xff] }
 0x276   :  { %5413 = vmatpush1.msra.mxu0 %v4326_v0  ;;  %5466 = vmatpush1.msra.mxu1 %v4695_v37  ;;  %v4525_v0 = vld [vmem:[%s19232_s3 + $0x46e8] sm:$0xff]  ;;  %v4606_v37 = vld [vmem:[%s19232_s3 + $0x4970] sm:$0xff] }
 0x277   :  { %5529 = vmatprep.mubr.f32.mxu1 %v12567_v47  ;;  %5414 = vmatprep.subr.mxu0 %v4318_v31  ;;  %v4524_v31 = vld [vmem:[%s19232_s3 + $0x46e0] sm:$0xff] }
 0x278   :  { %5467 = vmatprep.subr.mxu1 %v4687_v63  ;;  %5415 = vmatpush1.msra.mxu0 %v4317_v2  ;;  %v4605_v63 = vld [vmem:[%s19232_s3 + $0x4968] sm:$0xff]  ;;  %v4516_v2 = vld [vmem:[%s19232_s3 + $0x46a0] sm:$0xff] }
 0x279   :  { %5468 = vmatpush1.msra.mxu1 %v4686_v5  ;;  %5416 = vmatprep.subr.mxu0 %v4309_v18  ;;  %v4597_v5 = vld [vmem:[%s19232_s3 + $0x4928] sm:$0xff]  ;;  %v4515_v18 = vld [vmem:[%s19232_s3 + $0x4698] sm:$0xff] }
 0x27a   :  { %5469 = vmatprep.subr.mxu1 %v4678_v50  ;;  %5417 = vmatpush1.msra.mxu0 %v4308_v10  ;;  %v4596_v50 = vld [vmem:[%s19232_s3 + $0x4920] sm:$0xff]  ;;  %v4507_v10 = vld [vmem:[%s19232_s3 + $0x4658] sm:$0xff] }
 0x27b   :  { %5470 = vmatpush1.msra.mxu1 %v4677_v55  ;;  %5418 = vmatprep.subr.mxu0 %v4300_v25  ;;  %v4588_v55 = vld [vmem:[%s19232_s3 + $0x48e0] sm:$0xff]  ;;  %v4506_v25 = vld [vmem:[%s19232_s3 + $0x4650] sm:$0xff] }
 0x27c   :  { %5471 = vmatprep.subr.mxu1 %v4669_v40  ;;  %5419 = vmatpush1.msra.mxu0 %v4299_v15  ;;  %v4587_v40 = vld [vmem:[%s19232_s3 + $0x48d8] sm:$0xff]  ;;  %v4498_v15 = vld [vmem:[%s19232_s3 + $0x4610] sm:$0xff] }
 0x27d   :  { %5472 = vmatpush1.msra.mxu1 %v4668_v36  ;;  %5420 = vmatprep.subr.mxu0 %v4291_v42  ;;  %v4579_v36 = vld [vmem:[%s19232_s3 + $0x4898] sm:$0xff]  ;;  %v4497_v42 = vld [vmem:[%s19232_s3 + $0x4608] sm:$0xff] }
 0x27e   :  { %5473 = vmatprep.subr.mxu1 %v4660_v7  ;;  %5421 = vmatpush1.msra.mxu0 %v4290_v23  ;;  %v4578_v7 = vld [vmem:[%s19232_s3 + $0x4890] sm:$0xff]  ;;  %v4489_v23 = vld [vmem:[%s19232_s3 + $0x45c8] sm:$0xff] }
 0x27f   :  { %5474 = vmatpush1.msra.mxu1 %v4659_v26  ;;  %5422 = vmatprep.subr.mxu0 %v4282_v24  ;;  %v4570_v26 = vld [vmem:[%s19232_s3 + $0x4850] sm:$0xff]  ;;  %v4488_v24 = vld [vmem:[%s19232_s3 + $0x45c0] sm:$0xff] }
 0x280   :  { %5475 = vmatprep.subr.mxu1 %v4651_v27  ;;  %5423 = vmatpush1.msra.mxu0 %v4281_v30  ;;  %v4569_v27 = vld [vmem:[%s19232_s3 + $0x4848] sm:$0xff]  ;;  %v4480_v30 = vld [vmem:[%s19232_s3 + $0x4580] sm:$0xff] }
 0x281   :  { %5476 = vmatpush1.msra.mxu1 %v4650_v32  ;;  %5424 = vmatprep.subr.mxu0 %v4273_v14  ;;  %v4561_v32 = vld [vmem:[%s19232_s3 + $0x4808] sm:$0xff]  ;;  %v4479_v14 = vld [vmem:[%s19232_s3 + $0x4578] sm:$0xff] }
 0x282   :  { %5477 = vmatprep.subr.mxu1 %v4642_v34  ;;  %5425 = vmatpush1.msra.mxu0 %v4272_v35  ;;  %v4560_v34 = vld [vmem:[%s19232_s3 + $0x4800] sm:$0xff]  ;;  %v4471_v35 = vld [vmem:[%s19232_s3 + $0x4538] sm:$0xff] }
 0x283   :  { %5478 = vmatpush1.msra.mxu1 %v4641_v16  ;;  %5426 = vmatprep.subr.mxu0 %v4552_v39  ;;  %v4840_v16 = vld [vmem:[%s19232_s3 + $0x50c0] sm:$0xff]  ;;  %v4470_v39 = vld [vmem:[%s19232_s3 + $0x4530] sm:$0xff] }
 0x284   :  { %5479 = vmatprep.subr.mxu1 %v4633_v41  ;;  %5427 = vmatpush2.msra.mxu0 %v4551_v48  ;;  %v4839_v41 = vld [vmem:[%s19232_s3 + $0x50b8] sm:$0xff]  ;;  %v4462_v48 = vld [vmem:[%s19232_s3 + $0x44f0] sm:$0xff] }
 0x285   :  { %5480 = vmatpush1.msra.mxu1 %v4632_v49  ;;  %5428 = vmatprep.subr.mxu0 %v4543_v44  ;;  %v4831_v49 = vld [vmem:[%s19232_s3 + $0x5078] sm:$0xff]  ;;  %v4461_v44 = vld [vmem:[%s19232_s3 + $0x44e8] sm:$0xff] }
 0x286   :  { %5481 = vmatprep.subr.mxu1 %v4624_v54  ;;  %5429 = vmatpush2.msra.mxu0 %v4542_v12  ;;  %v4830_v54 = vld [vmem:[%s19232_s3 + $0x5070] sm:$0xff]  ;;  %v4453_v12 = vld [vmem:[%s19232_s3 + $0x44a8] sm:$0xff] }
 0x287   :  { %5482 = vmatpush1.msra.mxu1 %v4623_v52  ;;  %5430 = vmatprep.subr.mxu0 %v4534_v22  ;;  %v4822_v52 = vld [vmem:[%s19232_s3 + $0x5030] sm:$0xff]  ;;  %v4452_v22 = vld [vmem:[%s19232_s3 + $0x44a0] sm:$0xff] }
 0x288   :  { %5483 = vmatprep.subr.mxu1 %v4615_v61  ;;  %5431 = vmatpush2.msra.mxu0 %v4533_v60  ;;  %v4821_v61 = vld [vmem:[%s19232_s3 + $0x5028] sm:$0xff]  ;;  %v4444_v60 = vld [vmem:[%s19232_s3 + $0x4460] sm:$0xff] }
 0x289   :  { %5484 = vmatpush1.msra.mxu1 %v4614_v43  ;;  %5432 = vmatprep.subr.mxu0 %v4525_v0  ;;  %v4813_v43 = vld [vmem:[%s19232_s3 + $0x4fe8] sm:$0xff]  ;;  %v4443_v0 = vld [vmem:[%s19232_s3 + $0x4458] sm:$0xff] }
 0x28a   :  { %5485 = vmatprep.subr.mxu1 %v4606_v37  ;;  %5433 = vmatpush2.msra.mxu0 %v4524_v31  ;;  %v4812_v37 = vld [vmem:[%s19232_s3 + $0x4fe0] sm:$0xff]  ;;  %v4435_v31 = vld [vmem:[%s19232_s3 + $0x4418] sm:$0xff] }
 0x28b   :  { %5486 = vmatpush1.msra.mxu1 %v4605_v63  ;;  %5434 = vmatprep.subr.mxu0 %v4516_v2  ;;  %v4804_v63 = vld [vmem:[%s19232_s3 + $0x4fa0] sm:$0xff]  ;;  %v4434_v2 = vld [vmem:[%s19232_s3 + $0x4410] sm:$0xff] }
 0x28c   :  { %5487 = vmatprep.subr.mxu1 %v4597_v5  ;;  %5435 = vmatpush2.msra.mxu0 %v4515_v18  ;;  %v4803_v5 = vld [vmem:[%s19232_s3 + $0x4f98] sm:$0xff]  ;;  %v4426_v18 = vld [vmem:[%s19232_s3 + $0x43d0] sm:$0xff] }
 0x28d   :  { %5488 = vmatpush1.msra.mxu1 %v4596_v50  ;;  %5436 = vmatprep.subr.mxu0 %v4507_v10  ;;  %v4795_v50 = vld [vmem:[%s19232_s3 + $0x4f58] sm:$0xff]  ;;  %v4425_v10 = vld [vmem:[%s19232_s3 + $0x43c8] sm:$0xff] }
 0x28e   :  { %5489 = vmatprep.subr.mxu1 %v4588_v55  ;;  %5437 = vmatpush2.msra.mxu0 %v4506_v25  ;;  %v2234_v55 = vmul.f32 0.2, %v11992_v8  ;;  %v4794_v25 = vld [vmem:[%s19232_s3 + $0x4f50] sm:$0xff] }
 0x28f   :  { %5490 = vmatpush1.msra.mxu1 %v4587_v40  ;;  %5438 = vmatprep.subr.mxu0 %v4498_v15  ;;  %v4417_v40 = vld [vmem:[%s19232_s3 + $0x4388] sm:$0xff]  ;;  %v4786_v15 = vld [vmem:[%s19232_s3 + $0x4f10] sm:$0xff] }
 0x290   :  { %5491 = vmatprep.subr.mxu1 %v4579_v36  ;;  %5439 = vmatpush2.msra.mxu0 %v4497_v42  ;;  %v4416_v36 = vld [vmem:[%s19232_s3 + $0x4380] sm:$0xff]  ;;  %v4785_v42 = vld [vmem:[%s19232_s3 + $0x4f08] sm:$0xff] }
 0x291   :  { %5492 = vmatpush1.msra.mxu1 %v4578_v7  ;;  %5440 = vmatprep.subr.mxu0 %v4489_v23  ;;  %v4777_v7 = vld [vmem:[%s19232_s3 + $0x4ec8] sm:$0xff]  ;;  %v2394_v23 = vld [vmem:[%s19232_s3 + $0x450] sm:$0xff] }
 0x292   :  { %5493 = vmatprep.subr.mxu1 %v4570_v26  ;;  %5441 = vmatpush2.msra.mxu0 %v4488_v24  ;;  %v12834_v26 = vsel %vm2216_vm2, %v11992_v8, %v2234_v55  ;;  %v4776_v24 = vld [vmem:[%s19232_s3 + $0x4ec0] sm:$0xff]  ;;  %v2385_v8 = vld [vmem:[%s19232_s3 + $0x408] sm:$0xff]  ;;  %v4722_v55 = vld [vmem:[%s19232_s3 + $0x4d10] sm:$0xff] }
 0x293   :  { %5494 = vmatpush1.msra.mxu1 %v4569_v27  ;;  %5442 = vmatprep.subr.mxu0 %v4480_v30  ;;  %v2393_v27 = vld [vmem:[%s19232_s3 + $0x448] sm:$0xff]  ;;  %v4768_v30 = vld [vmem:[%s19232_s3 + $0x4e80] sm:$0xff] }
 0x294   :  { %5495 = vmatprep.subr.mxu1 %v4561_v32  ;;  %5443 = vmatpush2.msra.mxu0 %v4479_v14  ;;  %v4767_v32 = vld [vmem:[%s19232_s3 + $0x4e78] sm:$0xff]  ;;  %v2384_v14 = vld [vmem:[%s19232_s3 + $0x400] sm:$0xff] }
 0x295   :  { %5496 = vmatpush1.msra.mxu1 %v4560_v34  ;;  %5444 = vmatprep.subr.mxu0 %v4471_v35  ;;  %v4759_v34 = vld [vmem:[%s19232_s3 + $0x4e38] sm:$0xff]  ;;  %v4848_v35 = vld [vmem:[%s19233_s4] sm:$0xff] }
 0x296   :  { %5497 = vmatprep.subr.mxu1 %v4840_v16  ;;  %5445 = vmatpush2.msra.mxu0 %v4470_v39  ;;  %v2376_v16 = vld [vmem:[%s19232_s3 + $0x3c0] sm:$0xff]  ;;  %v4758_v39 = vld [vmem:[%s19232_s3 + $0x4e30] sm:$0xff] }
 0x297   :  { %5498 = vmatpush2.msra.mxu1 %v4839_v41  ;;  %5446 = vmatprep.subr.mxu0 %v4462_v48  ;;  %v2375_v41 = vld [vmem:[%s19232_s3 + $0x3b8] sm:$0xff]  ;;  %v4750_v48 = vld [vmem:[%s19232_s3 + $0x4df0] sm:$0xff] }
 0x298   :  { %5499 = vmatprep.subr.mxu1 %v4831_v49  ;;  %5447 = vmatpush2.msra.mxu0 %v4461_v44  ;;  %v2367_v49 = vld [vmem:[%s19232_s3 + $0x378] sm:$0xff]  ;;  %v4749_v44 = vld [vmem:[%s19232_s3 + $0x4de8] sm:$0xff] }
 0x299   :  { %5500 = vmatpush2.msra.mxu1 %v4830_v54  ;;  %5448 = vmatprep.subr.mxu0 %v4453_v12  ;;  %v4855_v54 = vrot.slane %v4848_v35, %v10146_v1  ;;  %v2366_v12 = vld [vmem:[%s19232_s3 + $0x370] sm:$0xff] }
 0x29a   :  { %5501 = vmatprep.subr.mxu1 %v4822_v52  ;;  %5449 = vmatpush2.msra.mxu0 %v4452_v22  ;;  %v4741_v52 = vld [vmem:[%s19232_s3 + $0x4da8] sm:$0xff]  ;;  %v4963_v22 = vpop.f32.mrf.mxu1  ;;  %v2682_v35 = vld [vmem:[%s19232_s3 + $0xd50] sm:$0xff] }
 0x29b   :  { %5502 = vmatpush2.msra.mxu1 %v4821_v61  ;;  %5450 = vmatprep.subr.mxu0 %v4444_v60  ;;  %v2358_v61 = vld [vmem:[%s19232_s3 + $0x330] sm:$0xff]  ;;  %v4740_v60 = vld [vmem:[%s19232_s3 + $0x4da0] sm:$0xff] }
 0x29c   :  { %5503 = vmatprep.subr.mxu1 %v4813_v43  ;;  %5451 = vmatpush2.msra.mxu0 %v4443_v0  ;;  %v2357_v43 = vld [vmem:[%s19232_s3 + $0x328] sm:$0xff]  ;;  %v4732_v0 = vld [vmem:[%s19232_s3 + $0x4d60] sm:$0xff] }
 0x29d   :  { %5504 = vmatpush2.msra.mxu1 %v4812_v37  ;;  %5452 = vmatprep.subr.mxu0 %v4435_v31  ;;  %v5034_v37 = vpop.f32.mrf.mxu0  ;;  %v2349_v31 = vld [vmem:[%s19232_s3 + $0x2e8] sm:$0xff] }
 0x29e   :  { %5505 = vmatprep.subr.mxu1 %v4804_v63  ;;  %5453 = vmatpush2.msra.mxu0 %v4434_v2  ;;  %v4731_v63 = vld [vmem:[%s19232_s3 + $0x4d58] sm:$0xff]  ;;  %v4964_v2 = vadd.f32 %v4963_v22, %v4855_v54 }
 0x29f   :  { %5506 = vmatpush2.msra.mxu1 %v4803_v5  ;;  %5454 = vmatprep.subr.mxu0 %v4426_v18  ;;  %v2348_v5 = vld [vmem:[%s19232_s3 + $0x2e0] sm:$0xff]  ;;  %v4723_v18 = vld [vmem:[%s19232_s3 + $0x4d18] sm:$0xff] }
 0x2a0   :  { %5507 = vmatprep.subr.mxu1 %v4795_v50  ;;  %5455 = vmatpush2.msra.mxu0 %v4425_v10  ;;  %v12911_v50 = vpop.f32.mrf.mxu1  ;;  %v2340_v10 = vld [vmem:[%s19232_s3 + $0x2a0] sm:$0xff]  ;;  %v2295_v54 = vld [vmem:[%s19232_s3 + $0x138] sm:$0xff] }
 0x2a1   :  { %5508 = vmatpush2.msra.mxu1 %v4794_v25  ;;  %5456 = vmatprep.subr.mxu0 %v4417_v40  ;;  %v5035_v25 = vadd.f32 %v5034_v37, %v4964_v2  ;;  %v2339_v40 = vld [vmem:[%s19232_s3 + $0x298] sm:$0xff]  ;;  %v2277_v37 = vld [vmem:[%s19232_s3 + $0xa8] sm:$0xff] }
 0x2a2   :  { %5509 = vmatprep.subr.mxu1 %v4786_v15  ;;  %5457 = vmatpush2.msra.mxu0 %v4416_v36  ;;  %v4714_v15 = vld [vmem:[%s19232_s3 + $0x4cd0] sm:$0xff]  ;;  %v2331_v36 = vld [vmem:[%s19232_s3 + $0x258] sm:$0xff]  ;;  %v2645_v2 = vld [vmem:[%s19232_s3 + $0xc28] sm:$0xff] }
 0x2a3   :  { %5510 = vmatpush2.msra.mxu1 %v4785_v42  ;;  %5459 = vmatmul.mubr.f32.vlgmr.msra.gmra.mxu0 %v12834_v26  ;;  %v4713_v42 = vld [vmem:[%s19232_s3 + $0x4cc8] sm:$0xff]  ;;  %v2663_v22 = vld [vmem:[%s19232_s3 + $0xcb8] sm:$0xff] }
 0x2a4   :  { %5511 = vmatprep.subr.mxu1 %v4777_v7  ;;  %5536 = vmatprep.subr.mxu0 %v2394_v23  ;;  %v2236_v23 = vmul.f32 0.2, %v12419_v9 }
 0x2a5   :  { %5512 = vmatpush2.msra.mxu1 %v4776_v24  ;;  %5537 = vmatpush1.msra.mxu0 %v2393_v27  ;;  %v2330_v24 = vld [vmem:[%s19232_s3 + $0x250] sm:$0xff]  ;;  %v4705_v27 = vld [vmem:[%s19232_s3 + $0x4c88] sm:$0xff] }
 0x2a6   :  { %5600 = vmatprep.mubr.f32.mxu0 %v10852_v3  ;;  %5513 = vmatprep.subr.mxu1 %v4768_v30 }
 0x2a7   :  { %5538 = vmatprep.subr.mxu0 %v2385_v8  ;;  %5514 = vmatpush2.msra.mxu1 %v4767_v32  ;;  %v2322_v8 = vld [vmem:[%s19232_s3 + $0x210] sm:$0xff]  ;;  %v4704_v32 = vld [vmem:[%s19232_s3 + $0x4c80] sm:$0xff] }
 0x2a8   :  { %5539 = vmatpush1.msra.mxu0 %v2384_v14  ;;  %5515 = vmatprep.subr.mxu1 %v4759_v34  ;;  %v2321_v14 = vld [vmem:[%s19232_s3 + $0x208] sm:$0xff] }
 0x2a9   :  { %5540 = vmatprep.subr.mxu0 %v2376_v16  ;;  %5516 = vmatpush2.msra.mxu1 %v4758_v39  ;;  %v2313_v34 = vld [vmem:[%s19232_s3 + $0x1c8] sm:$0xff]  ;;  %v12957_v16 = vsel %vm2218_vm3, %v12419_v9, %v2236_v23  ;;  %v2312_v39 = vld [vmem:[%s19232_s3 + $0x1c0] sm:$0xff] }
 0x2aa   :  { %5541 = vmatpush1.msra.mxu0 %v2375_v41  ;;  %5517 = vmatprep.subr.mxu1 %v4750_v48  ;;  %v2681_v41 = vld [vmem:[%s19232_s3 + $0xd48] sm:$0xff]  ;;  %v2304_v48 = vld [vmem:[%s19232_s3 + $0x180] sm:$0xff] }
 0x2ab   :  { %5542 = vmatprep.subr.mxu0 %v2367_v49  ;;  %5518 = vmatpush2.msra.mxu1 %v4749_v44  ;;  %v2673_v9 = vld [vmem:[%s19232_s3 + $0xd08] sm:$0xff]  ;;  %v2303_v49 = vld [vmem:[%s19232_s3 + $0x178] sm:$0xff]  ;;  %v2672_v44 = vld [vmem:[%s19232_s3 + $0xd00] sm:$0xff] }
 0x2ac   :  { %5543 = vmatpush1.msra.mxu0 %v2366_v12  ;;  %5519 = vmatprep.subr.mxu1 %v4741_v52  ;;  %v2664_v12 = vld [vmem:[%s19232_s3 + $0xcc0] sm:$0xff]  ;;  %v2294_v52 = vld [vmem:[%s19232_s3 + $0x130] sm:$0xff]  ;;  %v2537_v23 = vld [vmem:[%s19232_s3 + $0x8c8] sm:$0xff] }
 0x2ad   :  { %5544 = vmatprep.subr.mxu0 %v2358_v61  ;;  %5520 = vmatpush2.msra.mxu1 %v4740_v60  ;;  %v2286_v61 = vld [vmem:[%s19232_s3 + $0xf0] sm:$0xff]  ;;  %v2655_v60 = vld [vmem:[%s19232_s3 + $0xc78] sm:$0xff] }
 0x2ae   :  { %5545 = vmatpush1.msra.mxu0 %v2357_v43  ;;  %5521 = vmatprep.subr.mxu1 %v4732_v0  ;;  %v2285_v43 = vld [vmem:[%s19232_s3 + $0xe8] sm:$0xff]  ;;  %v2654_v0 = vld [vmem:[%s19232_s3 + $0xc70] sm:$0xff] }
 0x2af   :  { %5546 = vmatprep.subr.mxu0 %v2349_v31  ;;  %5522 = vmatpush2.msra.mxu1 %v4731_v63  ;;  %v2646_v31 = vld [vmem:[%s19232_s3 + $0xc30] sm:$0xff]  ;;  %v2276_v63 = vld [vmem:[%s19232_s3 + $0xa0] sm:$0xff] }
 0x2b0   :  { %5547 = vmatpush1.msra.mxu0 %v2348_v5  ;;  %5523 = vmatprep.subr.mxu1 %v4723_v18  ;;  %v5105_v7 = vpop.f32.mrf.mxu1  ;;  %v2268_v5 = vld [vmem:[%s19232_s3 + $0x60] sm:$0xff]  ;;  %v2637_v18 = vld [vmem:[%s19232_s3 + $0xbe8] sm:$0xff] }
 0x2b1   :  { %5548 = vmatprep.subr.mxu0 %v2340_v10  ;;  %5524 = vmatpush2.msra.mxu1 %v4722_v55  ;;  %v12938_v30 = vadd.f32 %v5105_v7, %v5035_v25  ;;  %v2267_v10 = vld [vmem:[%s19232_s3 + $0x58] sm:$0xff]  ;;  %v2636_v55 = vld [vmem:[%s19232_s3 + $0xbe0] sm:$0xff] }
 0x2b2   :  { %5549 = vmatpush1.msra.mxu0 %v2339_v40  ;;  %5525 = vmatprep.subr.mxu1 %v4714_v15  ;;  %v2259_v25 = vld [vmem:[%s19232_s3 + $0x18] sm:$0xff]  ;;  %v2628_v40 = vld [vmem:[%s19232_s3 + $0xba0] sm:$0xff]  ;;  %v2258_v15 = vld [vmem:[%s19232_s3 + $0x10] sm:$0xff] }
 0x2b3   :  { %5550 = vmatprep.subr.mxu0 %v2331_v36  ;;  %5526 = vmatpush2.msra.mxu1 %v4713_v42  ;;  %v2627_v36 = vld [vmem:[%s19232_s3 + $0xb98] sm:$0xff]  ;;  %v2538_v42 = vld [vmem:[%s19232_s3 + $0x8d0] sm:$0xff] }
 0x2b4   :  { %5551 = vmatpush1.msra.mxu0 %v2330_v24  ;;  %5527 = vmatprep.subr.mxu1 %v4705_v27  ;;  %v2619_v7 = vld [vmem:[%s19232_s3 + $0xb58] sm:$0xff]  ;;  %v2618_v24 = vld [vmem:[%s19232_s3 + $0xb50] sm:$0xff]  ;;  %v2529_v27 = vld [vmem:[%s19232_s3 + $0x888] sm:$0xff] }
 0x2b5   :  { %5552 = vmatprep.subr.mxu0 %v2322_v8  ;;  %5528 = vmatpush2.msra.mxu1 %v4704_v32  ;;  %v2610_v8 = vld [vmem:[%s19232_s3 + $0xb10] sm:$0xff]  ;;  %v2528_v32 = vld [vmem:[%s19232_s3 + $0x880] sm:$0xff] }
 0x2b6   :  { %5553 = vmatpush1.msra.mxu0 %v2321_v14  ;;  %5530 = vmatmul.mubr.f32.vlgmr.msra.gmra.mxu1 %v12957_v16  ;;  %v2609_v14 = vld [vmem:[%s19232_s3 + $0xb08] sm:$0xff] }
 0x2b7   :  { %5554 = vmatprep.subr.mxu0 %v2313_v34  ;;  %5607 = vmatprep.subr.mxu1 %v2682_v35  ;;  %v2520_v34 = vld [vmem:[%s19232_s3 + $0x840] sm:$0xff]  ;;  %v2601_v35 = vld [vmem:[%s19232_s3 + $0xac8] sm:$0xff] }
 0x2b8   :  { %5555 = vmatpush1.msra.mxu0 %v2312_v39  ;;  %5608 = vmatpush1.msra.mxu1 %v2681_v41  ;;  %v2519_v39 = vld [vmem:[%s19232_s3 + $0x838] sm:$0xff]  ;;  %v2600_v41 = vld [vmem:[%s19232_s3 + $0xac0] sm:$0xff] }
 0x2b9   :  { %5671 = vmatprep.mubr.f32.mxu1 %v11157_v33  ;;  %5556 = vmatprep.subr.mxu0 %v2304_v48  ;;  %v2511_v48 = vld [vmem:[%s19232_s3 + $0x7f8] sm:$0xff] }
 0x2ba   :  { %5609 = vmatprep.subr.mxu1 %v2673_v9  ;;  %5557 = vmatpush1.msra.mxu0 %v2303_v49  ;;  %v2592_v9 = vld [vmem:[%s19232_s3 + $0xa80] sm:$0xff]  ;;  %v2510_v49 = vld [vmem:[%s19232_s3 + $0x7f0] sm:$0xff] }
 0x2bb   :  { %5610 = vmatpush1.msra.mxu1 %v2672_v44  ;;  %5558 = vmatprep.subr.mxu0 %v2295_v54  ;;  %v2591_v44 = vld [vmem:[%s19232_s3 + $0xa78] sm:$0xff]  ;;  %v2502_v54 = vld [vmem:[%s19232_s3 + $0x7b0] sm:$0xff] }
 0x2bc   :  { %5611 = vmatprep.subr.mxu1 %v2664_v12  ;;  %5559 = vmatpush1.msra.mxu0 %v2294_v52  ;;  %v2583_v12 = vld [vmem:[%s19232_s3 + $0xa38] sm:$0xff]  ;;  %v2501_v52 = vld [vmem:[%s19232_s3 + $0x7a8] sm:$0xff] }
 0x2bd   :  { %5612 = vmatpush1.msra.mxu1 %v2663_v22  ;;  %5560 = vmatprep.subr.mxu0 %v2286_v61  ;;  %v2582_v22 = vld [vmem:[%s19232_s3 + $0xa30] sm:$0xff]  ;;  %v2493_v61 = vld [vmem:[%s19232_s3 + $0x768] sm:$0xff] }
 0x2be   :  { %5613 = vmatprep.subr.mxu1 %v2655_v60  ;;  %5561 = vmatpush1.msra.mxu0 %v2285_v43  ;;  %v2574_v60 = vld [vmem:[%s19232_s3 + $0x9f0] sm:$0xff]  ;;  %v2492_v43 = vld [vmem:[%s19232_s3 + $0x760] sm:$0xff] }
 0x2bf   :  { %5614 = vmatpush1.msra.mxu1 %v2654_v0  ;;  %5562 = vmatprep.subr.mxu0 %v2277_v37  ;;  %v2573_v0 = vld [vmem:[%s19232_s3 + $0x9e8] sm:$0xff]  ;;  %v2484_v37 = vld [vmem:[%s19232_s3 + $0x720] sm:$0xff] }
 0x2c0   :  { %5615 = vmatprep.subr.mxu1 %v2646_v31  ;;  %5563 = vmatpush1.msra.mxu0 %v2276_v63  ;;  %v2565_v31 = vld [vmem:[%s19232_s3 + $0x9a8] sm:$0xff]  ;;  %v2483_v63 = vld [vmem:[%s19232_s3 + $0x718] sm:$0xff] }
 0x2c1   :  { %5616 = vmatpush1.msra.mxu1 %v2645_v2  ;;  %5564 = vmatprep.subr.mxu0 %v2268_v5  ;;  %v2564_v2 = vld [vmem:[%s19232_s3 + $0x9a0] sm:$0xff]  ;;  %v2475_v5 = vld [vmem:[%s19232_s3 + $0x6d8] sm:$0xff] }
 0x2c2   :  { %5617 = vmatprep.subr.mxu1 %v2637_v18  ;;  %5565 = vmatpush1.msra.mxu0 %v2267_v10  ;;  %v2556_v18 = vld [vmem:[%s19232_s3 + $0x960] sm:$0xff]  ;;  %v2474_v10 = vld [vmem:[%s19232_s3 + $0x6d0] sm:$0xff] }
 0x2c3   :  { %5618 = vmatpush1.msra.mxu1 %v2636_v55  ;;  %5566 = vmatprep.subr.mxu0 %v2259_v25  ;;  %v2555_v55 = vld [vmem:[%s19232_s3 + $0x958] sm:$0xff]  ;;  %v2466_v25 = vld [vmem:[%s19232_s3 + $0x690] sm:$0xff] }
 0x2c4   :  { %5619 = vmatprep.subr.mxu1 %v2628_v40  ;;  %5567 = vmatpush1.msra.mxu0 %v2258_v15  ;;  %v2547_v40 = vld [vmem:[%s19232_s3 + $0x918] sm:$0xff]  ;;  %v2465_v15 = vld [vmem:[%s19232_s3 + $0x688] sm:$0xff] }
 0x2c5   :  { %5620 = vmatpush1.msra.mxu1 %v2627_v36  ;;  %5568 = vmatprep.subr.mxu0 %v2538_v42  ;;  %v2546_v36 = vld [vmem:[%s19232_s3 + $0x910] sm:$0xff]  ;;  %v2457_v42 = vld [vmem:[%s19232_s3 + $0x648] sm:$0xff] }
 0x2c6   :  { %5621 = vmatprep.subr.mxu1 %v2619_v7  ;;  %5569 = vmatpush2.msra.mxu0 %v2537_v23  ;;  %v2826_v7 = vld [vmem:[%s19232_s3 + $0x11d0] sm:$0xff]  ;;  %v2456_v23 = vld [vmem:[%s19232_s3 + $0x640] sm:$0xff] }
 0x2c7   :  { %5622 = vmatpush1.msra.mxu1 %v2618_v24  ;;  %5570 = vmatprep.subr.mxu0 %v2529_v27  ;;  %v2825_v24 = vld [vmem:[%s19232_s3 + $0x11c8] sm:$0xff]  ;;  %v2448_v27 = vld [vmem:[%s19232_s3 + $0x600] sm:$0xff] }
 0x2c8   :  { %5623 = vmatprep.subr.mxu1 %v2610_v8  ;;  %5571 = vmatpush2.msra.mxu0 %v2528_v32  ;;  %v2817_v8 = vld [vmem:[%s19232_s3 + $0x1188] sm:$0xff]  ;;  %v2447_v32 = vld [vmem:[%s19232_s3 + $0x5f8] sm:$0xff] }
 0x2c9   :  { %5624 = vmatpush1.msra.mxu1 %v2609_v14  ;;  %5572 = vmatprep.subr.mxu0 %v2520_v34  ;;  %v2816_v14 = vld [vmem:[%s19232_s3 + $0x1180] sm:$0xff]  ;;  %v2439_v34 = vld [vmem:[%s19232_s3 + $0x5b8] sm:$0xff] }
 0x2ca   :  { %5625 = vmatprep.subr.mxu1 %v2601_v35  ;;  %5573 = vmatpush2.msra.mxu0 %v2519_v39  ;;  %v2808_v35 = vld [vmem:[%s19232_s3 + $0x1140] sm:$0xff]  ;;  %v2438_v39 = vld [vmem:[%s19232_s3 + $0x5b0] sm:$0xff] }
 0x2cb   :  { %5626 = vmatpush1.msra.mxu1 %v2600_v41  ;;  %5574 = vmatprep.subr.mxu0 %v2511_v48  ;;  %v2807_v41 = vld [vmem:[%s19232_s3 + $0x1138] sm:$0xff]  ;;  %v2430_v48 = vld [vmem:[%s19232_s3 + $0x570] sm:$0xff] }
 0x2cc   :  { %5627 = vmatprep.subr.mxu1 %v2592_v9  ;;  %5575 = vmatpush2.msra.mxu0 %v2510_v49  ;;  %v2799_v9 = vld [vmem:[%s19232_s3 + $0x10f8] sm:$0xff]  ;;  %v2429_v49 = vld [vmem:[%s19232_s3 + $0x568] sm:$0xff] }
 0x2cd   :  { %5628 = vmatpush1.msra.mxu1 %v2591_v44  ;;  %5576 = vmatprep.subr.mxu0 %v2502_v54  ;;  %v2798_v44 = vld [vmem:[%s19232_s3 + $0x10f0] sm:$0xff]  ;;  %v2421_v54 = vld [vmem:[%s19232_s3 + $0x528] sm:$0xff] }
 0x2ce   :  { %5629 = vmatprep.subr.mxu1 %v2583_v12  ;;  %5577 = vmatpush2.msra.mxu0 %v2501_v52  ;;  %v2790_v12 = vld [vmem:[%s19232_s3 + $0x10b0] sm:$0xff]  ;;  %v2420_v52 = vld [vmem:[%s19232_s3 + $0x520] sm:$0xff] }
 0x2cf   :  { %5630 = vmatpush1.msra.mxu1 %v2582_v22  ;;  %5578 = vmatprep.subr.mxu0 %v2493_v61  ;;  %v2789_v22 = vld [vmem:[%s19232_s3 + $0x10a8] sm:$0xff]  ;;  %v2412_v61 = vld [vmem:[%s19232_s3 + $0x4e0] sm:$0xff] }
 0x2d0   :  { %5631 = vmatprep.subr.mxu1 %v2574_v60  ;;  %5579 = vmatpush2.msra.mxu0 %v2492_v43  ;;  %v2781_v60 = vld [vmem:[%s19232_s3 + $0x1068] sm:$0xff]  ;;  %v2411_v43 = vld [vmem:[%s19232_s3 + $0x4d8] sm:$0xff] }
 0x2d1   :  { %5632 = vmatpush1.msra.mxu1 %v2573_v0  ;;  %5580 = vmatprep.subr.mxu0 %v2484_v37  ;;  %v2780_v0 = vld [vmem:[%s19232_s3 + $0x1060] sm:$0xff]  ;;  %v2403_v37 = vld [vmem:[%s19232_s3 + $0x498] sm:$0xff] }
 0x2d2   :  { %5633 = vmatprep.subr.mxu1 %v2565_v31  ;;  %5581 = vmatpush2.msra.mxu0 %v2483_v63  ;;  %v2772_v31 = vld [vmem:[%s19232_s3 + $0x1020] sm:$0xff]  ;;  %v2402_v63 = vld [vmem:[%s19232_s3 + $0x490] sm:$0xff] }
 0x2d3   :  { %5634 = vmatpush1.msra.mxu1 %v2564_v2  ;;  %5582 = vmatprep.subr.mxu0 %v2475_v5  ;;  %v2771_v2 = vld [vmem:[%s19232_s3 + $0x1018] sm:$0xff] }
 0x2d4   :  { %5635 = vmatprep.subr.mxu1 %v2556_v18  ;;  %5583 = vmatpush2.msra.mxu0 %v2474_v10  ;;  %v2763_v5 = vld [vmem:[%s19232_s3 + $0xfd8] sm:$0xff]  ;;  %v2970_v18 = vld [vmem:[%s19232_s3 + $0x1650] sm:$0xff] }
 0x2d5   :  { %5636 = vmatpush1.msra.mxu1 %v2555_v55  ;;  %5584 = vmatprep.subr.mxu0 %v2466_v25  ;;  %v2762_v10 = vld [vmem:[%s19232_s3 + $0xfd0] sm:$0xff]  ;;  %v2969_v55 = vld [vmem:[%s19232_s3 + $0x1648] sm:$0xff] }
 0x2d6   :  { %5637 = vmatprep.subr.mxu1 %v2547_v40  ;;  %5585 = vmatpush2.msra.mxu0 %v2465_v15  ;;  %v2754_v25 = vld [vmem:[%s19232_s3 + $0xf90] sm:$0xff]  ;;  %v2961_v40 = vld [vmem:[%s19232_s3 + $0x1608] sm:$0xff] }
 0x2d7   :  { %5638 = vmatpush1.msra.mxu1 %v2546_v36  ;;  %5586 = vmatprep.subr.mxu0 %v2457_v42  ;;  %v2753_v15 = vld [vmem:[%s19232_s3 + $0xf88] sm:$0xff]  ;;  %v2960_v36 = vld [vmem:[%s19232_s3 + $0x1600] sm:$0xff] }
 0x2d8   :  { %5639 = vmatprep.subr.mxu1 %v2826_v7  ;;  %5587 = vmatpush2.msra.mxu0 %v2456_v23  ;;  %v2745_v42 = vld [vmem:[%s19232_s3 + $0xf48] sm:$0xff]  ;;  %v2952_v7 = vld [vmem:[%s19232_s3 + $0x15c0] sm:$0xff] }
 0x2d9   :  { %5640 = vmatpush2.msra.mxu1 %v2825_v24  ;;  %5588 = vmatprep.subr.mxu0 %v2448_v27  ;;  %v2744_v23 = vld [vmem:[%s19232_s3 + $0xf40] sm:$0xff]  ;;  %v2951_v24 = vld [vmem:[%s19232_s3 + $0x15b8] sm:$0xff] }
 0x2da   :  { %5641 = vmatprep.subr.mxu1 %v2817_v8  ;;  %5589 = vmatpush2.msra.mxu0 %v2447_v32  ;;  %v2736_v27 = vld [vmem:[%s19232_s3 + $0xf00] sm:$0xff]  ;;  %v2943_v8 = vld [vmem:[%s19232_s3 + $0x1578] sm:$0xff] }
 0x2db   :  { %5642 = vmatpush2.msra.mxu1 %v2816_v14  ;;  %5590 = vmatprep.subr.mxu0 %v2439_v34  ;;  %v2735_v32 = vld [vmem:[%s19232_s3 + $0xef8] sm:$0xff]  ;;  %v2942_v14 = vld [vmem:[%s19232_s3 + $0x1570] sm:$0xff] }
 0x2dc   :  { %5643 = vmatprep.subr.mxu1 %v2808_v35  ;;  %5591 = vmatpush2.msra.mxu0 %v2438_v39  ;;  %v2727_v34 = vld [vmem:[%s19232_s3 + $0xeb8] sm:$0xff]  ;;  %v13284_v35 = vpop.f32.mrf.mxu0  ;;  %v2934_v39 = vld [vmem:[%s19232_s3 + $0x1530] sm:$0xff] }
 0x2dd   :  { %5644 = vmatpush2.msra.mxu1 %v2807_v41  ;;  %5592 = vmatprep.subr.mxu0 %v2430_v48  ;;  %v2726_v41 = vld [vmem:[%s19232_s3 + $0xeb0] sm:$0xff]  ;;  %v2933_v48 = vld [vmem:[%s19232_s3 + $0x1528] sm:$0xff] }
 0x2de   :  { %5645 = vmatprep.subr.mxu1 %v2799_v9  ;;  %5593 = vmatpush2.msra.mxu0 %v2429_v49  ;;  %v2718_v9 = vld [vmem:[%s19232_s3 + $0xe70] sm:$0xff] }
 0x2df   :  { %5646 = vmatpush2.msra.mxu1 %v2798_v44  ;;  %5594 = vmatprep.subr.mxu0 %v2421_v54  ;;  %v5176_v49 = vpop.f32.mrf.mxu0  ;;  %v2925_v44 = vld [vmem:[%s19232_s3 + $0x14e8] sm:$0xff] }
 0x2e0   :  { %5647 = vmatprep.subr.mxu1 %v2790_v12  ;;  %5595 = vmatpush2.msra.mxu0 %v2420_v52  ;;  %v2717_v54 = vld [vmem:[%s19232_s3 + $0xe68] sm:$0xff]  ;;  %v2924_v12 = vld [vmem:[%s19232_s3 + $0x14e0] sm:$0xff] }
 0x2e1   :  { %5648 = vmatpush2.msra.mxu1 %v2789_v22  ;;  %5596 = vmatprep.subr.mxu0 %v2412_v61  ;;  %v2709_v52 = vld [vmem:[%s19232_s3 + $0xe28] sm:$0xff]  ;;  %v13310_v22 = vpop.f32.mrf.mxu1  ;;  %v2916_v61 = vld [vmem:[%s19232_s3 + $0x14a0] sm:$0xff] }
 0x2e2   :  { %5649 = vmatprep.subr.mxu1 %v2781_v60  ;;  %5597 = vmatpush2.msra.mxu0 %v2411_v43  ;;  %v2708_v60 = vld [vmem:[%s19232_s3 + $0xe20] sm:$0xff]  ;;  %v5177_v43 = vadd.f32 %v5176_v49, %v12938_v30  ;;  %v2699_v30 = vld [vmem:[%s19232_s3 + $0xdd8] sm:$0xff]  ;;  %v2853_v49 = vld [vmem:[%s19232_s3 + $0x12a8] sm:$0xff] }
 0x2e3   :  { %5650 = vmatpush2.msra.mxu1 %v2780_v0  ;;  %5598 = vmatprep.subr.mxu0 %v2403_v37  ;;  %v2915_v0 = vld [vmem:[%s19232_s3 + $0x1498] sm:$0xff]  ;;  %v2700_v37 = vld [vmem:[%s19232_s3 + $0xde0] sm:$0xff] }
 0x2e4   :  { %5651 = vmatprep.subr.mxu1 %v2772_v31  ;;  %5599 = vmatpush2.msra.mxu0 %v2402_v63  ;;  %v2907_v31 = vld [vmem:[%s19232_s3 + $0x1458] sm:$0xff] }
 0x2e5   :  { %5652 = vmatpush2.msra.mxu1 %v2771_v2  ;;  %5601 = vmatmul.mubr.f32.vlgmr.msra.gmra.mxu0 %v11271_v17  ;;  %v2906_v2 = vld [vmem:[%s19232_s3 + $0x1450] sm:$0xff] }
 0x2e6   :  { %5653 = vmatprep.subr.mxu1 %v2763_v5  ;;  %5678 = vmatprep.subr.mxu0 %v2970_v18  ;;  %v2691_v5 = vld [vmem:[%s19232_s3 + $0xd98] sm:$0xff] }
 0x2e7   :  { %5654 = vmatpush2.msra.mxu1 %v2762_v10  ;;  %5679 = vmatpush1.msra.mxu0 %v2969_v55  ;;  %v2898_v10 = vld [vmem:[%s19232_s3 + $0x1410] sm:$0xff] }
 0x2e8   :  { %5742 = vmatprep.mubr.f32.mxu0 %v11292_v28  ;;  %5655 = vmatprep.subr.mxu1 %v2754_v25  ;;  %v2690_v55 = vld [vmem:[%s19232_s3 + $0xd90] sm:$0xff]  ;;  %v2897_v25 = vld [vmem:[%s19232_s3 + $0x1408] sm:$0xff] }
 0x2e9   :  { %5680 = vmatprep.subr.mxu0 %v2961_v40  ;;  %5656 = vmatpush2.msra.mxu1 %v2753_v15  ;;  %v2889_v40 = vld [vmem:[%s19232_s3 + $0x13c8] sm:$0xff]  ;;  %v3258_v15 = vld [vmem:[%s19232_s3 + $0x1f50] sm:$0xff] }
 0x2ea   :  { %5681 = vmatpush1.msra.mxu0 %v2960_v36  ;;  %5657 = vmatprep.subr.mxu1 %v2745_v42  ;;  %v2888_v36 = vld [vmem:[%s19232_s3 + $0x13c0] sm:$0xff]  ;;  %v3257_v42 = vld [vmem:[%s19232_s3 + $0x1f48] sm:$0xff] }
 0x2eb   :  { %5682 = vmatprep.subr.mxu0 %v2952_v7  ;;  %5658 = vmatpush2.msra.mxu1 %v2744_v23  ;;  %v2880_v7 = vld [vmem:[%s19232_s3 + $0x1380] sm:$0xff]  ;;  %v3249_v23 = vld [vmem:[%s19232_s3 + $0x1f08] sm:$0xff] }
 0x2ec   :  { %5683 = vmatpush1.msra.mxu0 %v2951_v24  ;;  %5659 = vmatprep.subr.mxu1 %v2736_v27  ;;  %v2879_v24 = vld [vmem:[%s19232_s3 + $0x1378] sm:$0xff]  ;;  %v3248_v27 = vld [vmem:[%s19232_s3 + $0x1f00] sm:$0xff] }
 0x2ed   :  { %5684 = vmatprep.subr.mxu0 %v2943_v8  ;;  %5660 = vmatpush2.msra.mxu1 %v2735_v32  ;;  %v2871_v8 = vld [vmem:[%s19232_s3 + $0x1338] sm:$0xff]  ;;  %v3240_v32 = vld [vmem:[%s19232_s3 + $0x1ec0] sm:$0xff] }
 0x2ee   :  { %5685 = vmatpush1.msra.mxu0 %v2942_v14  ;;  %5661 = vmatprep.subr.mxu1 %v2727_v34  ;;  %v2870_v14 = vld [vmem:[%s19232_s3 + $0x1330] sm:$0xff]  ;;  %v3239_v34 = vld [vmem:[%s19232_s3 + $0x1eb8] sm:$0xff] }
 0x2ef   :  { %5686 = vmatprep.subr.mxu0 %v2934_v39  ;;  %5662 = vmatpush2.msra.mxu1 %v2726_v41  ;;  %v2862_v39 = vld [vmem:[%s19232_s3 + $0x12f0] sm:$0xff]  ;;  %v3231_v41 = vld [vmem:[%s19232_s3 + $0x1e78] sm:$0xff] }
 0x2f0   :  { %5687 = vmatpush1.msra.mxu0 %v2933_v48  ;;  %5663 = vmatprep.subr.mxu1 %v2718_v9  ;;  %v2861_v48 = vld [vmem:[%s19232_s3 + $0x12e8] sm:$0xff]  ;;  %v3230_v9 = vld [vmem:[%s19232_s3 + $0x1e70] sm:$0xff] }
 0x2f1   :  { %5688 = vmatprep.subr.mxu0 %v2925_v44  ;;  %5664 = vmatpush2.msra.mxu1 %v2717_v54  ;;  %v3222_v44 = vld [vmem:[%s19232_s3 + $0x1e30] sm:$0xff]  ;;  %v2852_v54 = vld [vmem:[%s19232_s3 + $0x12a0] sm:$0xff] }
 0x2f2   :  { %5689 = vmatpush1.msra.mxu0 %v2924_v12  ;;  %5665 = vmatprep.subr.mxu1 %v2709_v52  ;;  %v5247_v63 = vpop.f32.mrf.mxu1  ;;  %v3221_v12 = vld [vmem:[%s19232_s3 + $0x1e28] sm:$0xff]  ;;  %v2844_v52 = vld [vmem:[%s19232_s3 + $0x1260] sm:$0xff] }
 0x2f3   :  { %5690 = vmatprep.subr.mxu0 %v2916_v61  ;;  %5666 = vmatpush2.msra.mxu1 %v2708_v60  ;;  %v13337_v18 = vadd.f32 %v5247_v63, %v5177_v43  ;;  %v3213_v61 = vld [vmem:[%s19232_s3 + $0x1de8] sm:$0xff]  ;;  %v2843_v60 = vld [vmem:[%s19232_s3 + $0x1258] sm:$0xff]  ;;  %v3212_v43 = vld [vmem:[%s19232_s3 + $0x1de0] sm:$0xff] }
 0x2f4   :  { %5691 = vmatpush1.msra.mxu0 %v2915_v0  ;;  %5667 = vmatprep.subr.mxu1 %v2700_v37  ;;  %v2835_v0 = vld [vmem:[%s19232_s3 + $0x1218] sm:$0xff]  ;;  %v3204_v37 = vld [vmem:[%s19232_s3 + $0x1da0] sm:$0xff]  ;;  %v3114_v63 = vld [vmem:[%s19232_s3 + $0x1ad0] sm:$0xff] }
 0x2f5   :  { %5692 = vmatprep.subr.mxu0 %v2907_v31  ;;  %5668 = vmatpush2.msra.mxu1 %v2699_v30  ;;  %v2834_v31 = vld [vmem:[%s19232_s3 + $0x1210] sm:$0xff]  ;;  %v3203_v30 = vld [vmem:[%s19232_s3 + $0x1d98] sm:$0xff] }
 0x2f6   :  { %5693 = vmatpush1.msra.mxu0 %v2906_v2  ;;  %5669 = vmatprep.subr.mxu1 %v2691_v5  ;;  %v3195_v2 = vld [vmem:[%s19232_s3 + $0x1d58] sm:$0xff]  ;;  %v3113_v5 = vld [vmem:[%s19232_s3 + $0x1ac8] sm:$0xff] }
 0x2f7   :  { %5694 = vmatprep.subr.mxu0 %v2898_v10  ;;  %5670 = vmatpush2.msra.mxu1 %v2690_v55  ;;  %v3194_v10 = vld [vmem:[%s19232_s3 + $0x1d50] sm:$0xff]  ;;  %v3105_v55 = vld [vmem:[%s19232_s3 + $0x1a88] sm:$0xff] }
 0x2f8   :  { %5695 = vmatpush1.msra.mxu0 %v2897_v25  ;;  %5672 = vmatmul.mubr.f32.vlgmr.msra.gmra.mxu1 %v11576_v51  ;;  %v3186_v25 = vld [vmem:[%s19232_s3 + $0x1d10] sm:$0xff] }
 0x2f9   :  { %5696 = vmatprep.subr.mxu0 %v2889_v40  ;;  %5749 = vmatprep.subr.mxu1 %v3258_v15  ;;  %v3104_v40 = vld [vmem:[%s19232_s3 + $0x1a80] sm:$0xff]  ;;  %v3185_v15 = vld [vmem:[%s19232_s3 + $0x1d08] sm:$0xff] }
 0x2fa   :  { %5697 = vmatpush1.msra.mxu0 %v2888_v36  ;;  %5750 = vmatpush1.msra.mxu1 %v3257_v42  ;;  %v3096_v36 = vld [vmem:[%s19232_s3 + $0x1a40] sm:$0xff]  ;;  %v3177_v42 = vld [vmem:[%s19232_s3 + $0x1cc8] sm:$0xff] }
 0x2fb   :  { %5813 = vmatprep.mubr.f32.mxu1 %v11594_v58  ;;  %5698 = vmatprep.subr.mxu0 %v2880_v7  ;;  %v3095_v7 = vld [vmem:[%s19232_s3 + $0x1a38] sm:$0xff] }
 0x2fc   :  { %5751 = vmatprep.subr.mxu1 %v3249_v23  ;;  %5699 = vmatpush1.msra.mxu0 %v2879_v24  ;;  %v3176_v23 = vld [vmem:[%s19232_s3 + $0x1cc0] sm:$0xff]  ;;  %v3087_v24 = vld [vmem:[%s19232_s3 + $0x19f8] sm:$0xff] }
 0x2fd   :  { %5752 = vmatpush1.msra.mxu1 %v3248_v27  ;;  %5700 = vmatprep.subr.mxu0 %v2871_v8  ;;  %v3168_v27 = vld [vmem:[%s19232_s3 + $0x1c80] sm:$0xff]  ;;  %v3086_v8 = vld [vmem:[%s19232_s3 + $0x19f0] sm:$0xff] }
 0x2fe   :  { %5753 = vmatprep.subr.mxu1 %v3240_v32  ;;  %5701 = vmatpush1.msra.mxu0 %v2870_v14  ;;  %v3167_v32 = vld [vmem:[%s19232_s3 + $0x1c78] sm:$0xff]  ;;  %v3078_v14 = vld [vmem:[%s19232_s3 + $0x19b0] sm:$0xff] }
 0x2ff   :  { %5754 = vmatpush1.msra.mxu1 %v3239_v34  ;;  %5702 = vmatprep.subr.mxu0 %v2862_v39  ;;  %v3159_v34 = vld [vmem:[%s19232_s3 + $0x1c38] sm:$0xff]  ;;  %v3077_v39 = vld [vmem:[%s19232_s3 + $0x19a8] sm:$0xff] }
 0x300   :  { %5755 = vmatprep.subr.mxu1 %v3231_v41  ;;  %5703 = vmatpush1.msra.mxu0 %v2861_v48  ;;  %v3158_v41 = vld [vmem:[%s19232_s3 + $0x1c30] sm:$0xff]  ;;  %v3069_v48 = vld [vmem:[%s19232_s3 + $0x1968] sm:$0xff] }
 0x301   :  { %5756 = vmatpush1.msra.mxu1 %v3230_v9  ;;  %5704 = vmatprep.subr.mxu0 %v2853_v49  ;;  %v3150_v9 = vld [vmem:[%s19232_s3 + $0x1bf0] sm:$0xff]  ;;  %v3068_v49 = vld [vmem:[%s19232_s3 + $0x1960] sm:$0xff] }
 0x302   :  { %5757 = vmatprep.subr.mxu1 %v3222_v44  ;;  %5705 = vmatpush1.msra.mxu0 %v2852_v54  ;;  %v3149_v44 = vld [vmem:[%s19232_s3 + $0x1be8] sm:$0xff]  ;;  %v3060_v54 = vld [vmem:[%s19232_s3 + $0x1920] sm:$0xff] }
 0x303   :  { %5758 = vmatpush1.msra.mxu1 %v3221_v12  ;;  %5706 = vmatprep.subr.mxu0 %v2844_v52  ;;  %v3141_v12 = vld [vmem:[%s19232_s3 + $0x1ba8] sm:$0xff]  ;;  %v3059_v52 = vld [vmem:[%s19232_s3 + $0x1918] sm:$0xff] }
 0x304   :  { %5759 = vmatprep.subr.mxu1 %v3213_v61  ;;  %5707 = vmatpush1.msra.mxu0 %v2843_v60  ;;  %v3140_v61 = vld [vmem:[%s19232_s3 + $0x1ba0] sm:$0xff]  ;;  %v3051_v60 = vld [vmem:[%s19232_s3 + $0x18d8] sm:$0xff] }
 0x305   :  { %5760 = vmatpush1.msra.mxu1 %v3212_v43  ;;  %5708 = vmatprep.subr.mxu0 %v2835_v0  ;;  %v3132_v43 = vld [vmem:[%s19232_s3 + $0x1b60] sm:$0xff]  ;;  %v3050_v0 = vld [vmem:[%s19232_s3 + $0x18d0] sm:$0xff] }
 0x306   :  { %5761 = vmatprep.subr.mxu1 %v3204_v37  ;;  %5709 = vmatpush1.msra.mxu0 %v2834_v31  ;;  %v3131_v37 = vld [vmem:[%s19232_s3 + $0x1b58] sm:$0xff]  ;;  %v3042_v31 = vld [vmem:[%s19232_s3 + $0x1890] sm:$0xff] }
 0x307   :  { %5762 = vmatpush1.msra.mxu1 %v3203_v30  ;;  %5710 = vmatprep.subr.mxu0 %v3114_v63  ;;  %v3123_v30 = vld [vmem:[%s19232_s3 + $0x1b18] sm:$0xff]  ;;  %v3041_v63 = vld [vmem:[%s19232_s3 + $0x1888] sm:$0xff] }
 0x308   :  { %5763 = vmatprep.subr.mxu1 %v3195_v2  ;;  %5711 = vmatpush2.msra.mxu0 %v3113_v5  ;;  %v3122_v2 = vld [vmem:[%s19232_s3 + $0x1b10] sm:$0xff]  ;;  %v3033_v5 = vld [vmem:[%s19232_s3 + $0x1848] sm:$0xff] }
 0x309   :  { %5764 = vmatpush1.msra.mxu1 %v3194_v10  ;;  %5712 = vmatprep.subr.mxu0 %v3105_v55  ;;  %v3402_v10 = vld [vmem:[%s19232_s3 + $0x23d0] sm:$0xff]  ;;  %v3032_v55 = vld [vmem:[%s19232_s3 + $0x1840] sm:$0xff] }
 0x30a   :  { %5765 = vmatprep.subr.mxu1 %v3186_v25  ;;  %5713 = vmatpush2.msra.mxu0 %v3104_v40  ;;  %v3401_v25 = vld [vmem:[%s19232_s3 + $0x23c8] sm:$0xff]  ;;  %v3024_v40 = vld [vmem:[%s19232_s3 + $0x1800] sm:$0xff] }
 0x30b   :  { %5766 = vmatpush1.msra.mxu1 %v3185_v15  ;;  %5714 = vmatprep.subr.mxu0 %v3096_v36  ;;  %v3393_v15 = vld [vmem:[%s19232_s3 + $0x2388] sm:$0xff]  ;;  %v3023_v36 = vld [vmem:[%s19232_s3 + $0x17f8] sm:$0xff] }
 0x30c   :  { %5767 = vmatprep.subr.mxu1 %v3177_v42  ;;  %5715 = vmatpush2.msra.mxu0 %v3095_v7  ;;  %v3392_v42 = vld [vmem:[%s19232_s3 + $0x2380] sm:$0xff]  ;;  %v3015_v7 = vld [vmem:[%s19232_s3 + $0x17b8] sm:$0xff] }
 0x30d   :  { %5768 = vmatpush1.msra.mxu1 %v3176_v23  ;;  %5716 = vmatprep.subr.mxu0 %v3087_v24  ;;  %v3384_v23 = vld [vmem:[%s19232_s3 + $0x2340] sm:$0xff]  ;;  %v3014_v24 = vld [vmem:[%s19232_s3 + $0x17b0] sm:$0xff] }
 0x30e   :  { %5769 = vmatprep.subr.mxu1 %v3168_v27  ;;  %5717 = vmatpush2.msra.mxu0 %v3086_v8  ;;  %v3383_v27 = vld [vmem:[%s19232_s3 + $0x2338] sm:$0xff]  ;;  %v3006_v8 = vld [vmem:[%s19232_s3 + $0x1770] sm:$0xff] }
 0x30f   :  { %5770 = vmatpush1.msra.mxu1 %v3167_v32  ;;  %5718 = vmatprep.subr.mxu0 %v3078_v14  ;;  %v3375_v32 = vld [vmem:[%s19232_s3 + $0x22f8] sm:$0xff]  ;;  %v3005_v14 = vld [vmem:[%s19232_s3 + $0x1768] sm:$0xff] }
 0x310   :  { %5771 = vmatprep.subr.mxu1 %v3159_v34  ;;  %5719 = vmatpush2.msra.mxu0 %v3077_v39  ;;  %v3374_v34 = vld [vmem:[%s19232_s3 + $0x22f0] sm:$0xff]  ;;  %v2997_v39 = vld [vmem:[%s19232_s3 + $0x1728] sm:$0xff] }
 0x311   :  { %5772 = vmatpush1.msra.mxu1 %v3158_v41  ;;  %5720 = vmatprep.subr.mxu0 %v3069_v48  ;;  %v3366_v41 = vld [vmem:[%s19232_s3 + $0x22b0] sm:$0xff]  ;;  %v2996_v48 = vld [vmem:[%s19232_s3 + $0x1720] sm:$0xff] }
 0x312   :  { %5773 = vmatprep.subr.mxu1 %v3150_v9  ;;  %5721 = vmatpush2.msra.mxu0 %v3068_v49  ;;  %v3365_v9 = vld [vmem:[%s19232_s3 + $0x22a8] sm:$0xff]  ;;  %v2988_v49 = vld [vmem:[%s19232_s3 + $0x16e0] sm:$0xff] }
 0x313   :  { %5774 = vmatpush1.msra.mxu1 %v3149_v44  ;;  %5722 = vmatprep.subr.mxu0 %v3060_v54  ;;  %v3357_v44 = vld [vmem:[%s19232_s3 + $0x2268] sm:$0xff]  ;;  %v2987_v54 = vld [vmem:[%s19232_s3 + $0x16d8] sm:$0xff] }
 0x314   :  { %5775 = vmatprep.subr.mxu1 %v3141_v12  ;;  %5723 = vmatpush2.msra.mxu0 %v3059_v52  ;;  %v3356_v12 = vld [vmem:[%s19232_s3 + $0x2260] sm:$0xff]  ;;  %v2979_v52 = vld [vmem:[%s19232_s3 + $0x1698] sm:$0xff] }
 0x315   :  { %5776 = vmatpush1.msra.mxu1 %v3140_v61  ;;  %5724 = vmatprep.subr.mxu0 %v3051_v60  ;;  %v3348_v61 = vld [vmem:[%s19232_s3 + $0x2220] sm:$0xff]  ;;  %v2978_v60 = vld [vmem:[%s19232_s3 + $0x1690] sm:$0xff] }
 0x316   :  { %5777 = vmatprep.subr.mxu1 %v3132_v43  ;;  %5725 = vmatpush2.msra.mxu0 %v3050_v0  ;;  %v3347_v43 = vld [vmem:[%s19232_s3 + $0x2218] sm:$0xff] }
 0x317   :  { %5778 = vmatpush1.msra.mxu1 %v3131_v37  ;;  %5726 = vmatprep.subr.mxu0 %v3042_v31  ;;  %v3339_v0 = vld [vmem:[%s19232_s3 + $0x21d8] sm:$0xff]  ;;  %v3546_v37 = vld [vmem:[%s19232_s3 + $0x2850] sm:$0xff] }
 0x318   :  { %5779 = vmatprep.subr.mxu1 %v3123_v30  ;;  %5727 = vmatpush2.msra.mxu0 %v3041_v63  ;;  %v3338_v31 = vld [vmem:[%s19232_s3 + $0x21d0] sm:$0xff]  ;;  %v3545_v30 = vld [vmem:[%s19232_s3 + $0x2848] sm:$0xff] }
 0x319   :  { %5780 = vmatpush1.msra.mxu1 %v3122_v2  ;;  %5728 = vmatprep.subr.mxu0 %v3033_v5  ;;  %v3330_v63 = vld [vmem:[%s19232_s3 + $0x2190] sm:$0xff]  ;;  %v3537_v2 = vld [vmem:[%s19232_s3 + $0x2808] sm:$0xff] }
 0x31a   :  { %5781 = vmatprep.subr.mxu1 %v3402_v10  ;;  %5729 = vmatpush2.msra.mxu0 %v3032_v55  ;;  %v3329_v5 = vld [vmem:[%s19232_s3 + $0x2188] sm:$0xff]  ;;  %v3536_v10 = vld [vmem:[%s19232_s3 + $0x2800] sm:$0xff] }
 0x31b   :  { %5782 = vmatpush2.msra.mxu1 %v3401_v25  ;;  %5730 = vmatprep.subr.mxu0 %v3024_v40  ;;  %v3321_v55 = vld [vmem:[%s19232_s3 + $0x2148] sm:$0xff]  ;;  %v3528_v25 = vld [vmem:[%s19232_s3 + $0x27c0] sm:$0xff] }
 0x31c   :  { %5783 = vmatprep.subr.mxu1 %v3393_v15  ;;  %5731 = vmatpush2.msra.mxu0 %v3023_v36  ;;  %v3320_v40 = vld [vmem:[%s19232_s3 + $0x2140] sm:$0xff]  ;;  %v3527_v15 = vld [vmem:[%s19232_s3 + $0x27b8] sm:$0xff] }
 0x31d   :  { %5784 = vmatpush2.msra.mxu1 %v3392_v42  ;;  %5732 = vmatprep.subr.mxu0 %v3015_v7  ;;  %v3312_v36 = vld [vmem:[%s19232_s3 + $0x2100] sm:$0xff]  ;;  %v3519_v42 = vld [vmem:[%s19232_s3 + $0x2778] sm:$0xff] }
 0x31e   :  { %5785 = vmatprep.subr.mxu1 %v3384_v23  ;;  %5733 = vmatpush2.msra.mxu0 %v3014_v24  ;;  %v3311_v7 = vld [vmem:[%s19232_s3 + $0x20f8] sm:$0xff]  ;;  %v3518_v23 = vld [vmem:[%s19232_s3 + $0x2770] sm:$0xff] }
 0x31f   :  { %5786 = vmatpush2.msra.mxu1 %v3383_v27  ;;  %5734 = vmatprep.subr.mxu0 %v3006_v8  ;;  %v3303_v24 = vld [vmem:[%s19232_s3 + $0x20b8] sm:$0xff]  ;;  %v13679_v27 = vpop.f32.mrf.mxu0  ;;  %v3510_v8 = vld [vmem:[%s19232_s3 + $0x2730] sm:$0xff] }
 0x320   :  { %5787 = vmatprep.subr.mxu1 %v3375_v32  ;;  %5735 = vmatpush2.msra.mxu0 %v3005_v14  ;;  %v3302_v32 = vld [vmem:[%s19232_s3 + $0x20b0] sm:$0xff]  ;;  %v3509_v14 = vld [vmem:[%s19232_s3 + $0x2728] sm:$0xff] }
 0x321   :  { %5788 = vmatpush2.msra.mxu1 %v3374_v34  ;;  %5736 = vmatprep.subr.mxu0 %v2997_v39  ;;  %v3294_v34 = vld [vmem:[%s19232_s3 + $0x2070] sm:$0xff]  ;;  %v5318_v39 = vpop.f32.mrf.mxu0 }
 0x322   :  { %5789 = vmatprep.subr.mxu1 %v3366_v41  ;;  %5737 = vmatpush2.msra.mxu0 %v2996_v48  ;;  %v3501_v41 = vld [vmem:[%s19232_s3 + $0x26e8] sm:$0xff] }
 0x323   :  { %5790 = vmatpush2.msra.mxu1 %v3365_v9  ;;  %5738 = vmatprep.subr.mxu0 %v2988_v49  ;;  %v3293_v48 = vld [vmem:[%s19232_s3 + $0x2068] sm:$0xff]  ;;  %v3500_v9 = vld [vmem:[%s19232_s3 + $0x26e0] sm:$0xff] }
 0x324   :  { %5791 = vmatprep.subr.mxu1 %v3357_v44  ;;  %5739 = vmatpush2.msra.mxu0 %v2987_v54  ;;  %v3285_v49 = vld [vmem:[%s19232_s3 + $0x2028] sm:$0xff]  ;;  %v13705_v44 = vpop.f32.mrf.mxu1  ;;  %v3492_v54 = vld [vmem:[%s19232_s3 + $0x26a0] sm:$0xff] }
 0x325   :  { %5792 = vmatpush2.msra.mxu1 %v3356_v12  ;;  %5740 = vmatprep.subr.mxu0 %v2979_v52  ;;  %v3284_v12 = vld [vmem:[%s19232_s3 + $0x2020] sm:$0xff]  ;;  %v5319_v52 = vadd.f32 %v5318_v39, %v13337_v18  ;;  %v3275_v18 = vld [vmem:[%s19232_s3 + $0x1fd8] sm:$0xff]  ;;  %v3437_v39 = vld [vmem:[%s19232_s3 + $0x24e8] sm:$0xff] }
 0x326   :  { %5793 = vmatprep.subr.mxu1 %v3348_v61  ;;  %5741 = vmatpush2.msra.mxu0 %v2978_v60  ;;  %v3491_v61 = vld [vmem:[%s19232_s3 + $0x2698] sm:$0xff]  ;;  %v3276_v60 = vld [vmem:[%s19232_s3 + $0x1fe0] sm:$0xff] }
 0x327   :  { %5794 = vmatpush2.msra.mxu1 %v3347_v43  ;;  %5743 = vmatmul.mubr.f32.vlgmr.msra.gmra.mxu0 %v11699_v45  ;;  %v3483_v43 = vld [vmem:[%s19232_s3 + $0x2658] sm:$0xff] }
 0x328   :  { %5795 = vmatprep.subr.mxu1 %v3339_v0  ;;  %5820 = vmatprep.subr.mxu0 %v3546_v37  ;;  %v3482_v37 = vld [vmem:[%s19232_s3 + $0x2650] sm:$0xff] }
 0x329   :  { %5796 = vmatpush2.msra.mxu1 %v3338_v31  ;;  %5821 = vmatpush1.msra.mxu0 %v3545_v30  ;;  %v3267_v31 = vld [vmem:[%s19232_s3 + $0x1f98] sm:$0xff] }
 0x32a   :  { %5884 = vmatprep.mubr.f32.mxu0 %v11717_v53  ;;  %5797 = vmatprep.subr.mxu1 %v3330_v63  ;;  %v3474_v63 = vld [vmem:[%s19232_s3 + $0x2610] sm:$0xff] }
 0x32b   :  { %5822 = vmatprep.subr.mxu0 %v3537_v2  ;;  %5798 = vmatpush2.msra.mxu1 %v3329_v5  ;;  %v3266_v2 = vld [vmem:[%s19232_s3 + $0x1f90] sm:$0xff]  ;;  %v3473_v5 = vld [vmem:[%s19232_s3 + $0x2608] sm:$0xff] }
 0x32c   :  { %5823 = vmatpush1.msra.mxu0 %v3536_v10  ;;  %5799 = vmatprep.subr.mxu1 %v3321_v55  ;;  %v3465_v10 = vld [vmem:[%s19232_s3 + $0x25c8] sm:$0xff]  ;;  %v3834_v55 = vld [vmem:[%s19232_s3 + $0x3150] sm:$0xff] }
 0x32d   :  { %5824 = vmatprep.subr.mxu0 %v3528_v25  ;;  %5800 = vmatpush2.msra.mxu1 %v3320_v40  ;;  %v3464_v25 = vld [vmem:[%s19232_s3 + $0x25c0] sm:$0xff]  ;;  %v3833_v40 = vld [vmem:[%s19232_s3 + $0x3148] sm:$0xff] }
 0x32e   :  { %5825 = vmatpush1.msra.mxu0 %v3527_v15  ;;  %5801 = vmatprep.subr.mxu1 %v3312_v36  ;;  %v3456_v15 = vld [vmem:[%s19232_s3 + $0x2580] sm:$0xff]  ;;  %v3825_v36 = vld [vmem:[%s19232_s3 + $0x3108] sm:$0xff] }
 0x32f   :  { %5826 = vmatprep.subr.mxu0 %v3519_v42  ;;  %5802 = vmatpush2.msra.mxu1 %v3311_v7  ;;  %v3455_v42 = vld [vmem:[%s19232_s3 + $0x2578] sm:$0xff]  ;;  %v3824_v7 = vld [vmem:[%s19232_s3 + $0x3100] sm:$0xff] }
 0x330   :  { %5827 = vmatpush1.msra.mxu0 %v3518_v23  ;;  %5803 = vmatprep.subr.mxu1 %v3303_v24  ;;  %v3447_v23 = vld [vmem:[%s19232_s3 + $0x2538] sm:$0xff]  ;;  %v3816_v24 = vld [vmem:[%s19232_s3 + $0x30c0] sm:$0xff] }
 0x331   :  { %5828 = vmatprep.subr.mxu0 %v3510_v8  ;;  %5804 = vmatpush2.msra.mxu1 %v3302_v32  ;;  %v3446_v8 = vld [vmem:[%s19232_s3 + $0x2530] sm:$0xff]  ;;  %v3815_v32 = vld [vmem:[%s19232_s3 + $0x30b8] sm:$0xff] }
 0x332   :  { %5829 = vmatpush1.msra.mxu0 %v3509_v14  ;;  %5805 = vmatprep.subr.mxu1 %v3294_v34  ;;  %v3438_v14 = vld [vmem:[%s19232_s3 + $0x24f0] sm:$0xff]  ;;  %v3807_v34 = vld [vmem:[%s19232_s3 + $0x3078] sm:$0xff] }
 0x333   :  { %5830 = vmatprep.subr.mxu0 %v3501_v41  ;;  %5806 = vmatpush2.msra.mxu1 %v3293_v48  ;;  %v3806_v41 = vld [vmem:[%s19232_s3 + $0x3070] sm:$0xff]  ;;  %v3429_v48 = vld [vmem:[%s19232_s3 + $0x24a8] sm:$0xff] }
 0x334   :  { %5831 = vmatpush1.msra.mxu0 %v3500_v9  ;;  %5807 = vmatprep.subr.mxu1 %v3285_v49  ;;  %v5389_v0 = vpop.f32.mrf.mxu1  ;;  %v3798_v9 = vld [vmem:[%s19232_s3 + $0x3030] sm:$0xff]  ;;  %v3428_v49 = vld [vmem:[%s19232_s3 + $0x24a0] sm:$0xff] }
 0x335   :  { %5832 = vmatprep.subr.mxu0 %v3492_v54  ;;  %5808 = vmatpush2.msra.mxu1 %v3284_v12  ;;  %v13732_v30 = vadd.f32 %v5389_v0, %v5319_v52  ;;  %v3797_v54 = vld [vmem:[%s19232_s3 + $0x3028] sm:$0xff]  ;;  %v3420_v12 = vld [vmem:[%s19232_s3 + $0x2460] sm:$0xff]  ;;  %v3410_v0 = vld [vmem:[%s19232_s3 + $0x2410] sm:$0xff] }
 0x336   :  { %5833 = vmatpush1.msra.mxu0 %v3491_v61  ;;  %5809 = vmatprep.subr.mxu1 %v3276_v60  ;;  %v3789_v52 = vld [vmem:[%s19232_s3 + $0x2fe8] sm:$0xff]  ;;  %v3419_v61 = vld [vmem:[%s19232_s3 + $0x2458] sm:$0xff]  ;;  %v3788_v60 = vld [vmem:[%s19232_s3 + $0x2fe0] sm:$0xff] }
 0x337   :  { %5834 = vmatprep.subr.mxu0 %v3483_v43  ;;  %5810 = vmatpush2.msra.mxu1 %v3275_v18  ;;  %v3411_v43 = vld [vmem:[%s19232_s3 + $0x2418] sm:$0xff]  ;;  %v3780_v18 = vld [vmem:[%s19232_s3 + $0x2fa0] sm:$0xff] }
 0x338   :  { %5835 = vmatpush1.msra.mxu0 %v3482_v37  ;;  %5811 = vmatprep.subr.mxu1 %v3267_v31  ;;  %v3779_v37 = vld [vmem:[%s19232_s3 + $0x2f98] sm:$0xff]  ;;  %v3690_v31 = vld [vmem:[%s19232_s3 + $0x2cd0] sm:$0xff] }
 0x339   :  { %5836 = vmatprep.subr.mxu0 %v3474_v63  ;;  %5812 = vmatpush2.msra.mxu1 %v3266_v2  ;;  %v3771_v63 = vld [vmem:[%s19232_s3 + $0x2f58] sm:$0xff]  ;;  %v3689_v2 = vld [vmem:[%s19232_s3 + $0x2cc8] sm:$0xff] }
 0x33a   :  { %5837 = vmatpush1.msra.mxu0 %v3473_v5  ;;  %5814 = vmatmul.mubr.f32.vlgmr.msra.gmra.mxu1 %v12004_v11  ;;  %v3770_v5 = vld [vmem:[%s19232_s3 + $0x2f50] sm:$0xff] }
 0x33b   :  { %5838 = vmatprep.subr.mxu0 %v3465_v10  ;;  %5891 = vmatprep.subr.mxu1 %v3834_v55  ;;  %v3681_v10 = vld [vmem:[%s19232_s3 + $0x2c88] sm:$0xff]  ;;  %v3762_v55 = vld [vmem:[%s19232_s3 + $0x2f10] sm:$0xff] }
 0x33c   :  { %5839 = vmatpush1.msra.mxu0 %v3464_v25  ;;  %5892 = vmatpush1.msra.mxu1 %v3833_v40  ;;  %v3680_v25 = vld [vmem:[%s19232_s3 + $0x2c80] sm:$0xff]  ;;  %v3761_v40 = vld [vmem:[%s19232_s3 + $0x2f08] sm:$0xff] }
 0x33d   :  { %5955 = vmatprep.mubr.f32.mxu1 %v12022_v20  ;;  %5840 = vmatprep.subr.mxu0 %v3456_v15  ;;  %v3672_v15 = vld [vmem:[%s19232_s3 + $0x2c40] sm:$0xff] }
 0x33e   :  { %5893 = vmatprep.subr.mxu1 %v3825_v36  ;;  %5841 = vmatpush1.msra.mxu0 %v3455_v42  ;;  %v3753_v36 = vld [vmem:[%s19232_s3 + $0x2ec8] sm:$0xff]  ;;  %v3671_v42 = vld [vmem:[%s19232_s3 + $0x2c38] sm:$0xff] }
 0x33f   :  { %5894 = vmatpush1.msra.mxu1 %v3824_v7  ;;  %5842 = vmatprep.subr.mxu0 %v3447_v23  ;;  %v3752_v7 = vld [vmem:[%s19232_s3 + $0x2ec0] sm:$0xff]  ;;  %v3663_v23 = vld [vmem:[%s19232_s3 + $0x2bf8] sm:$0xff] }
 0x340   :  { %5895 = vmatprep.subr.mxu1 %v3816_v24  ;;  %5843 = vmatpush1.msra.mxu0 %v3446_v8  ;;  %v3744_v24 = vld [vmem:[%s19232_s3 + $0x2e80] sm:$0xff]  ;;  %v3662_v8 = vld [vmem:[%s19232_s3 + $0x2bf0] sm:$0xff] }
 0x341   :  { %5896 = vmatpush1.msra.mxu1 %v3815_v32  ;;  %5844 = vmatprep.subr.mxu0 %v3438_v14  ;;  %v3743_v32 = vld [vmem:[%s19232_s3 + $0x2e78] sm:$0xff]  ;;  %v3654_v14 = vld [vmem:[%s19232_s3 + $0x2bb0] sm:$0xff] }
 0x342   :  { %5897 = vmatprep.subr.mxu1 %v3807_v34  ;;  %5845 = vmatpush1.msra.mxu0 %v3437_v39  ;;  %v3735_v34 = vld [vmem:[%s19232_s3 + $0x2e38] sm:$0xff]  ;;  %v3653_v39 = vld [vmem:[%s19232_s3 + $0x2ba8] sm:$0xff] }
 0x343   :  { %5898 = vmatpush1.msra.mxu1 %v3806_v41  ;;  %5846 = vmatprep.subr.mxu0 %v3429_v48  ;;  %v3734_v41 = vld [vmem:[%s19232_s3 + $0x2e30] sm:$0xff]  ;;  %v3645_v48 = vld [vmem:[%s19232_s3 + $0x2b68] sm:$0xff] }
 0x344   :  { %5899 = vmatprep.subr.mxu1 %v3798_v9  ;;  %5847 = vmatpush1.msra.mxu0 %v3428_v49  ;;  %v3726_v9 = vld [vmem:[%s19232_s3 + $0x2df0] sm:$0xff]  ;;  %v3644_v49 = vld [vmem:[%s19232_s3 + $0x2b60] sm:$0xff] }
 0x345   :  { %5900 = vmatpush1.msra.mxu1 %v3797_v54  ;;  %5848 = vmatprep.subr.mxu0 %v3420_v12  ;;  %v3725_v54 = vld [vmem:[%s19232_s3 + $0x2de8] sm:$0xff]  ;;  %v3636_v12 = vld [vmem:[%s19232_s3 + $0x2b20] sm:$0xff] }
 0x346   :  { %5901 = vmatprep.subr.mxu1 %v3789_v52  ;;  %5849 = vmatpush1.msra.mxu0 %v3419_v61  ;;  %v3717_v52 = vld [vmem:[%s19232_s3 + $0x2da8] sm:$0xff]  ;;  %v3635_v61 = vld [vmem:[%s19232_s3 + $0x2b18] sm:$0xff] }
 0x347   :  { %5902 = vmatpush1.msra.mxu1 %v3788_v60  ;;  %5850 = vmatprep.subr.mxu0 %v3411_v43  ;;  %v3716_v60 = vld [vmem:[%s19232_s3 + $0x2da0] sm:$0xff]  ;;  %v3627_v43 = vld [vmem:[%s19232_s3 + $0x2ad8] sm:$0xff] }
 0x348   :  { %5903 = vmatprep.subr.mxu1 %v3780_v18  ;;  %5851 = vmatpush1.msra.mxu0 %v3410_v0  ;;  %v3708_v18 = vld [vmem:[%s19232_s3 + $0x2d60] sm:$0xff]  ;;  %v3626_v0 = vld [vmem:[%s19232_s3 + $0x2ad0] sm:$0xff] }
 0x349   :  { %5904 = vmatpush1.msra.mxu1 %v3779_v37  ;;  %5852 = vmatprep.subr.mxu0 %v3690_v31  ;;  %v3707_v37 = vld [vmem:[%s19232_s3 + $0x2d58] sm:$0xff]  ;;  %v3618_v31 = vld [vmem:[%s19232_s3 + $0x2a90] sm:$0xff] }
 0x34a   :  { %5905 = vmatprep.subr.mxu1 %v3771_v63  ;;  %5853 = vmatpush2.msra.mxu0 %v3689_v2  ;;  %v3699_v63 = vld [vmem:[%s19232_s3 + $0x2d18] sm:$0xff]  ;;  %v3617_v2 = vld [vmem:[%s19232_s3 + $0x2a88] sm:$0xff] }
 0x34b   :  { %5906 = vmatpush1.msra.mxu1 %v3770_v5  ;;  %5854 = vmatprep.subr.mxu0 %v3681_v10  ;;  %v3698_v5 = vld [vmem:[%s19232_s3 + $0x2d10] sm:$0xff]  ;;  %v3609_v10 = vld [vmem:[%s19232_s3 + $0x2a48] sm:$0xff] }
 0x34c   :  { %5907 = vmatprep.subr.mxu1 %v3762_v55  ;;  %5855 = vmatpush2.msra.mxu0 %v3680_v25  ;;  %v3978_v55 = vld [vmem:[%s19232_s3 + $0x35d0] sm:$0xff]  ;;  %v3608_v25 = vld [vmem:[%s19232_s3 + $0x2a40] sm:$0xff] }
 0x34d   :  { %5908 = vmatpush1.msra.mxu1 %v3761_v40  ;;  %5856 = vmatprep.subr.mxu0 %v3672_v15  ;;  %v3977_v40 = vld [vmem:[%s19232_s3 + $0x35c8] sm:$0xff]  ;;  %v3600_v15 = vld [vmem:[%s19232_s3 + $0x2a00] sm:$0xff] }
 0x34e   :  { %5909 = vmatprep.subr.mxu1 %v3753_v36  ;;  %5857 = vmatpush2.msra.mxu0 %v3671_v42  ;;  %v3969_v36 = vld [vmem:[%s19232_s3 + $0x3588] sm:$0xff]  ;;  %v3599_v42 = vld [vmem:[%s19232_s3 + $0x29f8] sm:$0xff] }
 0x34f   :  { %5910 = vmatpush1.msra.mxu1 %v3752_v7  ;;  %5858 = vmatprep.subr.mxu0 %v3663_v23  ;;  %v3968_v7 = vld [vmem:[%s19232_s3 + $0x3580] sm:$0xff]  ;;  %v3591_v23 = vld [vmem:[%s19232_s3 + $0x29b8] sm:$0xff] }
 0x350   :  { %5911 = vmatprep.subr.mxu1 %v3744_v24  ;;  %5859 = vmatpush2.msra.mxu0 %v3662_v8  ;;  %v3960_v24 = vld [vmem:[%s19232_s3 + $0x3540] sm:$0xff]  ;;  %v3590_v8 = vld [vmem:[%s19232_s3 + $0x29b0] sm:$0xff] }
 0x351   :  { %5912 = vmatpush1.msra.mxu1 %v3743_v32  ;;  %5860 = vmatprep.subr.mxu0 %v3654_v14  ;;  %v3959_v32 = vld [vmem:[%s19232_s3 + $0x3538] sm:$0xff]  ;;  %v3582_v14 = vld [vmem:[%s19232_s3 + $0x2970] sm:$0xff] }
 0x352   :  { %5913 = vmatprep.subr.mxu1 %v3735_v34  ;;  %5861 = vmatpush2.msra.mxu0 %v3653_v39  ;;  %v3951_v34 = vld [vmem:[%s19232_s3 + $0x34f8] sm:$0xff]  ;;  %v3581_v39 = vld [vmem:[%s19232_s3 + $0x2968] sm:$0xff] }
 0x353   :  { %5914 = vmatpush1.msra.mxu1 %v3734_v41  ;;  %5862 = vmatprep.subr.mxu0 %v3645_v48  ;;  %v3950_v41 = vld [vmem:[%s19232_s3 + $0x34f0] sm:$0xff]  ;;  %v3573_v48 = vld [vmem:[%s19232_s3 + $0x2928] sm:$0xff] }
 0x354   :  { %5915 = vmatprep.subr.mxu1 %v3726_v9  ;;  %5863 = vmatpush2.msra.mxu0 %v3644_v49  ;;  %v3942_v9 = vld [vmem:[%s19232_s3 + $0x34b0] sm:$0xff]  ;;  %v3572_v49 = vld [vmem:[%s19232_s3 + $0x2920] sm:$0xff] }
 0x355   :  { %5916 = vmatpush1.msra.mxu1 %v3725_v54  ;;  %5864 = vmatprep.subr.mxu0 %v3636_v12  ;;  %v3941_v54 = vld [vmem:[%s19232_s3 + $0x34a8] sm:$0xff]  ;;  %v3564_v12 = vld [vmem:[%s19232_s3 + $0x28e0] sm:$0xff] }
 0x356   :  { %5917 = vmatprep.subr.mxu1 %v3717_v52  ;;  %5865 = vmatpush2.msra.mxu0 %v3635_v61  ;;  %v3933_v52 = vld [vmem:[%s19232_s3 + $0x3468] sm:$0xff]  ;;  %v3563_v61 = vld [vmem:[%s19232_s3 + $0x28d8] sm:$0xff] }
 0x357   :  { %5918 = vmatpush1.msra.mxu1 %v3716_v60  ;;  %5866 = vmatprep.subr.mxu0 %v3627_v43  ;;  %v3932_v60 = vld [vmem:[%s19232_s3 + $0x3460] sm:$0xff]  ;;  %v3555_v43 = vld [vmem:[%s19232_s3 + $0x2898] sm:$0xff] }
 0x358   :  { %5919 = vmatprep.subr.mxu1 %v3708_v18  ;;  %5867 = vmatpush2.msra.mxu0 %v3626_v0  ;;  %v3924_v18 = vld [vmem:[%s19232_s3 + $0x3420] sm:$0xff]  ;;  %v3554_v0 = vld [vmem:[%s19232_s3 + $0x2890] sm:$0xff] }
 0x359   :  { %5920 = vmatpush1.msra.mxu1 %v3707_v37  ;;  %5868 = vmatprep.subr.mxu0 %v3618_v31  ;;  %v3923_v37 = vld [vmem:[%s19232_s3 + $0x3418] sm:$0xff] }
 0x35a   :  { %5921 = vmatprep.subr.mxu1 %v3699_v63  ;;  %5869 = vmatpush2.msra.mxu0 %v3617_v2  ;;  %v3915_v31 = vld [vmem:[%s19232_s3 + $0x33d8] sm:$0xff]  ;;  %v4122_v63 = vld [vmem:[%s19232_s3 + $0x3a50] sm:$0xff] }
 0x35b   :  { %5922 = vmatpush1.msra.mxu1 %v3698_v5  ;;  %5870 = vmatprep.subr.mxu0 %v3609_v10  ;;  %v3914_v2 = vld [vmem:[%s19232_s3 + $0x33d0] sm:$0xff]  ;;  %v4121_v5 = vld [vmem:[%s19232_s3 + $0x3a48] sm:$0xff] }
 0x35c   :  { %5923 = vmatprep.subr.mxu1 %v3978_v55  ;;  %5871 = vmatpush2.msra.mxu0 %v3608_v25  ;;  %v3906_v10 = vld [vmem:[%s19232_s3 + $0x3390] sm:$0xff]  ;;  %v4113_v55 = vld [vmem:[%s19232_s3 + $0x3a08] sm:$0xff] }
 0x35d   :  { %5924 = vmatpush2.msra.mxu1 %v3977_v40  ;;  %5872 = vmatprep.subr.mxu0 %v3600_v15  ;;  %v3905_v25 = vld [vmem:[%s19232_s3 + $0x3388] sm:$0xff]  ;;  %v4112_v40 = vld [vmem:[%s19232_s3 + $0x3a00] sm:$0xff] }
 0x35e   :  { %5925 = vmatprep.subr.mxu1 %v3969_v36  ;;  %5873 = vmatpush2.msra.mxu0 %v3599_v42  ;;  %v3897_v15 = vld [vmem:[%s19232_s3 + $0x3348] sm:$0xff]  ;;  %v4104_v36 = vld [vmem:[%s19232_s3 + $0x39c0] sm:$0xff] }
 0x35f   :  { %5926 = vmatpush2.msra.mxu1 %v3968_v7  ;;  %5874 = vmatprep.subr.mxu0 %v3591_v23  ;;  %v3896_v42 = vld [vmem:[%s19232_s3 + $0x3340] sm:$0xff]  ;;  %v4103_v7 = vld [vmem:[%s19232_s3 + $0x39b8] sm:$0xff] }
 0x360   :  { %5927 = vmatprep.subr.mxu1 %v3960_v24  ;;  %5875 = vmatpush2.msra.mxu0 %v3590_v8  ;;  %v3888_v23 = vld [vmem:[%s19232_s3 + $0x3300] sm:$0xff]  ;;  %v4095_v24 = vld [vmem:[%s19232_s3 + $0x3978] sm:$0xff] }
 0x361   :  { %5928 = vmatpush2.msra.mxu1 %v3959_v32  ;;  %5876 = vmatprep.subr.mxu0 %v3582_v14  ;;  %v3887_v8 = vld [vmem:[%s19232_s3 + $0x32f8] sm:$0xff]  ;;  %v4094_v32 = vld [vmem:[%s19232_s3 + $0x3970] sm:$0xff] }
 0x362   :  { %5929 = vmatprep.subr.mxu1 %v3951_v34  ;;  %5877 = vmatpush2.msra.mxu0 %v3581_v39  ;;  %v3879_v14 = vld [vmem:[%s19232_s3 + $0x32b8] sm:$0xff]  ;;  %v14074_v34 = vpop.f32.mrf.mxu0  ;;  %v4086_v39 = vld [vmem:[%s19232_s3 + $0x3930] sm:$0xff] }
 0x363   :  { %5930 = vmatpush2.msra.mxu1 %v3950_v41  ;;  %5878 = vmatprep.subr.mxu0 %v3573_v48  ;;  %v3878_v41 = vld [vmem:[%s19232_s3 + $0x32b0] sm:$0xff]  ;;  %v4085_v48 = vld [vmem:[%s19232_s3 + $0x3928] sm:$0xff] }
 0x364   :  { %5931 = vmatprep.subr.mxu1 %v3942_v9  ;;  %5879 = vmatpush2.msra.mxu0 %v3572_v49  ;;  %v3870_v9 = vld [vmem:[%s19232_s3 + $0x3270] sm:$0xff]  ;;  %v5460_v49 = vpop.f32.mrf.mxu0 }
 0x365   :  { %5932 = vmatpush2.msra.mxu1 %v3941_v54  ;;  %5880 = vmatprep.subr.mxu0 %v3564_v12  ;;  %v4077_v54 = vld [vmem:[%s19232_s3 + $0x38e8] sm:$0xff] }
 0x366   :  { %5933 = vmatprep.subr.mxu1 %v3933_v52  ;;  %5881 = vmatpush2.msra.mxu0 %v3563_v61  ;;  %v3869_v12 = vld [vmem:[%s19232_s3 + $0x3268] sm:$0xff]  ;;  %v4076_v52 = vld [vmem:[%s19232_s3 + $0x38e0] sm:$0xff] }
 0x367   :  { %5934 = vmatpush2.msra.mxu1 %v3932_v60  ;;  %5882 = vmatprep.subr.mxu0 %v3555_v43  ;;  %v3861_v61 = vld [vmem:[%s19232_s3 + $0x3228] sm:$0xff]  ;;  %v14100_v60 = vpop.f32.mrf.mxu1  ;;  %v4068_v43 = vld [vmem:[%s19232_s3 + $0x38a0] sm:$0xff] }
 0x368   :  { %5935 = vmatprep.subr.mxu1 %v3924_v18  ;;  %5883 = vmatpush2.msra.mxu0 %v3554_v0  ;;  %v3860_v18 = vld [vmem:[%s19232_s3 + $0x3220] sm:$0xff]  ;;  %v5461_v0 = vadd.f32 %v5460_v49, %v13732_v30  ;;  %v3851_v30 = vld [vmem:[%s19232_s3 + $0x31d8] sm:$0xff]  ;;  %v4014_v49 = vld [vmem:[%s19232_s3 + $0x36f0] sm:$0xff] }
 0x369   :  { %5936 = vmatpush2.msra.mxu1 %v3923_v37  ;;  %5885 = vmatmul.mubr.f32.vlgmr.msra.gmra.mxu0 %v12132_v13  ;;  %v4067_v37 = vld [vmem:[%s19232_s3 + $0x3898] sm:$0xff] }
 0x36a   :  { %5937 = vmatprep.subr.mxu1 %v3915_v31  ;;  %5962 = vmatprep.subr.mxu0 %v4122_v63  ;;  %v3852_v31 = vld [vmem:[%s19232_s3 + $0x31e0] sm:$0xff]  ;;  %v4059_v63 = vld [vmem:[%s19232_s3 + $0x3858] sm:$0xff] }
 0x36b   :  { %5938 = vmatpush2.msra.mxu1 %v3914_v2  ;;  %5963 = vmatpush1.msra.mxu0 %v4121_v5  ;;  %v4058_v5 = vld [vmem:[%s19232_s3 + $0x3850] sm:$0xff] }
 0x36c   :  { %6026 = vmatprep.mubr.f32.mxu0 %v12150_v21  ;;  %5939 = vmatprep.subr.mxu1 %v3906_v10  ;;  %v3843_v10 = vld [vmem:[%s19232_s3 + $0x3198] sm:$0xff] }
 0x36d   :  { %5964 = vmatprep.subr.mxu0 %v4113_v55  ;;  %5940 = vmatpush2.msra.mxu1 %v3905_v25  ;;  %v4050_v25 = vld [vmem:[%s19232_s3 + $0x3810] sm:$0xff] }
 0x36e   :  { %5965 = vmatpush1.msra.mxu0 %v4112_v40  ;;  %5941 = vmatprep.subr.mxu1 %v3897_v15  ;;  %v3842_v40 = vld [vmem:[%s19232_s3 + $0x3190] sm:$0xff]  ;;  %v4049_v15 = vld [vmem:[%s19232_s3 + $0x3808] sm:$0xff] }
 0x36f   :  { %5966 = vmatprep.subr.mxu0 %v4104_v36  ;;  %5942 = vmatpush2.msra.mxu1 %v3896_v42  ;;  %v4041_v36 = vld [vmem:[%s19232_s3 + $0x37c8] sm:$0xff]  ;;  %v4410_v42 = vld [vmem:[%s19232_s3 + $0x4350] sm:$0xff] }
 0x370   :  { %5967 = vmatpush1.msra.mxu0 %v4103_v7  ;;  %5943 = vmatprep.subr.mxu1 %v3888_v23  ;;  %v4040_v7 = vld [vmem:[%s19232_s3 + $0x37c0] sm:$0xff]  ;;  %v4409_v23 = vld [vmem:[%s19232_s3 + $0x4348] sm:$0xff] }
 0x371   :  { %5968 = vmatprep.subr.mxu0 %v4095_v24  ;;  %5944 = vmatpush2.msra.mxu1 %v3887_v8  ;;  %v4032_v24 = vld [vmem:[%s19232_s3 + $0x3780] sm:$0xff]  ;;  %v4401_v8 = vld [vmem:[%s19232_s3 + $0x4308] sm:$0xff] }
 0x372   :  { %5969 = vmatpush1.msra.mxu0 %v4094_v32  ;;  %5945 = vmatprep.subr.mxu1 %v3879_v14  ;;  %v4031_v32 = vld [vmem:[%s19232_s3 + $0x3778] sm:$0xff]  ;;  %v4400_v14 = vld [vmem:[%s19232_s3 + $0x4300] sm:$0xff] }
 0x373   :  { %5970 = vmatprep.subr.mxu0 %v4086_v39  ;;  %5946 = vmatpush2.msra.mxu1 %v3878_v41  ;;  %v4023_v39 = vld [vmem:[%s19232_s3 + $0x3738] sm:$0xff]  ;;  %v4392_v41 = vld [vmem:[%s19232_s3 + $0x42c0] sm:$0xff] }
 0x374   :  { %5971 = vmatpush1.msra.mxu0 %v4085_v48  ;;  %5947 = vmatprep.subr.mxu1 %v3870_v9  ;;  %v4022_v48 = vld [vmem:[%s19232_s3 + $0x3730] sm:$0xff]  ;;  %v4391_v9 = vld [vmem:[%s19232_s3 + $0x42b8] sm:$0xff] }
 0x375   :  { %5972 = vmatprep.subr.mxu0 %v4077_v54  ;;  %5948 = vmatpush2.msra.mxu1 %v3869_v12  ;;  %v4383_v54 = vld [vmem:[%s19232_s3 + $0x4278] sm:$0xff]  ;;  %v4013_v12 = vld [vmem:[%s19232_s3 + $0x36e8] sm:$0xff] }
 0x376   :  { %5973 = vmatpush1.msra.mxu0 %v4076_v52  ;;  %5949 = vmatprep.subr.mxu1 %v3861_v61  ;;  %v5531_v2 = vpop.f32.mrf.mxu1  ;;  %v4382_v52 = vld [vmem:[%s19232_s3 + $0x4270] sm:$0xff]  ;;  %v4005_v61 = vld [vmem:[%s19232_s3 + $0x36a8] sm:$0xff] }
 0x377   :  { %5974 = vmatprep.subr.mxu0 %v4068_v43  ;;  %5950 = vmatpush2.msra.mxu1 %v3860_v18  ;;  %v14127_v55 = vadd.f32 %v5531_v2, %v5461_v0  ;;  %v4374_v43 = vld [vmem:[%s19232_s3 + $0x4230] sm:$0xff]  ;;  %v4004_v18 = vld [vmem:[%s19232_s3 + $0x36a0] sm:$0xff]  ;;  %v4373_v0 = vld [vmem:[%s19232_s3 + $0x4228] sm:$0xff] }
 0x378   :  { %5975 = vmatpush1.msra.mxu0 %v4067_v37  ;;  %5951 = vmatprep.subr.mxu1 %v3852_v31  ;;  %v3996_v37 = vld [vmem:[%s19232_s3 + $0x3660] sm:$0xff]  ;;  %v4365_v31 = vld [vmem:[%s19232_s3 + $0x41e8] sm:$0xff]  ;;  %v3987_v2 = vld [vmem:[%s19232_s3 + $0x3618] sm:$0xff] }
 0x379   :  { %5976 = vmatprep.subr.mxu0 %v4059_v63  ;;  %5952 = vmatpush2.msra.mxu1 %v3851_v30  ;;  %v3995_v63 = vld [vmem:[%s19232_s3 + $0x3658] sm:$0xff]  ;;  %v4364_v30 = vld [vmem:[%s19232_s3 + $0x41e0] sm:$0xff]  ;;  %vm8083_vm4 = vcmp.gt.f32.partialorder %v14127_v55, 0.0 }
 0x37a   :  { %5977 = vmatpush1.msra.mxu0 %v4058_v5  ;;  %5953 = vmatprep.subr.mxu1 %v3843_v10  ;;  %v4356_v5 = vld [vmem:[%s19232_s3 + $0x41a0] sm:$0xff]  ;;  %v3986_v10 = vld [vmem:[%s19232_s3 + $0x3610] sm:$0xff] }
 0x37b   :  { %5978 = vmatprep.subr.mxu0 %v4050_v25  ;;  %5954 = vmatpush2.msra.mxu1 %v3842_v40  ;;  %v4355_v25 = vld [vmem:[%s19232_s3 + $0x4198] sm:$0xff]  ;;  %v4266_v40 = vld [vmem:[%s19232_s3 + $0x3ed0] sm:$0xff] }
 0x37c   :  { %5979 = vmatpush1.msra.mxu0 %v4049_v15  ;;  %5956 = vmatmul.mubr.f32.vlgmr.msra.gmra.mxu1 %v12428_v57  ;;  %v4347_v15 = vld [vmem:[%s19232_s3 + $0x4158] sm:$0xff] }
 0x37d   :  { %5980 = vmatprep.subr.mxu0 %v4041_v36  ;;  %6033 = vmatprep.subr.mxu1 %v4410_v42  ;;  %v4265_v36 = vld [vmem:[%s19232_s3 + $0x3ec8] sm:$0xff]  ;;  %v4346_v42 = vld [vmem:[%s19232_s3 + $0x4150] sm:$0xff] }
 0x37e   :  { %5981 = vmatpush1.msra.mxu0 %v4040_v7  ;;  %6034 = vmatpush1.msra.mxu1 %v4409_v23  ;;  %v4257_v7 = vld [vmem:[%s19232_s3 + $0x3e88] sm:$0xff]  ;;  %v4338_v23 = vld [vmem:[%s19232_s3 + $0x4110] sm:$0xff] }
 0x37f   :  { %6097 = vmatprep.mubr.f32.mxu1 %v12446_v62  ;;  %5982 = vmatprep.subr.mxu0 %v4032_v24  ;;  %v4256_v24 = vld [vmem:[%s19232_s3 + $0x3e80] sm:$0xff] }
 0x380   :  { %6035 = vmatprep.subr.mxu1 %v4401_v8  ;;  %5983 = vmatpush1.msra.mxu0 %v4031_v32  ;;  %v4337_v8 = vld [vmem:[%s19232_s3 + $0x4108] sm:$0xff]  ;;  %v4248_v32 = vld [vmem:[%s19232_s3 + $0x3e40] sm:$0xff] }
 0x381   :  { %6036 = vmatpush1.msra.mxu1 %v4400_v14  ;;  %5984 = vmatprep.subr.mxu0 %v4023_v39  ;;  %v4329_v14 = vld [vmem:[%s19232_s3 + $0x40c8] sm:$0xff]  ;;  %v4247_v39 = vld [vmem:[%s19232_s3 + $0x3e38] sm:$0xff] }
 0x382   :  { %6037 = vmatprep.subr.mxu1 %v4392_v41  ;;  %5985 = vmatpush1.msra.mxu0 %v4022_v48  ;;  %v4328_v41 = vld [vmem:[%s19232_s3 + $0x40c0] sm:$0xff]  ;;  %v4239_v48 = vld [vmem:[%s19232_s3 + $0x3df8] sm:$0xff] }
 0x383   :  { %6038 = vmatpush1.msra.mxu1 %v4391_v9  ;;  %5986 = vmatprep.subr.mxu0 %v4014_v49  ;;  %v4320_v9 = vld [vmem:[%s19232_s3 + $0x4080] sm:$0xff]  ;;  %v4238_v49 = vld [vmem:[%s19232_s3 + $0x3df0] sm:$0xff] }
 0x384   :  { %6039 = vmatprep.subr.mxu1 %v4383_v54  ;;  %5987 = vmatpush1.msra.mxu0 %v4013_v12  ;;  %v4319_v54 = vld [vmem:[%s19232_s3 + $0x4078] sm:$0xff]  ;;  %v4230_v12 = vld [vmem:[%s19232_s3 + $0x3db0] sm:$0xff] }
 0x385   :  { %6040 = vmatpush1.msra.mxu1 %v4382_v52  ;;  %5988 = vmatprep.subr.mxu0 %v4005_v61  ;;  %v4311_v52 = vld [vmem:[%s19232_s3 + $0x4038] sm:$0xff]  ;;  %v4229_v61 = vld [vmem:[%s19232_s3 + $0x3da8] sm:$0xff] }
 0x386   :  { %6041 = vmatprep.subr.mxu1 %v4374_v43  ;;  %5989 = vmatpush1.msra.mxu0 %v4004_v18  ;;  %v4310_v43 = vld [vmem:[%s19232_s3 + $0x4030] sm:$0xff]  ;;  %v4221_v18 = vld [vmem:[%s19232_s3 + $0x3d68] sm:$0xff] }
 0x387   :  { %6042 = vmatpush1.msra.mxu1 %v4373_v0  ;;  %5990 = vmatprep.subr.mxu0 %v3996_v37  ;;  %v4302_v0 = vld [vmem:[%s19232_s3 + $0x3ff0] sm:$0xff]  ;;  %v4220_v37 = vld [vmem:[%s19232_s3 + $0x3d60] sm:$0xff] }
 0x388   :  { %6043 = vmatprep.subr.mxu1 %v4365_v31  ;;  %5991 = vmatpush1.msra.mxu0 %v3995_v63  ;;  %v4301_v31 = vld [vmem:[%s19232_s3 + $0x3fe8] sm:$0xff]  ;;  %v4212_v63 = vld [vmem:[%s19232_s3 + $0x3d20] sm:$0xff] }
 0x389   :  { %6044 = vmatpush1.msra.mxu1 %v4364_v30  ;;  %5992 = vmatprep.subr.mxu0 %v3987_v2  ;;  %v4293_v30 = vld [vmem:[%s19232_s3 + $0x3fa8] sm:$0xff]  ;;  %v4211_v2 = vld [vmem:[%s19232_s3 + $0x3d18] sm:$0xff] }
 0x38a   :  { %6045 = vmatprep.subr.mxu1 %v4356_v5  ;;  %5993 = vmatpush1.msra.mxu0 %v3986_v10  ;;  %v4292_v5 = vld [vmem:[%s19232_s3 + $0x3fa0] sm:$0xff]  ;;  %v4203_v10 = vld [vmem:[%s19232_s3 + $0x3cd8] sm:$0xff] }
 0x38b   :  { %6046 = vmatpush1.msra.mxu1 %v4355_v25  ;;  %5994 = vmatprep.subr.mxu0 %v4266_v40  ;;  %v4284_v25 = vld [vmem:[%s19232_s3 + $0x3f60] sm:$0xff]  ;;  %v4202_v40 = vld [vmem:[%s19232_s3 + $0x3cd0] sm:$0xff] }
 0x38c   :  { %6047 = vmatprep.subr.mxu1 %v4347_v15  ;;  %5995 = vmatpush2.msra.mxu0 %v4265_v36  ;;  %v4283_v15 = vld [vmem:[%s19232_s3 + $0x3f58] sm:$0xff]  ;;  %v4194_v36 = vld [vmem:[%s19232_s3 + $0x3c90] sm:$0xff] }
 0x38d   :  { %6048 = vmatpush1.msra.mxu1 %v4346_v42  ;;  %5996 = vmatprep.subr.mxu0 %v4257_v7  ;;  %v4275_v42 = vld [vmem:[%s19232_s3 + $0x3f18] sm:$0xff]  ;;  %v4193_v7 = vld [vmem:[%s19232_s3 + $0x3c88] sm:$0xff] }
 0x38e   :  { %6049 = vmatprep.subr.mxu1 %v4338_v23  ;;  %5997 = vmatpush2.msra.mxu0 %v4256_v24  ;;  %v4274_v23 = vld [vmem:[%s19232_s3 + $0x3f10] sm:$0xff]  ;;  %v4185_v24 = vld [vmem:[%s19232_s3 + $0x3c48] sm:$0xff] }
 0x38f   :  { %6050 = vmatpush1.msra.mxu1 %v4337_v8  ;;  %5998 = vmatprep.subr.mxu0 %v4248_v32  ;;  %v4554_v8 = vld [vmem:[%s19232_s3 + $0x47d0] sm:$0xff]  ;;  %v4184_v32 = vld [vmem:[%s19232_s3 + $0x3c40] sm:$0xff] }
 0x390   :  { %6051 = vmatprep.subr.mxu1 %v4329_v14  ;;  %5999 = vmatpush2.msra.mxu0 %v4247_v39  ;;  %v4553_v14 = vld [vmem:[%s19232_s3 + $0x47c8] sm:$0xff]  ;;  %v4176_v39 = vld [vmem:[%s19232_s3 + $0x3c00] sm:$0xff] }
 0x391   :  { %6052 = vmatpush1.msra.mxu1 %v4328_v41  ;;  %6000 = vmatprep.subr.mxu0 %v4239_v48  ;;  %v4545_v41 = vld [vmem:[%s19232_s3 + $0x4788] sm:$0xff]  ;;  %v4175_v48 = vld [vmem:[%s19232_s3 + $0x3bf8] sm:$0xff] }
 0x392   :  { %6053 = vmatprep.subr.mxu1 %v4320_v9  ;;  %6001 = vmatpush2.msra.mxu0 %v4238_v49  ;;  %v4544_v9 = vld [vmem:[%s19232_s3 + $0x4780] sm:$0xff]  ;;  %v4167_v49 = vld [vmem:[%s19232_s3 + $0x3bb8] sm:$0xff] }
 0x393   :  { %6054 = vmatpush1.msra.mxu1 %v4319_v54  ;;  %6002 = vmatprep.subr.mxu0 %v4230_v12  ;;  %v4536_v54 = vld [vmem:[%s19232_s3 + $0x4740] sm:$0xff]  ;;  %v4166_v12 = vld [vmem:[%s19232_s3 + $0x3bb0] sm:$0xff] }
 0x394   :  { %6055 = vmatprep.subr.mxu1 %v4311_v52  ;;  %6003 = vmatpush2.msra.mxu0 %v4229_v61  ;;  %v4535_v52 = vld [vmem:[%s19232_s3 + $0x4738] sm:$0xff]  ;;  %v4158_v61 = vld [vmem:[%s19232_s3 + $0x3b70] sm:$0xff] }
 0x395   :  { %6056 = vmatpush1.msra.mxu1 %v4310_v43  ;;  %6004 = vmatprep.subr.mxu0 %v4221_v18  ;;  %v4527_v43 = vld [vmem:[%s19232_s3 + $0x46f8] sm:$0xff]  ;;  %v4157_v18 = vld [vmem:[%s19232_s3 + $0x3b68] sm:$0xff] }
 0x396   :  { %6057 = vmatprep.subr.mxu1 %v4302_v0  ;;  %6005 = vmatpush2.msra.mxu0 %v4220_v37  ;;  %v4526_v0 = vld [vmem:[%s19232_s3 + $0x46f0] sm:$0xff]  ;;  %v4149_v37 = vld [vmem:[%s19232_s3 + $0x3b28] sm:$0xff] }
 0x397   :  { %6058 = vmatpush1.msra.mxu1 %v4301_v31  ;;  %6006 = vmatprep.subr.mxu0 %v4212_v63  ;;  %v4518_v31 = vld [vmem:[%s19232_s3 + $0x46b0] sm:$0xff]  ;;  %v4148_v63 = vld [vmem:[%s19232_s3 + $0x3b20] sm:$0xff] }
 0x398   :  { %6059 = vmatprep.subr.mxu1 %v4293_v30  ;;  %6007 = vmatpush2.msra.mxu0 %v4211_v2  ;;  %v4517_v30 = vld [vmem:[%s19232_s3 + $0x46a8] sm:$0xff]  ;;  %v4140_v2 = vld [vmem:[%s19232_s3 + $0x3ae0] sm:$0xff] }
 0x399   :  { %6060 = vmatpush1.msra.mxu1 %v4292_v5  ;;  %6008 = vmatprep.subr.mxu0 %v4203_v10  ;;  %v4509_v5 = vld [vmem:[%s19232_s3 + $0x4668] sm:$0xff]  ;;  %v4139_v10 = vld [vmem:[%s19232_s3 + $0x3ad8] sm:$0xff] }
 0x39a   :  { %6061 = vmatprep.subr.mxu1 %v4284_v25  ;;  %6009 = vmatpush2.msra.mxu0 %v4202_v40  ;;  %v4508_v25 = vld [vmem:[%s19232_s3 + $0x4660] sm:$0xff]  ;;  %v4131_v40 = vld [vmem:[%s19232_s3 + $0x3a98] sm:$0xff] }
 0x39b   :  { %6062 = vmatpush1.msra.mxu1 %v4283_v15  ;;  %6010 = vmatprep.subr.mxu0 %v4194_v36  ;;  %v4500_v15 = vld [vmem:[%s19232_s3 + $0x4620] sm:$0xff]  ;;  %v4130_v36 = vld [vmem:[%s19232_s3 + $0x3a90] sm:$0xff] }
 0x39c   :  { %6063 = vmatprep.subr.mxu1 %v4275_v42  ;;  %6011 = vmatpush2.msra.mxu0 %v4193_v7  ;;  %v4499_v42 = vld [vmem:[%s19232_s3 + $0x4618] sm:$0xff] }
 0x39d   :  { %6064 = vmatpush1.msra.mxu1 %v4274_v23  ;;  %6012 = vmatprep.subr.mxu0 %v4185_v24  ;;  %v4491_v7 = vld [vmem:[%s19232_s3 + $0x45d8] sm:$0xff]  ;;  %v4698_v23 = vld [vmem:[%s19232_s3 + $0x4c50] sm:$0xff] }
 0x39e   :  { %6065 = vmatprep.subr.mxu1 %v4554_v8  ;;  %6013 = vmatpush2.msra.mxu0 %v4184_v32  ;;  %v4490_v24 = vld [vmem:[%s19232_s3 + $0x45d0] sm:$0xff]  ;;  %v4697_v8 = vld [vmem:[%s19232_s3 + $0x4c48] sm:$0xff] }
 0x39f   :  { %6066 = vmatpush2.msra.mxu1 %v4553_v14  ;;  %6014 = vmatprep.subr.mxu0 %v4176_v39  ;;  %v4482_v32 = vld [vmem:[%s19232_s3 + $0x4590] sm:$0xff]  ;;  %v4689_v14 = vld [vmem:[%s19232_s3 + $0x4c08] sm:$0xff] }
 0x3a0   :  { %6067 = vmatprep.subr.mxu1 %v4545_v41  ;;  %6015 = vmatpush2.msra.mxu0 %v4175_v48  ;;  %v4481_v39 = vld [vmem:[%s19232_s3 + $0x4588] sm:$0xff]  ;;  %v4688_v41 = vld [vmem:[%s19232_s3 + $0x4c00] sm:$0xff] }
 0x3a1   :  { %6068 = vmatpush2.msra.mxu1 %v4544_v9  ;;  %6016 = vmatprep.subr.mxu0 %v4167_v49  ;;  %v4473_v48 = vld [vmem:[%s19232_s3 + $0x4548] sm:$0xff]  ;;  %v4680_v9 = vld [vmem:[%s19232_s3 + $0x4bc0] sm:$0xff] }
 0x3a2   :  { %6069 = vmatprep.subr.mxu1 %v4536_v54  ;;  %6017 = vmatpush2.msra.mxu0 %v4166_v12  ;;  %v4472_v49 = vld [vmem:[%s19232_s3 + $0x4540] sm:$0xff]  ;;  %v4679_v54 = vld [vmem:[%s19232_s3 + $0x4bb8] sm:$0xff] }
 0x3a3   :  { %6070 = vmatpush2.msra.mxu1 %v4535_v52  ;;  %6018 = vmatprep.subr.mxu0 %v4158_v61  ;;  %v4464_v12 = vld [vmem:[%s19232_s3 + $0x4500] sm:$0xff]  ;;  %v4671_v52 = vld [vmem:[%s19232_s3 + $0x4b78] sm:$0xff] }
 0x3a4   :  { %6071 = vmatprep.subr.mxu1 %v4527_v43  ;;  %6019 = vmatpush2.msra.mxu0 %v4157_v18  ;;  %v4463_v61 = vld [vmem:[%s19232_s3 + $0x44f8] sm:$0xff]  ;;  %v4670_v43 = vld [vmem:[%s19232_s3 + $0x4b70] sm:$0xff] }
 0x3a5   :  { %6072 = vmatpush2.msra.mxu1 %v4526_v0  ;;  %6020 = vmatprep.subr.mxu0 %v4149_v37  ;;  %v4455_v18 = vld [vmem:[%s19232_s3 + $0x44b8] sm:$0xff]  ;;  %v4662_v0 = vld [vmem:[%s19232_s3 + $0x4b30] sm:$0xff] }
 0x3a6   :  { %6073 = vmatprep.subr.mxu1 %v4518_v31  ;;  %6021 = vmatpush2.msra.mxu0 %v4148_v63  ;;  %v4454_v37 = vld [vmem:[%s19232_s3 + $0x44b0] sm:$0xff]  ;;  %v4661_v31 = vld [vmem:[%s19232_s3 + $0x4b28] sm:$0xff] }
 0x3a7   :  { %6074 = vmatpush2.msra.mxu1 %v4517_v30  ;;  %6022 = vmatprep.subr.mxu0 %v4140_v2  ;;  %v4446_v63 = vld [vmem:[%s19232_s3 + $0x4470] sm:$0xff]  ;;  %v4653_v30 = vld [vmem:[%s19232_s3 + $0x4ae8] sm:$0xff] }
 0x3a8   :  { %6075 = vmatprep.subr.mxu1 %v4509_v5  ;;  %6023 = vmatpush2.msra.mxu0 %v4139_v10  ;;  %v4445_v2 = vld [vmem:[%s19232_s3 + $0x4468] sm:$0xff]  ;;  %v4652_v5 = vld [vmem:[%s19232_s3 + $0x4ae0] sm:$0xff] }
 0x3a9   :  { %6076 = vmatpush2.msra.mxu1 %v4508_v25  ;;  %6024 = vmatprep.subr.mxu0 %v4131_v40  ;;  %v4437_v10 = vld [vmem:[%s19232_s3 + $0x4428] sm:$0xff]  ;;  %v4644_v25 = vld [vmem:[%s19232_s3 + $0x4aa0] sm:$0xff] }
 0x3aa   :  { %6077 = vmatprep.subr.mxu1 %v4500_v15  ;;  %6025 = vmatpush2.msra.mxu0 %v4130_v36  ;;  %v4436_v40 = vld [vmem:[%s19232_s3 + $0x4420] sm:$0xff]  ;;  %v4643_v15 = vld [vmem:[%s19232_s3 + $0x4a98] sm:$0xff] }
 0x3ab   :  { %6078 = vmatpush2.msra.mxu1 %v4499_v42  ;;  %6027 = vmatmul.mubr.f32.vlgmr.msra.gmra.mxu0 %v12549_v56  ;;  %v4428_v36 = vld [vmem:[%s19232_s3 + $0x43e0] sm:$0xff]  ;;  %v4635_v42 = vld [vmem:[%s19232_s3 + $0x4a58] sm:$0xff] }
 0x3ac   :  { %6079 = vmatprep.subr.mxu1 %v4491_v7  ;;  %6104 = vmatprep.subr.mxu0 %v4698_v23  ;;  %v4427_v7 = vld [vmem:[%s19232_s3 + $0x43d8] sm:$0xff]  ;;  %v4634_v23 = vld [vmem:[%s19232_s3 + $0x4a50] sm:$0xff] }
 0x3ad   :  { %6080 = vmatpush2.msra.mxu1 %v4490_v24  ;;  %6105 = vmatpush1.msra.mxu0 %v4697_v8  ;;  %v4419_v24 = vld [vmem:[%s19232_s3 + $0x4398] sm:$0xff]  ;;  %v4626_v8 = vld [vmem:[%s19232_s3 + $0x4a10] sm:$0xff] }
 0x3ae   :  { %6168 = vmatprep.mubr.f32.mxu0 %v12567_v47  ;;  %6081 = vmatprep.subr.mxu1 %v4482_v32  ;;  %v4418_v32 = vld [vmem:[%s19232_s3 + $0x4390] sm:$0xff] }
 0x3af   :  { %6106 = vmatprep.subr.mxu0 %v4689_v14  ;;  %6082 = vmatpush2.msra.mxu1 %v4481_v39  ;;  %v4625_v14 = vld [vmem:[%s19232_s3 + $0x4a08] sm:$0xff] }
 0x3b0   :  { %6107 = vmatpush1.msra.mxu0 %v4688_v41  ;;  %6083 = vmatprep.subr.mxu1 %v4473_v48  ;;  %v4617_v39 = vld [vmem:[%s19232_s3 + $0x49c8] sm:$0xff]  ;;  %v2396_v41 = vld [vmem:[%s19232_s3 + $0x460] sm:$0xff] }
 0x3b1   :  { %6108 = vmatprep.subr.mxu0 %v4680_v9  ;;  %6084 = vmatpush2.msra.mxu1 %v4472_v49  ;;  %v4616_v48 = vld [vmem:[%s19232_s3 + $0x49c0] sm:$0xff]  ;;  %v2395_v9 = vld [vmem:[%s19232_s3 + $0x458] sm:$0xff] }
 0x3b2   :  { %6109 = vmatpush1.msra.mxu0 %v4679_v54  ;;  %6085 = vmatprep.subr.mxu1 %v4464_v12  ;;  %v4608_v49 = vld [vmem:[%s19232_s3 + $0x4980] sm:$0xff]  ;;  %v2387_v54 = vld [vmem:[%s19232_s3 + $0x418] sm:$0xff] }
 0x3b3   :  { %6110 = vmatprep.subr.mxu0 %v4671_v52  ;;  %6086 = vmatpush2.msra.mxu1 %v4463_v61  ;;  %v4607_v12 = vld [vmem:[%s19232_s3 + $0x4978] sm:$0xff]  ;;  %v2386_v52 = vld [vmem:[%s19232_s3 + $0x410] sm:$0xff] }
 0x3b4   :  { %6111 = vmatpush1.msra.mxu0 %v4670_v43  ;;  %6087 = vmatprep.subr.mxu1 %v4455_v18  ;;  %v4599_v61 = vld [vmem:[%s19232_s3 + $0x4938] sm:$0xff]  ;;  %v2378_v43 = vld [vmem:[%s19232_s3 + $0x3d0] sm:$0xff] }
 0x3b5   :  { %6112 = vmatprep.subr.mxu0 %v4662_v0  ;;  %6088 = vmatpush2.msra.mxu1 %v4454_v37  ;;  %v4598_v18 = vld [vmem:[%s19232_s3 + $0x4930] sm:$0xff]  ;;  %v2377_v0 = vld [vmem:[%s19232_s3 + $0x3c8] sm:$0xff] }
 0x3b6   :  { %6113 = vmatpush1.msra.mxu0 %v4661_v31  ;;  %6089 = vmatprep.subr.mxu1 %v4446_v63  ;;  %v4590_v37 = vld [vmem:[%s19232_s3 + $0x48f0] sm:$0xff]  ;;  %v2369_v31 = vld [vmem:[%s19232_s3 + $0x388] sm:$0xff] }
 0x3b7   :  { %6114 = vmatprep.subr.mxu0 %v4653_v30  ;;  %6090 = vmatpush2.msra.mxu1 %v4445_v2  ;;  %v4589_v63 = vld [vmem:[%s19232_s3 + $0x48e8] sm:$0xff]  ;;  %v2368_v30 = vld [vmem:[%s19232_s3 + $0x380] sm:$0xff] }
 0x3b8   :  { %6115 = vmatpush1.msra.mxu0 %v4652_v5  ;;  %6091 = vmatprep.subr.mxu1 %v4437_v10  ;;  %v4581_v2 = vld [vmem:[%s19232_s3 + $0x48a8] sm:$0xff]  ;;  %v2360_v5 = vld [vmem:[%s19232_s3 + $0x340] sm:$0xff] }
 0x3b9   :  { %6116 = vmatprep.subr.mxu0 %v4644_v25  ;;  %6092 = vmatpush2.msra.mxu1 %v4436_v40  ;;  %v4580_v10 = vld [vmem:[%s19232_s3 + $0x48a0] sm:$0xff]  ;;  %v2359_v25 = vld [vmem:[%s19232_s3 + $0x338] sm:$0xff] }
 0x3ba   :  { %6117 = vmatpush1.msra.mxu0 %v4643_v15  ;;  %6093 = vmatprep.subr.mxu1 %v4428_v36  ;;  %v4572_v40 = vld [vmem:[%s19232_s3 + $0x4860] sm:$0xff]  ;;  %v2351_v15 = vld [vmem:[%s19232_s3 + $0x2f8] sm:$0xff] }
 0x3bb   :  { %6118 = vmatprep.subr.mxu0 %v4635_v42  ;;  %6094 = vmatpush2.msra.mxu1 %v4427_v7  ;;  %v4571_v36 = vld [vmem:[%s19232_s3 + $0x4858] sm:$0xff]  ;;  %v2350_v42 = vld [vmem:[%s19232_s3 + $0x2f0] sm:$0xff] }
 0x3bc   :  { %6119 = vmatpush1.msra.mxu0 %v4634_v23  ;;  %6095 = vmatprep.subr.mxu1 %v4419_v24  ;;  %v4563_v7 = vld [vmem:[%s19232_s3 + $0x4818] sm:$0xff]  ;;  %v2342_v23 = vld [vmem:[%s19232_s3 + $0x2b0] sm:$0xff] }
 0x3bd   :  { %6120 = vmatprep.subr.mxu0 %v4626_v8  ;;  %6096 = vmatpush2.msra.mxu1 %v4418_v32  ;;  %v4562_v24 = vld [vmem:[%s19232_s3 + $0x4810] sm:$0xff]  ;;  %v2341_v8 = vld [vmem:[%s19232_s3 + $0x2a8] sm:$0xff] }
 0x3be   :  { %6121 = vmatpush1.msra.mxu0 %v4625_v14  ;;  %6098 = vmatmul.mubr.f32.vlgmr.msra.gmra.mxu1 %v12834_v26  ;;  %v4842_v32 = vld [vmem:[%s19232_s3 + $0x50d0] sm:$0xff]  ;;  %v2333_v14 = vld [vmem:[%s19232_s3 + $0x268] sm:$0xff] }
 0x3bf   :  { %6122 = vmatprep.subr.mxu0 %v4617_v39  ;;  %6175 = vmatprep.subr.mxu1 %v2396_v41  ;;  %v4841_v39 = vld [vmem:[%s19232_s3 + $0x50c8] sm:$0xff]  ;;  %v2332_v41 = vld [vmem:[%s19232_s3 + $0x260] sm:$0xff] }
 0x3c0   :  { %6123 = vmatpush1.msra.mxu0 %v4616_v48  ;;  %6176 = vmatpush1.msra.mxu1 %v2395_v9  ;;  %v4833_v48 = vld [vmem:[%s19232_s3 + $0x5088] sm:$0xff]  ;;  %v2324_v9 = vld [vmem:[%s19232_s3 + $0x220] sm:$0xff] }
 0x3c1   :  { %6239 = vmatprep.mubr.f32.mxu1 %v10852_v3  ;;  %6124 = vmatprep.subr.mxu0 %v4608_v49  ;;  %v4832_v49 = vld [vmem:[%s19232_s3 + $0x5080] sm:$0xff] }
 0x3c2   :  { %6177 = vmatprep.subr.mxu1 %v2387_v54  ;;  %6125 = vmatpush1.msra.mxu0 %v4607_v12  ;;  %v2323_v54 = vld [vmem:[%s19232_s3 + $0x218] sm:$0xff]  ;;  %v4824_v12 = vld [vmem:[%s19232_s3 + $0x5040] sm:$0xff] }
 0x3c3   :  { %6178 = vmatpush1.msra.mxu1 %v2386_v52  ;;  %6126 = vmatprep.subr.mxu0 %v4599_v61  ;;  %v2315_v52 = vld [vmem:[%s19232_s3 + $0x1d8] sm:$0xff] }
 0x3c4   :  { %6179 = vmatprep.subr.mxu1 %v2378_v43  ;;  %6127 = vmatpush1.msra.mxu0 %v4598_v18  ;;  %v4823_v61 = vld [vmem:[%s19232_s3 + $0x5038] sm:$0xff]  ;;  %v2314_v43 = vld [vmem:[%s19232_s3 + $0x1d0] sm:$0xff] }
 0x3c5   :  { %6180 = vmatpush1.msra.mxu1 %v2377_v0  ;;  %6128 = vmatprep.subr.mxu0 %v4590_v37  ;;  %v4815_v18 = vld [vmem:[%s19232_s3 + $0x4ff8] sm:$0xff]  ;;  %v2306_v0 = vld [vmem:[%s19232_s3 + $0x190] sm:$0xff] }
 0x3c6   :  { %6181 = vmatprep.subr.mxu1 %v2369_v31  ;;  %6129 = vmatpush1.msra.mxu0 %v4589_v63  ;;  %v4814_v37 = vld [vmem:[%s19232_s3 + $0x4ff0] sm:$0xff]  ;;  %v2305_v31 = vld [vmem:[%s19232_s3 + $0x188] sm:$0xff] }
 0x3c7   :  { %6182 = vmatpush1.msra.mxu1 %v2368_v30  ;;  %6130 = vmatprep.subr.mxu0 %v4581_v2  ;;  %v4806_v63 = vld [vmem:[%s19232_s3 + $0x4fb0] sm:$0xff]  ;;  %v2297_v30 = vld [vmem:[%s19232_s3 + $0x148] sm:$0xff] }
 0x3c8   :  { %6183 = vmatprep.subr.mxu1 %v2360_v5  ;;  %6131 = vmatpush1.msra.mxu0 %v4580_v10  ;;  %v4805_v2 = vld [vmem:[%s19232_s3 + $0x4fa8] sm:$0xff]  ;;  %v2296_v5 = vld [vmem:[%s19232_s3 + $0x140] sm:$0xff] }
 0x3c9   :  { %6184 = vmatpush1.msra.mxu1 %v2359_v25  ;;  %6132 = vmatprep.subr.mxu0 %v4572_v40  ;;  %v4797_v10 = vld [vmem:[%s19232_s3 + $0x4f68] sm:$0xff]  ;;  %v2288_v25 = vld [vmem:[%s19232_s3 + $0x100] sm:$0xff] }
 0x3ca   :  { %6185 = vmatprep.subr.mxu1 %v2351_v15  ;;  %6133 = vmatpush1.msra.mxu0 %v4571_v36  ;;  %v4796_v40 = vld [vmem:[%s19232_s3 + $0x4f60] sm:$0xff]  ;;  %v2287_v15 = vld [vmem:[%s19232_s3 + $0xf8] sm:$0xff] }
 0x3cb   :  { %6186 = vmatpush1.msra.mxu1 %v2350_v42  ;;  %6134 = vmatprep.subr.mxu0 %v4563_v7  ;;  %v4788_v36 = vld [vmem:[%s19232_s3 + $0x4f20] sm:$0xff]  ;;  %v2279_v42 = vld [vmem:[%s19232_s3 + $0xb8] sm:$0xff] }
 0x3cc   :  { %6187 = vmatprep.subr.mxu1 %v2342_v23  ;;  %6135 = vmatpush1.msra.mxu0 %v4562_v24  ;;  %v4787_v7 = vld [vmem:[%s19232_s3 + $0x4f18] sm:$0xff]  ;;  %v2278_v23 = vld [vmem:[%s19232_s3 + $0xb0] sm:$0xff] }
 0x3cd   :  { %6188 = vmatpush1.msra.mxu1 %v2341_v8  ;;  %6136 = vmatprep.subr.mxu0 %v4842_v32  ;;  %v4779_v24 = vld [vmem:[%s19232_s3 + $0x4ed8] sm:$0xff]  ;;  %v2270_v8 = vld [vmem:[%s19232_s3 + $0x70] sm:$0xff] }
 0x3ce   :  { %6189 = vmatprep.subr.mxu1 %v2333_v14  ;;  %6137 = vmatpush2.msra.mxu0 %v4841_v39  ;;  %v4778_v32 = vld [vmem:[%s19232_s3 + $0x4ed0] sm:$0xff]  ;;  %v2269_v14 = vld [vmem:[%s19232_s3 + $0x68] sm:$0xff] }
 0x3cf   :  { %6190 = vmatpush1.msra.mxu1 %v2332_v41  ;;  %6138 = vmatprep.subr.mxu0 %v4833_v48  ;;  %v4770_v39 = vld [vmem:[%s19232_s3 + $0x4e90] sm:$0xff]  ;;  %v2261_v41 = vld [vmem:[%s19232_s3 + $0x28] sm:$0xff] }
 0x3d0   :  { %6191 = vmatprep.subr.mxu1 %v2324_v9  ;;  %6139 = vmatpush2.msra.mxu0 %v4832_v49  ;;  %v4769_v48 = vld [vmem:[%s19232_s3 + $0x4e88] sm:$0xff]  ;;  %v2260_v9 = vld [vmem:[%s19232_s3 + $0x20] sm:$0xff] }
 0x3d1   :  { %6192 = vmatpush1.msra.mxu1 %v2323_v54  ;;  %6140 = vmatprep.subr.mxu0 %v4824_v12  ;;  %v4761_v49 = vld [vmem:[%s19232_s3 + $0x4e48] sm:$0xff]  ;;  %v2540_v54 = vld [vmem:[%s19232_s3 + $0x8e0] sm:$0xff] }
 0x3d2   :  { %6193 = vmatprep.subr.mxu1 %v2315_v52  ;;  %6141 = vmatpush2.msra.mxu0 %v4823_v61  ;;  %v4760_v12 = vld [vmem:[%s19232_s3 + $0x4e40] sm:$0xff]  ;;  %v2539_v52 = vld [vmem:[%s19232_s3 + $0x8d8] sm:$0xff] }
 0x3d3   :  { %6194 = vmatpush1.msra.mxu1 %v2314_v43  ;;  %6142 = vmatprep.subr.mxu0 %v4815_v18  ;;  %v4752_v61 = vld [vmem:[%s19232_s3 + $0x4e00] sm:$0xff]  ;;  %v2531_v43 = vld [vmem:[%s19232_s3 + $0x898] sm:$0xff] }
 0x3d4   :  { %6195 = vmatprep.subr.mxu1 %v2306_v0  ;;  %6143 = vmatpush2.msra.mxu0 %v4814_v37  ;;  %v4751_v18 = vld [vmem:[%s19232_s3 + $0x4df8] sm:$0xff]  ;;  %v2530_v0 = vld [vmem:[%s19232_s3 + $0x890] sm:$0xff] }
 0x3d5   :  { %6196 = vmatpush1.msra.mxu1 %v2305_v31  ;;  %6144 = vmatprep.subr.mxu0 %v4806_v63  ;;  %v4743_v37 = vld [vmem:[%s19232_s3 + $0x4db8] sm:$0xff]  ;;  %v2522_v31 = vld [vmem:[%s19232_s3 + $0x850] sm:$0xff] }
 0x3d6   :  { %6197 = vmatprep.subr.mxu1 %v2297_v30  ;;  %6145 = vmatpush2.msra.mxu0 %v4805_v2  ;;  %v4742_v63 = vld [vmem:[%s19232_s3 + $0x4db0] sm:$0xff]  ;;  %v2521_v30 = vld [vmem:[%s19232_s3 + $0x848] sm:$0xff] }
 0x3d7   :  { %6198 = vmatpush1.msra.mxu1 %v2296_v5  ;;  %6146 = vmatprep.subr.mxu0 %v4797_v10  ;;  %v4734_v2 = vld [vmem:[%s19232_s3 + $0x4d70] sm:$0xff]  ;;  %v2513_v5 = vld [vmem:[%s19232_s3 + $0x808] sm:$0xff] }
 0x3d8   :  { %6199 = vmatprep.subr.mxu1 %v2288_v25  ;;  %6147 = vmatpush2.msra.mxu0 %v4796_v40  ;;  %v4733_v10 = vld [vmem:[%s19232_s3 + $0x4d68] sm:$0xff]  ;;  %v2512_v25 = vld [vmem:[%s19232_s3 + $0x800] sm:$0xff] }
 0x3d9   :  { %6200 = vmatpush1.msra.mxu1 %v2287_v15  ;;  %6148 = vmatprep.subr.mxu0 %v4788_v36  ;;  %v4725_v40 = vld [vmem:[%s19232_s3 + $0x4d28] sm:$0xff]  ;;  %v2504_v15 = vld [vmem:[%s19232_s3 + $0x7c0] sm:$0xff] }
 0x3da   :  { %6201 = vmatprep.subr.mxu1 %v2279_v42  ;;  %6149 = vmatpush2.msra.mxu0 %v4787_v7  ;;  %v4724_v36 = vld [vmem:[%s19232_s3 + $0x4d20] sm:$0xff]  ;;  %v2503_v42 = vld [vmem:[%s19232_s3 + $0x7b8] sm:$0xff] }
 0x3db   :  { %6202 = vmatpush1.msra.mxu1 %v2278_v23  ;;  %6150 = vmatprep.subr.mxu0 %v4779_v24  ;;  %v4716_v7 = vld [vmem:[%s19232_s3 + $0x4ce0] sm:$0xff]  ;;  %v2495_v23 = vld [vmem:[%s19232_s3 + $0x778] sm:$0xff] }
 0x3dc   :  { %6203 = vmatprep.subr.mxu1 %v2270_v8  ;;  %6151 = vmatpush2.msra.mxu0 %v4778_v32  ;;  %v4715_v24 = vld [vmem:[%s19232_s3 + $0x4cd8] sm:$0xff]  ;;  %v2494_v8 = vld [vmem:[%s19232_s3 + $0x770] sm:$0xff] }
 0x3dd   :  { %6204 = vmatpush1.msra.mxu1 %v2269_v14  ;;  %6152 = vmatprep.subr.mxu0 %v4770_v39  ;;  %v4707_v32 = vld [vmem:[%s19232_s3 + $0x4c98] sm:$0xff]  ;;  %v2486_v14 = vld [vmem:[%s19232_s3 + $0x730] sm:$0xff] }
 0x3de   :  { %6205 = vmatprep.subr.mxu1 %v2261_v41  ;;  %6153 = vmatpush2.msra.mxu0 %v4769_v48  ;;  %v4706_v39 = vld [vmem:[%s19232_s3 + $0x4c90] sm:$0xff]  ;;  %v2485_v41 = vld [vmem:[%s19232_s3 + $0x728] sm:$0xff] }
 0x3df   :  { %6206 = vmatpush1.msra.mxu1 %v2260_v9  ;;  %6154 = vmatprep.subr.mxu0 %v4761_v49  ;;  %v2477_v48 = vld [vmem:[%s19232_s3 + $0x6e8] sm:$0xff]  ;;  %v2684_v9 = vld [vmem:[%s19232_s3 + $0xd60] sm:$0xff] }
 0x3e0   :  { %6207 = vmatprep.subr.mxu1 %v2540_v54  ;;  %6155 = vmatpush2.msra.mxu0 %v4760_v12  ;;  %v2476_v49 = vld [vmem:[%s19232_s3 + $0x6e0] sm:$0xff]  ;;  %v2683_v54 = vld [vmem:[%s19232_s3 + $0xd58] sm:$0xff] }
 0x3e1   :  { %6208 = vmatpush2.msra.mxu1 %v2539_v52  ;;  %6156 = vmatprep.subr.mxu0 %v4752_v61  ;;  %v2468_v12 = vld [vmem:[%s19232_s3 + $0x6a0] sm:$0xff]  ;;  %v2675_v52 = vld [vmem:[%s19232_s3 + $0xd18] sm:$0xff] }
 0x3e2   :  { %6209 = vmatprep.subr.mxu1 %v2531_v43  ;;  %6157 = vmatpush2.msra.mxu0 %v4751_v18  ;;  %v2467_v61 = vld [vmem:[%s19232_s3 + $0x698] sm:$0xff]  ;;  %v2674_v43 = vld [vmem:[%s19232_s3 + $0xd10] sm:$0xff] }
 0x3e3   :  { %6210 = vmatpush2.msra.mxu1 %v2530_v0  ;;  %6158 = vmatprep.subr.mxu0 %v4743_v37  ;;  %v2459_v18 = vld [vmem:[%s19232_s3 + $0x658] sm:$0xff]  ;;  %v2666_v0 = vld [vmem:[%s19232_s3 + $0xcd0] sm:$0xff] }
 0x3e4   :  { %6211 = vmatprep.subr.mxu1 %v2522_v31  ;;  %6159 = vmatpush2.msra.mxu0 %v4742_v63  ;;  %v2458_v37 = vld [vmem:[%s19232_s3 + $0x650] sm:$0xff]  ;;  %v2665_v31 = vld [vmem:[%s19232_s3 + $0xcc8] sm:$0xff] }
 0x3e5   :  { %6212 = vmatpush2.msra.mxu1 %v2521_v30  ;;  %6160 = vmatprep.subr.mxu0 %v4734_v2  ;;  %v2450_v63 = vld [vmem:[%s19232_s3 + $0x610] sm:$0xff]  ;;  %v2657_v30 = vld [vmem:[%s19232_s3 + $0xc88] sm:$0xff] }
 0x3e6   :  { %6213 = vmatprep.subr.mxu1 %v2513_v5  ;;  %6161 = vmatpush2.msra.mxu0 %v4733_v10  ;;  %v2449_v2 = vld [vmem:[%s19232_s3 + $0x608] sm:$0xff]  ;;  %v2656_v5 = vld [vmem:[%s19232_s3 + $0xc80] sm:$0xff] }
 0x3e7   :  { %6214 = vmatpush2.msra.mxu1 %v2512_v25  ;;  %6162 = vmatprep.subr.mxu0 %v4725_v40  ;;  %v2441_v10 = vld [vmem:[%s19232_s3 + $0x5c8] sm:$0xff]  ;;  %v2648_v25 = vld [vmem:[%s19232_s3 + $0xc40] sm:$0xff] }
 0x3e8   :  { %6215 = vmatprep.subr.mxu1 %v2504_v15  ;;  %6163 = vmatpush2.msra.mxu0 %v4724_v36  ;;  %v2440_v40 = vld [vmem:[%s19232_s3 + $0x5c0] sm:$0xff]  ;;  %v2647_v15 = vld [vmem:[%s19232_s3 + $0xc38] sm:$0xff] }
 0x3e9   :  { %6216 = vmatpush2.msra.mxu1 %v2503_v42  ;;  %6164 = vmatprep.subr.mxu0 %v4716_v7  ;;  %v2432_v36 = vld [vmem:[%s19232_s3 + $0x580] sm:$0xff]  ;;  %v2639_v42 = vld [vmem:[%s19232_s3 + $0xbf8] sm:$0xff] }
 0x3ea   :  { %6217 = vmatprep.subr.mxu1 %v2495_v23  ;;  %6165 = vmatpush2.msra.mxu0 %v4715_v24  ;;  %v2431_v7 = vld [vmem:[%s19232_s3 + $0x578] sm:$0xff]  ;;  %v2638_v23 = vld [vmem:[%s19232_s3 + $0xbf0] sm:$0xff] }
 0x3eb   :  { %6218 = vmatpush2.msra.mxu1 %v2494_v8  ;;  %6166 = vmatprep.subr.mxu0 %v4707_v32  ;;  %v2423_v24 = vld [vmem:[%s19232_s3 + $0x538] sm:$0xff]  ;;  %v2630_v8 = vld [vmem:[%s19232_s3 + $0xbb0] sm:$0xff] }
 0x3ec   :  { %6219 = vmatprep.subr.mxu1 %v2486_v14  ;;  %6167 = vmatpush2.msra.mxu0 %v4706_v39  ;;  %v2422_v32 = vld [vmem:[%s19232_s3 + $0x530] sm:$0xff]  ;;  %v2629_v14 = vld [vmem:[%s19232_s3 + $0xba8] sm:$0xff] }
 0x3ed   :  { %6220 = vmatpush2.msra.mxu1 %v2485_v41  ;;  %6169 = vmatmul.mubr.f32.vlgmr.msra.gmra.mxu0 %v12957_v16  ;;  %v2414_v39 = vld [vmem:[%s19232_s3 + $0x4f0] sm:$0xff]  ;;  %v2621_v41 = vld [vmem:[%s19232_s3 + $0xb68] sm:$0xff] }
 0x3ee   :  { %6221 = vmatprep.subr.mxu1 %v2477_v48  ;;  %6246 = vmatprep.subr.mxu0 %v2684_v9  ;;  %v2413_v48 = vld [vmem:[%s19232_s3 + $0x4e8] sm:$0xff]  ;;  %v2620_v9 = vld [vmem:[%s19232_s3 + $0xb60] sm:$0xff] }
 0x3ef   :  { %6222 = vmatpush2.msra.mxu1 %v2476_v49  ;;  %6247 = vmatpush1.msra.mxu0 %v2683_v54  ;;  %v2405_v49 = vld [vmem:[%s19232_s3 + $0x4a8] sm:$0xff]  ;;  %v2612_v54 = vld [vmem:[%s19232_s3 + $0xb20] sm:$0xff] }
 0x3f0   :  { %6310 = vmatprep.mubr.f32.mxu0 %v11157_v33  ;;  %6223 = vmatprep.subr.mxu1 %v2468_v12  ;;  %v2404_v12 = vld [vmem:[%s19232_s3 + $0x4a0] sm:$0xff] }
 0x3f1   :  { %6248 = vmatprep.subr.mxu0 %v2675_v52  ;;  %6224 = vmatpush2.msra.mxu1 %v2467_v61  ;;  %v2611_v52 = vld [vmem:[%s19232_s3 + $0xb18] sm:$0xff] }
 0x3f2   :  { %6249 = vmatpush1.msra.mxu0 %v2674_v43  ;;  %6225 = vmatprep.subr.mxu1 %v2459_v18  ;;  %v2603_v61 = vld [vmem:[%s19232_s3 + $0xad8] sm:$0xff]  ;;  %v2972_v43 = vld [vmem:[%s19232_s3 + $0x1660] sm:$0xff]  ;;  %v2602_v18 = vld [vmem:[%s19232_s3 + $0xad0] sm:$0xff] }
 0x3f3   :  { %6250 = vmatprep.subr.mxu0 %v2666_v0  ;;  %6226 = vmatpush2.msra.mxu1 %v2458_v37  ;;  %v2971_v0 = vld [vmem:[%s19232_s3 + $0x1658] sm:$0xff]  ;;  %v2594_v37 = vld [vmem:[%s19232_s3 + $0xa90] sm:$0xff] }
 0x3f4   :  { %6251 = vmatpush1.msra.mxu0 %v2665_v31  ;;  %6227 = vmatprep.subr.mxu1 %v2450_v63  ;;  %v2963_v31 = vld [vmem:[%s19232_s3 + $0x1618] sm:$0xff]  ;;  %v2593_v63 = vld [vmem:[%s19232_s3 + $0xa88] sm:$0xff] }
 0x3f5   :  { %6252 = vmatprep.subr.mxu0 %v2657_v30  ;;  %6228 = vmatpush2.msra.mxu1 %v2449_v2  ;;  %v2962_v30 = vld [vmem:[%s19232_s3 + $0x1610] sm:$0xff]  ;;  %v2585_v2 = vld [vmem:[%s19232_s3 + $0xa48] sm:$0xff] }
 0x3f6   :  { %6253 = vmatpush1.msra.mxu0 %v2656_v5  ;;  %6229 = vmatprep.subr.mxu1 %v2441_v10  ;;  %v2954_v5 = vld [vmem:[%s19232_s3 + $0x15d0] sm:$0xff]  ;;  %v2584_v10 = vld [vmem:[%s19232_s3 + $0xa40] sm:$0xff] }
 0x3f7   :  { %6254 = vmatprep.subr.mxu0 %v2648_v25  ;;  %6230 = vmatpush2.msra.mxu1 %v2440_v40  ;;  %v2953_v25 = vld [vmem:[%s19232_s3 + $0x15c8] sm:$0xff]  ;;  %v2576_v40 = vld [vmem:[%s19232_s3 + $0xa00] sm:$0xff] }
 0x3f8   :  { %6255 = vmatpush1.msra.mxu0 %v2647_v15  ;;  %6231 = vmatprep.subr.mxu1 %v2432_v36  ;;  %v2945_v15 = vld [vmem:[%s19232_s3 + $0x1588] sm:$0xff]  ;;  %v2575_v36 = vld [vmem:[%s19232_s3 + $0x9f8] sm:$0xff] }
 0x3f9   :  { %6256 = vmatprep.subr.mxu0 %v2639_v42  ;;  %6232 = vmatpush2.msra.mxu1 %v2431_v7  ;;  %v2944_v42 = vld [vmem:[%s19232_s3 + $0x1580] sm:$0xff]  ;;  %v2567_v7 = vld [vmem:[%s19232_s3 + $0x9b8] sm:$0xff] }
 0x3fa   :  { %6257 = vmatpush1.msra.mxu0 %v2638_v23  ;;  %6233 = vmatprep.subr.mxu1 %v2423_v24  ;;  %v2936_v23 = vld [vmem:[%s19232_s3 + $0x1540] sm:$0xff]  ;;  %v2566_v24 = vld [vmem:[%s19232_s3 + $0x9b0] sm:$0xff] }
 0x3fb   :  { %6258 = vmatprep.subr.mxu0 %v2630_v8  ;;  %6234 = vmatpush2.msra.mxu1 %v2422_v32  ;;  %v2935_v8 = vld [vmem:[%s19232_s3 + $0x1538] sm:$0xff]  ;;  %v2558_v32 = vld [vmem:[%s19232_s3 + $0x970] sm:$0xff] }
 0x3fc   :  { %6259 = vmatpush1.msra.mxu0 %v2629_v14  ;;  %6235 = vmatprep.subr.mxu1 %v2414_v39  ;;  %v2927_v14 = vld [vmem:[%s19232_s3 + $0x14f8] sm:$0xff]  ;;  %v2557_v39 = vld [vmem:[%s19232_s3 + $0x968] sm:$0xff] }
 0x3fd   :  { %6260 = vmatprep.subr.mxu0 %v2621_v41  ;;  %6236 = vmatpush2.msra.mxu1 %v2413_v48  ;;  %v2926_v41 = vld [vmem:[%s19232_s3 + $0x14f0] sm:$0xff]  ;;  %v2549_v48 = vld [vmem:[%s19232_s3 + $0x928] sm:$0xff] }
 0x3fe   :  { %6261 = vmatpush1.msra.mxu0 %v2620_v9  ;;  %6237 = vmatprep.subr.mxu1 %v2405_v49  ;;  %v2918_v9 = vld [vmem:[%s19232_s3 + $0x14b0] sm:$0xff]  ;;  %v2548_v49 = vld [vmem:[%s19232_s3 + $0x920] sm:$0xff] }
 0x3ff   :  { %6262 = vmatprep.subr.mxu0 %v2612_v54  ;;  %6238 = vmatpush2.msra.mxu1 %v2404_v12  ;;  %v2917_v54 = vld [vmem:[%s19232_s3 + $0x14a8] sm:$0xff]  ;;  %v2828_v12 = vld [vmem:[%s19232_s3 + $0x11e0] sm:$0xff] }
 0x400   :  { %6263 = vmatpush1.msra.mxu0 %v2611_v52  ;;  %6240 = vmatmul.mubr.f32.vlgmr.msra.gmra.mxu1 %v11271_v17  ;;  %v2909_v52 = vld [vmem:[%s19232_s3 + $0x1468] sm:$0xff] }
 0x401   :  { %6264 = vmatprep.subr.mxu0 %v2603_v61  ;;  %6317 = vmatprep.subr.mxu1 %v2972_v43  ;;  %v2827_v61 = vld [vmem:[%s19232_s3 + $0x11d8] sm:$0xff]  ;;  %v2908_v43 = vld [vmem:[%s19232_s3 + $0x1460] sm:$0xff] }
 0x402   :  { %6265 = vmatpush1.msra.mxu0 %v2602_v18  ;;  %6318 = vmatpush1.msra.mxu1 %v2971_v0  ;;  %v2819_v18 = vld [vmem:[%s19232_s3 + $0x1198] sm:$0xff]  ;;  %v2900_v0 = vld [vmem:[%s19232_s3 + $0x1420] sm:$0xff] }
 0x403   :  { %6381 = vmatprep.mubr.f32.mxu1 %v11292_v28  ;;  %6266 = vmatprep.subr.mxu0 %v2594_v37  ;;  %v2818_v37 = vld [vmem:[%s19232_s3 + $0x1190] sm:$0xff] }
 0x404   :  { %6319 = vmatprep.subr.mxu1 %v2963_v31  ;;  %6267 = vmatpush1.msra.mxu0 %v2593_v63  ;;  %v2899_v31 = vld [vmem:[%s19232_s3 + $0x1418] sm:$0xff]  ;;  %v2810_v63 = vld [vmem:[%s19232_s3 + $0x1150] sm:$0xff] }
 0x405   :  { %6320 = vmatpush1.msra.mxu1 %v2962_v30  ;;  %6268 = vmatprep.subr.mxu0 %v2585_v2  ;;  %v2891_v30 = vld [vmem:[%s19232_s3 + $0x13d8] sm:$0xff]  ;;  %v2809_v2 = vld [vmem:[%s19232_s3 + $0x1148] sm:$0xff] }
 0x406   :  { %6321 = vmatprep.subr.mxu1 %v2954_v5  ;;  %6269 = vmatpush1.msra.mxu0 %v2584_v10  ;;  %v2890_v5 = vld [vmem:[%s19232_s3 + $0x13d0] sm:$0xff]  ;;  %v2801_v10 = vld [vmem:[%s19232_s3 + $0x1108] sm:$0xff] }
 0x407   :  { %6322 = vmatpush1.msra.mxu1 %v2953_v25  ;;  %6270 = vmatprep.subr.mxu0 %v2576_v40  ;;  %v2882_v25 = vld [vmem:[%s19232_s3 + $0x1390] sm:$0xff]  ;;  %v2800_v40 = vld [vmem:[%s19232_s3 + $0x1100] sm:$0xff] }
 0x408   :  { %6323 = vmatprep.subr.mxu1 %v2945_v15  ;;  %6271 = vmatpush1.msra.mxu0 %v2575_v36  ;;  %v2881_v15 = vld [vmem:[%s19232_s3 + $0x1388] sm:$0xff]  ;;  %v2792_v36 = vld [vmem:[%s19232_s3 + $0x10c0] sm:$0xff] }
 0x409   :  { %6324 = vmatpush1.msra.mxu1 %v2944_v42  ;;  %6272 = vmatprep.subr.mxu0 %v2567_v7  ;;  %v2873_v42 = vld [vmem:[%s19232_s3 + $0x1348] sm:$0xff]  ;;  %v2791_v7 = vld [vmem:[%s19232_s3 + $0x10b8] sm:$0xff] }
 0x40a   :  { %6325 = vmatprep.subr.mxu1 %v2936_v23  ;;  %6273 = vmatpush1.msra.mxu0 %v2566_v24  ;;  %v2872_v23 = vld [vmem:[%s19232_s3 + $0x1340] sm:$0xff]  ;;  %v2783_v24 = vld [vmem:[%s19232_s3 + $0x1078] sm:$0xff] }
 0x40b   :  { %6326 = vmatpush1.msra.mxu1 %v2935_v8  ;;  %6274 = vmatprep.subr.mxu0 %v2558_v32  ;;  %v2864_v8 = vld [vmem:[%s19232_s3 + $0x1300] sm:$0xff]  ;;  %v2782_v32 = vld [vmem:[%s19232_s3 + $0x1070] sm:$0xff] }
 0x40c   :  { %6327 = vmatprep.subr.mxu1 %v2927_v14  ;;  %6275 = vmatpush1.msra.mxu0 %v2557_v39  ;;  %v2863_v14 = vld [vmem:[%s19232_s3 + $0x12f8] sm:$0xff]  ;;  %v2774_v39 = vld [vmem:[%s19232_s3 + $0x1030] sm:$0xff] }
 0x40d   :  { %6328 = vmatpush1.msra.mxu1 %v2926_v41  ;;  %6276 = vmatprep.subr.mxu0 %v2549_v48  ;;  %v2855_v41 = vld [vmem:[%s19232_s3 + $0x12b8] sm:$0xff]  ;;  %v2773_v48 = vld [vmem:[%s19232_s3 + $0x1028] sm:$0xff] }
 0x40e   :  { %6329 = vmatprep.subr.mxu1 %v2918_v9  ;;  %6277 = vmatpush1.msra.mxu0 %v2548_v49  ;;  %v2854_v9 = vld [vmem:[%s19232_s3 + $0x12b0] sm:$0xff]  ;;  %v2765_v49 = vld [vmem:[%s19232_s3 + $0xfe8] sm:$0xff] }
 0x40f   :  { %6330 = vmatpush1.msra.mxu1 %v2917_v54  ;;  %6278 = vmatprep.subr.mxu0 %v2828_v12  ;;  %v2846_v54 = vld [vmem:[%s19232_s3 + $0x1270] sm:$0xff]  ;;  %v2764_v12 = vld [vmem:[%s19232_s3 + $0xfe0] sm:$0xff] }
 0x410   :  { %6331 = vmatprep.subr.mxu1 %v2909_v52  ;;  %6279 = vmatpush2.msra.mxu0 %v2827_v61  ;;  %v2845_v52 = vld [vmem:[%s19232_s3 + $0x1268] sm:$0xff]  ;;  %v2756_v61 = vld [vmem:[%s19232_s3 + $0xfa0] sm:$0xff] }
 0x411   :  { %6332 = vmatpush1.msra.mxu1 %v2908_v43  ;;  %6280 = vmatprep.subr.mxu0 %v2819_v18  ;;  %v2837_v43 = vld [vmem:[%s19232_s3 + $0x1228] sm:$0xff]  ;;  %v2755_v18 = vld [vmem:[%s19232_s3 + $0xf98] sm:$0xff] }
 0x412   :  { %6333 = vmatprep.subr.mxu1 %v2900_v0  ;;  %6281 = vmatpush2.msra.mxu0 %v2818_v37  ;;  %v2836_v0 = vld [vmem:[%s19232_s3 + $0x1220] sm:$0xff]  ;;  %v2747_v37 = vld [vmem:[%s19232_s3 + $0xf58] sm:$0xff] }
 0x413   :  { %6334 = vmatpush1.msra.mxu1 %v2899_v31  ;;  %6282 = vmatprep.subr.mxu0 %v2810_v63  ;;  %v3116_v31 = vld [vmem:[%s19232_s3 + $0x1ae0] sm:$0xff]  ;;  %v2746_v63 = vld [vmem:[%s19232_s3 + $0xf50] sm:$0xff] }
 0x414   :  { %6335 = vmatprep.subr.mxu1 %v2891_v30  ;;  %6283 = vmatpush2.msra.mxu0 %v2809_v2  ;;  %v3115_v30 = vld [vmem:[%s19232_s3 + $0x1ad8] sm:$0xff]  ;;  %v2738_v2 = vld [vmem:[%s19232_s3 + $0xf10] sm:$0xff] }
 0x415   :  { %6336 = vmatpush1.msra.mxu1 %v2890_v5  ;;  %6284 = vmatprep.subr.mxu0 %v2801_v10  ;;  %v3107_v5 = vld [vmem:[%s19232_s3 + $0x1a98] sm:$0xff]  ;;  %v2737_v10 = vld [vmem:[%s19232_s3 + $0xf08] sm:$0xff] }
 0x416   :  { %6337 = vmatprep.subr.mxu1 %v2882_v25  ;;  %6285 = vmatpush2.msra.mxu0 %v2800_v40  ;;  %v3106_v25 = vld [vmem:[%s19232_s3 + $0x1a90] sm:$0xff]  ;;  %v2729_v40 = vld [vmem:[%s19232_s3 + $0xec8] sm:$0xff] }
 0x417   :  { %6338 = vmatpush1.msra.mxu1 %v2881_v15  ;;  %6286 = vmatprep.subr.mxu0 %v2792_v36  ;;  %v3098_v15 = vld [vmem:[%s19232_s3 + $0x1a50] sm:$0xff]  ;;  %v2728_v36 = vld [vmem:[%s19232_s3 + $0xec0] sm:$0xff] }
 0x418   :  { %6339 = vmatprep.subr.mxu1 %v2873_v42  ;;  %6287 = vmatpush2.msra.mxu0 %v2791_v7  ;;  %v3097_v42 = vld [vmem:[%s19232_s3 + $0x1a48] sm:$0xff]  ;;  %v2720_v7 = vld [vmem:[%s19232_s3 + $0xe80] sm:$0xff] }
 0x419   :  { %6340 = vmatpush1.msra.mxu1 %v2872_v23  ;;  %6288 = vmatprep.subr.mxu0 %v2783_v24  ;;  %v3089_v23 = vld [vmem:[%s19232_s3 + $0x1a08] sm:$0xff]  ;;  %v2719_v24 = vld [vmem:[%s19232_s3 + $0xe78] sm:$0xff] }
 0x41a   :  { %6341 = vmatprep.subr.mxu1 %v2864_v8  ;;  %6289 = vmatpush2.msra.mxu0 %v2782_v32  ;;  %v3088_v8 = vld [vmem:[%s19232_s3 + $0x1a00] sm:$0xff]  ;;  %v2711_v32 = vld [vmem:[%s19232_s3 + $0xe38] sm:$0xff] }
 0x41b   :  { %6342 = vmatpush1.msra.mxu1 %v2863_v14  ;;  %6290 = vmatprep.subr.mxu0 %v2774_v39  ;;  %v3080_v14 = vld [vmem:[%s19232_s3 + $0x19c0] sm:$0xff]  ;;  %v2710_v39 = vld [vmem:[%s19232_s3 + $0xe30] sm:$0xff] }
 0x41c   :  { %6343 = vmatprep.subr.mxu1 %v2855_v41  ;;  %6291 = vmatpush2.msra.mxu0 %v2773_v48  ;;  %v3079_v41 = vld [vmem:[%s19232_s3 + $0x19b8] sm:$0xff]  ;;  %v2702_v48 = vld [vmem:[%s19232_s3 + $0xdf0] sm:$0xff] }
 0x41d   :  { %6344 = vmatpush1.msra.mxu1 %v2854_v9  ;;  %6292 = vmatprep.subr.mxu0 %v2765_v49  ;;  %v3071_v9 = vld [vmem:[%s19232_s3 + $0x1978] sm:$0xff]  ;;  %v2701_v49 = vld [vmem:[%s19232_s3 + $0xde8] sm:$0xff] }
 0x41e   :  { %6345 = vmatprep.subr.mxu1 %v2846_v54  ;;  %6293 = vmatpush2.msra.mxu0 %v2764_v12  ;;  %v3070_v54 = vld [vmem:[%s19232_s3 + $0x1970] sm:$0xff]  ;;  %v2693_v12 = vld [vmem:[%s19232_s3 + $0xda8] sm:$0xff] }
 0x41f   :  { %6346 = vmatpush1.msra.mxu1 %v2845_v52  ;;  %6294 = vmatprep.subr.mxu0 %v2756_v61  ;;  %v3062_v52 = vld [vmem:[%s19232_s3 + $0x1930] sm:$0xff]  ;;  %v2692_v61 = vld [vmem:[%s19232_s3 + $0xda0] sm:$0xff] }
 0x420   :  { %6347 = vmatprep.subr.mxu1 %v2837_v43  ;;  %6295 = vmatpush2.msra.mxu0 %v2755_v18  ;;  %v3061_v43 = vld [vmem:[%s19232_s3 + $0x1928] sm:$0xff] }
 0x421   :  { %6348 = vmatpush1.msra.mxu1 %v2836_v0  ;;  %6296 = vmatprep.subr.mxu0 %v2747_v37  ;;  %v3053_v18 = vld [vmem:[%s19232_s3 + $0x18e8] sm:$0xff]  ;;  %v3260_v0 = vld [vmem:[%s19232_s3 + $0x1f60] sm:$0xff] }
 0x422   :  { %6349 = vmatprep.subr.mxu1 %v3116_v31  ;;  %6297 = vmatpush2.msra.mxu0 %v2746_v63  ;;  %v3052_v37 = vld [vmem:[%s19232_s3 + $0x18e0] sm:$0xff]  ;;  %v3259_v31 = vld [vmem:[%s19232_s3 + $0x1f58] sm:$0xff] }
 0x423   :  { %6350 = vmatpush2.msra.mxu1 %v3115_v30  ;;  %6298 = vmatprep.subr.mxu0 %v2738_v2  ;;  %v3044_v63 = vld [vmem:[%s19232_s3 + $0x18a0] sm:$0xff]  ;;  %v3251_v30 = vld [vmem:[%s19232_s3 + $0x1f18] sm:$0xff] }
 0x424   :  { %6351 = vmatprep.subr.mxu1 %v3107_v5  ;;  %6299 = vmatpush2.msra.mxu0 %v2737_v10  ;;  %v3043_v2 = vld [vmem:[%s19232_s3 + $0x1898] sm:$0xff]  ;;  %v3250_v5 = vld [vmem:[%s19232_s3 + $0x1f10] sm:$0xff] }
 0x425   :  { %6352 = vmatpush2.msra.mxu1 %v3106_v25  ;;  %6300 = vmatprep.subr.mxu0 %v2729_v40  ;;  %v3035_v10 = vld [vmem:[%s19232_s3 + $0x1858] sm:$0xff]  ;;  %v3242_v25 = vld [vmem:[%s19232_s3 + $0x1ed0] sm:$0xff] }
 0x426   :  { %6353 = vmatprep.subr.mxu1 %v3098_v15  ;;  %6301 = vmatpush2.msra.mxu0 %v2728_v36  ;;  %v3034_v40 = vld [vmem:[%s19232_s3 + $0x1850] sm:$0xff]  ;;  %v3241_v15 = vld [vmem:[%s19232_s3 + $0x1ec8] sm:$0xff] }
 0x427   :  { %6354 = vmatpush2.msra.mxu1 %v3097_v42  ;;  %6302 = vmatprep.subr.mxu0 %v2720_v7  ;;  %v3026_v36 = vld [vmem:[%s19232_s3 + $0x1810] sm:$0xff]  ;;  %v3233_v42 = vld [vmem:[%s19232_s3 + $0x1e88] sm:$0xff] }
 0x428   :  { %6355 = vmatprep.subr.mxu1 %v3089_v23  ;;  %6303 = vmatpush2.msra.mxu0 %v2719_v24  ;;  %v3025_v7 = vld [vmem:[%s19232_s3 + $0x1808] sm:$0xff]  ;;  %v3232_v23 = vld [vmem:[%s19232_s3 + $0x1e80] sm:$0xff] }
 0x429   :  { %6356 = vmatpush2.msra.mxu1 %v3088_v8  ;;  %6304 = vmatprep.subr.mxu0 %v2711_v32  ;;  %v3017_v24 = vld [vmem:[%s19232_s3 + $0x17c8] sm:$0xff]  ;;  %v3224_v8 = vld [vmem:[%s19232_s3 + $0x1e40] sm:$0xff] }
 0x42a   :  { %6357 = vmatprep.subr.mxu1 %v3080_v14  ;;  %6305 = vmatpush2.msra.mxu0 %v2710_v39  ;;  %v3016_v32 = vld [vmem:[%s19232_s3 + $0x17c0] sm:$0xff]  ;;  %v3223_v14 = vld [vmem:[%s19232_s3 + $0x1e38] sm:$0xff] }
 0x42b   :  { %6358 = vmatpush2.msra.mxu1 %v3079_v41  ;;  %6306 = vmatprep.subr.mxu0 %v2702_v48  ;;  %v3008_v39 = vld [vmem:[%s19232_s3 + $0x1780] sm:$0xff]  ;;  %v3215_v41 = vld [vmem:[%s19232_s3 + $0x1df8] sm:$0xff] }
 0x42c   :  { %6359 = vmatprep.subr.mxu1 %v3071_v9  ;;  %6307 = vmatpush2.msra.mxu0 %v2701_v49  ;;  %v3007_v48 = vld [vmem:[%s19232_s3 + $0x1778] sm:$0xff]  ;;  %v3214_v9 = vld [vmem:[%s19232_s3 + $0x1df0] sm:$0xff] }
 0x42d   :  { %6360 = vmatpush2.msra.mxu1 %v3070_v54  ;;  %6308 = vmatprep.subr.mxu0 %v2693_v12  ;;  %v2999_v49 = vld [vmem:[%s19232_s3 + $0x1738] sm:$0xff]  ;;  %v3206_v54 = vld [vmem:[%s19232_s3 + $0x1db0] sm:$0xff] }
 0x42e   :  { %6361 = vmatprep.subr.mxu1 %v3062_v52  ;;  %6309 = vmatpush2.msra.mxu0 %v2692_v61  ;;  %v2998_v12 = vld [vmem:[%s19232_s3 + $0x1730] sm:$0xff]  ;;  %v3205_v52 = vld [vmem:[%s19232_s3 + $0x1da8] sm:$0xff] }
 0x42f   :  { %6362 = vmatpush2.msra.mxu1 %v3061_v43  ;;  %6311 = vmatmul.mubr.f32.vlgmr.msra.gmra.mxu0 %v11576_v51  ;;  %v2990_v61 = vld [vmem:[%s19232_s3 + $0x16f0] sm:$0xff]  ;;  %v3197_v43 = vld [vmem:[%s19232_s3 + $0x1d68] sm:$0xff] }
 0x430   :  { %6363 = vmatprep.subr.mxu1 %v3053_v18  ;;  %6388 = vmatprep.subr.mxu0 %v3260_v0  ;;  %v2989_v18 = vld [vmem:[%s19232_s3 + $0x16e8] sm:$0xff]  ;;  %v3196_v0 = vld [vmem:[%s19232_s3 + $0x1d60] sm:$0xff] }
 0x431   :  { %6364 = vmatpush2.msra.mxu1 %v3052_v37  ;;  %6389 = vmatpush1.msra.mxu0 %v3259_v31  ;;  %v2981_v37 = vld [vmem:[%s19232_s3 + $0x16a8] sm:$0xff]  ;;  %v3188_v31 = vld [vmem:[%s19232_s3 + $0x1d20] sm:$0xff] }
 0x432   :  { %6452 = vmatprep.mubr.f32.mxu0 %v11594_v58  ;;  %6365 = vmatprep.subr.mxu1 %v3044_v63  ;;  %v2980_v63 = vld [vmem:[%s19232_s3 + $0x16a0] sm:$0xff] }
 0x433   :  { %6390 = vmatprep.subr.mxu0 %v3251_v30  ;;  %6366 = vmatpush2.msra.mxu1 %v3043_v2  ;;  %v3187_v30 = vld [vmem:[%s19232_s3 + $0x1d18] sm:$0xff] }
 0x434   :  { %6391 = vmatpush1.msra.mxu0 %v3250_v5  ;;  %6367 = vmatprep.subr.mxu1 %v3035_v10  ;;  %v3179_v2 = vld [vmem:[%s19232_s3 + $0x1cd8] sm:$0xff]  ;;  %v3548_v5 = vld [vmem:[%s19232_s3 + $0x2860] sm:$0xff]  ;;  %v3178_v10 = vld [vmem:[%s19232_s3 + $0x1cd0] sm:$0xff] }
 0x435   :  { %6392 = vmatprep.subr.mxu0 %v3242_v25  ;;  %6368 = vmatpush2.msra.mxu1 %v3034_v40  ;;  %v3547_v25 = vld [vmem:[%s19232_s3 + $0x2858] sm:$0xff]  ;;  %v3170_v40 = vld [vmem:[%s19232_s3 + $0x1c90] sm:$0xff] }
 0x436   :  { %6393 = vmatpush1.msra.mxu0 %v3241_v15  ;;  %6369 = vmatprep.subr.mxu1 %v3026_v36  ;;  %v3539_v15 = vld [vmem:[%s19232_s3 + $0x2818] sm:$0xff]  ;;  %v3169_v36 = vld [vmem:[%s19232_s3 + $0x1c88] sm:$0xff] }
 0x437   :  { %6394 = vmatprep.subr.mxu0 %v3233_v42  ;;  %6370 = vmatpush2.msra.mxu1 %v3025_v7  ;;  %v3538_v42 = vld [vmem:[%s19232_s3 + $0x2810] sm:$0xff]  ;;  %v3161_v7 = vld [vmem:[%s19232_s3 + $0x1c48] sm:$0xff] }
 0x438   :  { %6395 = vmatpush1.msra.mxu0 %v3232_v23  ;;  %6371 = vmatprep.subr.mxu1 %v3017_v24  ;;  %v3530_v23 = vld [vmem:[%s19232_s3 + $0x27d0] sm:$0xff]  ;;  %v3160_v24 = vld [vmem:[%s19232_s3 + $0x1c40] sm:$0xff] }
 0x439   :  { %6396 = vmatprep.subr.mxu0 %v3224_v8  ;;  %6372 = vmatpush2.msra.mxu1 %v3016_v32  ;;  %v3529_v8 = vld [vmem:[%s19232_s3 + $0x27c8] sm:$0xff]  ;;  %v3152_v32 = vld [vmem:[%s19232_s3 + $0x1c00] sm:$0xff] }
 0x43a   :  { %6397 = vmatpush1.msra.mxu0 %v3223_v14  ;;  %6373 = vmatprep.subr.mxu1 %v3008_v39  ;;  %v3521_v14 = vld [vmem:[%s19232_s3 + $0x2788] sm:$0xff]  ;;  %v3151_v39 = vld [vmem:[%s19232_s3 + $0x1bf8] sm:$0xff] }
 0x43b   :  { %6398 = vmatprep.subr.mxu0 %v3215_v41  ;;  %6374 = vmatpush2.msra.mxu1 %v3007_v48  ;;  %v3520_v41 = vld [vmem:[%s19232_s3 + $0x2780] sm:$0xff]  ;;  %v3143_v48 = vld [vmem:[%s19232_s3 + $0x1bb8] sm:$0xff] }
 0x43c   :  { %6399 = vmatpush1.msra.mxu0 %v3214_v9  ;;  %6375 = vmatprep.subr.mxu1 %v2999_v49  ;;  %v3512_v9 = vld [vmem:[%s19232_s3 + $0x2740] sm:$0xff]  ;;  %v3142_v49 = vld [vmem:[%s19232_s3 + $0x1bb0] sm:$0xff] }
 0x43d   :  { %6400 = vmatprep.subr.mxu0 %v3206_v54  ;;  %6376 = vmatpush2.msra.mxu1 %v2998_v12  ;;  %v3511_v54 = vld [vmem:[%s19232_s3 + $0x2738] sm:$0xff]  ;;  %v3134_v12 = vld [vmem:[%s19232_s3 + $0x1b70] sm:$0xff] }
 0x43e   :  { %6401 = vmatpush1.msra.mxu0 %v3205_v52  ;;  %6377 = vmatprep.subr.mxu1 %v2990_v61  ;;  %v3503_v52 = vld [vmem:[%s19232_s3 + $0x26f8] sm:$0xff]  ;;  %v3133_v61 = vld [vmem:[%s19232_s3 + $0x1b68] sm:$0xff] }
 0x43f   :  { %6402 = vmatprep.subr.mxu0 %v3197_v43  ;;  %6378 = vmatpush2.msra.mxu1 %v2989_v18  ;;  %v3502_v43 = vld [vmem:[%s19232_s3 + $0x26f0] sm:$0xff]  ;;  %v3125_v18 = vld [vmem:[%s19232_s3 + $0x1b28] sm:$0xff] }
 0x440   :  { %6403 = vmatpush1.msra.mxu0 %v3196_v0  ;;  %6379 = vmatprep.subr.mxu1 %v2981_v37  ;;  %v3494_v0 = vld [vmem:[%s19232_s3 + $0x26b0] sm:$0xff]  ;;  %v3124_v37 = vld [vmem:[%s19232_s3 + $0x1b20] sm:$0xff] }
 0x441   :  { %6404 = vmatprep.subr.mxu0 %v3188_v31  ;;  %6380 = vmatpush2.msra.mxu1 %v2980_v63  ;;  %v3493_v31 = vld [vmem:[%s19232_s3 + $0x26a8] sm:$0xff]  ;;  %v3404_v63 = vld [vmem:[%s19232_s3 + $0x23e0] sm:$0xff] }
 0x442   :  { %6405 = vmatpush1.msra.mxu0 %v3187_v30  ;;  %6382 = vmatmul.mubr.f32.vlgmr.msra.gmra.mxu1 %v11699_v45  ;;  %v3485_v30 = vld [vmem:[%s19232_s3 + $0x2668] sm:$0xff] }
 0x443   :  { %6406 = vmatprep.subr.mxu0 %v3179_v2  ;;  %6459 = vmatprep.subr.mxu1 %v3548_v5  ;;  %v3403_v2 = vld [vmem:[%s19232_s3 + $0x23d8] sm:$0xff]  ;;  %v3484_v5 = vld [vmem:[%s19232_s3 + $0x2660] sm:$0xff] }
 0x444   :  { %6407 = vmatpush1.msra.mxu0 %v3178_v10  ;;  %6460 = vmatpush1.msra.mxu1 %v3547_v25  ;;  %v3395_v10 = vld [vmem:[%s19232_s3 + $0x2398] sm:$0xff]  ;;  %v3476_v25 = vld [vmem:[%s19232_s3 + $0x2620] sm:$0xff] }
 0x445   :  { %6523 = vmatprep.mubr.f32.mxu1 %v11717_v53  ;;  %6408 = vmatprep.subr.mxu0 %v3170_v40  ;;  %v3394_v40 = vld [vmem:[%s19232_s3 + $0x2390] sm:$0xff] }
 0x446   :  { %6461 = vmatprep.subr.mxu1 %v3539_v15  ;;  %6409 = vmatpush1.msra.mxu0 %v3169_v36  ;;  %v3475_v15 = vld [vmem:[%s19232_s3 + $0x2618] sm:$0xff]  ;;  %v3386_v36 = vld [vmem:[%s19232_s3 + $0x2350] sm:$0xff] }
 0x447   :  { %6462 = vmatpush1.msra.mxu1 %v3538_v42  ;;  %6410 = vmatprep.subr.mxu0 %v3161_v7  ;;  %v3467_v42 = vld [vmem:[%s19232_s3 + $0x25d8] sm:$0xff]  ;;  %v3385_v7 = vld [vmem:[%s19232_s3 + $0x2348] sm:$0xff] }
 0x448   :  { %6463 = vmatprep.subr.mxu1 %v3530_v23  ;;  %6411 = vmatpush1.msra.mxu0 %v3160_v24  ;;  %v3466_v23 = vld [vmem:[%s19232_s3 + $0x25d0] sm:$0xff]  ;;  %v3377_v24 = vld [vmem:[%s19232_s3 + $0x2308] sm:$0xff] }
 0x449   :  { %6464 = vmatpush1.msra.mxu1 %v3529_v8  ;;  %6412 = vmatprep.subr.mxu0 %v3152_v32  ;;  %v3458_v8 = vld [vmem:[%s19232_s3 + $0x2590] sm:$0xff]  ;;  %v3376_v32 = vld [vmem:[%s19232_s3 + $0x2300] sm:$0xff] }
 0x44a   :  { %6465 = vmatprep.subr.mxu1 %v3521_v14  ;;  %6413 = vmatpush1.msra.mxu0 %v3151_v39  ;;  %v3457_v14 = vld [vmem:[%s19232_s3 + $0x2588] sm:$0xff]  ;;  %v3368_v39 = vld [vmem:[%s19232_s3 + $0x22c0] sm:$0xff] }
 0x44b   :  { %6466 = vmatpush1.msra.mxu1 %v3520_v41  ;;  %6414 = vmatprep.subr.mxu0 %v3143_v48  ;;  %v3449_v41 = vld [vmem:[%s19232_s3 + $0x2548] sm:$0xff]  ;;  %v3367_v48 = vld [vmem:[%s19232_s3 + $0x22b8] sm:$0xff] }
 0x44c   :  { %6467 = vmatprep.subr.mxu1 %v3512_v9  ;;  %6415 = vmatpush1.msra.mxu0 %v3142_v49  ;;  %v3448_v9 = vld [vmem:[%s19232_s3 + $0x2540] sm:$0xff]  ;;  %v3359_v49 = vld [vmem:[%s19232_s3 + $0x2278] sm:$0xff] }
 0x44d   :  { %6468 = vmatpush1.msra.mxu1 %v3511_v54  ;;  %6416 = vmatprep.subr.mxu0 %v3134_v12  ;;  %v3440_v54 = vld [vmem:[%s19232_s3 + $0x2500] sm:$0xff]  ;;  %v3358_v12 = vld [vmem:[%s19232_s3 + $0x2270] sm:$0xff] }
 0x44e   :  { %6469 = vmatprep.subr.mxu1 %v3503_v52  ;;  %6417 = vmatpush1.msra.mxu0 %v3133_v61  ;;  %v3439_v52 = vld [vmem:[%s19232_s3 + $0x24f8] sm:$0xff]  ;;  %v3350_v61 = vld [vmem:[%s19232_s3 + $0x2230] sm:$0xff] }
 0x44f   :  { %6470 = vmatpush1.msra.mxu1 %v3502_v43  ;;  %6418 = vmatprep.subr.mxu0 %v3125_v18  ;;  %v3431_v43 = vld [vmem:[%s19232_s3 + $0x24b8] sm:$0xff]  ;;  %v3349_v18 = vld [vmem:[%s19232_s3 + $0x2228] sm:$0xff] }
 0x450   :  { %6471 = vmatprep.subr.mxu1 %v3494_v0  ;;  %6419 = vmatpush1.msra.mxu0 %v3124_v37  ;;  %v3430_v0 = vld [vmem:[%s19232_s3 + $0x24b0] sm:$0xff]  ;;  %v3341_v37 = vld [vmem:[%s19232_s3 + $0x21e8] sm:$0xff] }
 0x451   :  { %6472 = vmatpush1.msra.mxu1 %v3493_v31  ;;  %6420 = vmatprep.subr.mxu0 %v3404_v63  ;;  %v3422_v31 = vld [vmem:[%s19232_s3 + $0x2470] sm:$0xff]  ;;  %v3340_v63 = vld [vmem:[%s19232_s3 + $0x21e0] sm:$0xff] }
 0x452   :  { %6473 = vmatprep.subr.mxu1 %v3485_v30  ;;  %6421 = vmatpush2.msra.mxu0 %v3403_v2  ;;  %v3421_v30 = vld [vmem:[%s19232_s3 + $0x2468] sm:$0xff]  ;;  %v3332_v2 = vld [vmem:[%s19232_s3 + $0x21a0] sm:$0xff] }
 0x453   :  { %6474 = vmatpush1.msra.mxu1 %v3484_v5  ;;  %6422 = vmatprep.subr.mxu0 %v3395_v10  ;;  %v3413_v5 = vld [vmem:[%s19232_s3 + $0x2428] sm:$0xff]  ;;  %v3331_v10 = vld [vmem:[%s19232_s3 + $0x2198] sm:$0xff] }
 0x454   :  { %6475 = vmatprep.subr.mxu1 %v3476_v25  ;;  %6423 = vmatpush2.msra.mxu0 %v3394_v40  ;;  %v3412_v25 = vld [vmem:[%s19232_s3 + $0x2420] sm:$0xff]  ;;  %v3323_v40 = vld [vmem:[%s19232_s3 + $0x2158] sm:$0xff] }
 0x455   :  { %6476 = vmatpush1.msra.mxu1 %v3475_v15  ;;  %6424 = vmatprep.subr.mxu0 %v3386_v36  ;;  %v3692_v15 = vld [vmem:[%s19232_s3 + $0x2ce0] sm:$0xff]  ;;  %v3322_v36 = vld [vmem:[%s19232_s3 + $0x2150] sm:$0xff] }
 0x456   :  { %6477 = vmatprep.subr.mxu1 %v3467_v42  ;;  %6425 = vmatpush2.msra.mxu0 %v3385_v7  ;;  %v3691_v42 = vld [vmem:[%s19232_s3 + $0x2cd8] sm:$0xff]  ;;  %v3314_v7 = vld [vmem:[%s19232_s3 + $0x2110] sm:$0xff] }
 0x457   :  { %6478 = vmatpush1.msra.mxu1 %v3466_v23  ;;  %6426 = vmatprep.subr.mxu0 %v3377_v24  ;;  %v3683_v23 = vld [vmem:[%s19232_s3 + $0x2c98] sm:$0xff]  ;;  %v3313_v24 = vld [vmem:[%s19232_s3 + $0x2108] sm:$0xff] }
 0x458   :  { %6479 = vmatprep.subr.mxu1 %v3458_v8  ;;  %6427 = vmatpush2.msra.mxu0 %v3376_v32  ;;  %v3682_v8 = vld [vmem:[%s19232_s3 + $0x2c90] sm:$0xff]  ;;  %v3305_v32 = vld [vmem:[%s19232_s3 + $0x20c8] sm:$0xff] }
 0x459   :  { %6480 = vmatpush1.msra.mxu1 %v3457_v14  ;;  %6428 = vmatprep.subr.mxu0 %v3368_v39  ;;  %v3674_v14 = vld [vmem:[%s19232_s3 + $0x2c50] sm:$0xff]  ;;  %v3304_v39 = vld [vmem:[%s19232_s3 + $0x20c0] sm:$0xff] }
 0x45a   :  { %6481 = vmatprep.subr.mxu1 %v3449_v41  ;;  %6429 = vmatpush2.msra.mxu0 %v3367_v48  ;;  %v3673_v41 = vld [vmem:[%s19232_s3 + $0x2c48] sm:$0xff]  ;;  %v3296_v48 = vld [vmem:[%s19232_s3 + $0x2080] sm:$0xff] }
 0x45b   :  { %6482 = vmatpush1.msra.mxu1 %v3448_v9  ;;  %6430 = vmatprep.subr.mxu0 %v3359_v49  ;;  %v3665_v9 = vld [vmem:[%s19232_s3 + $0x2c08] sm:$0xff]  ;;  %v3295_v49 = vld [vmem:[%s19232_s3 + $0x2078] sm:$0xff] }
 0x45c   :  { %6483 = vmatprep.subr.mxu1 %v3440_v54  ;;  %6431 = vmatpush2.msra.mxu0 %v3358_v12  ;;  %v3664_v54 = vld [vmem:[%s19232_s3 + $0x2c00] sm:$0xff]  ;;  %v3287_v12 = vld [vmem:[%s19232_s3 + $0x2038] sm:$0xff] }
 0x45d   :  { %6484 = vmatpush1.msra.mxu1 %v3439_v52  ;;  %6432 = vmatprep.subr.mxu0 %v3350_v61  ;;  %v3656_v52 = vld [vmem:[%s19232_s3 + $0x2bc0] sm:$0xff]  ;;  %v3286_v61 = vld [vmem:[%s19232_s3 + $0x2030] sm:$0xff] }
 0x45e   :  { %6485 = vmatprep.subr.mxu1 %v3431_v43  ;;  %6433 = vmatpush2.msra.mxu0 %v3349_v18  ;;  %v3655_v43 = vld [vmem:[%s19232_s3 + $0x2bb8] sm:$0xff]  ;;  %v3278_v18 = vld [vmem:[%s19232_s3 + $0x1ff0] sm:$0xff] }
 0x45f   :  { %6486 = vmatpush1.msra.mxu1 %v3430_v0  ;;  %6434 = vmatprep.subr.mxu0 %v3341_v37  ;;  %v3647_v0 = vld [vmem:[%s19232_s3 + $0x2b78] sm:$0xff]  ;;  %v3277_v37 = vld [vmem:[%s19232_s3 + $0x1fe8] sm:$0xff] }
 0x460   :  { %6487 = vmatprep.subr.mxu1 %v3422_v31  ;;  %6435 = vmatpush2.msra.mxu0 %v3340_v63  ;;  %v3646_v31 = vld [vmem:[%s19232_s3 + $0x2b70] sm:$0xff]  ;;  %v3269_v63 = vld [vmem:[%s19232_s3 + $0x1fa8] sm:$0xff] }
 0x461   :  { %6488 = vmatpush1.msra.mxu1 %v3421_v30  ;;  %6436 = vmatprep.subr.mxu0 %v3332_v2  ;;  %v3638_v30 = vld [vmem:[%s19232_s3 + $0x2b30] sm:$0xff]  ;;  %v3268_v2 = vld [vmem:[%s19232_s3 + $0x1fa0] sm:$0xff] }
 0x462   :  { %6489 = vmatprep.subr.mxu1 %v3413_v5  ;;  %6437 = vmatpush2.msra.mxu0 %v3331_v10  ;;  %v3637_v5 = vld [vmem:[%s19232_s3 + $0x2b28] sm:$0xff] }
 0x463   :  { %6490 = vmatpush1.msra.mxu1 %v3412_v25  ;;  %6438 = vmatprep.subr.mxu0 %v3323_v40  ;;  %v3629_v10 = vld [vmem:[%s19232_s3 + $0x2ae8] sm:$0xff]  ;;  %v3836_v25 = vld [vmem:[%s19232_s3 + $0x3160] sm:$0xff] }
 0x464   :  { %6491 = vmatprep.subr.mxu1 %v3692_v15  ;;  %6439 = vmatpush2.msra.mxu0 %v3322_v36  ;;  %v3628_v40 = vld [vmem:[%s19232_s3 + $0x2ae0] sm:$0xff]  ;;  %v3835_v15 = vld [vmem:[%s19232_s3 + $0x3158] sm:$0xff] }
 0x465   :  { %6492 = vmatpush2.msra.mxu1 %v3691_v42  ;;  %6440 = vmatprep.subr.mxu0 %v3314_v7  ;;  %v3620_v36 = vld [vmem:[%s19232_s3 + $0x2aa0] sm:$0xff]  ;;  %v3827_v42 = vld [vmem:[%s19232_s3 + $0x3118] sm:$0xff] }
 0x466   :  { %6493 = vmatprep.subr.mxu1 %v3683_v23  ;;  %6441 = vmatpush2.msra.mxu0 %v3313_v24  ;;  %v3619_v7 = vld [vmem:[%s19232_s3 + $0x2a98] sm:$0xff]  ;;  %v3826_v23 = vld [vmem:[%s19232_s3 + $0x3110] sm:$0xff] }
 0x467   :  { %6494 = vmatpush2.msra.mxu1 %v3682_v8  ;;  %6442 = vmatprep.subr.mxu0 %v3305_v32  ;;  %v3611_v24 = vld [vmem:[%s19232_s3 + $0x2a58] sm:$0xff]  ;;  %v3818_v8 = vld [vmem:[%s19232_s3 + $0x30d0] sm:$0xff] }
 0x468   :  { %6495 = vmatprep.subr.mxu1 %v3674_v14  ;;  %6443 = vmatpush2.msra.mxu0 %v3304_v39  ;;  %v3610_v32 = vld [vmem:[%s19232_s3 + $0x2a50] sm:$0xff]  ;;  %v3817_v14 = vld [vmem:[%s19232_s3 + $0x30c8] sm:$0xff] }
 0x469   :  { %6496 = vmatpush2.msra.mxu1 %v3673_v41  ;;  %6444 = vmatprep.subr.mxu0 %v3296_v48  ;;  %v3602_v39 = vld [vmem:[%s19232_s3 + $0x2a10] sm:$0xff]  ;;  %v3809_v41 = vld [vmem:[%s19232_s3 + $0x3088] sm:$0xff] }
 0x46a   :  { %6497 = vmatprep.subr.mxu1 %v3665_v9  ;;  %6445 = vmatpush2.msra.mxu0 %v3295_v49  ;;  %v3601_v48 = vld [vmem:[%s19232_s3 + $0x2a08] sm:$0xff]  ;;  %v3808_v9 = vld [vmem:[%s19232_s3 + $0x3080] sm:$0xff] }
 0x46b   :  { %6498 = vmatpush2.msra.mxu1 %v3664_v54  ;;  %6446 = vmatprep.subr.mxu0 %v3287_v12  ;;  %v3593_v49 = vld [vmem:[%s19232_s3 + $0x29c8] sm:$0xff]  ;;  %v3800_v54 = vld [vmem:[%s19232_s3 + $0x3040] sm:$0xff] }
 0x46c   :  { %6499 = vmatprep.subr.mxu1 %v3656_v52  ;;  %6447 = vmatpush2.msra.mxu0 %v3286_v61  ;;  %v3592_v12 = vld [vmem:[%s19232_s3 + $0x29c0] sm:$0xff]  ;;  %v3799_v52 = vld [vmem:[%s19232_s3 + $0x3038] sm:$0xff] }
 0x46d   :  { %6500 = vmatpush2.msra.mxu1 %v3655_v43  ;;  %6448 = vmatprep.subr.mxu0 %v3278_v18  ;;  %v3584_v61 = vld [vmem:[%s19232_s3 + $0x2980] sm:$0xff]  ;;  %v3791_v43 = vld [vmem:[%s19232_s3 + $0x2ff8] sm:$0xff] }
 0x46e   :  { %6501 = vmatprep.subr.mxu1 %v3647_v0  ;;  %6449 = vmatpush2.msra.mxu0 %v3277_v37  ;;  %v3583_v18 = vld [vmem:[%s19232_s3 + $0x2978] sm:$0xff]  ;;  %v3790_v0 = vld [vmem:[%s19232_s3 + $0x2ff0] sm:$0xff] }
 0x46f   :  { %6502 = vmatpush2.msra.mxu1 %v3646_v31  ;;  %6450 = vmatprep.subr.mxu0 %v3269_v63  ;;  %v3575_v37 = vld [vmem:[%s19232_s3 + $0x2938] sm:$0xff]  ;;  %v3782_v31 = vld [vmem:[%s19232_s3 + $0x2fb0] sm:$0xff] }
 0x470   :  { %6503 = vmatprep.subr.mxu1 %v3638_v30  ;;  %6451 = vmatpush2.msra.mxu0 %v3268_v2  ;;  %v3574_v63 = vld [vmem:[%s19232_s3 + $0x2930] sm:$0xff]  ;;  %v3781_v30 = vld [vmem:[%s19232_s3 + $0x2fa8] sm:$0xff] }
 0x471   :  { %6504 = vmatpush2.msra.mxu1 %v3637_v5  ;;  %6453 = vmatmul.mubr.f32.vlgmr.msra.gmra.mxu0 %v12004_v11  ;;  %v3566_v2 = vld [vmem:[%s19232_s3 + $0x28f0] sm:$0xff]  ;;  %v3773_v5 = vld [vmem:[%s19232_s3 + $0x2f68] sm:$0xff] }
 0x472   :  { %6505 = vmatprep.subr.mxu1 %v3629_v10  ;;  %6530 = vmatprep.subr.mxu0 %v3836_v25  ;;  %v3565_v10 = vld [vmem:[%s19232_s3 + $0x28e8] sm:$0xff]  ;;  %v3772_v25 = vld [vmem:[%s19232_s3 + $0x2f60] sm:$0xff] }
 0x473   :  { %6506 = vmatpush2.msra.mxu1 %v3628_v40  ;;  %6531 = vmatpush1.msra.mxu0 %v3835_v15  ;;  %v3557_v40 = vld [vmem:[%s19232_s3 + $0x28a8] sm:$0xff]  ;;  %v3764_v15 = vld [vmem:[%s19232_s3 + $0x2f20] sm:$0xff] }
 0x474   :  { %6594 = vmatprep.mubr.f32.mxu0 %v12022_v20  ;;  %6507 = vmatprep.subr.mxu1 %v3620_v36  ;;  %v3556_v36 = vld [vmem:[%s19232_s3 + $0x28a0] sm:$0xff] }
 0x475   :  { %6532 = vmatprep.subr.mxu0 %v3827_v42  ;;  %6508 = vmatpush2.msra.mxu1 %v3619_v7  ;;  %v3763_v42 = vld [vmem:[%s19232_s3 + $0x2f18] sm:$0xff] }
 0x476   :  { %6533 = vmatpush1.msra.mxu0 %v3826_v23  ;;  %6509 = vmatprep.subr.mxu1 %v3611_v24  ;;  %v3755_v7 = vld [vmem:[%s19232_s3 + $0x2ed8] sm:$0xff]  ;;  %v4124_v23 = vld [vmem:[%s19232_s3 + $0x3a60] sm:$0xff]  ;;  %v3754_v24 = vld [vmem:[%s19232_s3 + $0x2ed0] sm:$0xff] }
 0x477   :  { %6534 = vmatprep.subr.mxu0 %v3818_v8  ;;  %6510 = vmatpush2.msra.mxu1 %v3610_v32  ;;  %v4123_v8 = vld [vmem:[%s19232_s3 + $0x3a58] sm:$0xff]  ;;  %v3746_v32 = vld [vmem:[%s19232_s3 + $0x2e90] sm:$0xff] }
 0x478   :  { %6535 = vmatpush1.msra.mxu0 %v3817_v14  ;;  %6511 = vmatprep.subr.mxu1 %v3602_v39  ;;  %v4115_v14 = vld [vmem:[%s19232_s3 + $0x3a18] sm:$0xff]  ;;  %v3745_v39 = vld [vmem:[%s19232_s3 + $0x2e88] sm:$0xff] }
 0x479   :  { %6536 = vmatprep.subr.mxu0 %v3809_v41  ;;  %6512 = vmatpush2.msra.mxu1 %v3601_v48  ;;  %v4114_v41 = vld [vmem:[%s19232_s3 + $0x3a10] sm:$0xff]  ;;  %v3737_v48 = vld [vmem:[%s19232_s3 + $0x2e48] sm:$0xff] }
 0x47a   :  { %6537 = vmatpush1.msra.mxu0 %v3808_v9  ;;  %6513 = vmatprep.subr.mxu1 %v3593_v49  ;;  %v4106_v9 = vld [vmem:[%s19232_s3 + $0x39d0] sm:$0xff]  ;;  %v3736_v49 = vld [vmem:[%s19232_s3 + $0x2e40] sm:$0xff] }
 0x47b   :  { %6538 = vmatprep.subr.mxu0 %v3800_v54  ;;  %6514 = vmatpush2.msra.mxu1 %v3592_v12  ;;  %v4105_v54 = vld [vmem:[%s19232_s3 + $0x39c8] sm:$0xff]  ;;  %v3728_v12 = vld [vmem:[%s19232_s3 + $0x2e00] sm:$0xff] }
 0x47c   :  { %6539 = vmatpush1.msra.mxu0 %v3799_v52  ;;  %6515 = vmatprep.subr.mxu1 %v3584_v61  ;;  %v4097_v52 = vld [vmem:[%s19232_s3 + $0x3988] sm:$0xff]  ;;  %v3727_v61 = vld [vmem:[%s19232_s3 + $0x2df8] sm:$0xff] }
 0x47d   :  { %6540 = vmatprep.subr.mxu0 %v3791_v43  ;;  %6516 = vmatpush2.msra.mxu1 %v3583_v18  ;;  %v4096_v43 = vld [vmem:[%s19232_s3 + $0x3980] sm:$0xff]  ;;  %v3719_v18 = vld [vmem:[%s19232_s3 + $0x2db8] sm:$0xff] }
 0x47e   :  { %6541 = vmatpush1.msra.mxu0 %v3790_v0  ;;  %6517 = vmatprep.subr.mxu1 %v3575_v37  ;;  %v4088_v0 = vld [vmem:[%s19232_s3 + $0x3940] sm:$0xff]  ;;  %v3718_v37 = vld [vmem:[%s19232_s3 + $0x2db0] sm:$0xff] }
 0x47f   :  { %6542 = vmatprep.subr.mxu0 %v3782_v31  ;;  %6518 = vmatpush2.msra.mxu1 %v3574_v63  ;;  %v4087_v31 = vld [vmem:[%s19232_s3 + $0x3938] sm:$0xff]  ;;  %v3710_v63 = vld [vmem:[%s19232_s3 + $0x2d70] sm:$0xff] }
 0x480   :  { %6543 = vmatpush1.msra.mxu0 %v3781_v30  ;;  %6519 = vmatprep.subr.mxu1 %v3566_v2  ;;  %v4079_v30 = vld [vmem:[%s19232_s3 + $0x38f8] sm:$0xff]  ;;  %v3709_v2 = vld [vmem:[%s19232_s3 + $0x2d68] sm:$0xff] }
 0x481   :  { %6544 = vmatprep.subr.mxu0 %v3773_v5  ;;  %6520 = vmatpush2.msra.mxu1 %v3565_v10  ;;  %v4078_v5 = vld [vmem:[%s19232_s3 + $0x38f0] sm:$0xff]  ;;  %v3701_v10 = vld [vmem:[%s19232_s3 + $0x2d28] sm:$0xff] }
 0x482   :  { %6545 = vmatpush1.msra.mxu0 %v3772_v25  ;;  %6521 = vmatprep.subr.mxu1 %v3557_v40  ;;  %v4070_v25 = vld [vmem:[%s19232_s3 + $0x38b0] sm:$0xff]  ;;  %v3700_v40 = vld [vmem:[%s19232_s3 + $0x2d20] sm:$0xff] }
 0x483   :  { %6546 = vmatprep.subr.mxu0 %v3764_v15  ;;  %6522 = vmatpush2.msra.mxu1 %v3556_v36  ;;  %v4069_v15 = vld [vmem:[%s19232_s3 + $0x38a8] sm:$0xff]  ;;  %v3980_v36 = vld [vmem:[%s19232_s3 + $0x35e0] sm:$0xff] }
 0x484   :  { %6547 = vmatpush1.msra.mxu0 %v3763_v42  ;;  %6524 = vmatmul.mubr.f32.vlgmr.msra.gmra.mxu1 %v12132_v13  ;;  %v4061_v42 = vld [vmem:[%s19232_s3 + $0x3868] sm:$0xff] }
 0x485   :  { %6548 = vmatprep.subr.mxu0 %v3755_v7  ;;  %6601 = vmatprep.subr.mxu1 %v4124_v23  ;;  %v3979_v7 = vld [vmem:[%s19232_s3 + $0x35d8] sm:$0xff]  ;;  %v4060_v23 = vld [vmem:[%s19232_s3 + $0x3860] sm:$0xff] }
 0x486   :  { %6549 = vmatpush1.msra.mxu0 %v3754_v24  ;;  %6602 = vmatpush1.msra.mxu1 %v4123_v8  ;;  %v3971_v24 = vld [vmem:[%s19232_s3 + $0x3598] sm:$0xff]  ;;  %v4052_v8 = vld [vmem:[%s19232_s3 + $0x3820] sm:$0xff] }
 0x487   :  { %6665 = vmatprep.mubr.f32.mxu1 %v12150_v21  ;;  %6550 = vmatprep.subr.mxu0 %v3746_v32  ;;  %v3970_v32 = vld [vmem:[%s19232_s3 + $0x3590] sm:$0xff] }
 0x488   :  { %6603 = vmatprep.subr.mxu1 %v4115_v14  ;;  %6551 = vmatpush1.msra.mxu0 %v3745_v39  ;;  %v4051_v14 = vld [vmem:[%s19232_s3 + $0x3818] sm:$0xff]  ;;  %v3962_v39 = vld [vmem:[%s19232_s3 + $0x3550] sm:$0xff] }
 0x489   :  { %6604 = vmatpush1.msra.mxu1 %v4114_v41  ;;  %6552 = vmatprep.subr.mxu0 %v3737_v48  ;;  %v4043_v41 = vld [vmem:[%s19232_s3 + $0x37d8] sm:$0xff]  ;;  %v3961_v48 = vld [vmem:[%s19232_s3 + $0x3548] sm:$0xff] }
 0x48a   :  { %6605 = vmatprep.subr.mxu1 %v4106_v9  ;;  %6553 = vmatpush1.msra.mxu0 %v3736_v49  ;;  %v4042_v9 = vld [vmem:[%s19232_s3 + $0x37d0] sm:$0xff]  ;;  %v3953_v49 = vld [vmem:[%s19232_s3 + $0x3508] sm:$0xff] }
 0x48b   :  { %6606 = vmatpush1.msra.mxu1 %v4105_v54  ;;  %6554 = vmatprep.subr.mxu0 %v3728_v12  ;;  %v4034_v54 = vld [vmem:[%s19232_s3 + $0x3790] sm:$0xff]  ;;  %v3952_v12 = vld [vmem:[%s19232_s3 + $0x3500] sm:$0xff] }
 0x48c   :  { %6607 = vmatprep.subr.mxu1 %v4097_v52  ;;  %6555 = vmatpush1.msra.mxu0 %v3727_v61  ;;  %v4033_v52 = vld [vmem:[%s19232_s3 + $0x3788] sm:$0xff]  ;;  %v3944_v61 = vld [vmem:[%s19232_s3 + $0x34c0] sm:$0xff] }
 0x48d   :  { %6608 = vmatpush1.msra.mxu1 %v4096_v43  ;;  %6556 = vmatprep.subr.mxu0 %v3719_v18  ;;  %v4025_v43 = vld [vmem:[%s19232_s3 + $0x3748] sm:$0xff]  ;;  %v3943_v18 = vld [vmem:[%s19232_s3 + $0x34b8] sm:$0xff] }
 0x48e   :  { %6609 = vmatprep.subr.mxu1 %v4088_v0  ;;  %6557 = vmatpush1.msra.mxu0 %v3718_v37  ;;  %v4024_v0 = vld [vmem:[%s19232_s3 + $0x3740] sm:$0xff]  ;;  %v3935_v37 = vld [vmem:[%s19232_s3 + $0x3478] sm:$0xff] }
 0x48f   :  { %6610 = vmatpush1.msra.mxu1 %v4087_v31  ;;  %6558 = vmatprep.subr.mxu0 %v3710_v63  ;;  %v4016_v31 = vld [vmem:[%s19232_s3 + $0x3700] sm:$0xff]  ;;  %v3934_v63 = vld [vmem:[%s19232_s3 + $0x3470] sm:$0xff] }
 0x490   :  { %6611 = vmatprep.subr.mxu1 %v4079_v30  ;;  %6559 = vmatpush1.msra.mxu0 %v3709_v2  ;;  %v4015_v30 = vld [vmem:[%s19232_s3 + $0x36f8] sm:$0xff]  ;;  %v3926_v2 = vld [vmem:[%s19232_s3 + $0x3430] sm:$0xff] }
 0x491   :  { %6612 = vmatpush1.msra.mxu1 %v4078_v5  ;;  %6560 = vmatprep.subr.mxu0 %v3701_v10  ;;  %v4007_v5 = vld [vmem:[%s19232_s3 + $0x36b8] sm:$0xff]  ;;  %v3925_v10 = vld [vmem:[%s19232_s3 + $0x3428] sm:$0xff] }
 0x492   :  { %6613 = vmatprep.subr.mxu1 %v4070_v25  ;;  %6561 = vmatpush1.msra.mxu0 %v3700_v40  ;;  %v4006_v25 = vld [vmem:[%s19232_s3 + $0x36b0] sm:$0xff]  ;;  %v3917_v40 = vld [vmem:[%s19232_s3 + $0x33e8] sm:$0xff] }
 0x493   :  { %6614 = vmatpush1.msra.mxu1 %v4069_v15  ;;  %6562 = vmatprep.subr.mxu0 %v3980_v36  ;;  %v3998_v15 = vld [vmem:[%s19232_s3 + $0x3670] sm:$0xff]  ;;  %v3916_v36 = vld [vmem:[%s19232_s3 + $0x33e0] sm:$0xff] }
 0x494   :  { %6615 = vmatprep.subr.mxu1 %v4061_v42  ;;  %6563 = vmatpush2.msra.mxu0 %v3979_v7  ;;  %v3997_v42 = vld [vmem:[%s19232_s3 + $0x3668] sm:$0xff]  ;;  %v3908_v7 = vld [vmem:[%s19232_s3 + $0x33a0] sm:$0xff] }
 0x495   :  { %6616 = vmatpush1.msra.mxu1 %v4060_v23  ;;  %6564 = vmatprep.subr.mxu0 %v3971_v24  ;;  %v3989_v23 = vld [vmem:[%s19232_s3 + $0x3628] sm:$0xff]  ;;  %v3907_v24 = vld [vmem:[%s19232_s3 + $0x3398] sm:$0xff] }
 0x496   :  { %6617 = vmatprep.subr.mxu1 %v4052_v8  ;;  %6565 = vmatpush2.msra.mxu0 %v3970_v32  ;;  %v3988_v8 = vld [vmem:[%s19232_s3 + $0x3620] sm:$0xff]  ;;  %v3899_v32 = vld [vmem:[%s19232_s3 + $0x3358] sm:$0xff] }
 0x497   :  { %6618 = vmatpush1.msra.mxu1 %v4051_v14  ;;  %6566 = vmatprep.subr.mxu0 %v3962_v39  ;;  %v4268_v14 = vld [vmem:[%s19232_s3 + $0x3ee0] sm:$0xff]  ;;  %v3898_v39 = vld [vmem:[%s19232_s3 + $0x3350] sm:$0xff] }
 0x498   :  { %6619 = vmatprep.subr.mxu1 %v4043_v41  ;;  %6567 = vmatpush2.msra.mxu0 %v3961_v48  ;;  %v4267_v41 = vld [vmem:[%s19232_s3 + $0x3ed8] sm:$0xff]  ;;  %v3890_v48 = vld [vmem:[%s19232_s3 + $0x3310] sm:$0xff] }
 0x499   :  { %6620 = vmatpush1.msra.mxu1 %v4042_v9  ;;  %6568 = vmatprep.subr.mxu0 %v3953_v49  ;;  %v4259_v9 = vld [vmem:[%s19232_s3 + $0x3e98] sm:$0xff]  ;;  %v3889_v49 = vld [vmem:[%s19232_s3 + $0x3308] sm:$0xff] }
 0x49a   :  { %6621 = vmatprep.subr.mxu1 %v4034_v54  ;;  %6569 = vmatpush2.msra.mxu0 %v3952_v12  ;;  %v4258_v54 = vld [vmem:[%s19232_s3 + $0x3e90] sm:$0xff]  ;;  %v3881_v12 = vld [vmem:[%s19232_s3 + $0x32c8] sm:$0xff] }
 0x49b   :  { %6622 = vmatpush1.msra.mxu1 %v4033_v52  ;;  %6570 = vmatprep.subr.mxu0 %v3944_v61  ;;  %v4250_v52 = vld [vmem:[%s19232_s3 + $0x3e50] sm:$0xff]  ;;  %v3880_v61 = vld [vmem:[%s19232_s3 + $0x32c0] sm:$0xff] }
 0x49c   :  { %6623 = vmatprep.subr.mxu1 %v4025_v43  ;;  %6571 = vmatpush2.msra.mxu0 %v3943_v18  ;;  %v4249_v43 = vld [vmem:[%s19232_s3 + $0x3e48] sm:$0xff]  ;;  %v3872_v18 = vld [vmem:[%s19232_s3 + $0x3280] sm:$0xff] }
 0x49d   :  { %6624 = vmatpush1.msra.mxu1 %v4024_v0  ;;  %6572 = vmatprep.subr.mxu0 %v3935_v37  ;;  %v4241_v0 = vld [vmem:[%s19232_s3 + $0x3e08] sm:$0xff]  ;;  %v3871_v37 = vld [vmem:[%s19232_s3 + $0x3278] sm:$0xff] }
 0x49e   :  { %6625 = vmatprep.subr.mxu1 %v4016_v31  ;;  %6573 = vmatpush2.msra.mxu0 %v3934_v63  ;;  %v4240_v31 = vld [vmem:[%s19232_s3 + $0x3e00] sm:$0xff]  ;;  %v3863_v63 = vld [vmem:[%s19232_s3 + $0x3238] sm:$0xff] }
 0x49f   :  { %6626 = vmatpush1.msra.mxu1 %v4015_v30  ;;  %6574 = vmatprep.subr.mxu0 %v3926_v2  ;;  %v4232_v30 = vld [vmem:[%s19232_s3 + $0x3dc0] sm:$0xff]  ;;  %v3862_v2 = vld [vmem:[%s19232_s3 + $0x3230] sm:$0xff] }
 0x4a0   :  { %6627 = vmatprep.subr.mxu1 %v4007_v5  ;;  %6575 = vmatpush2.msra.mxu0 %v3925_v10  ;;  %v4231_v5 = vld [vmem:[%s19232_s3 + $0x3db8] sm:$0xff]  ;;  %v3854_v10 = vld [vmem:[%s19232_s3 + $0x31f0] sm:$0xff] }
 0x4a1   :  { %6628 = vmatpush1.msra.mxu1 %v4006_v25  ;;  %6576 = vmatprep.subr.mxu0 %v3917_v40  ;;  %v4223_v25 = vld [vmem:[%s19232_s3 + $0x3d78] sm:$0xff]  ;;  %v3853_v40 = vld [vmem:[%s19232_s3 + $0x31e8] sm:$0xff] }
 0x4a2   :  { %6629 = vmatprep.subr.mxu1 %v3998_v15  ;;  %6577 = vmatpush2.msra.mxu0 %v3916_v36  ;;  %v4222_v15 = vld [vmem:[%s19232_s3 + $0x3d70] sm:$0xff]  ;;  %v3845_v36 = vld [vmem:[%s19232_s3 + $0x31a8] sm:$0xff] }
 0x4a3   :  { %6630 = vmatpush1.msra.mxu1 %v3997_v42  ;;  %6578 = vmatprep.subr.mxu0 %v3908_v7  ;;  %v4214_v42 = vld [vmem:[%s19232_s3 + $0x3d30] sm:$0xff]  ;;  %v3844_v7 = vld [vmem:[%s19232_s3 + $0x31a0] sm:$0xff] }
 0x4a4   :  { %6631 = vmatprep.subr.mxu1 %v3989_v23  ;;  %6579 = vmatpush2.msra.mxu0 %v3907_v24  ;;  %v4213_v23 = vld [vmem:[%s19232_s3 + $0x3d28] sm:$0xff] }
 0x4a5   :  { %6632 = vmatpush1.msra.mxu1 %v3988_v8  ;;  %6580 = vmatprep.subr.mxu0 %v3899_v32  ;;  %v4205_v24 = vld [vmem:[%s19232_s3 + $0x3ce8] sm:$0xff]  ;;  %v4412_v8 = vld [vmem:[%s19232_s3 + $0x4360] sm:$0xff] }
 0x4a6   :  { %6633 = vmatprep.subr.mxu1 %v4268_v14  ;;  %6581 = vmatpush2.msra.mxu0 %v3898_v39  ;;  %v4204_v32 = vld [vmem:[%s19232_s3 + $0x3ce0] sm:$0xff]  ;;  %v4411_v14 = vld [vmem:[%s19232_s3 + $0x4358] sm:$0xff] }
 0x4a7   :  { %6634 = vmatpush2.msra.mxu1 %v4267_v41  ;;  %6582 = vmatprep.subr.mxu0 %v3890_v48  ;;  %v4196_v39 = vld [vmem:[%s19232_s3 + $0x3ca0] sm:$0xff]  ;;  %v4403_v41 = vld [vmem:[%s19232_s3 + $0x4318] sm:$0xff] }
 0x4a8   :  { %6635 = vmatprep.subr.mxu1 %v4259_v9  ;;  %6583 = vmatpush2.msra.mxu0 %v3889_v49  ;;  %v4195_v48 = vld [vmem:[%s19232_s3 + $0x3c98] sm:$0xff]  ;;  %v4402_v9 = vld [vmem:[%s19232_s3 + $0x4310] sm:$0xff] }
 0x4a9   :  { %6636 = vmatpush2.msra.mxu1 %v4258_v54  ;;  %6584 = vmatprep.subr.mxu0 %v3881_v12  ;;  %v4187_v49 = vld [vmem:[%s19232_s3 + $0x3c58] sm:$0xff]  ;;  %v4394_v54 = vld [vmem:[%s19232_s3 + $0x42d0] sm:$0xff] }
 0x4aa   :  { %6637 = vmatprep.subr.mxu1 %v4250_v52  ;;  %6585 = vmatpush2.msra.mxu0 %v3880_v61  ;;  %v4186_v12 = vld [vmem:[%s19232_s3 + $0x3c50] sm:$0xff]  ;;  %v4393_v52 = vld [vmem:[%s19232_s3 + $0x42c8] sm:$0xff] }
 0x4ab   :  { %6638 = vmatpush2.msra.mxu1 %v4249_v43  ;;  %6586 = vmatprep.subr.mxu0 %v3872_v18  ;;  %v4178_v61 = vld [vmem:[%s19232_s3 + $0x3c10] sm:$0xff]  ;;  %v4385_v43 = vld [vmem:[%s19232_s3 + $0x4288] sm:$0xff] }
 0x4ac   :  { %6639 = vmatprep.subr.mxu1 %v4241_v0  ;;  %6587 = vmatpush2.msra.mxu0 %v3871_v37  ;;  %v4177_v18 = vld [vmem:[%s19232_s3 + $0x3c08] sm:$0xff]  ;;  %v4384_v0 = vld [vmem:[%s19232_s3 + $0x4280] sm:$0xff] }
 0x4ad   :  { %6640 = vmatpush2.msra.mxu1 %v4240_v31  ;;  %6588 = vmatprep.subr.mxu0 %v3863_v63  ;;  %v4169_v37 = vld [vmem:[%s19232_s3 + $0x3bc8] sm:$0xff]  ;;  %v4376_v31 = vld [vmem:[%s19232_s3 + $0x4240] sm:$0xff] }
 0x4ae   :  { %6641 = vmatprep.subr.mxu1 %v4232_v30  ;;  %6589 = vmatpush2.msra.mxu0 %v3862_v2  ;;  %v4168_v63 = vld [vmem:[%s19232_s3 + $0x3bc0] sm:$0xff]  ;;  %v4375_v30 = vld [vmem:[%s19232_s3 + $0x4238] sm:$0xff] }
 0x4af   :  { %6642 = vmatpush2.msra.mxu1 %v4231_v5  ;;  %6590 = vmatprep.subr.mxu0 %v3854_v10  ;;  %v4160_v2 = vld [vmem:[%s19232_s3 + $0x3b80] sm:$0xff]  ;;  %v4367_v5 = vld [vmem:[%s19232_s3 + $0x41f8] sm:$0xff] }
 0x4b0   :  { %6643 = vmatprep.subr.mxu1 %v4223_v25  ;;  %6591 = vmatpush2.msra.mxu0 %v3853_v40  ;;  %v4159_v10 = vld [vmem:[%s19232_s3 + $0x3b78] sm:$0xff]  ;;  %v4366_v25 = vld [vmem:[%s19232_s3 + $0x41f0] sm:$0xff] }
 0x4b1   :  { %6644 = vmatpush2.msra.mxu1 %v4222_v15  ;;  %6592 = vmatprep.subr.mxu0 %v3845_v36  ;;  %v4151_v40 = vld [vmem:[%s19232_s3 + $0x3b38] sm:$0xff]  ;;  %v4358_v15 = vld [vmem:[%s19232_s3 + $0x41b0] sm:$0xff] }
 0x4b2   :  { %6645 = vmatprep.subr.mxu1 %v4214_v42  ;;  %6593 = vmatpush2.msra.mxu0 %v3844_v7  ;;  %v4150_v36 = vld [vmem:[%s19232_s3 + $0x3b30] sm:$0xff]  ;;  %v4357_v42 = vld [vmem:[%s19232_s3 + $0x41a8] sm:$0xff] }
 0x4b3   :  { %6646 = vmatpush2.msra.mxu1 %v4213_v23  ;;  %6595 = vmatmul.mubr.f32.vlgmr.msra.gmra.mxu0 %v12428_v57  ;;  %v4142_v7 = vld [vmem:[%s19232_s3 + $0x3af0] sm:$0xff]  ;;  %v4349_v23 = vld [vmem:[%s19232_s3 + $0x4168] sm:$0xff] }
 0x4b4   :  { %6647 = vmatprep.subr.mxu1 %v4205_v24  ;;  %6672 = vmatprep.subr.mxu0 %v4412_v8  ;;  %v4141_v24 = vld [vmem:[%s19232_s3 + $0x3ae8] sm:$0xff]  ;;  %v4348_v8 = vld [vmem:[%s19232_s3 + $0x4160] sm:$0xff] }
 0x4b5   :  { %6648 = vmatpush2.msra.mxu1 %v4204_v32  ;;  %6673 = vmatpush1.msra.mxu0 %v4411_v14  ;;  %v4133_v32 = vld [vmem:[%s19232_s3 + $0x3aa8] sm:$0xff]  ;;  %v4340_v14 = vld [vmem:[%s19232_s3 + $0x4120] sm:$0xff] }
 0x4b6   :  { %6736 = vmatprep.mubr.f32.mxu0 %v12446_v62  ;;  %6649 = vmatprep.subr.mxu1 %v4196_v39  ;;  %v4132_v39 = vld [vmem:[%s19232_s3 + $0x3aa0] sm:$0xff] }
 0x4b7   :  { %6674 = vmatprep.subr.mxu0 %v4403_v41  ;;  %6650 = vmatpush2.msra.mxu1 %v4195_v48  ;;  %v4339_v41 = vld [vmem:[%s19232_s3 + $0x4118] sm:$0xff] }
 0x4b8   :  { %6675 = vmatpush1.msra.mxu0 %v4402_v9  ;;  %6651 = vmatprep.subr.mxu1 %v4187_v49  ;;  %v4331_v48 = vld [vmem:[%s19232_s3 + $0x40d8] sm:$0xff]  ;;  %v4700_v9 = vld [vmem:[%s19232_s3 + $0x4c60] sm:$0xff]  ;;  %v4330_v49 = vld [vmem:[%s19232_s3 + $0x40d0] sm:$0xff] }
 0x4b9   :  { %6676 = vmatprep.subr.mxu0 %v4394_v54  ;;  %6652 = vmatpush2.msra.mxu1 %v4186_v12  ;;  %v4699_v54 = vld [vmem:[%s19232_s3 + $0x4c58] sm:$0xff]  ;;  %v4322_v12 = vld [vmem:[%s19232_s3 + $0x4090] sm:$0xff] }
 0x4ba   :  { %6677 = vmatpush1.msra.mxu0 %v4393_v52  ;;  %6653 = vmatprep.subr.mxu1 %v4178_v61  ;;  %v4691_v52 = vld [vmem:[%s19232_s3 + $0x4c18] sm:$0xff]  ;;  %v4321_v61 = vld [vmem:[%s19232_s3 + $0x4088] sm:$0xff] }
 0x4bb   :  { %6678 = vmatprep.subr.mxu0 %v4385_v43  ;;  %6654 = vmatpush2.msra.mxu1 %v4177_v18  ;;  %v4690_v43 = vld [vmem:[%s19232_s3 + $0x4c10] sm:$0xff]  ;;  %v4313_v18 = vld [vmem:[%s19232_s3 + $0x4048] sm:$0xff] }
 0x4bc   :  { %6679 = vmatpush1.msra.mxu0 %v4384_v0  ;;  %6655 = vmatprep.subr.mxu1 %v4169_v37  ;;  %v4682_v0 = vld [vmem:[%s19232_s3 + $0x4bd0] sm:$0xff]  ;;  %v4312_v37 = vld [vmem:[%s19232_s3 + $0x4040] sm:$0xff] }
 0x4bd   :  { %6680 = vmatprep.subr.mxu0 %v4376_v31  ;;  %6656 = vmatpush2.msra.mxu1 %v4168_v63  ;;  %v4681_v31 = vld [vmem:[%s19232_s3 + $0x4bc8] sm:$0xff]  ;;  %v4304_v63 = vld [vmem:[%s19232_s3 + $0x4000] sm:$0xff] }
 0x4be   :  { %6681 = vmatpush1.msra.mxu0 %v4375_v30  ;;  %6657 = vmatprep.subr.mxu1 %v4160_v2  ;;  %v4673_v30 = vld [vmem:[%s19232_s3 + $0x4b88] sm:$0xff]  ;;  %v4303_v2 = vld [vmem:[%s19232_s3 + $0x3ff8] sm:$0xff] }
 0x4bf   :  { %6682 = vmatprep.subr.mxu0 %v4367_v5  ;;  %6658 = vmatpush2.msra.mxu1 %v4159_v10  ;;  %v4672_v5 = vld [vmem:[%s19232_s3 + $0x4b80] sm:$0xff]  ;;  %v4295_v10 = vld [vmem:[%s19232_s3 + $0x3fb8] sm:$0xff] }
 0x4c0   :  { %6683 = vmatpush1.msra.mxu0 %v4366_v25  ;;  %6659 = vmatprep.subr.mxu1 %v4151_v40  ;;  %v4664_v25 = vld [vmem:[%s19232_s3 + $0x4b40] sm:$0xff]  ;;  %v4294_v40 = vld [vmem:[%s19232_s3 + $0x3fb0] sm:$0xff] }
 0x4c1   :  { %6684 = vmatprep.subr.mxu0 %v4358_v15  ;;  %6660 = vmatpush2.msra.mxu1 %v4150_v36  ;;  %v4663_v15 = vld [vmem:[%s19232_s3 + $0x4b38] sm:$0xff]  ;;  %v4286_v36 = vld [vmem:[%s19232_s3 + $0x3f70] sm:$0xff] }
 0x4c2   :  { %6685 = vmatpush1.msra.mxu0 %v4357_v42  ;;  %6661 = vmatprep.subr.mxu1 %v4142_v7  ;;  %v4655_v42 = vld [vmem:[%s19232_s3 + $0x4af8] sm:$0xff]  ;;  %v4285_v7 = vld [vmem:[%s19232_s3 + $0x3f68] sm:$0xff] }
 0x4c3   :  { %6686 = vmatprep.subr.mxu0 %v4349_v23  ;;  %6662 = vmatpush2.msra.mxu1 %v4141_v24  ;;  %v4654_v23 = vld [vmem:[%s19232_s3 + $0x4af0] sm:$0xff]  ;;  %v4277_v24 = vld [vmem:[%s19232_s3 + $0x3f28] sm:$0xff] }
 0x4c4   :  { %6687 = vmatpush1.msra.mxu0 %v4348_v8  ;;  %6663 = vmatprep.subr.mxu1 %v4133_v32  ;;  %v4646_v8 = vld [vmem:[%s19232_s3 + $0x4ab0] sm:$0xff]  ;;  %v4276_v32 = vld [vmem:[%s19232_s3 + $0x3f20] sm:$0xff] }
 0x4c5   :  { %6688 = vmatprep.subr.mxu0 %v4340_v14  ;;  %6664 = vmatpush2.msra.mxu1 %v4132_v39  ;;  %v4645_v14 = vld [vmem:[%s19232_s3 + $0x4aa8] sm:$0xff]  ;;  %v4556_v39 = vld [vmem:[%s19232_s3 + $0x47e0] sm:$0xff] }
 0x4c6   :  { %6689 = vmatpush1.msra.mxu0 %v4339_v41  ;;  %6666 = vmatmul.mubr.f32.vlgmr.msra.gmra.mxu1 %v12549_v56  ;;  %v4637_v41 = vld [vmem:[%s19232_s3 + $0x4a68] sm:$0xff] }
 0x4c7   :  { %6690 = vmatprep.subr.mxu0 %v4331_v48  ;;  %6743 = vmatprep.subr.mxu1 %v4700_v9  ;;  %v4555_v48 = vld [vmem:[%s19232_s3 + $0x47d8] sm:$0xff]  ;;  %v4636_v9 = vld [vmem:[%s19232_s3 + $0x4a60] sm:$0xff] }
 0x4c8   :  { %6691 = vmatpush1.msra.mxu0 %v4330_v49  ;;  %6744 = vmatpush1.msra.mxu1 %v4699_v54  ;;  %v4547_v49 = vld [vmem:[%s19232_s3 + $0x4798] sm:$0xff]  ;;  %v4628_v54 = vld [vmem:[%s19232_s3 + $0x4a20] sm:$0xff] }
 0x4c9   :  { %6807 = vmatprep.mubr.f32.mxu1 %v12567_v47  ;;  %6692 = vmatprep.subr.mxu0 %v4322_v12  ;;  %v4546_v12 = vld [vmem:[%s19232_s3 + $0x4790] sm:$0xff] }
 0x4ca   :  { %6745 = vmatprep.subr.mxu1 %v4691_v52  ;;  %6693 = vmatpush1.msra.mxu0 %v4321_v61  ;;  %v4627_v52 = vld [vmem:[%s19232_s3 + $0x4a18] sm:$0xff]  ;;  %v4538_v61 = vld [vmem:[%s19232_s3 + $0x4750] sm:$0xff] }
 0x4cb   :  { %6746 = vmatpush1.msra.mxu1 %v4690_v43  ;;  %6694 = vmatprep.subr.mxu0 %v4313_v18  ;;  %v4619_v43 = vld [vmem:[%s19232_s3 + $0x49d8] sm:$0xff]  ;;  %v4537_v18 = vld [vmem:[%s19232_s3 + $0x4748] sm:$0xff] }
 0x4cc   :  { %6747 = vmatprep.subr.mxu1 %v4682_v0  ;;  %6695 = vmatpush1.msra.mxu0 %v4312_v37  ;;  %v4618_v0 = vld [vmem:[%s19232_s3 + $0x49d0] sm:$0xff]  ;;  %v4529_v37 = vld [vmem:[%s19232_s3 + $0x4708] sm:$0xff] }
 0x4cd   :  { %6748 = vmatpush1.msra.mxu1 %v4681_v31  ;;  %6696 = vmatprep.subr.mxu0 %v4304_v63  ;;  %v4610_v31 = vld [vmem:[%s19232_s3 + $0x4990] sm:$0xff]  ;;  %v4528_v63 = vld [vmem:[%s19232_s3 + $0x4700] sm:$0xff] }
 0x4ce   :  { %6749 = vmatprep.subr.mxu1 %v4673_v30  ;;  %6697 = vmatpush1.msra.mxu0 %v4303_v2  ;;  %v4609_v30 = vld [vmem:[%s19232_s3 + $0x4988] sm:$0xff]  ;;  %v4520_v2 = vld [vmem:[%s19232_s3 + $0x46c0] sm:$0xff] }
 0x4cf   :  { %6750 = vmatpush1.msra.mxu1 %v4672_v5  ;;  %6698 = vmatprep.subr.mxu0 %v4295_v10  ;;  %v4601_v5 = vld [vmem:[%s19232_s3 + $0x4948] sm:$0xff]  ;;  %v4519_v10 = vld [vmem:[%s19232_s3 + $0x46b8] sm:$0xff] }
 0x4d0   :  { %6751 = vmatprep.subr.mxu1 %v4664_v25  ;;  %6699 = vmatpush1.msra.mxu0 %v4294_v40  ;;  %v4600_v25 = vld [vmem:[%s19232_s3 + $0x4940] sm:$0xff]  ;;  %v4511_v40 = vld [vmem:[%s19232_s3 + $0x4678] sm:$0xff] }
 0x4d1   :  { %6752 = vmatpush1.msra.mxu1 %v4663_v15  ;;  %6700 = vmatprep.subr.mxu0 %v4286_v36  ;;  %v4592_v15 = vld [vmem:[%s19232_s3 + $0x4900] sm:$0xff]  ;;  %v4510_v36 = vld [vmem:[%s19232_s3 + $0x4670] sm:$0xff] }
 0x4d2   :  { %6753 = vmatprep.subr.mxu1 %v4655_v42  ;;  %6701 = vmatpush1.msra.mxu0 %v4285_v7  ;;  %v4591_v42 = vld [vmem:[%s19232_s3 + $0x48f8] sm:$0xff]  ;;  %v4502_v7 = vld [vmem:[%s19232_s3 + $0x4630] sm:$0xff] }
 0x4d3   :  { %6754 = vmatpush1.msra.mxu1 %v4654_v23  ;;  %6702 = vmatprep.subr.mxu0 %v4277_v24  ;;  %v4583_v23 = vld [vmem:[%s19232_s3 + $0x48b8] sm:$0xff]  ;;  %v4501_v24 = vld [vmem:[%s19232_s3 + $0x4628] sm:$0xff] }
 0x4d4   :  { %6755 = vmatprep.subr.mxu1 %v4646_v8  ;;  %6703 = vmatpush1.msra.mxu0 %v4276_v32  ;;  %v4582_v8 = vld [vmem:[%s19232_s3 + $0x48b0] sm:$0xff]  ;;  %v4493_v32 = vld [vmem:[%s19232_s3 + $0x45e8] sm:$0xff] }
 0x4d5   :  { %6756 = vmatpush1.msra.mxu1 %v4645_v14  ;;  %6704 = vmatprep.subr.mxu0 %v4556_v39  ;;  %v4574_v14 = vld [vmem:[%s19232_s3 + $0x4870] sm:$0xff]  ;;  %v4492_v39 = vld [vmem:[%s19232_s3 + $0x45e0] sm:$0xff] }
 0x4d6   :  { %6757 = vmatprep.subr.mxu1 %v4637_v41  ;;  %6705 = vmatpush2.msra.mxu0 %v4555_v48  ;;  %v4573_v41 = vld [vmem:[%s19232_s3 + $0x4868] sm:$0xff]  ;;  %v4484_v48 = vld [vmem:[%s19232_s3 + $0x45a0] sm:$0xff] }
 0x4d7   :  { %6758 = vmatpush1.msra.mxu1 %v4636_v9  ;;  %6706 = vmatprep.subr.mxu0 %v4547_v49  ;;  %v4565_v9 = vld [vmem:[%s19232_s3 + $0x4828] sm:$0xff]  ;;  %v4483_v49 = vld [vmem:[%s19232_s3 + $0x4598] sm:$0xff] }
 0x4d8   :  { %6759 = vmatprep.subr.mxu1 %v4628_v54  ;;  %6707 = vmatpush2.msra.mxu0 %v4546_v12  ;;  %v4564_v54 = vld [vmem:[%s19232_s3 + $0x4820] sm:$0xff]  ;;  %v4475_v12 = vld [vmem:[%s19232_s3 + $0x4558] sm:$0xff] }
 0x4d9   :  { %6760 = vmatpush1.msra.mxu1 %v4627_v52  ;;  %6708 = vmatprep.subr.mxu0 %v4538_v61  ;;  %v4844_v52 = vld [vmem:[%s19232_s3 + $0x50e0] sm:$0xff]  ;;  %v4474_v61 = vld [vmem:[%s19232_s3 + $0x4550] sm:$0xff] }
 0x4da   :  { %6761 = vmatprep.subr.mxu1 %v4619_v43  ;;  %6709 = vmatpush2.msra.mxu0 %v4537_v18  ;;  %v4843_v43 = vld [vmem:[%s19232_s3 + $0x50d8] sm:$0xff]  ;;  %v4466_v18 = vld [vmem:[%s19232_s3 + $0x4510] sm:$0xff] }
 0x4db   :  { %6762 = vmatpush1.msra.mxu1 %v4618_v0  ;;  %6710 = vmatprep.subr.mxu0 %v4529_v37  ;;  %v4835_v0 = vld [vmem:[%s19232_s3 + $0x5098] sm:$0xff]  ;;  %v4465_v37 = vld [vmem:[%s19232_s3 + $0x4508] sm:$0xff] }
 0x4dc   :  { %6763 = vmatprep.subr.mxu1 %v4610_v31  ;;  %6711 = vmatpush2.msra.mxu0 %v4528_v63  ;;  %v4834_v31 = vld [vmem:[%s19232_s3 + $0x5090] sm:$0xff]  ;;  %v4457_v63 = vld [vmem:[%s19232_s3 + $0x44c8] sm:$0xff] }
 0x4dd   :  { %6764 = vmatpush1.msra.mxu1 %v4609_v30  ;;  %6712 = vmatprep.subr.mxu0 %v4520_v2  ;;  %v4826_v30 = vld [vmem:[%s19232_s3 + $0x5050] sm:$0xff]  ;;  %v4456_v2 = vld [vmem:[%s19232_s3 + $0x44c0] sm:$0xff] }
 0x4de   :  { %6765 = vmatprep.subr.mxu1 %v4601_v5  ;;  %6713 = vmatpush2.msra.mxu0 %v4519_v10  ;;  %v4825_v5 = vld [vmem:[%s19232_s3 + $0x5048] sm:$0xff]  ;;  %v4448_v10 = vld [vmem:[%s19232_s3 + $0x4480] sm:$0xff] }
 0x4df   :  { %6766 = vmatpush1.msra.mxu1 %v4600_v25  ;;  %6714 = vmatprep.subr.mxu0 %v4511_v40  ;;  %v4817_v25 = vld [vmem:[%s19232_s3 + $0x5008] sm:$0xff]  ;;  %v4447_v40 = vld [vmem:[%s19232_s3 + $0x4478] sm:$0xff] }
 0x4e0   :  { %6767 = vmatprep.subr.mxu1 %v4592_v15  ;;  %6715 = vmatpush2.msra.mxu0 %v4510_v36  ;;  %v4816_v15 = vld [vmem:[%s19232_s3 + $0x5000] sm:$0xff]  ;;  %v4439_v36 = vld [vmem:[%s19232_s3 + $0x4438] sm:$0xff] }
 0x4e1   :  { %6768 = vmatpush1.msra.mxu1 %v4591_v42  ;;  %6716 = vmatprep.subr.mxu0 %v4502_v7  ;;  %v4808_v42 = vld [vmem:[%s19232_s3 + $0x4fc0] sm:$0xff]  ;;  %v4438_v7 = vld [vmem:[%s19232_s3 + $0x4430] sm:$0xff] }
 0x4e2   :  { %6769 = vmatprep.subr.mxu1 %v4583_v23  ;;  %6717 = vmatpush2.msra.mxu0 %v4501_v24  ;;  %v4807_v23 = vld [vmem:[%s19232_s3 + $0x4fb8] sm:$0xff]  ;;  %v4430_v24 = vld [vmem:[%s19232_s3 + $0x43f0] sm:$0xff] }
 0x4e3   :  { %6770 = vmatpush1.msra.mxu1 %v4582_v8  ;;  %6718 = vmatprep.subr.mxu0 %v4493_v32  ;;  %v4799_v8 = vld [vmem:[%s19232_s3 + $0x4f78] sm:$0xff]  ;;  %v4429_v32 = vld [vmem:[%s19232_s3 + $0x43e8] sm:$0xff] }
 0x4e4   :  { %6771 = vmatprep.subr.mxu1 %v4574_v14  ;;  %6719 = vmatpush2.msra.mxu0 %v4492_v39  ;;  %v4798_v14 = vld [vmem:[%s19232_s3 + $0x4f70] sm:$0xff]  ;;  %v4421_v39 = vld [vmem:[%s19232_s3 + $0x43a8] sm:$0xff] }
 0x4e5   :  { %6772 = vmatpush1.msra.mxu1 %v4573_v41  ;;  %6720 = vmatprep.subr.mxu0 %v4484_v48  ;;  %v4790_v41 = vld [vmem:[%s19232_s3 + $0x4f30] sm:$0xff]  ;;  %v4420_v48 = vld [vmem:[%s19232_s3 + $0x43a0] sm:$0xff] }
 0x4e6   :  { %6773 = vmatprep.subr.mxu1 %v4565_v9  ;;  %6721 = vmatpush2.msra.mxu0 %v4483_v49  ;;  %v4789_v9 = vld [vmem:[%s19232_s3 + $0x4f28] sm:$0xff] }
 0x4e7   :  { %6774 = vmatpush1.msra.mxu1 %v4564_v54  ;;  %6722 = vmatprep.subr.mxu0 %v4475_v12  ;;  %v4781_v49 = vld [vmem:[%s19232_s3 + $0x4ee8] sm:$0xff]  ;;  %v2398_v54 = vld [vmem:[%s19232_s3 + $0x470] sm:$0xff]  ;;  %v4780_v12 = vld [vmem:[%s19232_s3 + $0x4ee0] sm:$0xff] }
 0x4e8   :  { %6775 = vmatprep.subr.mxu1 %v4844_v52  ;;  %6723 = vmatpush2.msra.mxu0 %v4474_v61  ;;  %v2397_v52 = vld [vmem:[%s19232_s3 + $0x468] sm:$0xff]  ;;  %v4772_v61 = vld [vmem:[%s19232_s3 + $0x4ea0] sm:$0xff] }
 0x4e9   :  { %6776 = vmatpush2.msra.mxu1 %v4843_v43  ;;  %6724 = vmatprep.subr.mxu0 %v4466_v18  ;;  %v2389_v43 = vld [vmem:[%s19232_s3 + $0x428] sm:$0xff]  ;;  %v4771_v18 = vld [vmem:[%s19232_s3 + $0x4e98] sm:$0xff] }
 0x4ea   :  { %6777 = vmatprep.subr.mxu1 %v4835_v0  ;;  %6725 = vmatpush2.msra.mxu0 %v4465_v37  ;;  %v2388_v0 = vld [vmem:[%s19232_s3 + $0x420] sm:$0xff]  ;;  %v4763_v37 = vld [vmem:[%s19232_s3 + $0x4e58] sm:$0xff] }
 0x4eb   :  { %6778 = vmatpush2.msra.mxu1 %v4834_v31  ;;  %6726 = vmatprep.subr.mxu0 %v4457_v63  ;;  %v2380_v31 = vld [vmem:[%s19232_s3 + $0x3e0] sm:$0xff]  ;;  %v4762_v63 = vld [vmem:[%s19232_s3 + $0x4e50] sm:$0xff] }
 0x4ec   :  { %6779 = vmatprep.subr.mxu1 %v4826_v30  ;;  %6727 = vmatpush2.msra.mxu0 %v4456_v2  ;;  %v2379_v30 = vld [vmem:[%s19232_s3 + $0x3d8] sm:$0xff]  ;;  %v4754_v2 = vld [vmem:[%s19232_s3 + $0x4e10] sm:$0xff] }
 0x4ed   :  { %6780 = vmatpush2.msra.mxu1 %v4825_v5  ;;  %6728 = vmatprep.subr.mxu0 %v4448_v10  ;;  %v2371_v5 = vld [vmem:[%s19232_s3 + $0x398] sm:$0xff]  ;;  %v4753_v10 = vld [vmem:[%s19232_s3 + $0x4e08] sm:$0xff] }
 0x4ee   :  { %6781 = vmatprep.subr.mxu1 %v4817_v25  ;;  %6729 = vmatpush2.msra.mxu0 %v4447_v40  ;;  %v2370_v25 = vld [vmem:[%s19232_s3 + $0x390] sm:$0xff]  ;;  %v4745_v40 = vld [vmem:[%s19232_s3 + $0x4dc8] sm:$0xff] }
 0x4ef   :  { %6782 = vmatpush2.msra.mxu1 %v4816_v15  ;;  %6730 = vmatprep.subr.mxu0 %v4439_v36  ;;  %v2362_v15 = vld [vmem:[%s19232_s3 + $0x350] sm:$0xff]  ;;  %v4744_v36 = vld [vmem:[%s19232_s3 + $0x4dc0] sm:$0xff] }
 0x4f0   :  { %6783 = vmatprep.subr.mxu1 %v4808_v42  ;;  %6731 = vmatpush2.msra.mxu0 %v4438_v7  ;;  %v2361_v42 = vld [vmem:[%s19232_s3 + $0x348] sm:$0xff]  ;;  %v4736_v7 = vld [vmem:[%s19232_s3 + $0x4d80] sm:$0xff] }
 0x4f1   :  { %6784 = vmatpush2.msra.mxu1 %v4807_v23  ;;  %6732 = vmatprep.subr.mxu0 %v4430_v24  ;;  %v2353_v23 = vld [vmem:[%s19232_s3 + $0x308] sm:$0xff]  ;;  %v4735_v24 = vld [vmem:[%s19232_s3 + $0x4d78] sm:$0xff] }
 0x4f2   :  { %6785 = vmatprep.subr.mxu1 %v4799_v8  ;;  %6733 = vmatpush2.msra.mxu0 %v4429_v32  ;;  %v2352_v8 = vld [vmem:[%s19232_s3 + $0x300] sm:$0xff]  ;;  %v4727_v32 = vld [vmem:[%s19232_s3 + $0x4d38] sm:$0xff] }
 0x4f3   :  { %6786 = vmatpush2.msra.mxu1 %v4798_v14  ;;  %6734 = vmatprep.subr.mxu0 %v4421_v39  ;;  %v2344_v14 = vld [vmem:[%s19232_s3 + $0x2c0] sm:$0xff]  ;;  %v4726_v39 = vld [vmem:[%s19232_s3 + $0x4d30] sm:$0xff] }
 0x4f4   :  { %6787 = vmatprep.subr.mxu1 %v4790_v41  ;;  %6735 = vmatpush2.msra.mxu0 %v4420_v48  ;;  %v2343_v41 = vld [vmem:[%s19232_s3 + $0x2b8] sm:$0xff]  ;;  %v4718_v48 = vld [vmem:[%s19232_s3 + $0x4cf0] sm:$0xff] }
 0x4f5   :  { %6788 = vmatpush2.msra.mxu1 %v4789_v9  ;;  %6737 = vmatmul.mubr.f32.vlgmr.msra.gmra.mxu0 %v12834_v26  ;;  %v2335_v9 = vld [vmem:[%s19232_s3 + $0x278] sm:$0xff] }
 0x4f6   :  { %6789 = vmatprep.subr.mxu1 %v4781_v49  ;;  %6814 = vmatprep.subr.mxu0 %v2398_v54  ;;  %v4717_v49 = vld [vmem:[%s19232_s3 + $0x4ce8] sm:$0xff]  ;;  %v2334_v54 = vld [vmem:[%s19232_s3 + $0x270] sm:$0xff] }
 0x4f7   :  { %6790 = vmatpush2.msra.mxu1 %v4780_v12  ;;  %6815 = vmatpush1.msra.mxu0 %v2397_v52  ;;  %v4709_v12 = vld [vmem:[%s19232_s3 + $0x4ca8] sm:$0xff]  ;;  %v2326_v52 = vld [vmem:[%s19232_s3 + $0x230] sm:$0xff] }
 0x4f8   :  { %6878 = vmatprep.mubr.f32.mxu0 %v10852_v3  ;;  %6791 = vmatprep.subr.mxu1 %v4772_v61  ;;  %v4708_v61 = vld [vmem:[%s19232_s3 + $0x4ca0] sm:$0xff] }
 0x4f9   :  { %6816 = vmatprep.subr.mxu0 %v2389_v43  ;;  %6792 = vmatpush2.msra.mxu1 %v4771_v18  ;;  %v2325_v43 = vld [vmem:[%s19232_s3 + $0x228] sm:$0xff] }
 0x4fa   :  { %6817 = vmatpush1.msra.mxu0 %v2388_v0  ;;  %6793 = vmatprep.subr.mxu1 %v4763_v37  ;;  %v2317_v18 = vld [vmem:[%s19232_s3 + $0x1e8] sm:$0xff]  ;;  %v2686_v0 = vld [vmem:[%s19232_s3 + $0xd70] sm:$0xff]  ;;  %v2316_v37 = vld [vmem:[%s19232_s3 + $0x1e0] sm:$0xff] }
 0x4fb   :  { %6818 = vmatprep.subr.mxu0 %v2380_v31  ;;  %6794 = vmatpush2.msra.mxu1 %v4762_v63  ;;  %v2685_v31 = vld [vmem:[%s19232_s3 + $0xd68] sm:$0xff]  ;;  %v2308_v63 = vld [vmem:[%s19232_s3 + $0x1a0] sm:$0xff] }
 0x4fc   :  { %6819 = vmatpush1.msra.mxu0 %v2379_v30  ;;  %6795 = vmatprep.subr.mxu1 %v4754_v2  ;;  %v2677_v30 = vld [vmem:[%s19232_s3 + $0xd28] sm:$0xff]  ;;  %v2307_v2 = vld [vmem:[%s19232_s3 + $0x198] sm:$0xff] }
 0x4fd   :  { %6820 = vmatprep.subr.mxu0 %v2371_v5  ;;  %6796 = vmatpush2.msra.mxu1 %v4753_v10  ;;  %v2676_v5 = vld [vmem:[%s19232_s3 + $0xd20] sm:$0xff]  ;;  %v2299_v10 = vld [vmem:[%s19232_s3 + $0x158] sm:$0xff] }
 0x4fe   :  { %6821 = vmatpush1.msra.mxu0 %v2370_v25  ;;  %6797 = vmatprep.subr.mxu1 %v4745_v40  ;;  %v2668_v25 = vld [vmem:[%s19232_s3 + $0xce0] sm:$0xff]  ;;  %v2298_v40 = vld [vmem:[%s19232_s3 + $0x150] sm:$0xff] }
 0x4ff   :  { %6822 = vmatprep.subr.mxu0 %v2362_v15  ;;  %6798 = vmatpush2.msra.mxu1 %v4744_v36  ;;  %v2667_v15 = vld [vmem:[%s19232_s3 + $0xcd8] sm:$0xff]  ;;  %v2290_v36 = vld [vmem:[%s19232_s3 + $0x110] sm:$0xff] }
 0x500   :  { %6823 = vmatpush1.msra.mxu0 %v2361_v42  ;;  %6799 = vmatprep.subr.mxu1 %v4736_v7  ;;  %v2659_v42 = vld [vmem:[%s19232_s3 + $0xc98] sm:$0xff]  ;;  %v2289_v7 = vld [vmem:[%s19232_s3 + $0x108] sm:$0xff] }
 0x501   :  { %6824 = vmatprep.subr.mxu0 %v2353_v23  ;;  %6800 = vmatpush2.msra.mxu1 %v4735_v24  ;;  %v2658_v23 = vld [vmem:[%s19232_s3 + $0xc90] sm:$0xff]  ;;  %v2281_v24 = vld [vmem:[%s19232_s3 + $0xc8] sm:$0xff] }
 0x502   :  { %6825 = vmatpush1.msra.mxu0 %v2352_v8  ;;  %6801 = vmatprep.subr.mxu1 %v4727_v32  ;;  %v2650_v8 = vld [vmem:[%s19232_s3 + $0xc50] sm:$0xff]  ;;  %v2280_v32 = vld [vmem:[%s19232_s3 + $0xc0] sm:$0xff] }
 0x503   :  { %6826 = vmatprep.subr.mxu0 %v2344_v14  ;;  %6802 = vmatpush2.msra.mxu1 %v4726_v39  ;;  %v2649_v14 = vld [vmem:[%s19232_s3 + $0xc48] sm:$0xff]  ;;  %v2272_v39 = vld [vmem:[%s19232_s3 + $0x80] sm:$0xff] }
 0x504   :  { %6827 = vmatpush1.msra.mxu0 %v2343_v41  ;;  %6803 = vmatprep.subr.mxu1 %v4718_v48  ;;  %v2641_v41 = vld [vmem:[%s19232_s3 + $0xc08] sm:$0xff]  ;;  %v2271_v48 = vld [vmem:[%s19232_s3 + $0x78] sm:$0xff] }
 0x505   :  { %6828 = vmatprep.subr.mxu0 %v2335_v9  ;;  %6804 = vmatpush2.msra.mxu1 %v4717_v49  ;;  %v2640_v9 = vld [vmem:[%s19232_s3 + $0xc00] sm:$0xff]  ;;  %v2263_v49 = vld [vmem:[%s19232_s3 + $0x38] sm:$0xff] }
 0x506   :  { %6829 = vmatpush1.msra.mxu0 %v2334_v54  ;;  %6805 = vmatprep.subr.mxu1 %v4709_v12  ;;  %v2632_v54 = vld [vmem:[%s19232_s3 + $0xbc0] sm:$0xff]  ;;  %v2262_v12 = vld [vmem:[%s19232_s3 + $0x30] sm:$0xff] }
 0x507   :  { %6830 = vmatprep.subr.mxu0 %v2326_v52  ;;  %6806 = vmatpush2.msra.mxu1 %v4708_v61  ;;  %v2631_v52 = vld [vmem:[%s19232_s3 + $0xbb8] sm:$0xff]  ;;  %v2542_v61 = vld [vmem:[%s19232_s3 + $0x8f0] sm:$0xff] }
 0x508   :  { %6831 = vmatpush1.msra.mxu0 %v2325_v43  ;;  %6808 = vmatmul.mubr.f32.vlgmr.msra.gmra.mxu1 %v12957_v16  ;;  %v2623_v43 = vld [vmem:[%s19232_s3 + $0xb78] sm:$0xff] }
 0x509   :  { %6832 = vmatprep.subr.mxu0 %v2317_v18  ;;  %6885 = vmatprep.subr.mxu1 %v2686_v0  ;;  %v2541_v18 = vld [vmem:[%s19232_s3 + $0x8e8] sm:$0xff]  ;;  %v2622_v0 = vld [vmem:[%s19232_s3 + $0xb70] sm:$0xff] }
 0x50a   :  { %6833 = vmatpush1.msra.mxu0 %v2316_v37  ;;  %6886 = vmatpush1.msra.mxu1 %v2685_v31  ;;  %v2533_v37 = vld [vmem:[%s19232_s3 + $0x8a8] sm:$0xff]  ;;  %v2614_v31 = vld [vmem:[%s19232_s3 + $0xb30] sm:$0xff] }
 0x50b   :  { %6949 = vmatprep.mubr.f32.mxu1 %v11157_v33  ;;  %6834 = vmatprep.subr.mxu0 %v2308_v63  ;;  %v2532_v63 = vld [vmem:[%s19232_s3 + $0x8a0] sm:$0xff] }
 0x50c   :  { %6887 = vmatprep.subr.mxu1 %v2677_v30  ;;  %6835 = vmatpush1.msra.mxu0 %v2307_v2  ;;  %v2613_v30 = vld [vmem:[%s19232_s3 + $0xb28] sm:$0xff]  ;;  %v2524_v2 = vld [vmem:[%s19232_s3 + $0x860] sm:$0xff] }
 0x50d   :  { %6888 = vmatpush1.msra.mxu1 %v2676_v5  ;;  %6836 = vmatprep.subr.mxu0 %v2299_v10  ;;  %v2605_v5 = vld [vmem:[%s19232_s3 + $0xae8] sm:$0xff]  ;;  %v2523_v10 = vld [vmem:[%s19232_s3 + $0x858] sm:$0xff] }
 0x50e   :  { %6889 = vmatprep.subr.mxu1 %v2668_v25  ;;  %6837 = vmatpush1.msra.mxu0 %v2298_v40  ;;  %v2604_v25 = vld [vmem:[%s19232_s3 + $0xae0] sm:$0xff]  ;;  %v2515_v40 = vld [vmem:[%s19232_s3 + $0x818] sm:$0xff] }
 0x50f   :  { %6890 = vmatpush1.msra.mxu1 %v2667_v15  ;;  %6838 = vmatprep.subr.mxu0 %v2290_v36  ;;  %v2596_v15 = vld [vmem:[%s19232_s3 + $0xaa0] sm:$0xff]  ;;  %v2514_v36 = vld [vmem:[%s19232_s3 + $0x810] sm:$0xff] }
 0x510   :  { %6891 = vmatprep.subr.mxu1 %v2659_v42  ;;  %6839 = vmatpush1.msra.mxu0 %v2289_v7  ;;  %v2595_v42 = vld [vmem:[%s19232_s3 + $0xa98] sm:$0xff]  ;;  %v2506_v7 = vld [vmem:[%s19232_s3 + $0x7d0] sm:$0xff] }
 0x511   :  { %6892 = vmatpush1.msra.mxu1 %v2658_v23  ;;  %6840 = vmatprep.subr.mxu0 %v2281_v24  ;;  %v2587_v23 = vld [vmem:[%s19232_s3 + $0xa58] sm:$0xff]  ;;  %v2505_v24 = vld [vmem:[%s19232_s3 + $0x7c8] sm:$0xff] }
 0x512   :  { %6893 = vmatprep.subr.mxu1 %v2650_v8  ;;  %6841 = vmatpush1.msra.mxu0 %v2280_v32  ;;  %v2586_v8 = vld [vmem:[%s19232_s3 + $0xa50] sm:$0xff]  ;;  %v2497_v32 = vld [vmem:[%s19232_s3 + $0x788] sm:$0xff] }
 0x513   :  { %6894 = vmatpush1.msra.mxu1 %v2649_v14  ;;  %6842 = vmatprep.subr.mxu0 %v2272_v39  ;;  %v2578_v14 = vld [vmem:[%s19232_s3 + $0xa10] sm:$0xff]  ;;  %v2496_v39 = vld [vmem:[%s19232_s3 + $0x780] sm:$0xff] }
 0x514   :  { %6895 = vmatprep.subr.mxu1 %v2641_v41  ;;  %6843 = vmatpush1.msra.mxu0 %v2271_v48  ;;  %v2577_v41 = vld [vmem:[%s19232_s3 + $0xa08] sm:$0xff]  ;;  %v2488_v48 = vld [vmem:[%s19232_s3 + $0x740] sm:$0xff] }
 0x515   :  { %6896 = vmatpush1.msra.mxu1 %v2640_v9  ;;  %6844 = vmatprep.subr.mxu0 %v2263_v49  ;;  %v2569_v9 = vld [vmem:[%s19232_s3 + $0x9c8] sm:$0xff]  ;;  %v2487_v49 = vld [vmem:[%s19232_s3 + $0x738] sm:$0xff] }
 0x516   :  { %6897 = vmatprep.subr.mxu1 %v2632_v54  ;;  %6845 = vmatpush1.msra.mxu0 %v2262_v12  ;;  %v2568_v54 = vld [vmem:[%s19232_s3 + $0x9c0] sm:$0xff]  ;;  %v2479_v12 = vld [vmem:[%s19232_s3 + $0x6f8] sm:$0xff] }
 0x517   :  { %6898 = vmatpush1.msra.mxu1 %v2631_v52  ;;  %6846 = vmatprep.subr.mxu0 %v2542_v61  ;;  %v2560_v52 = vld [vmem:[%s19232_s3 + $0x980] sm:$0xff]  ;;  %v2478_v61 = vld [vmem:[%s19232_s3 + $0x6f0] sm:$0xff] }
 0x518   :  { %6899 = vmatprep.subr.mxu1 %v2623_v43  ;;  %6847 = vmatpush2.msra.mxu0 %v2541_v18  ;;  %v2559_v43 = vld [vmem:[%s19232_s3 + $0x978] sm:$0xff]  ;;  %v2470_v18 = vld [vmem:[%s19232_s3 + $0x6b0] sm:$0xff] }
 0x519   :  { %6900 = vmatpush1.msra.mxu1 %v2622_v0  ;;  %6848 = vmatprep.subr.mxu0 %v2533_v37  ;;  %v2551_v0 = vld [vmem:[%s19232_s3 + $0x938] sm:$0xff]  ;;  %v2469_v37 = vld [vmem:[%s19232_s3 + $0x6a8] sm:$0xff] }
 0x51a   :  { %6901 = vmatprep.subr.mxu1 %v2614_v31  ;;  %6849 = vmatpush2.msra.mxu0 %v2532_v63  ;;  %v2550_v31 = vld [vmem:[%s19232_s3 + $0x930] sm:$0xff]  ;;  %v2461_v63 = vld [vmem:[%s19232_s3 + $0x668] sm:$0xff] }
 0x51b   :  { %6902 = vmatpush1.msra.mxu1 %v2613_v30  ;;  %6850 = vmatprep.subr.mxu0 %v2524_v2  ;;  %v2830_v30 = vld [vmem:[%s19232_s3 + $0x11f0] sm:$0xff]  ;;  %v2460_v2 = vld [vmem:[%s19232_s3 + $0x660] sm:$0xff] }
 0x51c   :  { %6903 = vmatprep.subr.mxu1 %v2605_v5  ;;  %6851 = vmatpush2.msra.mxu0 %v2523_v10  ;;  %v2829_v5 = vld [vmem:[%s19232_s3 + $0x11e8] sm:$0xff]  ;;  %v2452_v10 = vld [vmem:[%s19232_s3 + $0x620] sm:$0xff] }
 0x51d   :  { %6904 = vmatpush1.msra.mxu1 %v2604_v25  ;;  %6852 = vmatprep.subr.mxu0 %v2515_v40  ;;  %v2821_v25 = vld [vmem:[%s19232_s3 + $0x11a8] sm:$0xff]  ;;  %v2451_v40 = vld [vmem:[%s19232_s3 + $0x618] sm:$0xff] }
 0x51e   :  { %6905 = vmatprep.subr.mxu1 %v2596_v15  ;;  %6853 = vmatpush2.msra.mxu0 %v2514_v36  ;;  %v2820_v15 = vld [vmem:[%s19232_s3 + $0x11a0] sm:$0xff]  ;;  %v2443_v36 = vld [vmem:[%s19232_s3 + $0x5d8] sm:$0xff] }
 0x51f   :  { %6906 = vmatpush1.msra.mxu1 %v2595_v42  ;;  %6854 = vmatprep.subr.mxu0 %v2506_v7  ;;  %v2812_v42 = vld [vmem:[%s19232_s3 + $0x1160] sm:$0xff]  ;;  %v2442_v7 = vld [vmem:[%s19232_s3 + $0x5d0] sm:$0xff] }
 0x520   :  { %6907 = vmatprep.subr.mxu1 %v2587_v23  ;;  %6855 = vmatpush2.msra.mxu0 %v2505_v24  ;;  %v2811_v23 = vld [vmem:[%s19232_s3 + $0x1158] sm:$0xff]  ;;  %v2434_v24 = vld [vmem:[%s19232_s3 + $0x590] sm:$0xff] }
 0x521   :  { %6908 = vmatpush1.msra.mxu1 %v2586_v8  ;;  %6856 = vmatprep.subr.mxu0 %v2497_v32  ;;  %v2803_v8 = vld [vmem:[%s19232_s3 + $0x1118] sm:$0xff]  ;;  %v2433_v32 = vld [vmem:[%s19232_s3 + $0x588] sm:$0xff] }
 0x522   :  { %6909 = vmatprep.subr.mxu1 %v2578_v14  ;;  %6857 = vmatpush2.msra.mxu0 %v2496_v39  ;;  %v2802_v14 = vld [vmem:[%s19232_s3 + $0x1110] sm:$0xff]  ;;  %v2425_v39 = vld [vmem:[%s19232_s3 + $0x548] sm:$0xff] }
 0x523   :  { %6910 = vmatpush1.msra.mxu1 %v2577_v41  ;;  %6858 = vmatprep.subr.mxu0 %v2488_v48  ;;  %v2794_v41 = vld [vmem:[%s19232_s3 + $0x10d0] sm:$0xff]  ;;  %v2424_v48 = vld [vmem:[%s19232_s3 + $0x540] sm:$0xff] }
 0x524   :  { %6911 = vmatprep.subr.mxu1 %v2569_v9  ;;  %6859 = vmatpush2.msra.mxu0 %v2487_v49  ;;  %v2793_v9 = vld [vmem:[%s19232_s3 + $0x10c8] sm:$0xff]  ;;  %v2416_v49 = vld [vmem:[%s19232_s3 + $0x500] sm:$0xff] }
 0x525   :  { %6912 = vmatpush1.msra.mxu1 %v2568_v54  ;;  %6860 = vmatprep.subr.mxu0 %v2479_v12  ;;  %v2785_v54 = vld [vmem:[%s19232_s3 + $0x1088] sm:$0xff]  ;;  %v2415_v12 = vld [vmem:[%s19232_s3 + $0x4f8] sm:$0xff] }
 0x526   :  { %6913 = vmatprep.subr.mxu1 %v2560_v52  ;;  %6861 = vmatpush2.msra.mxu0 %v2478_v61  ;;  %v2784_v52 = vld [vmem:[%s19232_s3 + $0x1080] sm:$0xff]  ;;  %v2407_v61 = vld [vmem:[%s19232_s3 + $0x4b8] sm:$0xff] }
 0x527   :  { %6914 = vmatpush1.msra.mxu1 %v2559_v43  ;;  %6862 = vmatprep.subr.mxu0 %v2470_v18  ;;  %v2776_v43 = vld [vmem:[%s19232_s3 + $0x1040] sm:$0xff]  ;;  %v2406_v18 = vld [vmem:[%s19232_s3 + $0x4b0] sm:$0xff] }
 0x528   :  { %6915 = vmatprep.subr.mxu1 %v2551_v0  ;;  %6863 = vmatpush2.msra.mxu0 %v2469_v37  ;;  %v2775_v0 = vld [vmem:[%s19232_s3 + $0x1038] sm:$0xff] }
 0x529   :  { %6916 = vmatpush1.msra.mxu1 %v2550_v31  ;;  %6864 = vmatprep.subr.mxu0 %v2461_v63  ;;  %v2767_v37 = vld [vmem:[%s19232_s3 + $0xff8] sm:$0xff]  ;;  %v2974_v31 = vld [vmem:[%s19232_s3 + $0x1670] sm:$0xff] }
 0x52a   :  { %6917 = vmatprep.subr.mxu1 %v2830_v30  ;;  %6865 = vmatpush2.msra.mxu0 %v2460_v2  ;;  %v2766_v63 = vld [vmem:[%s19232_s3 + $0xff0] sm:$0xff]  ;;  %v2973_v30 = vld [vmem:[%s19232_s3 + $0x1668] sm:$0xff] }
 0x52b   :  { %6918 = vmatpush2.msra.mxu1 %v2829_v5  ;;  %6866 = vmatprep.subr.mxu0 %v2452_v10  ;;  %v2758_v2 = vld [vmem:[%s19232_s3 + $0xfb0] sm:$0xff]  ;;  %v2965_v5 = vld [vmem:[%s19232_s3 + $0x1628] sm:$0xff] }
 0x52c   :  { %6919 = vmatprep.subr.mxu1 %v2821_v25  ;;  %6867 = vmatpush2.msra.mxu0 %v2451_v40  ;;  %v2757_v10 = vld [vmem:[%s19232_s3 + $0xfa8] sm:$0xff]  ;;  %v2964_v25 = vld [vmem:[%s19232_s3 + $0x1620] sm:$0xff] }
 0x52d   :  { %6920 = vmatpush2.msra.mxu1 %v2820_v15  ;;  %6868 = vmatprep.subr.mxu0 %v2443_v36  ;;  %v2749_v40 = vld [vmem:[%s19232_s3 + $0xf68] sm:$0xff]  ;;  %v2956_v15 = vld [vmem:[%s19232_s3 + $0x15e0] sm:$0xff] }
 0x52e   :  { %6921 = vmatprep.subr.mxu1 %v2812_v42  ;;  %6869 = vmatpush2.msra.mxu0 %v2442_v7  ;;  %v2748_v36 = vld [vmem:[%s19232_s3 + $0xf60] sm:$0xff]  ;;  %v2955_v42 = vld [vmem:[%s19232_s3 + $0x15d8] sm:$0xff] }
 0x52f   :  { %6922 = vmatpush2.msra.mxu1 %v2811_v23  ;;  %6870 = vmatprep.subr.mxu0 %v2434_v24  ;;  %v2740_v7 = vld [vmem:[%s19232_s3 + $0xf20] sm:$0xff]  ;;  %v2947_v23 = vld [vmem:[%s19232_s3 + $0x1598] sm:$0xff] }
 0x530   :  { %6923 = vmatprep.subr.mxu1 %v2803_v8  ;;  %6871 = vmatpush2.msra.mxu0 %v2433_v32  ;;  %v2739_v24 = vld [vmem:[%s19232_s3 + $0xf18] sm:$0xff]  ;;  %v2946_v8 = vld [vmem:[%s19232_s3 + $0x1590] sm:$0xff] }
 0x531   :  { %6924 = vmatpush2.msra.mxu1 %v2802_v14  ;;  %6872 = vmatprep.subr.mxu0 %v2425_v39  ;;  %v2731_v32 = vld [vmem:[%s19232_s3 + $0xed8] sm:$0xff]  ;;  %v2938_v14 = vld [vmem:[%s19232_s3 + $0x1550] sm:$0xff] }
 0x532   :  { %6925 = vmatprep.subr.mxu1 %v2794_v41  ;;  %6873 = vmatpush2.msra.mxu0 %v2424_v48  ;;  %v2730_v39 = vld [vmem:[%s19232_s3 + $0xed0] sm:$0xff]  ;;  %v2937_v41 = vld [vmem:[%s19232_s3 + $0x1548] sm:$0xff] }
 0x533   :  { %6926 = vmatpush2.msra.mxu1 %v2793_v9  ;;  %6874 = vmatprep.subr.mxu0 %v2416_v49  ;;  %v2722_v48 = vld [vmem:[%s19232_s3 + $0xe90] sm:$0xff]  ;;  %v2929_v9 = vld [vmem:[%s19232_s3 + $0x1508] sm:$0xff] }
 0x534   :  { %6927 = vmatprep.subr.mxu1 %v2785_v54  ;;  %6875 = vmatpush2.msra.mxu0 %v2415_v12  ;;  %v2721_v49 = vld [vmem:[%s19232_s3 + $0xe88] sm:$0xff]  ;;  %v2928_v54 = vld [vmem:[%s19232_s3 + $0x1500] sm:$0xff] }
 0x535   :  { %6928 = vmatpush2.msra.mxu1 %v2784_v52  ;;  %6876 = vmatprep.subr.mxu0 %v2407_v61  ;;  %v2713_v12 = vld [vmem:[%s19232_s3 + $0xe48] sm:$0xff]  ;;  %v2920_v52 = vld [vmem:[%s19232_s3 + $0x14c0] sm:$0xff] }
 0x536   :  { %6929 = vmatprep.subr.mxu1 %v2776_v43  ;;  %6877 = vmatpush2.msra.mxu0 %v2406_v18  ;;  %v2712_v61 = vld [vmem:[%s19232_s3 + $0xe40] sm:$0xff]  ;;  %v2919_v43 = vld [vmem:[%s19232_s3 + $0x14b8] sm:$0xff] }
 0x537   :  { %6930 = vmatpush2.msra.mxu1 %v2775_v0  ;;  %6879 = vmatmul.mubr.f32.vlgmr.msra.gmra.mxu0 %v11271_v17  ;;  %v2704_v18 = vld [vmem:[%s19232_s3 + $0xe00] sm:$0xff]  ;;  %v2911_v0 = vld [vmem:[%s19232_s3 + $0x1478] sm:$0xff] }
 0x538   :  { %6931 = vmatprep.subr.mxu1 %v2767_v37  ;;  %6956 = vmatprep.subr.mxu0 %v2974_v31  ;;  %v2703_v37 = vld [vmem:[%s19232_s3 + $0xdf8] sm:$0xff]  ;;  %v2910_v31 = vld [vmem:[%s19232_s3 + $0x1470] sm:$0xff] }
 0x539   :  { %6932 = vmatpush2.msra.mxu1 %v2766_v63  ;;  %6957 = vmatpush1.msra.mxu0 %v2973_v30  ;;  %v2695_v63 = vld [vmem:[%s19232_s3 + $0xdb8] sm:$0xff]  ;;  %v2902_v30 = vld [vmem:[%s19232_s3 + $0x1430] sm:$0xff] }
 0x53a   :  { %7020 = vmatprep.mubr.f32.mxu0 %v11292_v28  ;;  %6933 = vmatprep.subr.mxu1 %v2758_v2  ;;  %v2694_v2 = vld [vmem:[%s19232_s3 + $0xdb0] sm:$0xff] }
 0x53b   :  { %6958 = vmatprep.subr.mxu0 %v2965_v5  ;;  %6934 = vmatpush2.msra.mxu1 %v2757_v10  ;;  %v2901_v5 = vld [vmem:[%s19232_s3 + $0x1428] sm:$0xff] }
 0x53c   :  { %6959 = vmatpush1.msra.mxu0 %v2964_v25  ;;  %6935 = vmatprep.subr.mxu1 %v2749_v40  ;;  %v2893_v10 = vld [vmem:[%s19232_s3 + $0x13e8] sm:$0xff]  ;;  %v3262_v25 = vld [vmem:[%s19232_s3 + $0x1f70] sm:$0xff]  ;;  %v2892_v40 = vld [vmem:[%s19232_s3 + $0x13e0] sm:$0xff] }
 0x53d   :  { %6960 = vmatprep.subr.mxu0 %v2956_v15  ;;  %6936 = vmatpush2.msra.mxu1 %v2748_v36  ;;  %v3261_v15 = vld [vmem:[%s19232_s3 + $0x1f68] sm:$0xff]  ;;  %v2884_v36 = vld [vmem:[%s19232_s3 + $0x13a0] sm:$0xff] }
 0x53e   :  { %6961 = vmatpush1.msra.mxu0 %v2955_v42  ;;  %6937 = vmatprep.subr.mxu1 %v2740_v7  ;;  %v3253_v42 = vld [vmem:[%s19232_s3 + $0x1f28] sm:$0xff]  ;;  %v2883_v7 = vld [vmem:[%s19232_s3 + $0x1398] sm:$0xff] }
 0x53f   :  { %6962 = vmatprep.subr.mxu0 %v2947_v23  ;;  %6938 = vmatpush2.msra.mxu1 %v2739_v24  ;;  %v3252_v23 = vld [vmem:[%s19232_s3 + $0x1f20] sm:$0xff]  ;;  %v2875_v24 = vld [vmem:[%s19232_s3 + $0x1358] sm:$0xff] }
 0x540   :  { %6963 = vmatpush1.msra.mxu0 %v2946_v8  ;;  %6939 = vmatprep.subr.mxu1 %v2731_v32  ;;  %v3244_v8 = vld [vmem:[%s19232_s3 + $0x1ee0] sm:$0xff]  ;;  %v2874_v32 = vld [vmem:[%s19232_s3 + $0x1350] sm:$0xff] }
 0x541   :  { %6964 = vmatprep.subr.mxu0 %v2938_v14  ;;  %6940 = vmatpush2.msra.mxu1 %v2730_v39  ;;  %v3243_v14 = vld [vmem:[%s19232_s3 + $0x1ed8] sm:$0xff]  ;;  %v2866_v39 = vld [vmem:[%s19232_s3 + $0x1310] sm:$0xff] }
 0x542   :  { %6965 = vmatpush1.msra.mxu0 %v2937_v41  ;;  %6941 = vmatprep.subr.mxu1 %v2722_v48  ;;  %v3235_v41 = vld [vmem:[%s19232_s3 + $0x1e98] sm:$0xff]  ;;  %v2865_v48 = vld [vmem:[%s19232_s3 + $0x1308] sm:$0xff] }
 0x543   :  { %6966 = vmatprep.subr.mxu0 %v2929_v9  ;;  %6942 = vmatpush2.msra.mxu1 %v2721_v49  ;;  %v3234_v9 = vld [vmem:[%s19232_s3 + $0x1e90] sm:$0xff]  ;;  %v2857_v49 = vld [vmem:[%s19232_s3 + $0x12c8] sm:$0xff] }
 0x544   :  { %6967 = vmatpush1.msra.mxu0 %v2928_v54  ;;  %6943 = vmatprep.subr.mxu1 %v2713_v12  ;;  %v3226_v54 = vld [vmem:[%s19232_s3 + $0x1e50] sm:$0xff]  ;;  %v2856_v12 = vld [vmem:[%s19232_s3 + $0x12c0] sm:$0xff] }
 0x545   :  { %6968 = vmatprep.subr.mxu0 %v2920_v52  ;;  %6944 = vmatpush2.msra.mxu1 %v2712_v61  ;;  %v3225_v52 = vld [vmem:[%s19232_s3 + $0x1e48] sm:$0xff]  ;;  %v2848_v61 = vld [vmem:[%s19232_s3 + $0x1280] sm:$0xff] }
 0x546   :  { %6969 = vmatpush1.msra.mxu0 %v2919_v43  ;;  %6945 = vmatprep.subr.mxu1 %v2704_v18  ;;  %v3217_v43 = vld [vmem:[%s19232_s3 + $0x1e08] sm:$0xff]  ;;  %v2847_v18 = vld [vmem:[%s19232_s3 + $0x1278] sm:$0xff] }
 0x547   :  { %6970 = vmatprep.subr.mxu0 %v2911_v0  ;;  %6946 = vmatpush2.msra.mxu1 %v2703_v37  ;;  %v3216_v0 = vld [vmem:[%s19232_s3 + $0x1e00] sm:$0xff]  ;;  %v2839_v37 = vld [vmem:[%s19232_s3 + $0x1238] sm:$0xff] }
 0x548   :  { %6971 = vmatpush1.msra.mxu0 %v2910_v31  ;;  %6947 = vmatprep.subr.mxu1 %v2695_v63  ;;  %v3208_v31 = vld [vmem:[%s19232_s3 + $0x1dc0] sm:$0xff]  ;;  %v2838_v63 = vld [vmem:[%s19232_s3 + $0x1230] sm:$0xff] }
 0x549   :  { %6972 = vmatprep.subr.mxu0 %v2902_v30  ;;  %6948 = vmatpush2.msra.mxu1 %v2694_v2  ;;  %v3207_v30 = vld [vmem:[%s19232_s3 + $0x1db8] sm:$0xff]  ;;  %v3118_v2 = vld [vmem:[%s19232_s3 + $0x1af0] sm:$0xff] }
 0x54a   :  { %6973 = vmatpush1.msra.mxu0 %v2901_v5  ;;  %6950 = vmatmul.mubr.f32.vlgmr.msra.gmra.mxu1 %v11576_v51  ;;  %v3199_v5 = vld [vmem:[%s19232_s3 + $0x1d78] sm:$0xff] }
 0x54b   :  { %6974 = vmatprep.subr.mxu0 %v2893_v10  ;;  %7027 = vmatprep.subr.mxu1 %v3262_v25  ;;  %v3117_v10 = vld [vmem:[%s19232_s3 + $0x1ae8] sm:$0xff]  ;;  %v3198_v25 = vld [vmem:[%s19232_s3 + $0x1d70] sm:$0xff] }
 0x54c   :  { %6975 = vmatpush1.msra.mxu0 %v2892_v40  ;;  %7028 = vmatpush1.msra.mxu1 %v3261_v15  ;;  %v3109_v40 = vld [vmem:[%s19232_s3 + $0x1aa8] sm:$0xff]  ;;  %v3190_v15 = vld [vmem:[%s19232_s3 + $0x1d30] sm:$0xff] }
 0x54d   :  { %7091 = vmatprep.mubr.f32.mxu1 %v11594_v58  ;;  %6976 = vmatprep.subr.mxu0 %v2884_v36  ;;  %v3108_v36 = vld [vmem:[%s19232_s3 + $0x1aa0] sm:$0xff] }
 0x54e   :  { %7029 = vmatprep.subr.mxu1 %v3253_v42  ;;  %6977 = vmatpush1.msra.mxu0 %v2883_v7  ;;  %v3189_v42 = vld [vmem:[%s19232_s3 + $0x1d28] sm:$0xff]  ;;  %v3100_v7 = vld [vmem:[%s19232_s3 + $0x1a60] sm:$0xff] }
 0x54f   :  { %7030 = vmatpush1.msra.mxu1 %v3252_v23  ;;  %6978 = vmatprep.subr.mxu0 %v2875_v24  ;;  %v3181_v23 = vld [vmem:[%s19232_s3 + $0x1ce8] sm:$0xff]  ;;  %v3099_v24 = vld [vmem:[%s19232_s3 + $0x1a58] sm:$0xff] }
 0x550   :  { %7031 = vmatprep.subr.mxu1 %v3244_v8  ;;  %6979 = vmatpush1.msra.mxu0 %v2874_v32  ;;  %v3180_v8 = vld [vmem:[%s19232_s3 + $0x1ce0] sm:$0xff]  ;;  %v3091_v32 = vld [vmem:[%s19232_s3 + $0x1a18] sm:$0xff] }
 0x551   :  { %7032 = vmatpush1.msra.mxu1 %v3243_v14  ;;  %6980 = vmatprep.subr.mxu0 %v2866_v39  ;;  %v3172_v14 = vld [vmem:[%s19232_s3 + $0x1ca0] sm:$0xff]  ;;  %v3090_v39 = vld [vmem:[%s19232_s3 + $0x1a10] sm:$0xff] }
 0x552   :  { %7033 = vmatprep.subr.mxu1 %v3235_v41  ;;  %6981 = vmatpush1.msra.mxu0 %v2865_v48  ;;  %v3171_v41 = vld [vmem:[%s19232_s3 + $0x1c98] sm:$0xff]  ;;  %v3082_v48 = vld [vmem:[%s19232_s3 + $0x19d0] sm:$0xff] }
 0x553   :  { %7034 = vmatpush1.msra.mxu1 %v3234_v9  ;;  %6982 = vmatprep.subr.mxu0 %v2857_v49  ;;  %v3163_v9 = vld [vmem:[%s19232_s3 + $0x1c58] sm:$0xff]  ;;  %v3081_v49 = vld [vmem:[%s19232_s3 + $0x19c8] sm:$0xff] }
 0x554   :  { %7035 = vmatprep.subr.mxu1 %v3226_v54  ;;  %6983 = vmatpush1.msra.mxu0 %v2856_v12  ;;  %v3162_v54 = vld [vmem:[%s19232_s3 + $0x1c50] sm:$0xff]  ;;  %v3073_v12 = vld [vmem:[%s19232_s3 + $0x1988] sm:$0xff] }
 0x555   :  { %7036 = vmatpush1.msra.mxu1 %v3225_v52  ;;  %6984 = vmatprep.subr.mxu0 %v2848_v61  ;;  %v3154_v52 = vld [vmem:[%s19232_s3 + $0x1c10] sm:$0xff]  ;;  %v3072_v61 = vld [vmem:[%s19232_s3 + $0x1980] sm:$0xff] }
 0x556   :  { %7037 = vmatprep.subr.mxu1 %v3217_v43  ;;  %6985 = vmatpush1.msra.mxu0 %v2847_v18  ;;  %v3153_v43 = vld [vmem:[%s19232_s3 + $0x1c08] sm:$0xff]  ;;  %v3064_v18 = vld [vmem:[%s19232_s3 + $0x1940] sm:$0xff] }
 0x557   :  { %7038 = vmatpush1.msra.mxu1 %v3216_v0  ;;  %6986 = vmatprep.subr.mxu0 %v2839_v37  ;;  %v3145_v0 = vld [vmem:[%s19232_s3 + $0x1bc8] sm:$0xff]  ;;  %v3063_v37 = vld [vmem:[%s19232_s3 + $0x1938] sm:$0xff] }
 0x558   :  { %7039 = vmatprep.subr.mxu1 %v3208_v31  ;;  %6987 = vmatpush1.msra.mxu0 %v2838_v63  ;;  %v3144_v31 = vld [vmem:[%s19232_s3 + $0x1bc0] sm:$0xff]  ;;  %v3055_v63 = vld [vmem:[%s19232_s3 + $0x18f8] sm:$0xff] }
 0x559   :  { %7040 = vmatpush1.msra.mxu1 %v3207_v30  ;;  %6988 = vmatprep.subr.mxu0 %v3118_v2  ;;  %v3136_v30 = vld [vmem:[%s19232_s3 + $0x1b80] sm:$0xff]  ;;  %v3054_v2 = vld [vmem:[%s19232_s3 + $0x18f0] sm:$0xff] }
 0x55a   :  { %7041 = vmatprep.subr.mxu1 %v3199_v5  ;;  %6989 = vmatpush2.msra.mxu0 %v3117_v10  ;;  %v3135_v5 = vld [vmem:[%s19232_s3 + $0x1b78] sm:$0xff]  ;;  %v3046_v10 = vld [vmem:[%s19232_s3 + $0x18b0] sm:$0xff] }
 0x55b   :  { %7042 = vmatpush1.msra.mxu1 %v3198_v25  ;;  %6990 = vmatprep.subr.mxu0 %v3109_v40  ;;  %v3127_v25 = vld [vmem:[%s19232_s3 + $0x1b38] sm:$0xff]  ;;  %v3045_v40 = vld [vmem:[%s19232_s3 + $0x18a8] sm:$0xff] }
 0x55c   :  { %7043 = vmatprep.subr.mxu1 %v3190_v15  ;;  %6991 = vmatpush2.msra.mxu0 %v3108_v36  ;;  %v3126_v15 = vld [vmem:[%s19232_s3 + $0x1b30] sm:$0xff]  ;;  %v3037_v36 = vld [vmem:[%s19232_s3 + $0x1868] sm:$0xff] }
 0x55d   :  { %7044 = vmatpush1.msra.mxu1 %v3189_v42  ;;  %6992 = vmatprep.subr.mxu0 %v3100_v7  ;;  %v3406_v42 = vld [vmem:[%s19232_s3 + $0x23f0] sm:$0xff]  ;;  %v3036_v7 = vld [vmem:[%s19232_s3 + $0x1860] sm:$0xff] }
 0x55e   :  { %7045 = vmatprep.subr.mxu1 %v3181_v23  ;;  %6993 = vmatpush2.msra.mxu0 %v3099_v24  ;;  %v3405_v23 = vld [vmem:[%s19232_s3 + $0x23e8] sm:$0xff]  ;;  %v3028_v24 = vld [vmem:[%s19232_s3 + $0x1820] sm:$0xff] }
 0x55f   :  { %7046 = vmatpush1.msra.mxu1 %v3180_v8  ;;  %6994 = vmatprep.subr.mxu0 %v3091_v32  ;;  %v3397_v8 = vld [vmem:[%s19232_s3 + $0x23a8] sm:$0xff]  ;;  %v3027_v32 = vld [vmem:[%s19232_s3 + $0x1818] sm:$0xff] }
 0x560   :  { %7047 = vmatprep.subr.mxu1 %v3172_v14  ;;  %6995 = vmatpush2.msra.mxu0 %v3090_v39  ;;  %v3396_v14 = vld [vmem:[%s19232_s3 + $0x23a0] sm:$0xff]  ;;  %v3019_v39 = vld [vmem:[%s19232_s3 + $0x17d8] sm:$0xff] }
 0x561   :  { %7048 = vmatpush1.msra.mxu1 %v3171_v41  ;;  %6996 = vmatprep.subr.mxu0 %v3082_v48  ;;  %v3388_v41 = vld [vmem:[%s19232_s3 + $0x2360] sm:$0xff]  ;;  %v3018_v48 = vld [vmem:[%s19232_s3 + $0x17d0] sm:$0xff] }
 0x562   :  { %7049 = vmatprep.subr.mxu1 %v3163_v9  ;;  %6997 = vmatpush2.msra.mxu0 %v3081_v49  ;;  %v3387_v9 = vld [vmem:[%s19232_s3 + $0x2358] sm:$0xff]  ;;  %v3010_v49 = vld [vmem:[%s19232_s3 + $0x1790] sm:$0xff] }
 0x563   :  { %7050 = vmatpush1.msra.mxu1 %v3162_v54  ;;  %6998 = vmatprep.subr.mxu0 %v3073_v12  ;;  %v3379_v54 = vld [vmem:[%s19232_s3 + $0x2318] sm:$0xff]  ;;  %v3009_v12 = vld [vmem:[%s19232_s3 + $0x1788] sm:$0xff] }
 0x564   :  { %7051 = vmatprep.subr.mxu1 %v3154_v52  ;;  %6999 = vmatpush2.msra.mxu0 %v3072_v61  ;;  %v3378_v52 = vld [vmem:[%s19232_s3 + $0x2310] sm:$0xff]  ;;  %v3001_v61 = vld [vmem:[%s19232_s3 + $0x1748] sm:$0xff] }
 0x565   :  { %7052 = vmatpush1.msra.mxu1 %v3153_v43  ;;  %7000 = vmatprep.subr.mxu0 %v3064_v18  ;;  %v3370_v43 = vld [vmem:[%s19232_s3 + $0x22d0] sm:$0xff]  ;;  %v3000_v18 = vld [vmem:[%s19232_s3 + $0x1740] sm:$0xff] }
 0x566   :  { %7053 = vmatprep.subr.mxu1 %v3145_v0  ;;  %7001 = vmatpush2.msra.mxu0 %v3063_v37  ;;  %v3369_v0 = vld [vmem:[%s19232_s3 + $0x22c8] sm:$0xff]  ;;  %v2992_v37 = vld [vmem:[%s19232_s3 + $0x1700] sm:$0xff] }
 0x567   :  { %7054 = vmatpush1.msra.mxu1 %v3144_v31  ;;  %7002 = vmatprep.subr.mxu0 %v3055_v63  ;;  %v3361_v31 = vld [vmem:[%s19232_s3 + $0x2288] sm:$0xff]  ;;  %v2991_v63 = vld [vmem:[%s19232_s3 + $0x16f8] sm:$0xff] }
 0x568   :  { %7055 = vmatprep.subr.mxu1 %v3136_v30  ;;  %7003 = vmatpush2.msra.mxu0 %v3054_v2  ;;  %v3360_v30 = vld [vmem:[%s19232_s3 + $0x2280] sm:$0xff]  ;;  %v2983_v2 = vld [vmem:[%s19232_s3 + $0x16b8] sm:$0xff] }
 0x569   :  { %7056 = vmatpush1.msra.mxu1 %v3135_v5  ;;  %7004 = vmatprep.subr.mxu0 %v3046_v10  ;;  %v3352_v5 = vld [vmem:[%s19232_s3 + $0x2240] sm:$0xff]  ;;  %v2982_v10 = vld [vmem:[%s19232_s3 + $0x16b0] sm:$0xff] }
 0x56a   :  { %7057 = vmatprep.subr.mxu1 %v3127_v25  ;;  %7005 = vmatpush2.msra.mxu0 %v3045_v40  ;;  %v3351_v25 = vld [vmem:[%s19232_s3 + $0x2238] sm:$0xff] }
 0x56b   :  { %7058 = vmatpush1.msra.mxu1 %v3126_v15  ;;  %7006 = vmatprep.subr.mxu0 %v3037_v36  ;;  %v3343_v40 = vld [vmem:[%s19232_s3 + $0x21f8] sm:$0xff]  ;;  %v3550_v15 = vld [vmem:[%s19232_s3 + $0x2870] sm:$0xff] }
 0x56c   :  { %7059 = vmatprep.subr.mxu1 %v3406_v42  ;;  %7007 = vmatpush2.msra.mxu0 %v3036_v7  ;;  %v3342_v36 = vld [vmem:[%s19232_s3 + $0x21f0] sm:$0xff]  ;;  %v3549_v42 = vld [vmem:[%s19232_s3 + $0x2868] sm:$0xff] }
 0x56d   :  { %7060 = vmatpush2.msra.mxu1 %v3405_v23  ;;  %7008 = vmatprep.subr.mxu0 %v3028_v24  ;;  %v3334_v7 = vld [vmem:[%s19232_s3 + $0x21b0] sm:$0xff]  ;;  %v3541_v23 = vld [vmem:[%s19232_s3 + $0x2828] sm:$0xff] }
 0x56e   :  { %7061 = vmatprep.subr.mxu1 %v3397_v8  ;;  %7009 = vmatpush2.msra.mxu0 %v3027_v32  ;;  %v3333_v24 = vld [vmem:[%s19232_s3 + $0x21a8] sm:$0xff]  ;;  %v3540_v8 = vld [vmem:[%s19232_s3 + $0x2820] sm:$0xff] }
 0x56f   :  { %7062 = vmatpush2.msra.mxu1 %v3396_v14  ;;  %7010 = vmatprep.subr.mxu0 %v3019_v39  ;;  %v3325_v32 = vld [vmem:[%s19232_s3 + $0x2168] sm:$0xff]  ;;  %v3532_v14 = vld [vmem:[%s19232_s3 + $0x27e0] sm:$0xff] }
 0x570   :  { %7063 = vmatprep.subr.mxu1 %v3388_v41  ;;  %7011 = vmatpush2.msra.mxu0 %v3018_v48  ;;  %v3324_v39 = vld [vmem:[%s19232_s3 + $0x2160] sm:$0xff]  ;;  %v3531_v41 = vld [vmem:[%s19232_s3 + $0x27d8] sm:$0xff] }
 0x571   :  { %7064 = vmatpush2.msra.mxu1 %v3387_v9  ;;  %7012 = vmatprep.subr.mxu0 %v3010_v49  ;;  %v3316_v48 = vld [vmem:[%s19232_s3 + $0x2120] sm:$0xff]  ;;  %v3523_v9 = vld [vmem:[%s19232_s3 + $0x2798] sm:$0xff] }
 0x572   :  { %7065 = vmatprep.subr.mxu1 %v3379_v54  ;;  %7013 = vmatpush2.msra.mxu0 %v3009_v12  ;;  %v3315_v49 = vld [vmem:[%s19232_s3 + $0x2118] sm:$0xff]  ;;  %v3522_v54 = vld [vmem:[%s19232_s3 + $0x2790] sm:$0xff] }
 0x573   :  { %7066 = vmatpush2.msra.mxu1 %v3378_v52  ;;  %7014 = vmatprep.subr.mxu0 %v3001_v61  ;;  %v3307_v12 = vld [vmem:[%s19232_s3 + $0x20d8] sm:$0xff]  ;;  %v3514_v52 = vld [vmem:[%s19232_s3 + $0x2750] sm:$0xff] }
 0x574   :  { %7067 = vmatprep.subr.mxu1 %v3370_v43  ;;  %7015 = vmatpush2.msra.mxu0 %v3000_v18  ;;  %v3306_v61 = vld [vmem:[%s19232_s3 + $0x20d0] sm:$0xff]  ;;  %v3513_v43 = vld [vmem:[%s19232_s3 + $0x2748] sm:$0xff] }
 0x575   :  { %7068 = vmatpush2.msra.mxu1 %v3369_v0  ;;  %7016 = vmatprep.subr.mxu0 %v2992_v37  ;;  %v3298_v18 = vld [vmem:[%s19232_s3 + $0x2090] sm:$0xff]  ;;  %v3505_v0 = vld [vmem:[%s19232_s3 + $0x2708] sm:$0xff] }
 0x576   :  { %7069 = vmatprep.subr.mxu1 %v3361_v31  ;;  %7017 = vmatpush2.msra.mxu0 %v2991_v63  ;;  %v3297_v37 = vld [vmem:[%s19232_s3 + $0x2088] sm:$0xff]  ;;  %v3504_v31 = vld [vmem:[%s19232_s3 + $0x2700] sm:$0xff] }
 0x577   :  { %7070 = vmatpush2.msra.mxu1 %v3360_v30  ;;  %7018 = vmatprep.subr.mxu0 %v2983_v2  ;;  %v3289_v63 = vld [vmem:[%s19232_s3 + $0x2048] sm:$0xff]  ;;  %v3496_v30 = vld [vmem:[%s19232_s3 + $0x26c0] sm:$0xff] }
 0x578   :  { %7071 = vmatprep.subr.mxu1 %v3352_v5  ;;  %7019 = vmatpush2.msra.mxu0 %v2982_v10  ;;  %v3288_v2 = vld [vmem:[%s19232_s3 + $0x2040] sm:$0xff]  ;;  %v3495_v5 = vld [vmem:[%s19232_s3 + $0x26b8] sm:$0xff] }
 0x579   :  { %7072 = vmatpush2.msra.mxu1 %v3351_v25  ;;  %7021 = vmatmul.mubr.f32.vlgmr.msra.gmra.mxu0 %v11699_v45  ;;  %v3280_v10 = vld [vmem:[%s19232_s3 + $0x2000] sm:$0xff]  ;;  %v3487_v25 = vld [vmem:[%s19232_s3 + $0x2678] sm:$0xff] }
 0x57a   :  { %7073 = vmatprep.subr.mxu1 %v3343_v40  ;;  %7098 = vmatprep.subr.mxu0 %v3550_v15  ;;  %v3279_v40 = vld [vmem:[%s19232_s3 + $0x1ff8] sm:$0xff]  ;;  %v3486_v15 = vld [vmem:[%s19232_s3 + $0x2670] sm:$0xff] }
 0x57b   :  { %7074 = vmatpush2.msra.mxu1 %v3342_v36  ;;  %7099 = vmatpush1.msra.mxu0 %v3549_v42  ;;  %v3271_v36 = vld [vmem:[%s19232_s3 + $0x1fb8] sm:$0xff]  ;;  %v3478_v42 = vld [vmem:[%s19232_s3 + $0x2630] sm:$0xff] }
 0x57c   :  { %7162 = vmatprep.mubr.f32.mxu0 %v11717_v53  ;;  %7075 = vmatprep.subr.mxu1 %v3334_v7  ;;  %v3270_v7 = vld [vmem:[%s19232_s3 + $0x1fb0] sm:$0xff] }
 0x57d   :  { %7100 = vmatprep.subr.mxu0 %v3541_v23  ;;  %7076 = vmatpush2.msra.mxu1 %v3333_v24  ;;  %v3477_v23 = vld [vmem:[%s19232_s3 + $0x2628] sm:$0xff] }
 0x57e   :  { %7101 = vmatpush1.msra.mxu0 %v3540_v8  ;;  %7077 = vmatprep.subr.mxu1 %v3325_v32  ;;  %v3469_v24 = vld [vmem:[%s19232_s3 + $0x25e8] sm:$0xff]  ;;  %v3838_v8 = vld [vmem:[%s19232_s3 + $0x3170] sm:$0xff]  ;;  %v3468_v32 = vld [vmem:[%s19232_s3 + $0x25e0] sm:$0xff] }
 0x57f   :  { %7102 = vmatprep.subr.mxu0 %v3532_v14  ;;  %7078 = vmatpush2.msra.mxu1 %v3324_v39  ;;  %v3837_v14 = vld [vmem:[%s19232_s3 + $0x3168] sm:$0xff]  ;;  %v3460_v39 = vld [vmem:[%s19232_s3 + $0x25a0] sm:$0xff] }
 0x580   :  { %7103 = vmatpush1.msra.mxu0 %v3531_v41  ;;  %7079 = vmatprep.subr.mxu1 %v3316_v48  ;;  %v3829_v41 = vld [vmem:[%s19232_s3 + $0x3128] sm:$0xff]  ;;  %v3459_v48 = vld [vmem:[%s19232_s3 + $0x2598] sm:$0xff] }
 0x581   :  { %7104 = vmatprep.subr.mxu0 %v3523_v9  ;;  %7080 = vmatpush2.msra.mxu1 %v3315_v49  ;;  %v3828_v9 = vld [vmem:[%s19232_s3 + $0x3120] sm:$0xff]  ;;  %v3451_v49 = vld [vmem:[%s19232_s3 + $0x2558] sm:$0xff] }
 0x582   :  { %7105 = vmatpush1.msra.mxu0 %v3522_v54  ;;  %7081 = vmatprep.subr.mxu1 %v3307_v12  ;;  %v3820_v54 = vld [vmem:[%s19232_s3 + $0x30e0] sm:$0xff]  ;;  %v3450_v12 = vld [vmem:[%s19232_s3 + $0x2550] sm:$0xff] }
 0x583   :  { %7106 = vmatprep.subr.mxu0 %v3514_v52  ;;  %7082 = vmatpush2.msra.mxu1 %v3306_v61  ;;  %v3819_v52 = vld [vmem:[%s19232_s3 + $0x30d8] sm:$0xff]  ;;  %v3442_v61 = vld [vmem:[%s19232_s3 + $0x2510] sm:$0xff] }
 0x584   :  { %7107 = vmatpush1.msra.mxu0 %v3513_v43  ;;  %7083 = vmatprep.subr.mxu1 %v3298_v18  ;;  %v3811_v43 = vld [vmem:[%s19232_s3 + $0x3098] sm:$0xff]  ;;  %v3441_v18 = vld [vmem:[%s19232_s3 + $0x2508] sm:$0xff] }
 0x585   :  { %7108 = vmatprep.subr.mxu0 %v3505_v0  ;;  %7084 = vmatpush2.msra.mxu1 %v3297_v37  ;;  %v3810_v0 = vld [vmem:[%s19232_s3 + $0x3090] sm:$0xff]  ;;  %v3433_v37 = vld [vmem:[%s19232_s3 + $0x24c8] sm:$0xff] }
 0x586   :  { %7109 = vmatpush1.msra.mxu0 %v3504_v31  ;;  %7085 = vmatprep.subr.mxu1 %v3289_v63  ;;  %v3802_v31 = vld [vmem:[%s19232_s3 + $0x3050] sm:$0xff]  ;;  %v3432_v63 = vld [vmem:[%s19232_s3 + $0x24c0] sm:$0xff] }
 0x587   :  { %7110 = vmatprep.subr.mxu0 %v3496_v30  ;;  %7086 = vmatpush2.msra.mxu1 %v3288_v2  ;;  %v3801_v30 = vld [vmem:[%s19232_s3 + $0x3048] sm:$0xff]  ;;  %v3424_v2 = vld [vmem:[%s19232_s3 + $0x2480] sm:$0xff] }
 0x588   :  { %7111 = vmatpush1.msra.mxu0 %v3495_v5  ;;  %7087 = vmatprep.subr.mxu1 %v3280_v10  ;;  %v3793_v5 = vld [vmem:[%s19232_s3 + $0x3008] sm:$0xff]  ;;  %v3423_v10 = vld [vmem:[%s19232_s3 + $0x2478] sm:$0xff] }
 0x589   :  { %7112 = vmatprep.subr.mxu0 %v3487_v25  ;;  %7088 = vmatpush2.msra.mxu1 %v3279_v40  ;;  %v3792_v25 = vld [vmem:[%s19232_s3 + $0x3000] sm:$0xff]  ;;  %v3415_v40 = vld [vmem:[%s19232_s3 + $0x2438] sm:$0xff] }
 0x58a   :  { %7113 = vmatpush1.msra.mxu0 %v3486_v15  ;;  %7089 = vmatprep.subr.mxu1 %v3271_v36  ;;  %v3784_v15 = vld [vmem:[%s19232_s3 + $0x2fc0] sm:$0xff]  ;;  %v3414_v36 = vld [vmem:[%s19232_s3 + $0x2430] sm:$0xff] }
 0x58b   :  { %7114 = vmatprep.subr.mxu0 %v3478_v42  ;;  %7090 = vmatpush2.msra.mxu1 %v3270_v7  ;;  %v3783_v42 = vld [vmem:[%s19232_s3 + $0x2fb8] sm:$0xff]  ;;  %v3694_v7 = vld [vmem:[%s19232_s3 + $0x2cf0] sm:$0xff] }
 0x58c   :  { %7115 = vmatpush1.msra.mxu0 %v3477_v23  ;;  %7092 = vmatmul.mubr.f32.vlgmr.msra.gmra.mxu1 %v12004_v11  ;;  %v3775_v23 = vld [vmem:[%s19232_s3 + $0x2f78] sm:$0xff] }
 0x58d   :  { %7116 = vmatprep.subr.mxu0 %v3469_v24  ;;  %7169 = vmatprep.subr.mxu1 %v3838_v8  ;;  %v3693_v24 = vld [vmem:[%s19232_s3 + $0x2ce8] sm:$0xff]  ;;  %v3774_v8 = vld [vmem:[%s19232_s3 + $0x2f70] sm:$0xff] }
 0x58e   :  { %7117 = vmatpush1.msra.mxu0 %v3468_v32  ;;  %7170 = vmatpush1.msra.mxu1 %v3837_v14  ;;  %v3685_v32 = vld [vmem:[%s19232_s3 + $0x2ca8] sm:$0xff]  ;;  %v3766_v14 = vld [vmem:[%s19232_s3 + $0x2f30] sm:$0xff] }
 0x58f   :  { %7233 = vmatprep.mubr.f32.mxu1 %v12022_v20  ;;  %7118 = vmatprep.subr.mxu0 %v3460_v39  ;;  %v3684_v39 = vld [vmem:[%s19232_s3 + $0x2ca0] sm:$0xff] }
 0x590   :  { %7171 = vmatprep.subr.mxu1 %v3829_v41  ;;  %7119 = vmatpush1.msra.mxu0 %v3459_v48  ;;  %v3765_v41 = vld [vmem:[%s19232_s3 + $0x2f28] sm:$0xff]  ;;  %v3676_v48 = vld [vmem:[%s19232_s3 + $0x2c60] sm:$0xff] }
 0x591   :  { %7172 = vmatpush1.msra.mxu1 %v3828_v9  ;;  %7120 = vmatprep.subr.mxu0 %v3451_v49  ;;  %v3757_v9 = vld [vmem:[%s19232_s3 + $0x2ee8] sm:$0xff]  ;;  %v3675_v49 = vld [vmem:[%s19232_s3 + $0x2c58] sm:$0xff] }
 0x592   :  { %7173 = vmatprep.subr.mxu1 %v3820_v54  ;;  %7121 = vmatpush1.msra.mxu0 %v3450_v12  ;;  %v3756_v54 = vld [vmem:[%s19232_s3 + $0x2ee0] sm:$0xff]  ;;  %v3667_v12 = vld [vmem:[%s19232_s3 + $0x2c18] sm:$0xff] }
 0x593   :  { %7174 = vmatpush1.msra.mxu1 %v3819_v52  ;;  %7122 = vmatprep.subr.mxu0 %v3442_v61  ;;  %v3748_v52 = vld [vmem:[%s19232_s3 + $0x2ea0] sm:$0xff]  ;;  %v3666_v61 = vld [vmem:[%s19232_s3 + $0x2c10] sm:$0xff] }
 0x594   :  { %7175 = vmatprep.subr.mxu1 %v3811_v43  ;;  %7123 = vmatpush1.msra.mxu0 %v3441_v18  ;;  %v3747_v43 = vld [vmem:[%s19232_s3 + $0x2e98] sm:$0xff]  ;;  %v3658_v18 = vld [vmem:[%s19232_s3 + $0x2bd0] sm:$0xff] }
 0x595   :  { %7176 = vmatpush1.msra.mxu1 %v3810_v0  ;;  %7124 = vmatprep.subr.mxu0 %v3433_v37  ;;  %v3739_v0 = vld [vmem:[%s19232_s3 + $0x2e58] sm:$0xff]  ;;  %v3657_v37 = vld [vmem:[%s19232_s3 + $0x2bc8] sm:$0xff] }
 0x596   :  { %7177 = vmatprep.subr.mxu1 %v3802_v31  ;;  %7125 = vmatpush1.msra.mxu0 %v3432_v63  ;;  %v3738_v31 = vld [vmem:[%s19232_s3 + $0x2e50] sm:$0xff]  ;;  %v3649_v63 = vld [vmem:[%s19232_s3 + $0x2b88] sm:$0xff] }
 0x597   :  { %7178 = vmatpush1.msra.mxu1 %v3801_v30  ;;  %7126 = vmatprep.subr.mxu0 %v3424_v2  ;;  %v3730_v30 = vld [vmem:[%s19232_s3 + $0x2e10] sm:$0xff]  ;;  %v3648_v2 = vld [vmem:[%s19232_s3 + $0x2b80] sm:$0xff] }
 0x598   :  { %7179 = vmatprep.subr.mxu1 %v3793_v5  ;;  %7127 = vmatpush1.msra.mxu0 %v3423_v10  ;;  %v3729_v5 = vld [vmem:[%s19232_s3 + $0x2e08] sm:$0xff]  ;;  %v3640_v10 = vld [vmem:[%s19232_s3 + $0x2b40] sm:$0xff] }
 0x599   :  { %7180 = vmatpush1.msra.mxu1 %v3792_v25  ;;  %7128 = vmatprep.subr.mxu0 %v3415_v40  ;;  %v3721_v25 = vld [vmem:[%s19232_s3 + $0x2dc8] sm:$0xff]  ;;  %v3639_v40 = vld [vmem:[%s19232_s3 + $0x2b38] sm:$0xff] }
 0x59a   :  { %7181 = vmatprep.subr.mxu1 %v3784_v15  ;;  %7129 = vmatpush1.msra.mxu0 %v3414_v36  ;;  %v3720_v15 = vld [vmem:[%s19232_s3 + $0x2dc0] sm:$0xff]  ;;  %v3631_v36 = vld [vmem:[%s19232_s3 + $0x2af8] sm:$0xff] }
 0x59b   :  { %7182 = vmatpush1.msra.mxu1 %v3783_v42  ;;  %7130 = vmatprep.subr.mxu0 %v3694_v7  ;;  %v3712_v42 = vld [vmem:[%s19232_s3 + $0x2d80] sm:$0xff]  ;;  %v3630_v7 = vld [vmem:[%s19232_s3 + $0x2af0] sm:$0xff] }
 0x59c   :  { %7183 = vmatprep.subr.mxu1 %v3775_v23  ;;  %7131 = vmatpush2.msra.mxu0 %v3693_v24  ;;  %v3711_v23 = vld [vmem:[%s19232_s3 + $0x2d78] sm:$0xff]  ;;  %v3622_v24 = vld [vmem:[%s19232_s3 + $0x2ab0] sm:$0xff] }
 0x59d   :  { %7184 = vmatpush1.msra.mxu1 %v3774_v8  ;;  %7132 = vmatprep.subr.mxu0 %v3685_v32  ;;  %v3703_v8 = vld [vmem:[%s19232_s3 + $0x2d38] sm:$0xff]  ;;  %v3621_v32 = vld [vmem:[%s19232_s3 + $0x2aa8] sm:$0xff] }
 0x59e   :  { %7185 = vmatprep.subr.mxu1 %v3766_v14  ;;  %7133 = vmatpush2.msra.mxu0 %v3684_v39  ;;  %v3702_v14 = vld [vmem:[%s19232_s3 + $0x2d30] sm:$0xff]  ;;  %v3613_v39 = vld [vmem:[%s19232_s3 + $0x2a68] sm:$0xff] }
 0x59f   :  { %7186 = vmatpush1.msra.mxu1 %v3765_v41  ;;  %7134 = vmatprep.subr.mxu0 %v3676_v48  ;;  %v3982_v41 = vld [vmem:[%s19232_s3 + $0x35f0] sm:$0xff]  ;;  %v3612_v48 = vld [vmem:[%s19232_s3 + $0x2a60] sm:$0xff] }
 0x5a0   :  { %7187 = vmatprep.subr.mxu1 %v3757_v9  ;;  %7135 = vmatpush2.msra.mxu0 %v3675_v49  ;;  %v3981_v9 = vld [vmem:[%s19232_s3 + $0x35e8] sm:$0xff]  ;;  %v3604_v49 = vld [vmem:[%s19232_s3 + $0x2a20] sm:$0xff] }
 0x5a1   :  { %7188 = vmatpush1.msra.mxu1 %v3756_v54  ;;  %7136 = vmatprep.subr.mxu0 %v3667_v12  ;;  %v3973_v54 = vld [vmem:[%s19232_s3 + $0x35a8] sm:$0xff]  ;;  %v3603_v12 = vld [vmem:[%s19232_s3 + $0x2a18] sm:$0xff] }
 0x5a2   :  { %7189 = vmatprep.subr.mxu1 %v3748_v52  ;;  %7137 = vmatpush2.msra.mxu0 %v3666_v61  ;;  %v3972_v52 = vld [vmem:[%s19232_s3 + $0x35a0] sm:$0xff]  ;;  %v3595_v61 = vld [vmem:[%s19232_s3 + $0x29d8] sm:$0xff] }
 0x5a3   :  { %7190 = vmatpush1.msra.mxu1 %v3747_v43  ;;  %7138 = vmatprep.subr.mxu0 %v3658_v18  ;;  %v3964_v43 = vld [vmem:[%s19232_s3 + $0x3560] sm:$0xff]  ;;  %v3594_v18 = vld [vmem:[%s19232_s3 + $0x29d0] sm:$0xff] }
 0x5a4   :  { %7191 = vmatprep.subr.mxu1 %v3739_v0  ;;  %7139 = vmatpush2.msra.mxu0 %v3657_v37  ;;  %v3963_v0 = vld [vmem:[%s19232_s3 + $0x3558] sm:$0xff]  ;;  %v3586_v37 = vld [vmem:[%s19232_s3 + $0x2990] sm:$0xff] }
 0x5a5   :  { %7192 = vmatpush1.msra.mxu1 %v3738_v31  ;;  %7140 = vmatprep.subr.mxu0 %v3649_v63  ;;  %v3955_v31 = vld [vmem:[%s19232_s3 + $0x3518] sm:$0xff]  ;;  %v3585_v63 = vld [vmem:[%s19232_s3 + $0x2988] sm:$0xff] }
 0x5a6   :  { %7193 = vmatprep.subr.mxu1 %v3730_v30  ;;  %7141 = vmatpush2.msra.mxu0 %v3648_v2  ;;  %v3954_v30 = vld [vmem:[%s19232_s3 + $0x3510] sm:$0xff]  ;;  %v3577_v2 = vld [vmem:[%s19232_s3 + $0x2948] sm:$0xff] }
 0x5a7   :  { %7194 = vmatpush1.msra.mxu1 %v3729_v5  ;;  %7142 = vmatprep.subr.mxu0 %v3640_v10  ;;  %v3946_v5 = vld [vmem:[%s19232_s3 + $0x34d0] sm:$0xff]  ;;  %v3576_v10 = vld [vmem:[%s19232_s3 + $0x2940] sm:$0xff] }
 0x5a8   :  { %7195 = vmatprep.subr.mxu1 %v3721_v25  ;;  %7143 = vmatpush2.msra.mxu0 %v3639_v40  ;;  %v3945_v25 = vld [vmem:[%s19232_s3 + $0x34c8] sm:$0xff]  ;;  %v3568_v40 = vld [vmem:[%s19232_s3 + $0x2900] sm:$0xff] }
 0x5a9   :  { %7196 = vmatpush1.msra.mxu1 %v3720_v15  ;;  %7144 = vmatprep.subr.mxu0 %v3631_v36  ;;  %v3937_v15 = vld [vmem:[%s19232_s3 + $0x3488] sm:$0xff]  ;;  %v3567_v36 = vld [vmem:[%s19232_s3 + $0x28f8] sm:$0xff] }
 0x5aa   :  { %7197 = vmatprep.subr.mxu1 %v3712_v42  ;;  %7145 = vmatpush2.msra.mxu0 %v3630_v7  ;;  %v3936_v42 = vld [vmem:[%s19232_s3 + $0x3480] sm:$0xff]  ;;  %v3559_v7 = vld [vmem:[%s19232_s3 + $0x28b8] sm:$0xff] }
 0x5ab   :  { %7198 = vmatpush1.msra.mxu1 %v3711_v23  ;;  %7146 = vmatprep.subr.mxu0 %v3622_v24  ;;  %v3928_v23 = vld [vmem:[%s19232_s3 + $0x3440] sm:$0xff]  ;;  %v3558_v24 = vld [vmem:[%s19232_s3 + $0x28b0] sm:$0xff] }
 0x5ac   :  { %7199 = vmatprep.subr.mxu1 %v3703_v8  ;;  %7147 = vmatpush2.msra.mxu0 %v3621_v32  ;;  %v3927_v8 = vld [vmem:[%s19232_s3 + $0x3438] sm:$0xff] }
 0x5ad   :  { %7200 = vmatpush1.msra.mxu1 %v3702_v14  ;;  %7148 = vmatprep.subr.mxu0 %v3613_v39  ;;  %v3919_v32 = vld [vmem:[%s19232_s3 + $0x33f8] sm:$0xff]  ;;  %v4126_v14 = vld [vmem:[%s19232_s3 + $0x3a70] sm:$0xff] }
 0x5ae   :  { %7201 = vmatprep.subr.mxu1 %v3982_v41  ;;  %7149 = vmatpush2.msra.mxu0 %v3612_v48  ;;  %v3918_v39 = vld [vmem:[%s19232_s3 + $0x33f0] sm:$0xff]  ;;  %v4125_v41 = vld [vmem:[%s19232_s3 + $0x3a68] sm:$0xff] }
 0x5af   :  { %7202 = vmatpush2.msra.mxu1 %v3981_v9  ;;  %7150 = vmatprep.subr.mxu0 %v3604_v49  ;;  %v3910_v48 = vld [vmem:[%s19232_s3 + $0x33b0] sm:$0xff]  ;;  %v4117_v9 = vld [vmem:[%s19232_s3 + $0x3a28] sm:$0xff] }
 0x5b0   :  { %7203 = vmatprep.subr.mxu1 %v3973_v54  ;;  %7151 = vmatpush2.msra.mxu0 %v3603_v12  ;;  %v3909_v49 = vld [vmem:[%s19232_s3 + $0x33a8] sm:$0xff]  ;;  %v4116_v54 = vld [vmem:[%s19232_s3 + $0x3a20] sm:$0xff] }
 0x5b1   :  { %7204 = vmatpush2.msra.mxu1 %v3972_v52  ;;  %7152 = vmatprep.subr.mxu0 %v3595_v61  ;;  %v3901_v12 = vld [vmem:[%s19232_s3 + $0x3368] sm:$0xff]  ;;  %v4108_v52 = vld [vmem:[%s19232_s3 + $0x39e0] sm:$0xff] }
 0x5b2   :  { %7205 = vmatprep.subr.mxu1 %v3964_v43  ;;  %7153 = vmatpush2.msra.mxu0 %v3594_v18  ;;  %v3900_v61 = vld [vmem:[%s19232_s3 + $0x3360] sm:$0xff]  ;;  %v4107_v43 = vld [vmem:[%s19232_s3 + $0x39d8] sm:$0xff] }
 0x5b3   :  { %7206 = vmatpush2.msra.mxu1 %v3963_v0  ;;  %7154 = vmatprep.subr.mxu0 %v3586_v37  ;;  %v3892_v18 = vld [vmem:[%s19232_s3 + $0x3320] sm:$0xff]  ;;  %v4099_v0 = vld [vmem:[%s19232_s3 + $0x3998] sm:$0xff] }
 0x5b4   :  { %7207 = vmatprep.subr.mxu1 %v3955_v31  ;;  %7155 = vmatpush2.msra.mxu0 %v3585_v63  ;;  %v3891_v37 = vld [vmem:[%s19232_s3 + $0x3318] sm:$0xff]  ;;  %v4098_v31 = vld [vmem:[%s19232_s3 + $0x3990] sm:$0xff] }
 0x5b5   :  { %7208 = vmatpush2.msra.mxu1 %v3954_v30  ;;  %7156 = vmatprep.subr.mxu0 %v3577_v2  ;;  %v3883_v63 = vld [vmem:[%s19232_s3 + $0x32d8] sm:$0xff]  ;;  %v4090_v30 = vld [vmem:[%s19232_s3 + $0x3950] sm:$0xff] }
 0x5b6   :  { %7209 = vmatprep.subr.mxu1 %v3946_v5  ;;  %7157 = vmatpush2.msra.mxu0 %v3576_v10  ;;  %v3882_v2 = vld [vmem:[%s19232_s3 + $0x32d0] sm:$0xff]  ;;  %v4089_v5 = vld [vmem:[%s19232_s3 + $0x3948] sm:$0xff] }
 0x5b7   :  { %7210 = vmatpush2.msra.mxu1 %v3945_v25  ;;  %7158 = vmatprep.subr.mxu0 %v3568_v40  ;;  %v3874_v10 = vld [vmem:[%s19232_s3 + $0x3290] sm:$0xff]  ;;  %v4081_v25 = vld [vmem:[%s19232_s3 + $0x3908] sm:$0xff] }
 0x5b8   :  { %7211 = vmatprep.subr.mxu1 %v3937_v15  ;;  %7159 = vmatpush2.msra.mxu0 %v3567_v36  ;;  %v3873_v40 = vld [vmem:[%s19232_s3 + $0x3288] sm:$0xff]  ;;  %v4080_v15 = vld [vmem:[%s19232_s3 + $0x3900] sm:$0xff] }
 0x5b9   :  { %7212 = vmatpush2.msra.mxu1 %v3936_v42  ;;  %7160 = vmatprep.subr.mxu0 %v3559_v7  ;;  %v3865_v36 = vld [vmem:[%s19232_s3 + $0x3248] sm:$0xff]  ;;  %v4072_v42 = vld [vmem:[%s19232_s3 + $0x38c0] sm:$0xff] }
 0x5ba   :  { %7213 = vmatprep.subr.mxu1 %v3928_v23  ;;  %7161 = vmatpush2.msra.mxu0 %v3558_v24  ;;  %v3864_v7 = vld [vmem:[%s19232_s3 + $0x3240] sm:$0xff]  ;;  %v4071_v23 = vld [vmem:[%s19232_s3 + $0x38b8] sm:$0xff] }
 0x5bb   :  { %7214 = vmatpush2.msra.mxu1 %v3927_v8  ;;  %7163 = vmatmul.mubr.f32.vlgmr.msra.gmra.mxu0 %v12132_v13  ;;  %v3856_v24 = vld [vmem:[%s19232_s3 + $0x3200] sm:$0xff]  ;;  %v4063_v8 = vld [vmem:[%s19232_s3 + $0x3878] sm:$0xff] }
 0x5bc   :  { %7215 = vmatprep.subr.mxu1 %v3919_v32  ;;  %7240 = vmatprep.subr.mxu0 %v4126_v14  ;;  %v3855_v32 = vld [vmem:[%s19232_s3 + $0x31f8] sm:$0xff]  ;;  %v4062_v14 = vld [vmem:[%s19232_s3 + $0x3870] sm:$0xff] }
 0x5bd   :  { %7216 = vmatpush2.msra.mxu1 %v3918_v39  ;;  %7241 = vmatpush1.msra.mxu0 %v4125_v41  ;;  %v3847_v39 = vld [vmem:[%s19232_s3 + $0x31b8] sm:$0xff]  ;;  %v4054_v41 = vld [vmem:[%s19232_s3 + $0x3830] sm:$0xff] }
 0x5be   :  { %7304 = vmatprep.mubr.f32.mxu0 %v12150_v21  ;;  %7217 = vmatprep.subr.mxu1 %v3910_v48  ;;  %v3846_v48 = vld [vmem:[%s19232_s3 + $0x31b0] sm:$0xff] }
 0x5bf   :  { %7242 = vmatprep.subr.mxu0 %v4117_v9  ;;  %7218 = vmatpush2.msra.mxu1 %v3909_v49  ;;  %v4053_v9 = vld [vmem:[%s19232_s3 + $0x3828] sm:$0xff] }
 0x5c0   :  { %7243 = vmatpush1.msra.mxu0 %v4116_v54  ;;  %7219 = vmatprep.subr.mxu1 %v3901_v12  ;;  %v4045_v49 = vld [vmem:[%s19232_s3 + $0x37e8] sm:$0xff]  ;;  %v4414_v54 = vld [vmem:[%s19232_s3 + $0x4370] sm:$0xff]  ;;  %v4044_v12 = vld [vmem:[%s19232_s3 + $0x37e0] sm:$0xff] }
 0x5c1   :  { %7244 = vmatprep.subr.mxu0 %v4108_v52  ;;  %7220 = vmatpush2.msra.mxu1 %v3900_v61  ;;  %v4413_v52 = vld [vmem:[%s19232_s3 + $0x4368] sm:$0xff]  ;;  %v4036_v61 = vld [vmem:[%s19232_s3 + $0x37a0] sm:$0xff] }
 0x5c2   :  { %7245 = vmatpush1.msra.mxu0 %v4107_v43  ;;  %7221 = vmatprep.subr.mxu1 %v3892_v18  ;;  %v4405_v43 = vld [vmem:[%s19232_s3 + $0x4328] sm:$0xff]  ;;  %v4035_v18 = vld [vmem:[%s19232_s3 + $0x3798] sm:$0xff] }
 0x5c3   :  { %7246 = vmatprep.subr.mxu0 %v4099_v0  ;;  %7222 = vmatpush2.msra.mxu1 %v3891_v37  ;;  %v4404_v0 = vld [vmem:[%s19232_s3 + $0x4320] sm:$0xff]  ;;  %v4027_v37 = vld [vmem:[%s19232_s3 + $0x3758] sm:$0xff] }
 0x5c4   :  { %7247 = vmatpush1.msra.mxu0 %v4098_v31  ;;  %7223 = vmatprep.subr.mxu1 %v3883_v63  ;;  %v4396_v31 = vld [vmem:[%s19232_s3 + $0x42e0] sm:$0xff]  ;;  %v4026_v63 = vld [vmem:[%s19232_s3 + $0x3750] sm:$0xff] }
 0x5c5   :  { %7248 = vmatprep.subr.mxu0 %v4090_v30  ;;  %7224 = vmatpush2.msra.mxu1 %v3882_v2  ;;  %v4395_v30 = vld [vmem:[%s19232_s3 + $0x42d8] sm:$0xff]  ;;  %v4018_v2 = vld [vmem:[%s19232_s3 + $0x3710] sm:$0xff] }
 0x5c6   :  { %7249 = vmatpush1.msra.mxu0 %v4089_v5  ;;  %7225 = vmatprep.subr.mxu1 %v3874_v10  ;;  %v4387_v5 = vld [vmem:[%s19232_s3 + $0x4298] sm:$0xff]  ;;  %v4017_v10 = vld [vmem:[%s19232_s3 + $0x3708] sm:$0xff] }
 0x5c7   :  { %7250 = vmatprep.subr.mxu0 %v4081_v25  ;;  %7226 = vmatpush2.msra.mxu1 %v3873_v40  ;;  %v4386_v25 = vld [vmem:[%s19232_s3 + $0x4290] sm:$0xff]  ;;  %v4009_v40 = vld [vmem:[%s19232_s3 + $0x36c8] sm:$0xff] }
 0x5c8   :  { %7251 = vmatpush1.msra.mxu0 %v4080_v15  ;;  %7227 = vmatprep.subr.mxu1 %v3865_v36  ;;  %v4378_v15 = vld [vmem:[%s19232_s3 + $0x4250] sm:$0xff]  ;;  %v4008_v36 = vld [vmem:[%s19232_s3 + $0x36c0] sm:$0xff] }
 0x5c9   :  { %7252 = vmatprep.subr.mxu0 %v4072_v42  ;;  %7228 = vmatpush2.msra.mxu1 %v3864_v7  ;;  %v4377_v42 = vld [vmem:[%s19232_s3 + $0x4248] sm:$0xff]  ;;  %v4000_v7 = vld [vmem:[%s19232_s3 + $0x3680] sm:$0xff] }
 0x5ca   :  { %7253 = vmatpush1.msra.mxu0 %v4071_v23  ;;  %7229 = vmatprep.subr.mxu1 %v3856_v24  ;;  %v4369_v23 = vld [vmem:[%s19232_s3 + $0x4208] sm:$0xff]  ;;  %v3999_v24 = vld [vmem:[%s19232_s3 + $0x3678] sm:$0xff] }
 0x5cb   :  { %7254 = vmatprep.subr.mxu0 %v4063_v8  ;;  %7230 = vmatpush2.msra.mxu1 %v3855_v32  ;;  %v4368_v8 = vld [vmem:[%s19232_s3 + $0x4200] sm:$0xff]  ;;  %v3991_v32 = vld [vmem:[%s19232_s3 + $0x3638] sm:$0xff] }
 0x5cc   :  { %7255 = vmatpush1.msra.mxu0 %v4062_v14  ;;  %7231 = vmatprep.subr.mxu1 %v3847_v39  ;;  %v4360_v14 = vld [vmem:[%s19232_s3 + $0x41c0] sm:$0xff]  ;;  %v3990_v39 = vld [vmem:[%s19232_s3 + $0x3630] sm:$0xff] }
 0x5cd   :  { %7256 = vmatprep.subr.mxu0 %v4054_v41  ;;  %7232 = vmatpush2.msra.mxu1 %v3846_v48  ;;  %v4359_v41 = vld [vmem:[%s19232_s3 + $0x41b8] sm:$0xff]  ;;  %v4270_v48 = vld [vmem:[%s19232_s3 + $0x3ef0] sm:$0xff] }
 0x5ce   :  { %7257 = vmatpush1.msra.mxu0 %v4053_v9  ;;  %7234 = vmatmul.mubr.f32.vlgmr.msra.gmra.mxu1 %v12428_v57  ;;  %v4351_v9 = vld [vmem:[%s19232_s3 + $0x4178] sm:$0xff] }
 0x5cf   :  { %7258 = vmatprep.subr.mxu0 %v4045_v49  ;;  %7311 = vmatprep.subr.mxu1 %v4414_v54  ;;  %v4269_v49 = vld [vmem:[%s19232_s3 + $0x3ee8] sm:$0xff]  ;;  %v4350_v54 = vld [vmem:[%s19232_s3 + $0x4170] sm:$0xff] }
 0x5d0   :  { %7259 = vmatpush1.msra.mxu0 %v4044_v12  ;;  %7312 = vmatpush1.msra.mxu1 %v4413_v52  ;;  %v4261_v12 = vld [vmem:[%s19232_s3 + $0x3ea8] sm:$0xff]  ;;  %v4342_v52 = vld [vmem:[%s19232_s3 + $0x4130] sm:$0xff] }
 0x5d1   :  { %7375 = vmatprep.mubr.f32.mxu1 %v12446_v62  ;;  %7260 = vmatprep.subr.mxu0 %v4036_v61  ;;  %v4260_v61 = vld [vmem:[%s19232_s3 + $0x3ea0] sm:$0xff] }
 0x5d2   :  { %7313 = vmatprep.subr.mxu1 %v4405_v43  ;;  %7261 = vmatpush1.msra.mxu0 %v4035_v18  ;;  %v4341_v43 = vld [vmem:[%s19232_s3 + $0x4128] sm:$0xff]  ;;  %v4252_v18 = vld [vmem:[%s19232_s3 + $0x3e60] sm:$0xff] }
 0x5d3   :  { %7314 = vmatpush1.msra.mxu1 %v4404_v0  ;;  %7262 = vmatprep.subr.mxu0 %v4027_v37  ;;  %v4333_v0 = vld [vmem:[%s19232_s3 + $0x40e8] sm:$0xff]  ;;  %v4251_v37 = vld [vmem:[%s19232_s3 + $0x3e58] sm:$0xff] }
 0x5d4   :  { %7315 = vmatprep.subr.mxu1 %v4396_v31  ;;  %7263 = vmatpush1.msra.mxu0 %v4026_v63  ;;  %v4332_v31 = vld [vmem:[%s19232_s3 + $0x40e0] sm:$0xff]  ;;  %v4243_v63 = vld [vmem:[%s19232_s3 + $0x3e18] sm:$0xff] }
 0x5d5   :  { %7316 = vmatpush1.msra.mxu1 %v4395_v30  ;;  %7264 = vmatprep.subr.mxu0 %v4018_v2  ;;  %v4324_v30 = vld [vmem:[%s19232_s3 + $0x40a0] sm:$0xff]  ;;  %v4242_v2 = vld [vmem:[%s19232_s3 + $0x3e10] sm:$0xff] }
 0x5d6   :  { %7317 = vmatprep.subr.mxu1 %v4387_v5  ;;  %7265 = vmatpush1.msra.mxu0 %v4017_v10  ;;  %v4323_v5 = vld [vmem:[%s19232_s3 + $0x4098] sm:$0xff]  ;;  %v4234_v10 = vld [vmem:[%s19232_s3 + $0x3dd0] sm:$0xff] }
 0x5d7   :  { %7318 = vmatpush1.msra.mxu1 %v4386_v25  ;;  %7266 = vmatprep.subr.mxu0 %v4009_v40  ;;  %v4315_v25 = vld [vmem:[%s19232_s3 + $0x4058] sm:$0xff]  ;;  %v4233_v40 = vld [vmem:[%s19232_s3 + $0x3dc8] sm:$0xff] }
 0x5d8   :  { %7319 = vmatprep.subr.mxu1 %v4378_v15  ;;  %7267 = vmatpush1.msra.mxu0 %v4008_v36  ;;  %v4314_v15 = vld [vmem:[%s19232_s3 + $0x4050] sm:$0xff]  ;;  %v4225_v36 = vld [vmem:[%s19232_s3 + $0x3d88] sm:$0xff] }
 0x5d9   :  { %7320 = vmatpush1.msra.mxu1 %v4377_v42  ;;  %7268 = vmatprep.subr.mxu0 %v4000_v7  ;;  %v4306_v42 = vld [vmem:[%s19232_s3 + $0x4010] sm:$0xff]  ;;  %v4224_v7 = vld [vmem:[%s19232_s3 + $0x3d80] sm:$0xff] }
 0x5da   :  { %7321 = vmatprep.subr.mxu1 %v4369_v23  ;;  %7269 = vmatpush1.msra.mxu0 %v3999_v24  ;;  %v4305_v23 = vld [vmem:[%s19232_s3 + $0x4008] sm:$0xff]  ;;  %v4216_v24 = vld [vmem:[%s19232_s3 + $0x3d40] sm:$0xff] }
 0x5db   :  { %7322 = vmatpush1.msra.mxu1 %v4368_v8  ;;  %7270 = vmatprep.subr.mxu0 %v3991_v32  ;;  %v4297_v8 = vld [vmem:[%s19232_s3 + $0x3fc8] sm:$0xff]  ;;  %v4215_v32 = vld [vmem:[%s19232_s3 + $0x3d38] sm:$0xff] }
 0x5dc   :  { %7323 = vmatprep.subr.mxu1 %v4360_v14  ;;  %7271 = vmatpush1.msra.mxu0 %v3990_v39  ;;  %v4296_v14 = vld [vmem:[%s19232_s3 + $0x3fc0] sm:$0xff]  ;;  %v4207_v39 = vld [vmem:[%s19232_s3 + $0x3cf8] sm:$0xff] }
 0x5dd   :  { %7324 = vmatpush1.msra.mxu1 %v4359_v41  ;;  %7272 = vmatprep.subr.mxu0 %v4270_v48  ;;  %v4288_v41 = vld [vmem:[%s19232_s3 + $0x3f80] sm:$0xff]  ;;  %v4206_v48 = vld [vmem:[%s19232_s3 + $0x3cf0] sm:$0xff] }
 0x5de   :  { %7325 = vmatprep.subr.mxu1 %v4351_v9  ;;  %7273 = vmatpush2.msra.mxu0 %v4269_v49  ;;  %v4287_v9 = vld [vmem:[%s19232_s3 + $0x3f78] sm:$0xff]  ;;  %v4198_v49 = vld [vmem:[%s19232_s3 + $0x3cb0] sm:$0xff] }
 0x5df   :  { %7326 = vmatpush1.msra.mxu1 %v4350_v54  ;;  %7274 = vmatprep.subr.mxu0 %v4261_v12  ;;  %v4279_v54 = vld [vmem:[%s19232_s3 + $0x3f38] sm:$0xff]  ;;  %v4197_v12 = vld [vmem:[%s19232_s3 + $0x3ca8] sm:$0xff] }
 0x5e0   :  { %7327 = vmatprep.subr.mxu1 %v4342_v52  ;;  %7275 = vmatpush2.msra.mxu0 %v4260_v61  ;;  %v4278_v52 = vld [vmem:[%s19232_s3 + $0x3f30] sm:$0xff]  ;;  %v4189_v61 = vld [vmem:[%s19232_s3 + $0x3c68] sm:$0xff] }
 0x5e1   :  { %7328 = vmatpush1.msra.mxu1 %v4341_v43  ;;  %7276 = vmatprep.subr.mxu0 %v4252_v18  ;;  %v4558_v43 = vld [vmem:[%s19232_s3 + $0x47f0] sm:$0xff]  ;;  %v4188_v18 = vld [vmem:[%s19232_s3 + $0x3c60] sm:$0xff] }
 0x5e2   :  { %7329 = vmatprep.subr.mxu1 %v4333_v0  ;;  %7277 = vmatpush2.msra.mxu0 %v4251_v37  ;;  %v4557_v0 = vld [vmem:[%s19232_s3 + $0x47e8] sm:$0xff]  ;;  %v4180_v37 = vld [vmem:[%s19232_s3 + $0x3c20] sm:$0xff] }
 0x5e3   :  { %7330 = vmatpush1.msra.mxu1 %v4332_v31  ;;  %7278 = vmatprep.subr.mxu0 %v4243_v63  ;;  %v4549_v31 = vld [vmem:[%s19232_s3 + $0x47a8] sm:$0xff]  ;;  %v4179_v63 = vld [vmem:[%s19232_s3 + $0x3c18] sm:$0xff] }
 0x5e4   :  { %7331 = vmatprep.subr.mxu1 %v4324_v30  ;;  %7279 = vmatpush2.msra.mxu0 %v4242_v2  ;;  %v4548_v30 = vld [vmem:[%s19232_s3 + $0x47a0] sm:$0xff]  ;;  %v4171_v2 = vld [vmem:[%s19232_s3 + $0x3bd8] sm:$0xff] }
 0x5e5   :  { %7332 = vmatpush1.msra.mxu1 %v4323_v5  ;;  %7280 = vmatprep.subr.mxu0 %v4234_v10  ;;  %v4540_v5 = vld [vmem:[%s19232_s3 + $0x4760] sm:$0xff]  ;;  %v4170_v10 = vld [vmem:[%s19232_s3 + $0x3bd0] sm:$0xff] }
 0x5e6   :  { %7333 = vmatprep.subr.mxu1 %v4315_v25  ;;  %7281 = vmatpush2.msra.mxu0 %v4233_v40  ;;  %v4539_v25 = vld [vmem:[%s19232_s3 + $0x4758] sm:$0xff]  ;;  %v4162_v40 = vld [vmem:[%s19232_s3 + $0x3b90] sm:$0xff] }
 0x5e7   :  { %7334 = vmatpush1.msra.mxu1 %v4314_v15  ;;  %7282 = vmatprep.subr.mxu0 %v4225_v36  ;;  %v4531_v15 = vld [vmem:[%s19232_s3 + $0x4718] sm:$0xff]  ;;  %v4161_v36 = vld [vmem:[%s19232_s3 + $0x3b88] sm:$0xff] }
 0x5e8   :  { %7335 = vmatprep.subr.mxu1 %v4306_v42  ;;  %7283 = vmatpush2.msra.mxu0 %v4224_v7  ;;  %v4530_v42 = vld [vmem:[%s19232_s3 + $0x4710] sm:$0xff]  ;;  %v4153_v7 = vld [vmem:[%s19232_s3 + $0x3b48] sm:$0xff] }
 0x5e9   :  { %7336 = vmatpush1.msra.mxu1 %v4305_v23  ;;  %7284 = vmatprep.subr.mxu0 %v4216_v24  ;;  %v4522_v23 = vld [vmem:[%s19232_s3 + $0x46d0] sm:$0xff]  ;;  %v4152_v24 = vld [vmem:[%s19232_s3 + $0x3b40] sm:$0xff] }
 0x5ea   :  { %7337 = vmatprep.subr.mxu1 %v4297_v8  ;;  %7285 = vmatpush2.msra.mxu0 %v4215_v32  ;;  %v4521_v8 = vld [vmem:[%s19232_s3 + $0x46c8] sm:$0xff]  ;;  %v4144_v32 = vld [vmem:[%s19232_s3 + $0x3b00] sm:$0xff] }
 0x5eb   :  { %7338 = vmatpush1.msra.mxu1 %v4296_v14  ;;  %7286 = vmatprep.subr.mxu0 %v4207_v39  ;;  %v4513_v14 = vld [vmem:[%s19232_s3 + $0x4688] sm:$0xff]  ;;  %v4143_v39 = vld [vmem:[%s19232_s3 + $0x3af8] sm:$0xff] }
 0x5ec   :  { %7339 = vmatprep.subr.mxu1 %v4288_v41  ;;  %7287 = vmatpush2.msra.mxu0 %v4206_v48  ;;  %v4512_v41 = vld [vmem:[%s19232_s3 + $0x4680] sm:$0xff]  ;;  %v4135_v48 = vld [vmem:[%s19232_s3 + $0x3ab8] sm:$0xff] }
 0x5ed   :  { %7340 = vmatpush1.msra.mxu1 %v4287_v9  ;;  %7288 = vmatprep.subr.mxu0 %v4198_v49  ;;  %v4504_v9 = vld [vmem:[%s19232_s3 + $0x4640] sm:$0xff]  ;;  %v4134_v49 = vld [vmem:[%s19232_s3 + $0x3ab0] sm:$0xff] }
 0x5ee   :  { %7341 = vmatprep.subr.mxu1 %v4279_v54  ;;  %7289 = vmatpush2.msra.mxu0 %v4197_v12  ;;  %v4503_v54 = vld [vmem:[%s19232_s3 + $0x4638] sm:$0xff] }
 0x5ef   :  { %7342 = vmatpush1.msra.mxu1 %v4278_v52  ;;  %7290 = vmatprep.subr.mxu0 %v4189_v61  ;;  %v4495_v12 = vld [vmem:[%s19232_s3 + $0x45f8] sm:$0xff]  ;;  %v4702_v52 = vld [vmem:[%s19232_s3 + $0x4c70] sm:$0xff] }
 0x5f0   :  { %7343 = vmatprep.subr.mxu1 %v4558_v43  ;;  %7291 = vmatpush2.msra.mxu0 %v4188_v18  ;;  %v4494_v61 = vld [vmem:[%s19232_s3 + $0x45f0] sm:$0xff]  ;;  %v4701_v43 = vld [vmem:[%s19232_s3 + $0x4c68] sm:$0xff] }
 0x5f1   :  { %7344 = vmatpush2.msra.mxu1 %v4557_v0  ;;  %7292 = vmatprep.subr.mxu0 %v4180_v37  ;;  %v4486_v18 = vld [vmem:[%s19232_s3 + $0x45b0] sm:$0xff]  ;;  %v4693_v0 = vld [vmem:[%s19232_s3 + $0x4c28] sm:$0xff] }
 0x5f2   :  { %7345 = vmatprep.subr.mxu1 %v4549_v31  ;;  %7293 = vmatpush2.msra.mxu0 %v4179_v63  ;;  %v4485_v37 = vld [vmem:[%s19232_s3 + $0x45a8] sm:$0xff]  ;;  %v4692_v31 = vld [vmem:[%s19232_s3 + $0x4c20] sm:$0xff] }
 0x5f3   :  { %7346 = vmatpush2.msra.mxu1 %v4548_v30  ;;  %7294 = vmatprep.subr.mxu0 %v4171_v2  ;;  %v4477_v63 = vld [vmem:[%s19232_s3 + $0x4568] sm:$0xff]  ;;  %v4684_v30 = vld [vmem:[%s19232_s3 + $0x4be0] sm:$0xff] }
 0x5f4   :  { %7347 = vmatprep.subr.mxu1 %v4540_v5  ;;  %7295 = vmatpush2.msra.mxu0 %v4170_v10  ;;  %v4476_v2 = vld [vmem:[%s19232_s3 + $0x4560] sm:$0xff]  ;;  %v4683_v5 = vld [vmem:[%s19232_s3 + $0x4bd8] sm:$0xff] }
 0x5f5   :  { %7348 = vmatpush2.msra.mxu1 %v4539_v25  ;;  %7296 = vmatprep.subr.mxu0 %v4162_v40  ;;  %v4468_v10 = vld [vmem:[%s19232_s3 + $0x4520] sm:$0xff]  ;;  %v4675_v25 = vld [vmem:[%s19232_s3 + $0x4b98] sm:$0xff] }
 0x5f6   :  { %7349 = vmatprep.subr.mxu1 %v4531_v15  ;;  %7297 = vmatpush2.msra.mxu0 %v4161_v36  ;;  %v4467_v40 = vld [vmem:[%s19232_s3 + $0x4518] sm:$0xff]  ;;  %v4674_v15 = vld [vmem:[%s19232_s3 + $0x4b90] sm:$0xff] }
 0x5f7   :  { %7350 = vmatpush2.msra.mxu1 %v4530_v42  ;;  %7298 = vmatprep.subr.mxu0 %v4153_v7  ;;  %v4459_v36 = vld [vmem:[%s19232_s3 + $0x44d8] sm:$0xff]  ;;  %v4666_v42 = vld [vmem:[%s19232_s3 + $0x4b50] sm:$0xff] }
 0x5f8   :  { %7351 = vmatprep.subr.mxu1 %v4522_v23  ;;  %7299 = vmatpush2.msra.mxu0 %v4152_v24  ;;  %v4458_v7 = vld [vmem:[%s19232_s3 + $0x44d0] sm:$0xff]  ;;  %v4665_v23 = vld [vmem:[%s19232_s3 + $0x4b48] sm:$0xff] }
 0x5f9   :  { %7352 = vmatpush2.msra.mxu1 %v4521_v8  ;;  %7300 = vmatprep.subr.mxu0 %v4144_v32  ;;  %v4450_v24 = vld [vmem:[%s19232_s3 + $0x4490] sm:$0xff]  ;;  %v4657_v8 = vld [vmem:[%s19232_s3 + $0x4b08] sm:$0xff] }
 0x5fa   :  { %7353 = vmatprep.subr.mxu1 %v4513_v14  ;;  %7301 = vmatpush2.msra.mxu0 %v4143_v39  ;;  %v4449_v32 = vld [vmem:[%s19232_s3 + $0x4488] sm:$0xff]  ;;  %v4656_v14 = vld [vmem:[%s19232_s3 + $0x4b00] sm:$0xff] }
 0x5fb   :  { %7354 = vmatpush2.msra.mxu1 %v4512_v41  ;;  %7302 = vmatprep.subr.mxu0 %v4135_v48  ;;  %v4441_v39 = vld [vmem:[%s19232_s3 + $0x4448] sm:$0xff]  ;;  %v4648_v41 = vld [vmem:[%s19232_s3 + $0x4ac0] sm:$0xff] }
 0x5fc   :  { %7355 = vmatprep.subr.mxu1 %v4504_v9  ;;  %7303 = vmatpush2.msra.mxu0 %v4134_v49  ;;  %v4440_v48 = vld [vmem:[%s19232_s3 + $0x4440] sm:$0xff]  ;;  %v4647_v9 = vld [vmem:[%s19232_s3 + $0x4ab8] sm:$0xff] }
 0x5fd   :  { %7356 = vmatpush2.msra.mxu1 %v4503_v54  ;;  %7305 = vmatmul.mubr.f32.vlgmr.msra.gmra.mxu0 %v12549_v56  ;;  %v4432_v49 = vld [vmem:[%s19232_s3 + $0x4400] sm:$0xff]  ;;  %v4639_v54 = vld [vmem:[%s19232_s3 + $0x4a78] sm:$0xff] }
 0x5fe   :  { %7357 = vmatprep.subr.mxu1 %v4495_v12  ;;  %7382 = vmatprep.subr.mxu0 %v4702_v52  ;;  %v4431_v12 = vld [vmem:[%s19232_s3 + $0x43f8] sm:$0xff]  ;;  %v4638_v52 = vld [vmem:[%s19232_s3 + $0x4a70] sm:$0xff] }
 0x5ff   :  { %7358 = vmatpush2.msra.mxu1 %v4494_v61  ;;  %7383 = vmatpush1.msra.mxu0 %v4701_v43  ;;  %v4423_v61 = vld [vmem:[%s19232_s3 + $0x43b8] sm:$0xff]  ;;  %v4630_v43 = vld [vmem:[%s19232_s3 + $0x4a30] sm:$0xff] }
 0x600   :  { %7446 = vmatprep.mubr.f32.mxu0 %v12567_v47  ;;  %7359 = vmatprep.subr.mxu1 %v4486_v18  ;;  %v4422_v18 = vld [vmem:[%s19232_s3 + $0x43b0] sm:$0xff] }
 0x601   :  { %7384 = vmatprep.subr.mxu0 %v4693_v0  ;;  %7360 = vmatpush2.msra.mxu1 %v4485_v37  ;;  %v4629_v0 = vld [vmem:[%s19232_s3 + $0x4a28] sm:$0xff] }
 0x602   :  { %7385 = vmatpush1.msra.mxu0 %v4692_v31  ;;  %7361 = vmatprep.subr.mxu1 %v4477_v63  ;;  %v4621_v37 = vld [vmem:[%s19232_s3 + $0x49e8] sm:$0xff]  ;;  %v2543_v31 = vld [vmem:[%s19232_s3 + $0x8f8] sm:$0xff]  ;;  %v4620_v63 = vld [vmem:[%s19232_s3 + $0x49e0] sm:$0xff] }
 0x603   :  { %7386 = vmatprep.subr.mxu0 %v4684_v30  ;;  %7362 = vmatpush2.msra.mxu1 %v4476_v2  ;;  %v2399_v30 = vld [vmem:[%s19232_s3 + $0x478] sm:$0xff]  ;;  %v4612_v2 = vld [vmem:[%s19232_s3 + $0x49a0] sm:$0xff] }
 0x604   :  { %7387 = vmatpush1.msra.mxu0 %v4683_v5  ;;  %7363 = vmatprep.subr.mxu1 %v4468_v10  ;;  %v2534_v5 = vld [vmem:[%s19232_s3 + $0x8b0] sm:$0xff]  ;;  %v4611_v10 = vld [vmem:[%s19232_s3 + $0x4998] sm:$0xff] }
 0x605   :  { %7388 = vmatprep.subr.mxu0 %v4675_v25  ;;  %7364 = vmatpush2.msra.mxu1 %v4467_v40  ;;  %v2390_v25 = vld [vmem:[%s19232_s3 + $0x430] sm:$0xff]  ;;  %v4603_v40 = vld [vmem:[%s19232_s3 + $0x4958] sm:$0xff] }
 0x606   :  { %7389 = vmatpush1.msra.mxu0 %v4674_v15  ;;  %7365 = vmatprep.subr.mxu1 %v4459_v36  ;;  %v2525_v15 = vld [vmem:[%s19232_s3 + $0x868] sm:$0xff]  ;;  %v4602_v36 = vld [vmem:[%s19232_s3 + $0x4950] sm:$0xff] }
 0x607   :  { %7390 = vmatprep.subr.mxu0 %v4666_v42  ;;  %7366 = vmatpush2.msra.mxu1 %v4458_v7  ;;  %v2381_v42 = vld [vmem:[%s19232_s3 + $0x3e8] sm:$0xff]  ;;  %v4594_v7 = vld [vmem:[%s19232_s3 + $0x4910] sm:$0xff] }
 0x608   :  { %7391 = vmatpush1.msra.mxu0 %v4665_v23  ;;  %7367 = vmatprep.subr.mxu1 %v4450_v24  ;;  %v4593_v23 = vld [vmem:[%s19232_s3 + $0x4908] sm:$0xff]  ;;  %v2372_v24 = vld [vmem:[%s19232_s3 + $0x3a0] sm:$0xff] }
 0x609   :  { %7392 = vmatprep.subr.mxu0 %v4657_v8  ;;  %7368 = vmatpush2.msra.mxu1 %v4449_v32  ;;  %v4585_v8 = vld [vmem:[%s19232_s3 + $0x48c8] sm:$0xff]  ;;  %v2507_v32 = vld [vmem:[%s19232_s3 + $0x7d8] sm:$0xff] }
 0x60a   :  { %7393 = vmatpush1.msra.mxu0 %v4656_v14  ;;  %7369 = vmatprep.subr.mxu1 %v4441_v39  ;;  %v4584_v14 = vld [vmem:[%s19232_s3 + $0x48c0] sm:$0xff]  ;;  %v2363_v39 = vld [vmem:[%s19232_s3 + $0x358] sm:$0xff] }
 0x60b   :  { %7394 = vmatprep.subr.mxu0 %v4648_v41  ;;  %7370 = vmatpush2.msra.mxu1 %v4440_v48  ;;  %v4576_v41 = vld [vmem:[%s19232_s3 + $0x4880] sm:$0xff]  ;;  %v2498_v48 = vld [vmem:[%s19232_s3 + $0x790] sm:$0xff] }
 0x60c   :  { %7395 = vmatpush1.msra.mxu0 %v4647_v9  ;;  %7371 = vmatprep.subr.mxu1 %v4432_v49  ;;  %v4575_v9 = vld [vmem:[%s19232_s3 + $0x4878] sm:$0xff]  ;;  %v2354_v49 = vld [vmem:[%s19232_s3 + $0x310] sm:$0xff] }
 0x60d   :  { %7396 = vmatprep.subr.mxu0 %v4639_v54  ;;  %7372 = vmatpush2.msra.mxu1 %v4431_v12  ;;  %v4567_v54 = vld [vmem:[%s19232_s3 + $0x4838] sm:$0xff]  ;;  %v2489_v12 = vld [vmem:[%s19232_s3 + $0x748] sm:$0xff] }
 0x60e   :  { %7397 = vmatpush1.msra.mxu0 %v4638_v52  ;;  %7373 = vmatprep.subr.mxu1 %v4423_v61  ;;  %v4566_v52 = vld [vmem:[%s19232_s3 + $0x4830] sm:$0xff]  ;;  %v2345_v61 = vld [vmem:[%s19232_s3 + $0x2c8] sm:$0xff] }
 0x60f   :  { %7398 = vmatprep.subr.mxu0 %v4630_v43  ;;  %7374 = vmatpush2.msra.mxu1 %v4422_v18  ;;  %v4846_v43 = vld [vmem:[%s19232_s3 + $0x50f0] sm:$0xff]  ;;  %v2480_v18 = vld [vmem:[%s19232_s3 + $0x700] sm:$0xff] }
 0x610   :  { %7399 = vmatpush1.msra.mxu0 %v4629_v0  ;;  %7376 = vmatmul.mubr.f32.vlgmr.msra.gmra.mxu1 %v12834_v26  ;;  %v4845_v0 = vld [vmem:[%s19232_s3 + $0x50e8] sm:$0xff] }
 0x611   :  { %7400 = vmatprep.subr.mxu0 %v4621_v37  ;;  %8236 = vmatprep.subr.mxu1 %v2543_v31  ;;  %v2336_v37 = vld [vmem:[%s19232_s3 + $0x280] sm:$0xff]  ;;  %v4837_v31 = vld [vmem:[%s19232_s3 + $0x50a8] sm:$0xff] }
 0x612   :  { %7401 = vmatpush1.msra.mxu0 %v4620_v63  ;;  %8237 = vmatpush3.msra.mxu1 %v2399_v30  ;;  %v2471_v63 = vld [vmem:[%s19232_s3 + $0x6b8] sm:$0xff]  ;;  %v4836_v30 = vld [vmem:[%s19232_s3 + $0x50a0] sm:$0xff] }
 0x613   :  { %7517 = vmatprep.mubr.f32.mxu1 %v10852_v3  ;;  %7402 = vmatprep.subr.mxu0 %v4612_v2  ;;  %v2516_v3 = vld [vmem:[%s19232_s3 + $0x820] sm:$0xff]  ;;  %v2327_v2 = vld [vmem:[%s19232_s3 + $0x238] sm:$0xff] }
 0x614   :  { %8238 = vmatprep.subr.mxu1 %v2534_v5  ;;  %7403 = vmatpush1.msra.mxu0 %v4611_v10  ;;  %v4828_v5 = vld [vmem:[%s19232_s3 + $0x5060] sm:$0xff]  ;;  %v2462_v10 = vld [vmem:[%s19232_s3 + $0x670] sm:$0xff] }
 0x615   :  { %8239 = vmatpush3.msra.mxu1 %v2390_v25  ;;  %7404 = vmatprep.subr.mxu0 %v4603_v40  ;;  %v4827_v25 = vld [vmem:[%s19232_s3 + $0x5058] sm:$0xff]  ;;  %v2318_v40 = vld [vmem:[%s19232_s3 + $0x1f0] sm:$0xff] }
 0x616   :  { %8240 = vmatprep.subr.mxu1 %v2525_v15  ;;  %7405 = vmatpush1.msra.mxu0 %v4602_v36  ;;  %v4819_v15 = vld [vmem:[%s19232_s3 + $0x5018] sm:$0xff]  ;;  %v2453_v36 = vld [vmem:[%s19232_s3 + $0x628] sm:$0xff] }
 0x617   :  { %8241 = vmatpush3.msra.mxu1 %v2381_v42  ;;  %7406 = vmatprep.subr.mxu0 %v4594_v7  ;;  %v4818_v42 = vld [vmem:[%s19232_s3 + $0x5010] sm:$0xff]  ;;  %v2309_v7 = vld [vmem:[%s19232_s3 + $0x1a8] sm:$0xff] }
 0x618   :  { %8242 = vmatprep.subr.mxu1 %v2516_v3  ;;  %7407 = vmatpush1.msra.mxu0 %v4593_v23  ;;  %v4810_v3 = vld [vmem:[%s19232_s3 + $0x4fd0] sm:$0xff]  ;;  %v2444_v23 = vld [vmem:[%s19232_s3 + $0x5e0] sm:$0xff] }
 0x619   :  { %8243 = vmatpush3.msra.mxu1 %v2372_v24  ;;  %7408 = vmatprep.subr.mxu0 %v4585_v8  ;;  %v4809_v24 = vld [vmem:[%s19232_s3 + $0x4fc8] sm:$0xff]  ;;  %v2300_v8 = vld [vmem:[%s19232_s3 + $0x160] sm:$0xff] }
 0x61a   :  { %8244 = vmatprep.subr.mxu1 %v2507_v32  ;;  %7409 = vmatpush1.msra.mxu0 %v4584_v14  ;;  %v4801_v32 = vld [vmem:[%s19232_s3 + $0x4f88] sm:$0xff]  ;;  %v2435_v14 = vld [vmem:[%s19232_s3 + $0x598] sm:$0xff] }
 0x61b   :  { %8245 = vmatpush3.msra.mxu1 %v2363_v39  ;;  %7410 = vmatprep.subr.mxu0 %v4576_v41  ;;  %v4800_v39 = vld [vmem:[%s19232_s3 + $0x4f80] sm:$0xff]  ;;  %v2291_v41 = vld [vmem:[%s19232_s3 + $0x118] sm:$0xff] }
 0x61c   :  { %8246 = vmatprep.subr.mxu1 %v2498_v48  ;;  %7411 = vmatpush1.msra.mxu0 %v4575_v9  ;;  %v4792_v48 = vld [vmem:[%s19232_s3 + $0x4f40] sm:$0xff]  ;;  %v2426_v9 = vld [vmem:[%s19232_s3 + $0x550] sm:$0xff] }
 0x61d   :  { %8247 = vmatpush3.msra.mxu1 %v2354_v49  ;;  %7412 = vmatprep.subr.mxu0 %v4567_v54  ;;  %v4791_v49 = vld [vmem:[%s19232_s3 + $0x4f38] sm:$0xff]  ;;  %v2282_v54 = vld [vmem:[%s19232_s3 + $0xd0] sm:$0xff] }
 0x61e   :  { %8248 = vmatprep.subr.mxu1 %v2489_v12  ;;  %7413 = vmatpush1.msra.mxu0 %v4566_v52  ;;  %v4783_v12 = vld [vmem:[%s19232_s3 + $0x4ef8] sm:$0xff]  ;;  %v2417_v52 = vld [vmem:[%s19232_s3 + $0x508] sm:$0xff] }
 0x61f   :  { %8249 = vmatpush3.msra.mxu1 %v2345_v61  ;;  %7414 = vmatprep.subr.mxu0 %v4846_v43  ;;  %v4782_v61 = vld [vmem:[%s19232_s3 + $0x4ef0] sm:$0xff]  ;;  %v2273_v43 = vld [vmem:[%s19232_s3 + $0x88] sm:$0xff] }
 0x620   :  { %8250 = vmatprep.subr.mxu1 %v2480_v18  ;;  %7415 = vmatpush2.msra.mxu0 %v4845_v0  ;;  %v4774_v18 = vld [vmem:[%s19232_s3 + $0x4eb0] sm:$0xff]  ;;  %v2408_v0 = vld [vmem:[%s19232_s3 + $0x4c0] sm:$0xff] }
 0x621   :  { %8251 = vmatpush3.msra.mxu1 %v2336_v37  ;;  %7416 = vmatprep.subr.mxu0 %v4837_v31  ;;  %v4773_v37 = vld [vmem:[%s19232_s3 + $0x4ea8] sm:$0xff]  ;;  %v2264_v31 = vld [vmem:[%s19232_s3 + $0x40] sm:$0xff] }
 0x622   :  { %8252 = vmatprep.subr.mxu1 %v2471_v63  ;;  %7417 = vmatpush2.msra.mxu0 %v4836_v30  ;;  %v4765_v63 = vld [vmem:[%s19232_s3 + $0x4e68] sm:$0xff]  ;;  %v2831_v30 = vld [vmem:[%s19232_s3 + $0x11f8] sm:$0xff] }
 0x623   :  { %8253 = vmatpush3.msra.mxu1 %v2327_v2  ;;  %7418 = vmatprep.subr.mxu0 %v4828_v5  ;;  %v4764_v2 = vld [vmem:[%s19232_s3 + $0x4e60] sm:$0xff]  ;;  %v2687_v5 = vld [vmem:[%s19232_s3 + $0xd78] sm:$0xff] }
 0x624   :  { %8254 = vmatprep.subr.mxu1 %v2462_v10  ;;  %7419 = vmatpush2.msra.mxu0 %v4827_v25  ;;  %v4756_v10 = vld [vmem:[%s19232_s3 + $0x4e20] sm:$0xff]  ;;  %v2822_v25 = vld [vmem:[%s19232_s3 + $0x11b0] sm:$0xff] }
 0x625   :  { %8255 = vmatpush3.msra.mxu1 %v2318_v40  ;;  %7420 = vmatprep.subr.mxu0 %v4819_v15  ;;  %v4755_v40 = vld [vmem:[%s19232_s3 + $0x4e18] sm:$0xff]  ;;  %v2678_v15 = vld [vmem:[%s19232_s3 + $0xd30] sm:$0xff] }
 0x626   :  { %8256 = vmatprep.subr.mxu1 %v2453_v36  ;;  %7421 = vmatpush2.msra.mxu0 %v4818_v42  ;;  %v4747_v36 = vld [vmem:[%s19232_s3 + $0x4dd8] sm:$0xff]  ;;  %v4746_v42 = vld [vmem:[%s19232_s3 + $0x4dd0] sm:$0xff] }
 0x627   :  { %8257 = vmatpush3.msra.mxu1 %v2309_v7  ;;  %7422 = vmatprep.subr.mxu0 %v4810_v3  ;;  %v2669_v7 = vld [vmem:[%s19232_s3 + $0xce8] sm:$0xff]  ;;  %v4738_v3 = vld [vmem:[%s19232_s3 + $0x4d90] sm:$0xff] }
 0x628   :  { %8258 = vmatprep.subr.mxu1 %v2444_v23  ;;  %7423 = vmatpush2.msra.mxu0 %v4809_v24  ;;  %v4737_v23 = vld [vmem:[%s19232_s3 + $0x4d88] sm:$0xff]  ;;  %v2660_v24 = vld [vmem:[%s19232_s3 + $0xca0] sm:$0xff] }
 0x629   :  { %8259 = vmatpush3.msra.mxu1 %v2300_v8  ;;  %7424 = vmatprep.subr.mxu0 %v4801_v32  ;;  %v4729_v8 = vld [vmem:[%s19232_s3 + $0x4d48] sm:$0xff]  ;;  %v2795_v32 = vld [vmem:[%s19232_s3 + $0x10d8] sm:$0xff] }
 0x62a   :  { %8260 = vmatprep.subr.mxu1 %v2435_v14  ;;  %7425 = vmatpush2.msra.mxu0 %v4800_v39  ;;  %v4728_v14 = vld [vmem:[%s19232_s3 + $0x4d40] sm:$0xff]  ;;  %v2651_v39 = vld [vmem:[%s19232_s3 + $0xc58] sm:$0xff] }
 0x62b   :  { %8261 = vmatpush3.msra.mxu1 %v2291_v41  ;;  %7426 = vmatprep.subr.mxu0 %v4792_v48  ;;  %v4720_v41 = vld [vmem:[%s19232_s3 + $0x4d00] sm:$0xff]  ;;  %v2786_v48 = vld [vmem:[%s19232_s3 + $0x1090] sm:$0xff] }
 0x62c   :  { %8262 = vmatprep.subr.mxu1 %v2426_v9  ;;  %7427 = vmatpush2.msra.mxu0 %v4791_v49  ;;  %v4719_v9 = vld [vmem:[%s19232_s3 + $0x4cf8] sm:$0xff]  ;;  %v2642_v49 = vld [vmem:[%s19232_s3 + $0xc10] sm:$0xff] }
 0x62d   :  { %8263 = vmatpush3.msra.mxu1 %v2282_v54  ;;  %7428 = vmatprep.subr.mxu0 %v4783_v12  ;;  %v4711_v54 = vld [vmem:[%s19232_s3 + $0x4cb8] sm:$0xff]  ;;  %v2777_v12 = vld [vmem:[%s19232_s3 + $0x1048] sm:$0xff] }
 0x62e   :  { %8264 = vmatprep.subr.mxu1 %v2417_v52  ;;  %7429 = vmatpush2.msra.mxu0 %v4782_v61  ;;  %v4710_v52 = vld [vmem:[%s19232_s3 + $0x4cb0] sm:$0xff]  ;;  %v2633_v61 = vld [vmem:[%s19232_s3 + $0xbc8] sm:$0xff] }
 0x62f   :  { %8265 = vmatpush3.msra.mxu1 %v2273_v43  ;;  %7430 = vmatprep.subr.mxu0 %v4774_v18  ;;  %v2768_v43 = vld [vmem:[%s19232_s3 + $0x1000] sm:$0xff]  ;;  %v3119_v18 = vld [vmem:[%s19232_s3 + $0x1af8] sm:$0xff] }
 0x630   :  { %8266 = vmatprep.subr.mxu1 %v2408_v0  ;;  %7431 = vmatpush2.msra.mxu0 %v4773_v37  ;;  %v2624_v0 = vld [vmem:[%s19232_s3 + $0xb80] sm:$0xff]  ;;  %v2975_v37 = vld [vmem:[%s19232_s3 + $0x1678] sm:$0xff] }
 0x631   :  { %8267 = vmatpush3.msra.mxu1 %v2264_v31  ;;  %7432 = vmatprep.subr.mxu0 %v4765_v63  ;;  %v2759_v31 = vld [vmem:[%s19232_s3 + $0xfb8] sm:$0xff]  ;;  %v3110_v63 = vld [vmem:[%s19232_s3 + $0x1ab0] sm:$0xff] }
 0x632   :  { %7518 = vmatmul.mubr.f32.vlgmr.msra.gmra.mxu1 %v11271_v17  ;;  %8271 = vmatprep.subr.mxu1 %v2831_v30  ;;  %v2813_v17 = vld [vmem:[%s19232_s3 + $0x1168] sm:$0xff]  ;;  %v2615_v30 = vld [vmem:[%s19232_s3 + $0xb38] sm:$0xff] }
 0x633   :  { %7433 = vmatpush2.msra.mxu0 %v4764_v2  ;;  %8272 = vmatpush3.msra.mxu1 %v2687_v5  ;;  %v2966_v2 = vld [vmem:[%s19232_s3 + $0x1630] sm:$0xff] }
 0x634   :  { %7587 = vmatprep.mubr.f32.mxu1 %v11157_v33  ;;  %7434 = vmatprep.subr.mxu0 %v4756_v10  ;;  %v2804_v33 = vld [vmem:[%s19232_s3 + $0x1120] sm:$0xff]  ;;  %v2750_v5 = vld [vmem:[%s19232_s3 + $0xf70] sm:$0xff]  ;;  %v3101_v10 = vld [vmem:[%s19232_s3 + $0x1a68] sm:$0xff] }
 0x635   :  { %8273 = vmatprep.subr.mxu1 %v2822_v25  ;;  %7435 = vmatpush2.msra.mxu0 %v4755_v40  ;;  %v2606_v25 = vld [vmem:[%s19232_s3 + $0xaf0] sm:$0xff]  ;;  %v2957_v40 = vld [vmem:[%s19232_s3 + $0x15e8] sm:$0xff] }
 0x636   :  { %8274 = vmatpush3.msra.mxu1 %v2678_v15  ;;  %7436 = vmatprep.subr.mxu0 %v4747_v36  ;;  %v2741_v15 = vld [vmem:[%s19232_s3 + $0xf28] sm:$0xff] }
 0x637   :  { %8275 = vmatprep.subr.mxu1 %v2813_v17  ;;  %7437 = vmatpush2.msra.mxu0 %v4746_v42  ;;  %v2597_v36 = vld [vmem:[%s19232_s3 + $0xaa8] sm:$0xff]  ;;  %v2948_v17 = vld [vmem:[%s19232_s3 + $0x15a0] sm:$0xff] }
 0x638   :  { %8276 = vmatpush3.msra.mxu1 %v2669_v7  ;;  %7438 = vmatprep.subr.mxu0 %v4738_v3  ;;  %v2732_v42 = vld [vmem:[%s19232_s3 + $0xee0] sm:$0xff]  ;;  %v3083_v7 = vld [vmem:[%s19232_s3 + $0x19d8] sm:$0xff] }
 0x639   :  { %8277 = vmatprep.subr.mxu1 %v2804_v33  ;;  %7439 = vmatpush2.msra.mxu0 %v4737_v23  ;;  %v2588_v3 = vld [vmem:[%s19232_s3 + $0xa60] sm:$0xff]  ;;  %v2939_v33 = vld [vmem:[%s19232_s3 + $0x1558] sm:$0xff] }
 0x63a   :  { %8278 = vmatpush3.msra.mxu1 %v2660_v24  ;;  %7440 = vmatprep.subr.mxu0 %v4729_v8  ;;  %v2723_v23 = vld [vmem:[%s19232_s3 + $0xe98] sm:$0xff]  ;;  %v3074_v24 = vld [vmem:[%s19232_s3 + $0x1990] sm:$0xff] }
 0x63b   :  { %8279 = vmatprep.subr.mxu1 %v2795_v32  ;;  %7441 = vmatpush2.msra.mxu0 %v4728_v14  ;;  %v2579_v8 = vld [vmem:[%s19232_s3 + $0xa18] sm:$0xff]  ;;  %v2930_v32 = vld [vmem:[%s19232_s3 + $0x1510] sm:$0xff] }
 0x63c   :  { %8280 = vmatpush3.msra.mxu1 %v2651_v39  ;;  %7442 = vmatprep.subr.mxu0 %v4720_v41  ;;  %v2714_v14 = vld [vmem:[%s19232_s3 + $0xe50] sm:$0xff]  ;;  %v3065_v39 = vld [vmem:[%s19232_s3 + $0x1948] sm:$0xff] }
 0x63d   :  { %8281 = vmatprep.subr.mxu1 %v2786_v48  ;;  %7443 = vmatpush2.msra.mxu0 %v4719_v9  ;;  %v2570_v41 = vld [vmem:[%s19232_s3 + $0x9d0] sm:$0xff]  ;;  %v2921_v48 = vld [vmem:[%s19232_s3 + $0x14c8] sm:$0xff] }
 0x63e   :  { %8282 = vmatpush3.msra.mxu1 %v2642_v49  ;;  %7444 = vmatprep.subr.mxu0 %v4711_v54  ;;  %v2705_v9 = vld [vmem:[%s19232_s3 + $0xe08] sm:$0xff]  ;;  %v3056_v49 = vld [vmem:[%s19232_s3 + $0x1900] sm:$0xff] }
 0x63f   :  { %8283 = vmatprep.subr.mxu1 %v2777_v12  ;;  %7445 = vmatpush2.msra.mxu0 %v4710_v52  ;;  %v2561_v54 = vld [vmem:[%s19232_s3 + $0x988] sm:$0xff]  ;;  %v2912_v12 = vld [vmem:[%s19232_s3 + $0x1480] sm:$0xff] }
 0x640   :  { %8284 = vmatpush3.msra.mxu1 %v2633_v61  ;;  %7447 = vmatmul.mubr.f32.vlgmr.msra.gmra.mxu0 %v12957_v16  ;;  %v2696_v52 = vld [vmem:[%s19232_s3 + $0xdc0] sm:$0xff]  ;;  %v3047_v61 = vld [vmem:[%s19232_s3 + $0x18b8] sm:$0xff] }
 0x641   :  { %8285 = vmatprep.subr.mxu1 %v2768_v43  ;;  %8306 = vmatprep.subr.mxu0 %v3119_v18  ;;  %v2552_v43 = vld [vmem:[%s19232_s3 + $0x940] sm:$0xff]  ;;  %v2903_v18 = vld [vmem:[%s19232_s3 + $0x1438] sm:$0xff] }
 0x642   :  { %8286 = vmatpush3.msra.mxu1 %v2624_v0  ;;  %8307 = vmatpush3.msra.mxu0 %v2975_v37  ;;  %v3038_v0 = vld [vmem:[%s19232_s3 + $0x1870] sm:$0xff]  ;;  %v3407_v37 = vld [vmem:[%s19232_s3 + $0x23f8] sm:$0xff] }
 0x643   :  { %7657 = vmatprep.mubr.f32.mxu0 %v11292_v28  ;;  %8287 = vmatprep.subr.mxu1 %v2759_v31  ;;  %v3092_v28 = vld [vmem:[%s19232_s3 + $0x1a20] sm:$0xff]  ;;  %v2894_v31 = vld [vmem:[%s19232_s3 + $0x13f0] sm:$0xff] }
 0x644   :  { %8308 = vmatprep.subr.mxu0 %v3110_v63  ;;  %8288 = vmatpush3.msra.mxu1 %v2615_v30  ;;  %v3263_v63 = vld [vmem:[%s19232_s3 + $0x1f78] sm:$0xff]  ;;  %v3029_v30 = vld [vmem:[%s19232_s3 + $0x1828] sm:$0xff] }
 0x645   :  { %8309 = vmatpush3.msra.mxu0 %v2966_v2  ;;  %8289 = vmatprep.subr.mxu1 %v2750_v5  ;;  %v3398_v2 = vld [vmem:[%s19232_s3 + $0x23b0] sm:$0xff]  ;;  %v2885_v5 = vld [vmem:[%s19232_s3 + $0x13a8] sm:$0xff] }
 0x646   :  { %8310 = vmatprep.subr.mxu0 %v3101_v10  ;;  %8290 = vmatpush3.msra.mxu1 %v2606_v25  ;;  %v3020_v10 = vld [vmem:[%s19232_s3 + $0x17e0] sm:$0xff]  ;;  %v3389_v25 = vld [vmem:[%s19232_s3 + $0x2368] sm:$0xff] }
 0x647   :  { %8311 = vmatpush3.msra.mxu0 %v2957_v40  ;;  %8291 = vmatprep.subr.mxu1 %v2741_v15  ;;  %v2876_v40 = vld [vmem:[%s19232_s3 + $0x1360] sm:$0xff]  ;;  %v3245_v15 = vld [vmem:[%s19232_s3 + $0x1ee8] sm:$0xff] }
 0x648   :  { %8312 = vmatprep.subr.mxu0 %v3092_v28  ;;  %8292 = vmatpush3.msra.mxu1 %v2597_v36  ;;  %v3011_v28 = vld [vmem:[%s19232_s3 + $0x1798] sm:$0xff] }
 0x649   :  { %8313 = vmatpush3.msra.mxu0 %v2948_v17  ;;  %8293 = vmatprep.subr.mxu1 %v2732_v42  ;;  %v2867_v36 = vld [vmem:[%s19232_s3 + $0x1318] sm:$0xff]  ;;  %v3236_v17 = vld [vmem:[%s19232_s3 + $0x1ea0] sm:$0xff]  ;;  %v3002_v42 = vld [vmem:[%s19232_s3 + $0x1750] sm:$0xff] }
 0x64a   :  { %8314 = vmatprep.subr.mxu0 %v3083_v7  ;;  %8294 = vmatpush3.msra.mxu1 %v2588_v3  ;;  %v3371_v7 = vld [vmem:[%s19232_s3 + $0x22d8] sm:$0xff]  ;;  %v2858_v3 = vld [vmem:[%s19232_s3 + $0x12d0] sm:$0xff] }
 0x64b   :  { %8315 = vmatpush3.msra.mxu0 %v2939_v33  ;;  %8295 = vmatprep.subr.mxu1 %v2723_v23  ;;  %v3227_v33 = vld [vmem:[%s19232_s3 + $0x1e58] sm:$0xff]  ;;  %v2993_v23 = vld [vmem:[%s19232_s3 + $0x1708] sm:$0xff] }
 0x64c   :  { %8316 = vmatprep.subr.mxu0 %v3074_v24  ;;  %8296 = vmatpush3.msra.mxu1 %v2579_v8  ;;  %v3362_v24 = vld [vmem:[%s19232_s3 + $0x2290] sm:$0xff]  ;;  %v2849_v8 = vld [vmem:[%s19232_s3 + $0x1288] sm:$0xff] }
 0x64d   :  { %8317 = vmatpush3.msra.mxu0 %v2930_v32  ;;  %8297 = vmatprep.subr.mxu1 %v2714_v14  ;;  %v3218_v32 = vld [vmem:[%s19232_s3 + $0x1e10] sm:$0xff]  ;;  %v2984_v14 = vld [vmem:[%s19232_s3 + $0x16c0] sm:$0xff] }
 0x64e   :  { %8318 = vmatprep.subr.mxu0 %v3065_v39  ;;  %8298 = vmatpush3.msra.mxu1 %v2570_v41  ;;  %v3353_v39 = vld [vmem:[%s19232_s3 + $0x2248] sm:$0xff]  ;;  %v2840_v41 = vld [vmem:[%s19232_s3 + $0x1240] sm:$0xff] }
 0x64f   :  { %8319 = vmatpush3.msra.mxu0 %v2921_v48  ;;  %8299 = vmatprep.subr.mxu1 %v2705_v9  ;;  %v3209_v48 = vld [vmem:[%s19232_s3 + $0x1dc8] sm:$0xff]  ;;  %v3344_v9 = vld [vmem:[%s19232_s3 + $0x2200] sm:$0xff] }
 0x650   :  { %8320 = vmatprep.subr.mxu0 %v3056_v49  ;;  %8300 = vmatpush3.msra.mxu1 %v2561_v54  ;;  %v3695_v49 = vld [vmem:[%s19232_s3 + $0x2cf8] sm:$0xff]  ;;  %v3200_v54 = vld [vmem:[%s19232_s3 + $0x1d80] sm:$0xff] }
 0x651   :  { %8321 = vmatpush3.msra.mxu0 %v2912_v12  ;;  %8301 = vmatprep.subr.mxu1 %v2696_v52  ;;  %v3551_v12 = vld [vmem:[%s19232_s3 + $0x2878] sm:$0xff] }
 0x652   :  { %8322 = vmatprep.subr.mxu0 %v3047_v61  ;;  %8302 = vmatpush3.msra.mxu1 %v2552_v43  ;;  %v3335_v52 = vld [vmem:[%s19232_s3 + $0x21b8] sm:$0xff]  ;;  %v3686_v61 = vld [vmem:[%s19232_s3 + $0x2cb0] sm:$0xff] }
 0x653   :  { %8323 = vmatpush3.msra.mxu0 %v2903_v18  ;;  %7588 = vmatmul.mubr.f32.vlgmr.msra.gmra.mxu1 %v11576_v51  ;;  %v3254_v51 = vld [vmem:[%s19232_s3 + $0x1f30] sm:$0xff]  ;;  %v3191_v43 = vld [vmem:[%s19232_s3 + $0x1d38] sm:$0xff] }
 0x654   :  { %8324 = vmatprep.subr.mxu0 %v3038_v0  ;;  %8341 = vmatprep.subr.mxu1 %v3407_v37  ;;  %v3326_v18 = vld [vmem:[%s19232_s3 + $0x2170] sm:$0xff]  ;;  %v3677_v0 = vld [vmem:[%s19232_s3 + $0x2c68] sm:$0xff] }
 0x655   :  { %8325 = vmatpush3.msra.mxu0 %v2894_v31  ;;  %8342 = vmatpush3.msra.mxu1 %v3263_v63  ;;  %v3182_v37 = vld [vmem:[%s19232_s3 + $0x1cf0] sm:$0xff]  ;;  %v3533_v31 = vld [vmem:[%s19232_s3 + $0x27e8] sm:$0xff] }
 0x656   :  { %7727 = vmatprep.mubr.f32.mxu1 %v11594_v58  ;;  %8326 = vmatprep.subr.mxu0 %v3029_v30  ;;  %v3380_v58 = vld [vmem:[%s19232_s3 + $0x2320] sm:$0xff]  ;;  %v3317_v63 = vld [vmem:[%s19232_s3 + $0x2128] sm:$0xff] }
 0x657   :  { %8343 = vmatprep.subr.mxu1 %v3398_v2  ;;  %8327 = vmatpush3.msra.mxu0 %v2885_v5  ;;  %v3173_v30 = vld [vmem:[%s19232_s3 + $0x1ca8] sm:$0xff]  ;;  %v3524_v2 = vld [vmem:[%s19232_s3 + $0x27a0] sm:$0xff] }
 0x658   :  { %8344 = vmatpush3.msra.mxu1 %v3254_v51  ;;  %8328 = vmatprep.subr.mxu0 %v3020_v10  ;;  %v3308_v5 = vld [vmem:[%s19232_s3 + $0x20e0] sm:$0xff]  ;;  %v3659_v51 = vld [vmem:[%s19232_s3 + $0x2bd8] sm:$0xff] }
 0x659   :  { %8345 = vmatprep.subr.mxu1 %v3389_v25  ;;  %8329 = vmatpush3.msra.mxu0 %v2876_v40  ;;  %v3164_v10 = vld [vmem:[%s19232_s3 + $0x1c60] sm:$0xff]  ;;  %v3515_v25 = vld [vmem:[%s19232_s3 + $0x2758] sm:$0xff] }
 0x65a   :  { %8346 = vmatpush3.msra.mxu1 %v3245_v15  ;;  %8330 = vmatprep.subr.mxu0 %v3011_v28  ;;  %v3299_v40 = vld [vmem:[%s19232_s3 + $0x2098] sm:$0xff]  ;;  %v3650_v15 = vld [vmem:[%s19232_s3 + $0x2b90] sm:$0xff] }
 0x65b   :  { %8347 = vmatprep.subr.mxu1 %v3380_v58  ;;  %8331 = vmatpush3.msra.mxu0 %v2867_v36  ;;  %v3155_v28 = vld [vmem:[%s19232_s3 + $0x1c18] sm:$0xff]  ;;  %v3506_v58 = vld [vmem:[%s19232_s3 + $0x2710] sm:$0xff] }
 0x65c   :  { %8348 = vmatpush3.msra.mxu1 %v3236_v17  ;;  %8332 = vmatprep.subr.mxu0 %v3002_v42  ;;  %v3290_v36 = vld [vmem:[%s19232_s3 + $0x2050] sm:$0xff]  ;;  %v3641_v17 = vld [vmem:[%s19232_s3 + $0x2b48] sm:$0xff] }
 0x65d   :  { %8349 = vmatprep.subr.mxu1 %v3371_v7  ;;  %8333 = vmatpush3.msra.mxu0 %v2858_v3  ;;  %v3146_v42 = vld [vmem:[%s19232_s3 + $0x1bd0] sm:$0xff]  ;;  %v3497_v7 = vld [vmem:[%s19232_s3 + $0x26c8] sm:$0xff] }
 0x65e   :  { %8350 = vmatpush3.msra.mxu1 %v3227_v33  ;;  %8334 = vmatprep.subr.mxu0 %v2993_v23  ;;  %v3281_v3 = vld [vmem:[%s19232_s3 + $0x2008] sm:$0xff]  ;;  %v3632_v33 = vld [vmem:[%s19232_s3 + $0x2b00] sm:$0xff] }
 0x65f   :  { %8351 = vmatprep.subr.mxu1 %v3362_v24  ;;  %8335 = vmatpush3.msra.mxu0 %v2849_v8  ;;  %v3137_v23 = vld [vmem:[%s19232_s3 + $0x1b88] sm:$0xff]  ;;  %v3488_v24 = vld [vmem:[%s19232_s3 + $0x2680] sm:$0xff] }
 0x660   :  { %8352 = vmatpush3.msra.mxu1 %v3218_v32  ;;  %8336 = vmatprep.subr.mxu0 %v2984_v14  ;;  %v3272_v8 = vld [vmem:[%s19232_s3 + $0x1fc0] sm:$0xff]  ;;  %v3623_v32 = vld [vmem:[%s19232_s3 + $0x2ab8] sm:$0xff] }
 0x661   :  { %8353 = vmatprep.subr.mxu1 %v3353_v39  ;;  %8337 = vmatpush3.msra.mxu0 %v2840_v41  ;;  %v3128_v14 = vld [vmem:[%s19232_s3 + $0x1b40] sm:$0xff]  ;;  %v3479_v39 = vld [vmem:[%s19232_s3 + $0x2638] sm:$0xff]  ;;  %v3614_v41 = vld [vmem:[%s19232_s3 + $0x2a70] sm:$0xff] }
 0x662   :  { %8354 = vmatpush3.msra.mxu1 %v3209_v48  ;;  %7658 = vmatmul.mubr.f32.vlgmr.msra.gmra.mxu0 %v11699_v45  ;;  %v3542_v45 = vld [vmem:[%s19232_s3 + $0x2830] sm:$0xff]  ;;  %v3983_v48 = vld [vmem:[%s19232_s3 + $0x35f8] sm:$0xff] }
 0x663   :  { %8355 = vmatprep.subr.mxu1 %v3344_v9  ;;  %8376 = vmatprep.subr.mxu0 %v3695_v49  ;;  %v3470_v9 = vld [vmem:[%s19232_s3 + $0x25f0] sm:$0xff]  ;;  %v3839_v49 = vld [vmem:[%s19232_s3 + $0x3178] sm:$0xff] }
 0x664   :  { %8356 = vmatpush3.msra.mxu1 %v3200_v54  ;;  %8377 = vmatpush3.msra.mxu0 %v3551_v12  ;;  %v3605_v54 = vld [vmem:[%s19232_s3 + $0x2a28] sm:$0xff]  ;;  %v3974_v12 = vld [vmem:[%s19232_s3 + $0x35b0] sm:$0xff] }
 0x665   :  { %7797 = vmatprep.mubr.f32.mxu0 %v11717_v53  ;;  %8357 = vmatprep.subr.mxu1 %v3335_v52  ;;  %v3668_v53 = vld [vmem:[%s19232_s3 + $0x2c20] sm:$0xff]  ;;  %v3461_v52 = vld [vmem:[%s19232_s3 + $0x25a8] sm:$0xff] }
 0x666   :  { %8378 = vmatprep.subr.mxu0 %v3686_v61  ;;  %8358 = vmatpush3.msra.mxu1 %v3191_v43  ;;  %v3596_v61 = vld [vmem:[%s19232_s3 + $0x29e0] sm:$0xff]  ;;  %v3965_v43 = vld [vmem:[%s19232_s3 + $0x3568] sm:$0xff] }
 0x667   :  { %8379 = vmatpush3.msra.mxu0 %v3542_v45  ;;  %8359 = vmatprep.subr.mxu1 %v3326_v18  ;;  %v3452_v45 = vld [vmem:[%s19232_s3 + $0x2560] sm:$0xff]  ;;  %v3821_v18 = vld [vmem:[%s19232_s3 + $0x30e8] sm:$0xff] }
 0x668   :  { %8380 = vmatprep.subr.mxu0 %v3677_v0  ;;  %8360 = vmatpush3.msra.mxu1 %v3182_v37  ;;  %v3587_v0 = vld [vmem:[%s19232_s3 + $0x2998] sm:$0xff] }
 0x669   :  { %8381 = vmatpush3.msra.mxu0 %v3533_v31  ;;  %8361 = vmatprep.subr.mxu1 %v3317_v63  ;;  %v3443_v37 = vld [vmem:[%s19232_s3 + $0x2518] sm:$0xff]  ;;  %v3812_v31 = vld [vmem:[%s19232_s3 + $0x30a0] sm:$0xff]  ;;  %v3578_v63 = vld [vmem:[%s19232_s3 + $0x2950] sm:$0xff] }
 0x66a   :  { %8382 = vmatprep.subr.mxu0 %v3668_v53  ;;  %8362 = vmatpush3.msra.mxu1 %v3173_v30  ;;  %v3947_v53 = vld [vmem:[%s19232_s3 + $0x34d8] sm:$0xff]  ;;  %v3434_v30 = vld [vmem:[%s19232_s3 + $0x24d0] sm:$0xff] }
 0x66b   :  { %8383 = vmatpush3.msra.mxu0 %v3524_v2  ;;  %8363 = vmatprep.subr.mxu1 %v3308_v5  ;;  %v3803_v2 = vld [vmem:[%s19232_s3 + $0x3058] sm:$0xff]  ;;  %v3569_v5 = vld [vmem:[%s19232_s3 + $0x2908] sm:$0xff] }
 0x66c   :  { %8384 = vmatprep.subr.mxu0 %v3659_v51  ;;  %8364 = vmatpush3.msra.mxu1 %v3164_v10  ;;  %v3938_v51 = vld [vmem:[%s19232_s3 + $0x3490] sm:$0xff]  ;;  %v3425_v10 = vld [vmem:[%s19232_s3 + $0x2488] sm:$0xff] }
 0x66d   :  { %8385 = vmatpush3.msra.mxu0 %v3515_v25  ;;  %8365 = vmatprep.subr.mxu1 %v3299_v40  ;;  %v3794_v25 = vld [vmem:[%s19232_s3 + $0x3010] sm:$0xff]  ;;  %v3560_v40 = vld [vmem:[%s19232_s3 + $0x28c0] sm:$0xff] }
 0x66e   :  { %8386 = vmatprep.subr.mxu0 %v3650_v15  ;;  %8366 = vmatpush3.msra.mxu1 %v3155_v28  ;;  %v3929_v15 = vld [vmem:[%s19232_s3 + $0x3448] sm:$0xff]  ;;  %v3416_v28 = vld [vmem:[%s19232_s3 + $0x2440] sm:$0xff] }
 0x66f   :  { %8387 = vmatpush3.msra.mxu0 %v3506_v58  ;;  %8367 = vmatprep.subr.mxu1 %v3290_v36  ;;  %v3785_v58 = vld [vmem:[%s19232_s3 + $0x2fc8] sm:$0xff]  ;;  %v3920_v36 = vld [vmem:[%s19232_s3 + $0x3400] sm:$0xff] }
 0x670   :  { %8388 = vmatprep.subr.mxu0 %v3641_v17  ;;  %8368 = vmatpush3.msra.mxu1 %v3146_v42  ;;  %v4271_v17 = vld [vmem:[%s19232_s3 + $0x3ef8] sm:$0xff]  ;;  %v3776_v42 = vld [vmem:[%s19232_s3 + $0x2f80] sm:$0xff] }
 0x671   :  { %8389 = vmatpush3.msra.mxu0 %v3497_v7  ;;  %8369 = vmatprep.subr.mxu1 %v3281_v3  ;;  %v4127_v7 = vld [vmem:[%s19232_s3 + $0x3a78] sm:$0xff] }
 0x672   :  { %8390 = vmatprep.subr.mxu0 %v3632_v33  ;;  %8370 = vmatpush3.msra.mxu1 %v3137_v23  ;;  %v3911_v3 = vld [vmem:[%s19232_s3 + $0x33b8] sm:$0xff]  ;;  %v4262_v33 = vld [vmem:[%s19232_s3 + $0x3eb0] sm:$0xff] }
 0x673   :  { %8391 = vmatpush3.msra.mxu0 %v3488_v24  ;;  %8371 = vmatprep.subr.mxu1 %v3272_v8  ;;  %v3767_v23 = vld [vmem:[%s19232_s3 + $0x2f38] sm:$0xff]  ;;  %v3902_v24 = vld [vmem:[%s19232_s3 + $0x3370] sm:$0xff]  ;;  %v4253_v8 = vld [vmem:[%s19232_s3 + $0x3e68] sm:$0xff] }
 0x674   :  { %8392 = vmatprep.subr.mxu0 %v3623_v32  ;;  %8372 = vmatpush3.msra.mxu1 %v3128_v14  ;;  %v3758_v32 = vld [vmem:[%s19232_s3 + $0x2ef0] sm:$0xff]  ;;  %v4109_v14 = vld [vmem:[%s19232_s3 + $0x39e8] sm:$0xff] }
 0x675   :  { %8393 = vmatpush3.msra.mxu0 %v3479_v39  ;;  %7728 = vmatmul.mubr.f32.vlgmr.msra.gmra.mxu1 %v12004_v11  ;;  %v3830_v11 = vld [vmem:[%s19232_s3 + $0x3130] sm:$0xff]  ;;  %v3893_v39 = vld [vmem:[%s19232_s3 + $0x3328] sm:$0xff] }
 0x676   :  { %8394 = vmatprep.subr.mxu0 %v3614_v41  ;;  %8411 = vmatprep.subr.mxu1 %v3983_v48  ;;  %v3749_v41 = vld [vmem:[%s19232_s3 + $0x2ea8] sm:$0xff]  ;;  %v4100_v48 = vld [vmem:[%s19232_s3 + $0x39a0] sm:$0xff] }
 0x677   :  { %8395 = vmatpush3.msra.mxu0 %v3470_v9  ;;  %8412 = vmatpush3.msra.mxu1 %v3839_v49  ;;  %v3884_v9 = vld [vmem:[%s19232_s3 + $0x32e0] sm:$0xff]  ;;  %v4235_v49 = vld [vmem:[%s19232_s3 + $0x3dd8] sm:$0xff] }
 0x678   :  { %7867 = vmatprep.mubr.f32.mxu1 %v12022_v20  ;;  %8396 = vmatprep.subr.mxu0 %v3605_v54  ;;  %v3956_v20 = vld [vmem:[%s19232_s3 + $0x3520] sm:$0xff] }
 0x679   :  { %8413 = vmatprep.subr.mxu1 %v3974_v12  ;;  %8397 = vmatpush3.msra.mxu0 %v3461_v52  ;;  %v3740_v54 = vld [vmem:[%s19232_s3 + $0x2e60] sm:$0xff]  ;;  %v4091_v12 = vld [vmem:[%s19232_s3 + $0x3958] sm:$0xff] }
 0x67a   :  { %8414 = vmatpush3.msra.mxu1 %v3830_v11  ;;  %8398 = vmatprep.subr.mxu0 %v3596_v61  ;;  %v3875_v52 = vld [vmem:[%s19232_s3 + $0x3298] sm:$0xff]  ;;  %v4226_v11 = vld [vmem:[%s19232_s3 + $0x3d90] sm:$0xff] }
 0x67b   :  { %8415 = vmatprep.subr.mxu1 %v3965_v43  ;;  %8399 = vmatpush3.msra.mxu0 %v3452_v45  ;;  %v3731_v61 = vld [vmem:[%s19232_s3 + $0x2e18] sm:$0xff]  ;;  %v4082_v43 = vld [vmem:[%s19232_s3 + $0x3910] sm:$0xff] }
 0x67c   :  { %8416 = vmatpush3.msra.mxu1 %v3821_v18  ;;  %8400 = vmatprep.subr.mxu0 %v3587_v0  ;;  %v3866_v45 = vld [vmem:[%s19232_s3 + $0x3250] sm:$0xff]  ;;  %v4217_v18 = vld [vmem:[%s19232_s3 + $0x3d48] sm:$0xff] }
 0x67d   :  { %8417 = vmatprep.subr.mxu1 %v3956_v20  ;;  %8401 = vmatpush3.msra.mxu0 %v3443_v37  ;;  %v3722_v0 = vld [vmem:[%s19232_s3 + $0x2dd0] sm:$0xff]  ;;  %v4073_v20 = vld [vmem:[%s19232_s3 + $0x38c8] sm:$0xff] }
 0x67e   :  { %8418 = vmatpush3.msra.mxu1 %v3812_v31  ;;  %8402 = vmatprep.subr.mxu0 %v3578_v63  ;;  %v3857_v37 = vld [vmem:[%s19232_s3 + $0x3208] sm:$0xff]  ;;  %v4208_v31 = vld [vmem:[%s19232_s3 + $0x3d00] sm:$0xff] }
 0x67f   :  { %8419 = vmatprep.subr.mxu1 %v3947_v53  ;;  %8403 = vmatpush3.msra.mxu0 %v3434_v30  ;;  %v3713_v63 = vld [vmem:[%s19232_s3 + $0x2d88] sm:$0xff]  ;;  %v4064_v53 = vld [vmem:[%s19232_s3 + $0x3880] sm:$0xff] }
 0x680   :  { %8420 = vmatpush3.msra.mxu1 %v3803_v2  ;;  %8404 = vmatprep.subr.mxu0 %v3569_v5  ;;  %v3848_v30 = vld [vmem:[%s19232_s3 + $0x31c0] sm:$0xff]  ;;  %v4199_v2 = vld [vmem:[%s19232_s3 + $0x3cb8] sm:$0xff] }
 0x681   :  { %8421 = vmatprep.subr.mxu1 %v3938_v51  ;;  %8405 = vmatpush3.msra.mxu0 %v3425_v10  ;;  %v3704_v5 = vld [vmem:[%s19232_s3 + $0x2d40] sm:$0xff]  ;;  %v4055_v51 = vld [vmem:[%s19232_s3 + $0x3838] sm:$0xff]  ;;  %v4190_v10 = vld [vmem:[%s19232_s3 + $0x3c70] sm:$0xff] }
 0x682   :  { %8422 = vmatpush3.msra.mxu1 %v3794_v25  ;;  %8406 = vmatprep.subr.mxu0 %v3560_v40  ;;  %v4559_v25 = vld [vmem:[%s19232_s3 + $0x47f8] sm:$0xff]  ;;  %v4046_v40 = vld [vmem:[%s19232_s3 + $0x37f0] sm:$0xff] }
 0x683   :  { %8423 = vmatprep.subr.mxu1 %v3929_v15  ;;  %8407 = vmatpush3.msra.mxu0 %v3416_v28  ;;  %v4415_v15 = vld [vmem:[%s19232_s3 + $0x4378] sm:$0xff]  ;;  %v4181_v28 = vld [vmem:[%s19232_s3 + $0x3c28] sm:$0xff] }
 0x684   :  { %8424 = vmatpush3.msra.mxu1 %v3785_v58  ;;  %7798 = vmatmul.mubr.f32.vlgmr.msra.gmra.mxu0 %v12132_v13  ;;  %v4118_v13 = vld [vmem:[%s19232_s3 + $0x3a30] sm:$0xff] }
 0x685   :  { %8425 = vmatprep.subr.mxu1 %v3920_v36  ;;  %8446 = vmatprep.subr.mxu0 %v4271_v17  ;;  %v4550_v58 = vld [vmem:[%s19232_s3 + $0x47b0] sm:$0xff]  ;;  %v4037_v36 = vld [vmem:[%s19232_s3 + $0x37a8] sm:$0xff]  ;;  %v4172_v17 = vld [vmem:[%s19232_s3 + $0x3be0] sm:$0xff] }
 0x686   :  { %8426 = vmatpush3.msra.mxu1 %v3776_v42  ;;  %8447 = vmatpush3.msra.mxu0 %v4127_v7  ;;  %v4541_v42 = vld [vmem:[%s19232_s3 + $0x4768] sm:$0xff]  ;;  %v4028_v7 = vld [vmem:[%s19232_s3 + $0x3760] sm:$0xff] }
 0x687   :  { %7937 = vmatprep.mubr.f32.mxu0 %v12150_v21  ;;  %8427 = vmatprep.subr.mxu1 %v3911_v3  ;;  %v4244_v21 = vld [vmem:[%s19232_s3 + $0x3e20] sm:$0xff]  ;;  %v4397_v3 = vld [vmem:[%s19232_s3 + $0x42e8] sm:$0xff] }
 0x688   :  { %8448 = vmatprep.subr.mxu0 %v4262_v33  ;;  %8428 = vmatpush3.msra.mxu1 %v3767_v23  ;;  %v4163_v33 = vld [vmem:[%s19232_s3 + $0x3b98] sm:$0xff] }
 0x689   :  { %8449 = vmatpush3.msra.mxu0 %v4118_v13  ;;  %8429 = vmatprep.subr.mxu1 %v3902_v24  ;;  %v4019_v23 = vld [vmem:[%s19232_s3 + $0x3718] sm:$0xff]  ;;  %v4388_v13 = vld [vmem:[%s19232_s3 + $0x42a0] sm:$0xff]  ;;  %v4154_v24 = vld [vmem:[%s19232_s3 + $0x3b50] sm:$0xff] }
 0x68a   :  { %8450 = vmatprep.subr.mxu0 %v4253_v8  ;;  %8430 = vmatpush3.msra.mxu1 %v3758_v32  ;;  %v4523_v8 = vld [vmem:[%s19232_s3 + $0x46d8] sm:$0xff]  ;;  %v4010_v32 = vld [vmem:[%s19232_s3 + $0x36d0] sm:$0xff] }
 0x68b   :  { %8451 = vmatpush3.msra.mxu0 %v4109_v14  ;;  %8431 = vmatprep.subr.mxu1 %v3893_v39  ;;  %v4379_v14 = vld [vmem:[%s19232_s3 + $0x4258] sm:$0xff]  ;;  %v4145_v39 = vld [vmem:[%s19232_s3 + $0x3b08] sm:$0xff] }
 0x68c   :  { %8452 = vmatprep.subr.mxu0 %v4244_v21  ;;  %8432 = vmatpush3.msra.mxu1 %v3749_v41  ;;  %v4514_v21 = vld [vmem:[%s19232_s3 + $0x4690] sm:$0xff]  ;;  %v4001_v41 = vld [vmem:[%s19232_s3 + $0x3688] sm:$0xff] }
 0x68d   :  { %8453 = vmatpush3.msra.mxu0 %v4100_v48  ;;  %8433 = vmatprep.subr.mxu1 %v3884_v9  ;;  %v4370_v48 = vld [vmem:[%s19232_s3 + $0x4210] sm:$0xff]  ;;  %v4136_v9 = vld [vmem:[%s19232_s3 + $0x3ac0] sm:$0xff] }
 0x68e   :  { %8454 = vmatprep.subr.mxu0 %v4235_v49  ;;  %8434 = vmatpush3.msra.mxu1 %v3740_v54  ;;  %v4505_v49 = vld [vmem:[%s19232_s3 + $0x4648] sm:$0xff]  ;;  %v3992_v54 = vld [vmem:[%s19232_s3 + $0x3640] sm:$0xff] }
 0x68f   :  { %8455 = vmatpush3.msra.mxu0 %v4091_v12  ;;  %8435 = vmatprep.subr.mxu1 %v3875_v52  ;;  %v4361_v12 = vld [vmem:[%s19232_s3 + $0x41c8] sm:$0xff]  ;;  %v4496_v52 = vld [vmem:[%s19232_s3 + $0x4600] sm:$0xff] }
 0x690   :  { %8456 = vmatprep.subr.mxu0 %v4226_v11  ;;  %8436 = vmatpush3.msra.mxu1 %v3731_v61  ;;  %v4847_v11 = vld [vmem:[%s19232_s3 + $0x50f8] sm:$0xff]  ;;  %v4352_v61 = vld [vmem:[%s19232_s3 + $0x4180] sm:$0xff] }
 0x691   :  { %8457 = vmatpush3.msra.mxu0 %v4082_v43  ;;  %8437 = vmatprep.subr.mxu1 %v3866_v45  ;;  %v4703_v43 = vld [vmem:[%s19232_s3 + $0x4c78] sm:$0xff] }
 0x692   :  { %8458 = vmatprep.subr.mxu0 %v4217_v18  ;;  %8438 = vmatpush3.msra.mxu1 %v3722_v0  ;;  %v4487_v45 = vld [vmem:[%s19232_s3 + $0x45b8] sm:$0xff]  ;;  %v4838_v18 = vld [vmem:[%s19232_s3 + $0x50b0] sm:$0xff] }
 0x693   :  { %8459 = vmatpush3.msra.mxu0 %v4073_v20  ;;  %8439 = vmatprep.subr.mxu1 %v3857_v37  ;;  %v4343_v0 = vld [vmem:[%s19232_s3 + $0x4138] sm:$0xff]  ;;  %v4478_v20 = vld [vmem:[%s19232_s3 + $0x4570] sm:$0xff]  ;;  %v4829_v37 = vld [vmem:[%s19232_s3 + $0x5068] sm:$0xff] }
 0x694   :  { %8460 = vmatprep.subr.mxu0 %v4208_v31  ;;  %8440 = vmatpush3.msra.mxu1 %v3713_v63  ;;  %v4334_v31 = vld [vmem:[%s19232_s3 + $0x40f0] sm:$0xff]  ;;  %v4685_v63 = vld [vmem:[%s19232_s3 + $0x4be8] sm:$0xff] }
 0x695   :  { %8461 = vmatpush3.msra.mxu0 %v4064_v53  ;;  %8441 = vmatprep.subr.mxu1 %v3848_v30  ;;  %v4469_v53 = vld [vmem:[%s19232_s3 + $0x4528] sm:$0xff] }
 0x696   :  { %8462 = vmatprep.subr.mxu0 %v4199_v2  ;;  %8442 = vmatpush3.msra.mxu1 %v3704_v5  ;;  %v4325_v30 = vld [vmem:[%s19232_s3 + $0x40a8] sm:$0xff]  ;;  %v4676_v2 = vld [vmem:[%s19232_s3 + $0x4ba0] sm:$0xff] }
 0x697   :  { %8463 = vmatpush3.msra.mxu0 %v4055_v51  ;;  %7868 = vmatmul.mubr.f32.vlgmr.msra.gmra.mxu1 %v12428_v57  ;;  %v4406_v57 = vld [vmem:[%s19232_s3 + $0x4330] sm:$0xff]  ;;  %v4460_v5 = vld [vmem:[%s19232_s3 + $0x44e0] sm:$0xff]  ;;  %v4811_v51 = vld [vmem:[%s19232_s3 + $0x4fd8] sm:$0xff] }
 0x698   :  { %8464 = vmatprep.subr.mxu0 %v4190_v10  ;;  %8481 = vmatprep.subr.mxu1 %v4559_v25  ;;  %v4316_v10 = vld [vmem:[%s19232_s3 + $0x4060] sm:$0xff]  ;;  %v4667_v25 = vld [vmem:[%s19232_s3 + $0x4b58] sm:$0xff] }
 0x699   :  { %8465 = vmatpush3.msra.mxu0 %v4046_v40  ;;  %8482 = vmatpush3.msra.mxu1 %v4415_v15  ;;  %v4451_v40 = vld [vmem:[%s19232_s3 + $0x4498] sm:$0xff]  ;;  %v4802_v15 = vld [vmem:[%s19232_s3 + $0x4f90] sm:$0xff] }
 0x69a   :  { %8007 = vmatprep.mubr.f32.mxu1 %v12446_v62  ;;  %8466 = vmatprep.subr.mxu0 %v4181_v28  ;;  %v4532_v62 = vld [vmem:[%s19232_s3 + $0x4720] sm:$0xff]  ;;  %v4307_v28 = vld [vmem:[%s19232_s3 + $0x4018] sm:$0xff] }
 0x69b   :  { %8483 = vmatprep.subr.mxu1 %v4550_v58  ;;  %8467 = vmatpush3.msra.mxu0 %v4037_v36  ;;  %v4658_v58 = vld [vmem:[%s19232_s3 + $0x4b10] sm:$0xff] }
 0x69c   :  { %8484 = vmatpush3.msra.mxu1 %v4406_v57  ;;  %8468 = vmatprep.subr.mxu0 %v4172_v17  ;;  %v4442_v36 = vld [vmem:[%s19232_s3 + $0x4450] sm:$0xff]  ;;  %v4793_v57 = vld [vmem:[%s19232_s3 + $0x4f48] sm:$0xff] }
 0x69d   :  { %8485 = vmatprep.subr.mxu1 %v4541_v42  ;;  %8469 = vmatpush3.msra.mxu0 %v4028_v7  ;;  %v4298_v17 = vld [vmem:[%s19232_s3 + $0x3fd0] sm:$0xff]  ;;  %v4649_v42 = vld [vmem:[%s19232_s3 + $0x4ac8] sm:$0xff] }
 0x69e   :  { %8486 = vmatpush3.msra.mxu1 %v4397_v3  ;;  %8470 = vmatprep.subr.mxu0 %v4163_v33  ;;  %v4433_v7 = vld [vmem:[%s19232_s3 + $0x4408] sm:$0xff]  ;;  %v4784_v3 = vld [vmem:[%s19232_s3 + $0x4f00] sm:$0xff] }
 0x69f   :  { %8487 = vmatprep.subr.mxu1 %v4532_v62  ;;  %8471 = vmatpush3.msra.mxu0 %v4019_v23  ;;  %v4289_v33 = vld [vmem:[%s19232_s3 + $0x3f88] sm:$0xff]  ;;  %v4640_v62 = vld [vmem:[%s19232_s3 + $0x4a80] sm:$0xff] }
 0x6a0   :  { %8488 = vmatpush3.msra.mxu1 %v4388_v13  ;;  %8472 = vmatprep.subr.mxu0 %v4154_v24  ;;  %v4424_v23 = vld [vmem:[%s19232_s3 + $0x43c0] sm:$0xff]  ;;  %v4775_v13 = vld [vmem:[%s19232_s3 + $0x4eb8] sm:$0xff] }
 0x6a1   :  { %8489 = vmatprep.subr.mxu1 %v4523_v8  ;;  %8473 = vmatpush3.msra.mxu0 %v4010_v32  ;;  %v4280_v24 = vld [vmem:[%s19232_s3 + $0x3f40] sm:$0xff]  ;;  %v4631_v8 = vld [vmem:[%s19232_s3 + $0x4a38] sm:$0xff]  ;;  %v4766_v32 = vld [vmem:[%s19232_s3 + $0x4e70] sm:$0xff] }
 0x6a2   :  { %8490 = vmatpush3.msra.mxu1 %v4379_v14  ;;  %8474 = vmatprep.subr.mxu0 %v4145_v39  ;;  %v4622_v14 = vld [vmem:[%s19232_s3 + $0x49f0] sm:$0xff]  ;;  %v4757_v39 = vld [vmem:[%s19232_s3 + $0x4e28] sm:$0xff] }
 0x6a3   :  { %8491 = vmatprep.subr.mxu1 %v4514_v21  ;;  %8475 = vmatpush3.msra.mxu0 %v4001_v41  ;;  %v4613_v21 = vld [vmem:[%s19232_s3 + $0x49a8] sm:$0xff]  ;;  %v4748_v41 = vld [vmem:[%s19232_s3 + $0x4de0] sm:$0xff] }
 0x6a4   :  { %8492 = vmatpush3.msra.mxu1 %v4370_v48  ;;  %8476 = vmatprep.subr.mxu0 %v4136_v9  ;;  %v4604_v48 = vld [vmem:[%s19232_s3 + $0x4960] sm:$0xff]  ;;  %v4595_v9 = vld [vmem:[%s19232_s3 + $0x4918] sm:$0xff] }
 0x6a5   :  { %8493 = vmatprep.subr.mxu1 %v4505_v49  ;;  %8477 = vmatpush3.msra.mxu0 %v3992_v54  ;;  %v4730_v49 = vld [vmem:[%s19232_s3 + $0x4d50] sm:$0xff] }
 0x6a6   :  { %8494 = vmatpush3.msra.mxu1 %v4361_v12  ;;  %7938 = vmatmul.mubr.f32.vlgmr.msra.gmra.mxu0 %v12549_v56  ;;  %v4694_v56 = vld [vmem:[%s19232_s3 + $0x4c30] sm:$0xff]  ;;  %v4721_v12 = vld [vmem:[%s19232_s3 + $0x4d08] sm:$0xff] }
 0x6a7   :  { %8495 = vmatprep.subr.mxu1 %v4496_v52  ;;  %8516 = vmatprep.subr.mxu0 %v4847_v11  ;;  %v4586_v54 = vld [vmem:[%s19232_s3 + $0x48d0] sm:$0xff]  ;;  %v4577_v52 = vld [vmem:[%s19232_s3 + $0x4888] sm:$0xff]  ;;  %v4712_v11 = vld [vmem:[%s19232_s3 + $0x4cc0] sm:$0xff] }
 0x6a8   :  { %8496 = vmatpush3.msra.mxu1 %v4352_v61  ;;  %8517 = vmatpush3.msra.mxu0 %v4703_v43  ;;  %v4568_v61 = vld [vmem:[%s19232_s3 + $0x4840] sm:$0xff]  ;;  %v12_v43 = vstv %s19234_s6 }
 0x6a9   :  { %8077 = vmatprep.mubr.f32.mxu0 %v12567_v47  ;;  %8497 = vmatprep.subr.mxu1 %v4487_v45  ;;  %v4820_v47 = vld [vmem:[%s19232_s3 + $0x5020] sm:$0xff]  ;;  %v19043_v45 = vpop.f32.mrf.mxu1  ;;  %13 = vst [vmem:[#allocation2] sm:$0x1] %v12_v43 }
 0x6aa   :  { %8518 = vmatprep.subr.mxu0 %v4838_v18  ;;  %8498 = vmatpush3.msra.mxu1 %v4343_v0  ;;  %v19045_v0 = vpop.f32.mrf.mxu0 }
 0x6ab   :  { %8519 = vmatpush3.msra.mxu0 %v4694_v56  ;;  %8499 = vmatprep.subr.mxu1 %v4478_v20  ;;  %v5673_v18 = vpop.f32.mrf.mxu1 }
 0x6ac   :  { %8520 = vmatprep.subr.mxu0 %v4829_v37  ;;  %8500 = vmatpush3.msra.mxu1 %v4334_v31  ;;  %v5602_v56 = vpop.f32.mrf.mxu0 }
 0x6ad   :  { %8521 = vmatpush3.msra.mxu0 %v4685_v63  ;;  %8501 = vmatprep.subr.mxu1 %v4469_v53  ;;  %v5675_v20 = vpop.f32.mrf.mxu1 }
 0x6ae   :  { %8522 = vmatprep.subr.mxu0 %v4820_v47  ;;  %8502 = vmatpush3.msra.mxu1 %v4325_v30  ;;  %v5604_v31 = vpop.f32.mrf.mxu0 }
 0x6af   :  { %8523 = vmatpush3.msra.mxu0 %v4676_v2  ;;  %8503 = vmatprep.subr.mxu1 %v4460_v5  ;;  %v5815_v37 = vpop.f32.mrf.mxu1 }
 0x6b0   :  { %8524 = vmatprep.subr.mxu0 %v4811_v51  ;;  %8504 = vmatpush3.msra.mxu1 %v4316_v10  ;;  %v5744_v63 = vpop.f32.mrf.mxu0 }
 0x6b1   :  { %8525 = vmatpush3.msra.mxu0 %v4667_v25  ;;  %8505 = vmatprep.subr.mxu1 %v4451_v40  ;;  %v19047_v53 = vpop.f32.mrf.mxu1 }
 0x6b2   :  { %8526 = vmatprep.subr.mxu0 %v4802_v15  ;;  %8506 = vmatpush3.msra.mxu1 %v4307_v28 }
 0x6b3   :  { %8527 = vmatpush3.msra.mxu0 %v4658_v58  ;;  %8507 = vmatprep.subr.mxu1 %v4442_v36  ;;  %v19049_v47 = vpop.f32.mrf.mxu1 }
 0x6b4   :  { %8528 = vmatprep.subr.mxu0 %v4793_v57  ;;  %8508 = vmatpush3.msra.mxu1 %v4298_v17 }
 0x6b5   :  { %8529 = vmatpush3.msra.mxu0 %v4649_v42  ;;  %8509 = vmatprep.subr.mxu1 %v4433_v7  ;;  %v19051_v2 = vpop.f32.mrf.mxu1 }
 0x6b6   :  { %8530 = vmatprep.subr.mxu0 %v4784_v3  ;;  %8510 = vmatpush3.msra.mxu1 %v4289_v33 }
 0x6b7   :  { %8531 = vmatpush3.msra.mxu0 %v4640_v62  ;;  %8511 = vmatprep.subr.mxu1 %v4424_v23  ;;  %v19053_v5 = vpop.f32.mrf.mxu1 }
 0x6b8   :  { %8532 = vmatprep.subr.mxu0 %v4775_v13  ;;  %8512 = vmatpush3.msra.mxu1 %v4280_v24 }
 0x6b9   :  { %8533 = vmatpush3.msra.mxu0 %v4631_v8  ;;  %8008 = vmatmul.mubr.f32.vlgmr.msra.gmra.mxu1 %v12834_v26  ;;  %v4739_v26 = vld [vmem:[%s19232_s3 + $0x4d98] sm:$0xff]  ;;  %v19059_v25 = vpop.f32.mrf.mxu1 }
 0x6ba   :  { %8534 = vmatprep.subr.mxu0 %v4766_v32 }
 0x6bb   :  { %8535 = vmatpush3.msra.mxu0 %v4622_v14  ;;  %v6241_v40 = vpop.f32.mrf.mxu1 }
 0x6bc   :  { %8536 = vmatprep.subr.mxu0 %v4757_v39 }
 0x6bd   :  { %8537 = vmatpush3.msra.mxu0 %v4613_v21  ;;  %v6243_v58 = vpop.f32.mrf.mxu1 }
 0x6be   :  { %8538 = vmatprep.subr.mxu0 %v4748_v41 }
 0x6bf   :  { %8539 = vmatpush3.msra.mxu0 %v4604_v48  ;;  %v6383_v36 = vpop.f32.mrf.mxu1 }
 0x6c0   :  { %8540 = vmatprep.subr.mxu0 %v4739_v26 }
 0x6c1   :  { %8541 = vmatpush3.msra.mxu0 %v4595_v9  ;;  %v19067_v42 = vpop.f32.mrf.mxu1 }
 0x6c2   :  { %8542 = vmatprep.subr.mxu0 %v4730_v49 }
 0x6c3   :  { %8543 = vmatpush3.msra.mxu0 %v4586_v54  ;;  %v19069_v7 = vpop.f32.mrf.mxu1 }
 0x6c4   :  { %8544 = vmatprep.subr.mxu0 %v4721_v12 }
 0x6c5   :  { %8545 = vmatpush3.msra.mxu0 %v4577_v52  ;;  %v19071_v62 = vpop.f32.mrf.mxu1 }
 0x6c6   :  { %8546 = vmatprep.subr.mxu0 %v4712_v11 }
 0x6c7   :  { %8547 = vmatpush3.msra.mxu0 %v4568_v61  ;;  %v19073_v23 = vpop.f32.mrf.mxu1  ;;  %v19106_v61 = vld [vmem:[%s19233_s4] sm:$0xff] }
 0x6c8   :  { %8078 = vmatmul.mubr.f32.vlgmr.msra.gmra.mxu0 %v12957_v16  ;;  %v5746_v16 = vpop.f32.mrf.mxu0  ;;  %v4859_v43 = vrot.slane %v19106_v61, %v10709_v6  ;;  %v4867_v1 = vrot.slane %v19106_v61, %v11026_v38 }
 0x6c9   :  { %v19079_v8 = vpop.f32.mrf.mxu1 }
 0x6ca   :  { %v5886_v30 = vpop.f32.mrf.mxu0  ;;  %19246 = vst [vmem:[#allocation8_spill] sm:$0xff] %v19079_v8 }
 0x6cb   :  { %v19081_v32 = vpop.f32.mrf.mxu1 }
 0x6cc   :  { %v19055_v51 = vpop.f32.mrf.mxu0  ;;  %19247 = vst [vmem:[#allocation9_spill] sm:$0xff] %v19081_v32 }
 0x6cd   :  { %v19087_v21 = vpop.f32.mrf.mxu1 }
 0x6ce   :  { %v19057_v10 = vpop.f32.mrf.mxu0  ;;  %19250 = vst [vmem:[#allocation12_spill] sm:$0xff] %v19087_v21  ;;  %v4863_v21 = vrot.slane %v19106_v61, %v10267_v46  ;;  %v4871_v46 = vrot.slane %v19106_v61, %v10675_v19 }
 0x6cf   :  { %v6951_v41 = vpop.f32.mrf.mxu1 }
 0x6d0   :  { %v19061_v15 = vpop.f32.mrf.mxu0  ;;  %v6242_v38 = vadd.f32 %v6241_v40, %v4871_v46 }
 0x6d1   :  { %v19091_v9 = vpop.f32.mrf.mxu1 }
 0x6d2   :  { %v19063_v28 = vpop.f32.mrf.mxu0 }
 0x6d3   :  { %v19093_v49 = vpop.f32.mrf.mxu1 }
 0x6d4   :  { %v19065_v57 = vpop.f32.mrf.mxu0  ;;  %19252 = vst [vmem:[#allocation14_spill] sm:$0xff] %v19093_v49 }
 0x6d5   :  { %19245 = vst [vmem:[#allocation7_spill] sm:$0xff] %v19065_v57  ;;  %v19099_v52 = vpop.f32.mrf.mxu1 }
 0x6d6   :  { %v6312_v17 = vpop.f32.mrf.mxu0  ;;  %19253 = vst [vmem:[#allocation15_spill] sm:$0xff] %v19099_v52  ;;  %v4966_v52 = vadd.f32 %v12911_v50, %v4859_v43 }
 0x6d7   :  { %v19101_v11 = vpop.f32.mrf.mxu1 }
 0x6d8   :  { %v6314_v3 = vpop.f32.mrf.mxu0  ;;  %19254 = vst [vmem:[#allocation16_spill] sm:$0xff] %v19101_v11  ;;  %v5603_v11 = vadd.f32 %v5602_v56, %v4863_v21 }
 0x6d9   :  { %v19116_v8 = vpop.f32.mrf.mxu1 }
 0x6da   :  { %v6454_v33 = vpop.f32.mrf.mxu0  ;;  %19257 = vst [vmem:[#allocation19_spill] sm:$0xff] %v19116_v8  ;;  %v5674_v6 = vadd.f32 %v5673_v18, %v5603_v11 }
 0x6dc   :  { %v19075_v13 = vpop.f32.mrf.mxu0  ;;  %v5745_v8 = vadd.f32 %v5744_v63, %v5674_v6 }
 0x6de   :  { %v19077_v24 = vpop.f32.mrf.mxu0  ;;  %v5816_v43 = vadd.f32 %v5815_v37, %v5745_v8 }
 0x6e0   :  { %v19083_v14 = vpop.f32.mrf.mxu0 }
 0x6e1   :  { %19248 = vst [vmem:[#allocation10_spill] sm:$0xff] %v19083_v14  ;;  %v5037_v14 = vadd.f32 %v13284_v35, %v4966_v52  ;;  %v4875_v35 = vrot.slane %v19106_v61, %v11149_v4 }
 0x6e2   :  { %v19085_v39 = vpop.f32.mrf.mxu0 }
 0x6e3   :  { %19249 = vst [vmem:[#allocation11_spill] sm:$0xff] %v19085_v39  ;;  %v19121_v39 = vpop.f32.mrf.mxu1  ;;  %v6244_v37 = vadd.f32 %v6243_v58, %v4875_v35 }
 0x6e4   :  { %v19089_v48 = vpop.f32.mrf.mxu0 }
 0x6e5   :  { %19251 = vst [vmem:[#allocation13_spill] sm:$0xff] %v19089_v48  ;;  %v19131_v50 = vpop.f32.mrf.mxu1 }
 0x6e6   :  { %v6880_v26 = vpop.f32.mrf.mxu0 }
 0x6e8   :  { %v19095_v54 = vpop.f32.mrf.mxu0 }
 0x6ea   :  { %v19097_v12 = vpop.f32.mrf.mxu0 }
 0x6ec   :  { %v19112_v48 = vpop.f32.mrf.mxu0 }
 0x6ed   :  { %19255 = vst [vmem:[#allocation17_spill] sm:$0xff] %v19112_v48  ;;  %v5605_v48 = vadd.f32 %v5604_v31, %v4867_v1  ;;  %v6313_v1 = vadd.f32 %v6312_v17, %v6242_v38 }
 0x6ee   :  { %v19114_v32 = vpop.f32.mrf.mxu0 }
 0x6ef   :  { %19256 = vst [vmem:[#allocation18_spill] sm:$0xff] %v19114_v32  ;;  %v5108_v32 = vadd.f32 %v13310_v22, %v5037_v14  ;;  %v5676_v21 = vadd.f32 %v5675_v20, %v5605_v48  ;;  %v5887_v22 = vadd.f32 %v5886_v30, %v5816_v43  ;;  %v6384_v63 = vadd.f32 %v6383_v36, %v6313_v1  ;;  %v19259_v43 = vld [vmem:[#allocation7_spill] sm:$0xff] }
 0x6f0   :  { %v19126_v57 = vpop.f32.mrf.mxu0  ;;  %v6315_v30 = vadd.f32 %v6314_v3, %v6244_v37  ;;  %v19265_v37 = vld [vmem:[#allocation8_spill] sm:$0xff] }
 0x6f1   :  { %v5179_v56 = vadd.f32 %v13679_v27, %v5108_v32  ;;  %v5747_v11 = vadd.f32 %v5746_v16, %v5676_v21  ;;  %v4879_v27 = vrot.slane %v19106_v61, %v10807_v29  ;;  %v5958_v46 = vadd.f32 %v19049_v47, %v5887_v22 }
 0x6f2   :  { %v19129_v49 = vpop.f32.mrf.mxu0  ;;  %v19136_v18 = vpop.f32.mrf.mxu1  ;;  %v6386_v36 = vadd.f32 %v19067_v42, %v6315_v30 }
 0x6f3   :  { %v5250_v52 = vadd.f32 %v13705_v44, %v5179_v56  ;;  %v5818_v20 = vadd.f32 %v19047_v53, %v5747_v11  ;;  %v6029_v16 = vadd.f32 %v19057_v10, %v5958_v46  ;;  %v6881_v14 = vadd.f32 %v6880_v26, %v4879_v27  ;;  %v19258_v56 = vld [vmem:[#allocation14_spill] sm:$0xff] }
 0x6f4   :  { %v19139_v6 = vpop.f32.mrf.mxu0  ;;  %v8269_v40 = vpop.f32.mrf.mxu1  ;;  %v4883_v53 = vrot.slane %v19106_v61, %v11468_v59  ;;  %v6457_v48 = vadd.f32 %v19075_v13, %v6386_v36  ;;  %v19175_v13 = vld [vmem:[%s19235_s5] sm:$0xff]  ;;  %v19262_v22 = vld [vmem:[#allocation17_spill] sm:$0xff] }
 0x6f5   :  { %v5321_v31 = vadd.f32 %v14074_v34, %v5250_v52  ;;  %v5889_v38 = vadd.f32 %v19055_v51, %v5818_v20  ;;  %v6455_v34 = vadd.f32 %v6454_v33, %v6384_v63  ;;  %v6100_v58 = vadd.f32 %v19053_v5, %v6029_v16  ;;  %v19264_v20 = vld [vmem:[#allocation3_spill] sm:$0xff] }
 0x6f6   :  { %v6952_v3 = vadd.f32 %v6951_v41, %v6881_v14  ;;  %v6883_v5 = vadd.f32 %v19095_v54, %v4883_v53  ;;  %v8117_v46 = vrot.slane %v19175_v13, %v19264_v20  ;;  %v19268_v53 = vld [vmem:[#allocation15_spill] sm:$0xff] }
 0x6f7   :  { %v5392_v44 = vadd.f32 %v14100_v60, %v5321_v31  ;;  %v5960_v47 = vadd.f32 %v19051_v2, %v5889_v38  ;;  %v6526_v60 = vadd.f32 %v19069_v7, %v6455_v34  ;;  %v8092_v7 = vmul.f32 0.2, %v14127_v55  ;;  %v19263_v31 = vld [vmem:[#allocation18_spill] sm:$0xff]  ;;  %v19267_v34 = vld [vmem:[#allocation5_spill] sm:$0xff] }
 0x6f8   :  { %v7023_v42 = vadd.f32 %v19097_v12, %v6952_v3  ;;  %v6954_v54 = vadd.f32 %v19091_v9, %v6883_v5 }
 0x6f9   :  { %v5463_v32 = vadd.f32 %v19045_v0, %v5392_v44  ;;  %v6031_v33 = vadd.f32 %v19061_v15, %v5960_v47  ;;  %v6171_v0 = vadd.f32 %v19063_v28, %v6100_v58  ;;  %v6597_v26 = vadd.f32 %v19077_v24, %v6526_v60  ;;  %v19266_v44 = vld [vmem:[#allocation9_spill] sm:$0xff]  ;;  %v19269_v58 = vld [vmem:[#allocation16_spill] sm:$0xff] }
 0x6fa   :  { %v6528_v15 = vadd.f32 %v19071_v62, %v6457_v48  ;;  %v7094_v12 = vadd.f32 %v19258_v56, %v7023_v42  ;;  %v19261_v62 = vld [vmem:[#allocation11_spill] sm:$0xff]  ;;  %v7025_v1 = vadd.f32 %v19262_v22, %v6954_v54  ;;  %v8101_v9 = vsel %vm8083_vm4, %v14127_v55, %v8092_v7  ;;  %v19270_v55 = vld [vmem:[#allocation13_spill] sm:$0xff]  ;;  %v19271_v42 = vld [vmem:[#allocation4_spill] sm:$0xff] }
 0x6fb   :  { %v5534_v10 = vadd.f32 %v19043_v45, %v5463_v32  ;;  %v6102_v45 = vadd.f32 %v19059_v25, %v6031_v33  ;;  %v6668_v28 = vadd.f32 %v19073_v23, %v6597_v26  ;;  %v8094_v21 = vmul.f32 0.2, %v6171_v0  ;;  %v19260_v25 = vld [vmem:[#allocation10_spill] sm:$0xff]  ;;  %v8233_v26 = vld [vmem:[%s19233_s4 + $0x8] ss:$0 sm:$0xff] }
 0x6fc   :  { %v6599_v52 = vadd.f32 %v19260_v25, %v6528_v15  ;;  %vm8085_vm6 = vcmp.gt.f32.partialorder %v6171_v0, 0.0  ;;  %v7165_v27 = vadd.f32 %v19263_v31, %v7094_v12  ;;  %v8121_v32 = vrot.slane %v19175_v13, %v19267_v34  ;;  %v19273_v54 = vld [vmem:[#allocation19_spill] sm:$0xff] }
 0x6fd   :  { %vm8084_vm5 = vcmp.gt.f32.partialorder %v5534_v10, 0.0  ;;  %v8093_v24 = vmul.f32 0.2, %v5534_v10  ;;  %v6173_v35 = vadd.f32 %v19259_v43, %v6102_v45  ;;  %v6739_v11 = vadd.f32 %v19261_v62, %v6668_v28 }
 0x6fe   :  { %v6670_v63 = vadd.f32 %v19265_v37, %v6599_v52  ;;  %v7096_v47 = vadd.f32 %v19268_v53, %v7025_v1  ;;  %v7236_v36 = vadd.f32 %v19269_v58, %v7165_v27  ;;  %v8270_v60 = vadd.f32 %v8269_v40, %v19136_v18  ;;  %v19272_v40 = vld [vmem:[#allocation12_spill] sm:$0xff] }
 0x6ff   :  { %v6810_v38 = vadd.f32 %v19266_v44, %v6739_v11  ;;  %v8102_v14 = vsel %vm8084_vm5, %v5534_v10, %v8093_v24  ;;  %v8103_v3 = vsel %vm8085_vm6, %v6171_v0, %v8094_v21  ;;  %v8095_v33 = vmul.f32 0.2, %v6173_v35  ;;  %v19274_v11 = vld [vmem:[#allocation6_spill] sm:$0xff] }
 0x700   :  { %v19146_v8 = vpop.f32.mrf.mxu0  ;;  %v6741_v48 = vadd.f32 %v19270_v55, %v6670_v63  ;;  %v8125_v7 = vrot.slane %v19175_v13, %v19271_v42  ;;  %vm8086_vm7 = vcmp.gt.f32.partialorder %v6173_v35, 0.0  ;;  %v7167_v10 = vadd.f32 %v19126_v57, %v7096_v47 }
 0x701   :  { %v7307_v45 = vadd.f32 %v19129_v49, %v7236_v36  ;;  %vm8087_vm8 = vcmp.gt.f32.partialorder %v6810_v38, 0.0  ;;  %v8096_v18 = vmul.f32 0.2, %v6810_v38  ;;  %v8160_v24 = vmul.f32 %v8121_v32, %v8102_v14 }
 0x702   :  { %v19158_v51 = vpop.f32.mrf.mxu0  ;;  %v6812_v0 = vadd.f32 %v19272_v40, %v6741_v48  ;;  %v7238_v56 = vadd.f32 %v19273_v54, %v7167_v10  ;;  %v7520_v21 = vadd.f32 %v8270_v60, %v8233_v26  ;;  %v8104_v25 = vsel %vm8086_vm7, %v6173_v35, %v8095_v33  ;;  %v8234_v40 = vld [vmem:[%s19235_s5 + $0x8] ss:$0 sm:$0xff] }
 0x703   :  { %v7378_v12 = vadd.f32 %v19121_v39, %v7307_v45  ;;  %v8129_v57 = vrot.slane %v19175_v13, %v19274_v11  ;;  %v8159_v49 = vmul.f32 %v8117_v46, %v8101_v9  ;;  %v8105_v27 = vsel %vm8087_vm8, %v6810_v38, %v8096_v18 }
 0x704   :  { %v8133_v39 = vrot.slane %v19175_v13, %v10675_v19  ;;  %v8097_v35 = vmul.f32 0.2, %v6812_v0  ;;  %vm8088_vm9 = vcmp.gt.f32.partialorder %v6812_v0, 0.0  ;;  %v8137_v19 = vrot.slane %v19175_v13, %v11149_v4 }
 0x705   :  { %v7449_v22 = vadd.f32 %v19146_v8, %v7378_v12  ;;  %v8162_v9 = vmul.f32 %v8129_v57, %v8104_v25  ;;  %v8145_v4 = vrot.slane %v19175_v13, %v11468_v59  ;;  %v8568_v59 = vmov 0  }
 0x706   :  { %v8163_v34 = vmul.f32 %v8133_v39, %v8105_v27  ;;  %v8106_v32 = vsel %vm8088_vm9, %v6812_v0, %v8097_v35  ;;  %8553 = vset.pattern.permute.xlu0 %v8568_v59 }
 0x707   :  { %v8098_v44 = vmul.f32 0.2, %v7449_v22  ;;  %vm8089_vm10 = vcmp.gt.f32.partialorder %v7449_v22, 0.0 }
 0x709   :  { %v8107_v47 = vsel %vm8089_vm10, %v7449_v22, %v8098_v44 }
 0x713   :  { %v8303_v17 = vpop.f32.mrf.mxu1 }
 0x715   :  { %v8304_v2 = vpop.f32.mrf.mxu1 }
 0x716   :  { %v8305_v15 = vadd.f32 %v8304_v2, %v8303_v17  ;;  %v8161_v17 = vmul.f32 %v8125_v7, %v8103_v3  ;;  %v7309_v2 = vadd.f32 %v19139_v6, %v7238_v56  ;;  %v8164_v3 = vmul.f32 %v8137_v19, %v8106_v32 }
 0x718   :  { %v7590_v1 = vadd.f32 %v8305_v15, %v7520_v21 }
 0x722   :  { %v8338_v61 = vpop.f32.mrf.mxu0 }
 0x724   :  { %v8339_v23 = vpop.f32.mrf.mxu0 }
 0x725   :  { %v8340_v43 = vadd.f32 %v8339_v23, %v8338_v61  ;;  %v8168_v61 = vadd.f32 %v8160_v24, %v8159_v49  ;;  %v7380_v23 = vadd.f32 %v19131_v50, %v7309_v2 }
 0x727   :  { %v7660_v37 = vadd.f32 %v8340_v43, %v7590_v1  ;;  %v8169_v6 = vadd.f32 %v8168_v61, %v8161_v17  ;;  %v7451_v8 = vadd.f32 %v19158_v51, %v7380_v23 }
 0x729   :  { %v8170_v53 = vadd.f32 %v8169_v6, %v8162_v9  ;;  %v8099_v58 = vmul.f32 0.2, %v7451_v8  ;;  %vm8090_vm11 = vcmp.gt.f32.partialorder %v7451_v8, 0.0 }
 0x72b   :  { %v8171_v33 = vadd.f32 %v8170_v53, %v8163_v34  ;;  %v8108_v7 = vsel %vm8090_vm11, %v7451_v8, %v8099_v58 }
 0x72c   :  { %v8166_v45 = vmul.f32 %v8145_v4, %v8108_v7 }
 0x72d   :  { %v8172_v10 = vadd.f32 %v8171_v33, %v8164_v3 }
 0x735   :  { %v8373_v41 = vpop.f32.mrf.mxu1 }
 0x737   :  { %v8374_v16 = vpop.f32.mrf.mxu1 }
 0x738   :  { %v8375_v31 = vadd.f32 %v8374_v16, %v8373_v41 }
 0x73a   :  { %v7730_v41 = vadd.f32 %v8375_v31, %v7660_v37 }
 0x744   :  { %v8408_v30 = vpop.f32.mrf.mxu0 }
 0x746   :  { %v8409_v28 = vpop.f32.mrf.mxu0 }
 0x747   :  { %v8410_v63 = vadd.f32 %v8409_v28, %v8408_v30  ;;  %v8141_v30 = vrot.slane %v19175_v13, %v10807_v29  ;;  %v8235_v13 = vld [vmem:[#allocation2] ss:$0 sm:$0xff] }
 0x749   :  { %v7800_v14 = vadd.f32 %v8410_v63, %v7730_v41  ;;  %v8165_v26 = vmul.f32 %v8141_v30, %v8107_v47 }
 0x74b   :  { %v8173_v15 = vadd.f32 %v8172_v10, %v8165_v26 }
 0x74d   :  { %v8174_v24 = vadd.f32 %v8173_v15, %v8166_v45 }
 0x757   :  { %v8443_v5 = vpop.f32.mrf.mxu1 }
 0x759   :  { %v8444_v52 = vpop.f32.mrf.mxu1 }
 0x75a   :  { %v8445_v16 = vadd.f32 %v8444_v52, %v8443_v5 }
 0x75c   :  { %v7870_v36 = vadd.f32 %v8445_v16, %v7800_v14 }
 0x766   :  { %v8478_v62 = vpop.f32.mrf.mxu0 }
 0x768   :  { %v8479_v46 = vpop.f32.mrf.mxu0 }
 0x769   :  { %v8480_v50 = vadd.f32 %v8479_v46, %v8478_v62 }
 0x76b   :  { %v7940_v55 = vadd.f32 %v8480_v50, %v7870_v36 }
 0x779   :  { %v8513_v20 = vpop.f32.mrf.mxu1 }
 0x77b   :  { %v8514_v38 = vpop.f32.mrf.mxu1 }
 0x77c   :  { %v8515_v60 = vadd.f32 %v8514_v38, %v8513_v20 }
 0x77e   :  { %v8010_v5 = vadd.f32 %v8515_v60, %v7940_v55 }
 0x788   :  { %v8548_v51 = vpop.f32.mrf.mxu0 }
 0x78a   :  { %v8549_v48 = vpop.f32.mrf.mxu0 }
 0x78b   :  { %v8550_v42 = vadd.f32 %v8549_v48, %v8548_v51 }
 0x78d   :  { %v8080_v29 = vadd.f32 %v8550_v42, %v8010_v5 }
 0x78f   :  { %v8100_v18 = vmul.f32 0.2, %v8080_v29  ;;  %vm8091_vm12 = vcmp.gt.f32.partialorder %v8080_v29, 0.0 }
 0x791   :  { %v8109_v0 = vsel %vm8091_vm12, %v8080_v29, %v8100_v18 }
 0x792   :  { %v8167_v28 = vmul.f32 %v8234_v40, %v8109_v0 }
 0x794   :  { %v8175_v54 = vadd.f32 %v8174_v24, %v8167_v28 }
 0x796   :  { %8176 = vadd.xlane.f32.xlu0 %v8175_v54 }
 0x81f   :  { %v8177_v56 = vpop.xlane.xlu0 %8176 }
 0x820   :  { %v8185_v12 = vadd.f32 %v8235_v13, %v8177_v56 }
 0x822   :  { %v8186_v21 = vand.u32 2147483647, %v8185_v12  ;;  %vm8190_vm13 = vcmp.ge.f32.partialorder %v8185_v12, 0.0 }
 0x824   :  { %v8187_v43 = vsub.f32 0.0, %v8186_v21 }
 0x826   :  { %v8188_v25 = vmul.f32 1.442695, %v8187_v43 }
 0x828   :  { %8554 = vpow2.f32 %v8188_v25 }
 0x835   :  { %v8555_v52 = vpop.eup %8554 }
 0x836   :  { %v8191_v62 = vadd.f32 1.0, %v8555_v52 }
 0x838   :  { %8556 = vrcp.f32 %v8191_v62 }
 0x845   :  { %v8557_v11 = vpop.eup %8556 }
 0x846   :  { %v8194_v57 = vmul.f32 %v8557_v11, %v8555_v52 }
 0x848   :  { %v8195_v49 = vsel %vm8190_vm13, %v8557_v11, %v8194_v57 }
 0x849   :  { %8198 = vperm.xlu0 %8553, %v8195_v49  }
 0x8c4   :  { %v8199_v17 = vpop.permute.xlu0 %8198 }
 0x8c5   :  { %8201 = vst [vmem:[%s19236_s7] sm:$0xff] %v8199_v17 }

</bundles_post_ra>
